<compile_context>
chip_gen: v7x
topology: tpu7x:2x2x1
jax: 0.10.0
libtpu: 0.0.40
codegen_flags: <defaults>
</compile_context>

<pallas_src>
import numpy as np
import jax
import jax.numpy as jnp
from jax.experimental import pallas as pl
from jax.experimental.pallas import tpu as pltpu

NEG_INF = -1e30  # finite "minus infinity": exp(NEG_INF - m) == 0, never NaN


def cc_kernel(x_ref, xt_ref, wqkv_ref, bqkv_ref, g_ref, o_hw_ref, o_wh_ref):
    # x_ref : (Bt, H, W, C)   xt_ref : (Bt, W, H, C)   (same images, H/W swapped)
    Bt, H, W, C = x_ref.shape
    Cqkv = wqkv_ref.shape[1]
    Cq = (Cqkv - C) // 2

    wqkv = wqkv_ref[...]                     # (C, 2*Cq + C)   [wq | wk | wv]
    bqkv = bqkv_ref[...]                     # (1, 2*Cq + C)
    g = g_ref[0]                             # scalar gamma from SMEM

    x = x_ref[...]                           # (Bt, H, W, C)
    xt = xt_ref[...]                         # (Bt, W, H, C)

    # Fused Q|K|V projection: one fat MXU matmul per orientation over the whole
    # batch block (M = Bt*H*W) instead of 6 tiny per-tensor matmuls.
    y = jnp.dot(x.reshape(Bt * H * W, C), wqkv,
                preferred_element_type=jnp.float32) + bqkv
    y = y.reshape(Bt, H, W, Cqkv)
    yt = jnp.dot(xt.reshape(Bt * W * H, C), wqkv,
                 preferred_element_type=jnp.float32) + bqkv
    yt = yt.reshape(Bt, W, H, Cqkv)

    # (H, H) additive diagonal mask, built once from a single iota compare.
    diag = (jax.lax.broadcasted_iota(jnp.int32, (H, H), 0)
            == jax.lax.broadcasted_iota(jnp.int32, (H, H), 1))
    mask_hh = jnp.where(diag, NEG_INF, 0.0).astype(jnp.float32)   # (H, H)

    def energy(qv, kv):
        # qv, kv: (A, n, Cq) -> (A, n, n), contraction over the Cq channels.
        if Cq <= 4:
            # K=Cq is tiny: compute on the VPU with broadcast-mul-adds instead
            # of paying MXU pipeline + result-FIFO latency per batch row.
            acc = qv[:, :, None, 0] * kv[:, None, :, 0]
            for c in range(1, Cq):
                acc = acc + qv[:, :, None, c] * kv[:, None, :, c]
            return acc
        return jnp.einsum('anc,amc->anm', qv, kv,
                          preferred_element_type=jnp.float32)

    for b in range(Bt):                      # static unroll; Bt is small
        yb, ytb = y[b], yt[b]                # (H, W, Cqkv) / (W, H, Cqkv)
        q = yb[:, :, 0:Cq]
        k = yb[:, :, Cq:2 * Cq]
        v = yb[:, :, 2 * Cq:]
        qt = ytb[:, :, 0:Cq]
        kt = ytb[:, :, Cq:2 * Cq]
        vt = ytb[:, :, 2 * Cq:]

        # Column ("H") energies, stored (W, H, G): batch dim = w.
        e_h = energy(qt, kt) + mask_hh[None, :, :]        # (W, H, H)
        # Row ("W") energies, stored (H, W, U): batch dim = h.
        e_w = energy(q, k)                                # (H, W, W)

        # Joint softmax over concat([H keys, W keys]) for every (h, w) position,
        # kept UNNORMALIZED; shared 1/s applied once to the PV results.
        m_h = jnp.max(e_h, axis=2)                        # (W, H)
        m_w = jnp.max(e_w, axis=2)                        # (H, W)
        m = jnp.maximum(m_w, m_h.T)                       # (H, W)
        p_h = jnp.exp(e_h - m.T[:, :, None])              # (W, H, H)
        p_w = jnp.exp(e_w - m[:, :, None])                # (H, W, W)
        s = jnp.sum(p_w, axis=2) + jnp.sum(p_h, axis=2).T   # (H, W)

        # 1/s on the EUP (approx vrcp) + one Newton step, folded with gamma.
        inv_s = pl.reciprocal(s, approx=True)
        inv_s = inv_s * (2.0 - s * inv_s)
        gs = g * inv_s                                    # (H, W)

        # out_H[h,w,c] = sum_g att_H[h,w,g] * V[g,w,c]  (kept in (W,H,C) form)
        out_h_t = jnp.einsum('whg,wgc->whc', p_h, vt,
                             preferred_element_type=jnp.float32)   # (W, H, C)
        # out_W[h,w,c] = sum_u att_W[h,w,u] * V[h,u,c]
        out_w = jnp.einsum('hwu,huc->hwc', p_w, v,
                           preferred_element_type=jnp.float32)     # (H, W, C)

        o_hw_ref[b] = (gs[:, :, None] * out_w + x[b]).astype(o_hw_ref.dtype)
        o_wh_ref[b] = (gs.T[:, :, None] * out_h_t).astype(o_wh_ref.dtype)


def cc_forward(x_nchw, wq, bq, wk, bk, wv, bv, gamma, *, batch_block=None):
    B, C, H, W = x_nchw.shape
    Cq = wq.shape[1]
    Cqkv = 2 * Cq + C

    if batch_block is None:
        # Fewer, fatter grid steps to amortize the ~0.35 us/step fixed cost,
        # while keeping >= 2 steps so both v7x TensorCores get work.
        batch_block = B // 2 if (B >= 2 and B % 2 == 0) else 1
    Bt = batch_block
    assert B % Bt == 0, "batch_block must divide batch"

    x_hwc = jnp.transpose(x_nchw, (0, 2, 3, 1))   # (B, H, W, C)
    x_whc = jnp.transpose(x_nchw, (0, 3, 2, 1))   # (B, W, H, C)

    wqkv = jnp.concatenate([wq, wk, wv], axis=1)            # (C, Cqkv)
    bqkv = jnp.concatenate([bq, bk, bv]).reshape(1, Cqkv)   # (1, Cqkv)
    g1 = gamma.reshape(1)

    # Advisory cost estimate so XLA schedules the surrounding transposes /
    # fused epilogue sensibly around the custom call.
    npix = B * H * W
    flops = (2 * 2 * npix * C * Cqkv            # fused QKV, both orientations
             + 2 * npix * (H + W) * Cq          # energies
             + 2 * npix * (H + W) * C)          # PV matmuls
    transcendentals = npix * (H + W) + npix     # exps + reciprocal
    bytes_accessed = 4 * (4 * npix * C + C * Cqkv + Cqkv + 1)

    o_hw, o_wh = pl.pallas_call(
        cc_kernel,
        grid=(B // Bt,),
        in_specs=[
            pl.BlockSpec((Bt, H, W, C), lambda b: (b, 0, 0, 0)),
            pl.BlockSpec((Bt, W, H, C), lambda b: (b, 0, 0, 0)),
            pl.BlockSpec((C, Cqkv), lambda b: (0, 0)),
            pl.BlockSpec((1, Cqkv), lambda b: (0, 0)),
            pl.BlockSpec(memory_space=pltpu.MemorySpace.SMEM),   # gamma scalar
        ],
        out_specs=(
            pl.BlockSpec((Bt, H, W, C), lambda b: (b, 0, 0, 0)),
            pl.BlockSpec((Bt, W, H, C), lambda b: (b, 0, 0, 0)),
        ),
        out_shape=(
            jax.ShapeDtypeStruct((B, H, W, C), x_nchw.dtype),
            jax.ShapeDtypeStruct((B, W, H, C), x_nchw.dtype),
        ),
        # Reuse the (transient) transposed-input HBM buffers for the outputs.
        input_output_aliases={0: 0, 1: 1},
        compiler_params=pltpu.CompilerParams(
            dimension_semantics=("parallel",),   # batch blocks are independent
            vmem_limit_bytes=32 * 1024 * 1024),
        cost_estimate=pl.CostEstimate(
            flops=flops, transcendentals=transcendentals,
            bytes_accessed=bytes_accessed),
    )(x_hwc, x_whc, wqkv, bqkv, g1)

    # Combine the two criss-cross branches; XLA fuses both transposed reads
    # into the single NCHW-producing epilogue pass (kept in f32).
    return (jnp.transpose(o_hw, (0, 3, 1, 2)) +
            jnp.transpose(o_wh, (0, 3, 2, 1)))      # (B, C, H, W)


def reference_numpy(x, wq, bq, wk, bk, wv, bv, gamma):
    """Pure-numpy transcription of the PyTorch CC_module forward (NCHW)."""
    B, C, H, W = x.shape
    q = np.einsum('bchw,cd->bdhw', x, wq) + bq[None, :, None, None]
    k = np.einsum('bchw,cd->bdhw', x, wk) + bk[None, :, None, None]
    v = np.einsum('bchw,cd->bdhw', x, wv) + bv[None, :, None, None]
    e_h = np.einsum('bdhw,bdgw->bhwg', q, k)                # (B,H,W,H2)
    diag = np.eye(H, dtype=bool)[None, :, None, :]
    e_h = np.where(diag, -np.inf, e_h)
    e_w = np.einsum('bdhw,bdhu->bhwu', q, k)                # (B,H,W,W2)
    energy = np.concatenate([e_h, e_w], axis=-1)
    energy = energy - energy.max(-1, keepdims=True)
    p = np.exp(energy)
    att = p / p.sum(-1, keepdims=True)
    att_h, att_w = att[..., :H], att[..., H:]
    out_h = np.einsum('bcgw,bhwg->bchw', v, att_h)
    out_w = np.einsum('bchu,bhwu->bchw', v, att_w)
    return gamma * (out_h + out_w) + x


if __name__ == "__main__":
    B, C, H, W = 2, 16, 16, 16
    Cq = C // 8

    key = jax.random.PRNGKey(0)
    ks = jax.random.split(key, 7)
    x = jax.random.normal(ks[0], (B, C, H, W), jnp.float32)
    wq = 0.1 * jax.random.normal(ks[1], (C, Cq), jnp.float32)
    bq = 0.1 * jax.random.normal(ks[2], (Cq,), jnp.float32)
    wk = 0.1 * jax.random.normal(ks[3], (C, Cq), jnp.float32)
    bk = 0.1 * jax.random.normal(ks[4], (Cq,), jnp.float32)
    wv = 0.1 * jax.random.normal(ks[5], (C, C), jnp.float32)
    bv = 0.1 * jax.random.normal(ks[6], (C,), jnp.float32)
    # nn.Parameter(torch.zeros(1)) starts gamma at 0 (output == x); use a
    # deterministic nonzero value so the attention path is actually exercised.
    gamma = jnp.array([0.5], jnp.float32)

    out = jax.jit(cc_forward)(x, wq, bq, wk, bk, wv, bv, gamma)
    out = jax.block_until_ready(out)

    ref = reference_numpy(np.asarray(x), np.asarray(wq), np.asarray(bq),
                          np.asarray(wk), np.asarray(bk), np.asarray(wv),
                          np.asarray(bv), float(gamma[0]))
    np.testing.assert_allclose(np.asarray(out), ref, rtol=1e-3, atol=1e-3)
    print("KERNEL_OK")
</pallas_src>

<mosaic_0001>
module attributes {stable_mosaic.version = 11 : i64} {
  func.func @cc_kernel(%arg0: i32, %arg1: memref<1x16x16x16xf32, #tpu.memory_space<vmem>>, %arg2: memref<1x16x16x16xf32, #tpu.memory_space<vmem>>, %arg3: memref<16x20xf32, #tpu.memory_space<vmem>>, %arg4: memref<1x20xf32, #tpu.memory_space<vmem>>, %arg5: memref<1xf32, #tpu.memory_space<smem>>, %arg6: memref<1x16x16x16xf32, #tpu.memory_space<vmem>>, %arg7: memref<1x16x16x16xf32, #tpu.memory_space<vmem>>) attributes {dimension_semantics = [#tpu.dimension_semantics<parallel>], iteration_bounds = array<i64: 2>, scalar_prefetch = 0 : i64, scratch_operands = 0 : i64, tpu.core_type = #tpu.core_type<tc>, window_params = [{transform_indices = @transform_0, window_bounds = array<i64: 1, 16, 16, 16>}, {transform_indices = @transform_1, window_bounds = array<i64: 1, 16, 16, 16>}, {pipeline_mode = #tpu.pipeline_mode<synchronous>, transform_indices = @transform_2, window_bounds = array<i64: 16, 20>}, {pipeline_mode = #tpu.pipeline_mode<synchronous>, transform_indices = @transform_3, window_bounds = array<i64: 1, 20>}, {transform_indices = @transform_4, window_bounds = array<i64: 1>}, {transform_indices = @transform_5, window_bounds = array<i64: 1, 16, 16, 16>}, {transform_indices = @transform_6, window_bounds = array<i64: 1, 16, 16, 16>}]} {
    %c0 = arith.constant 0 : index
    %c0_0 = arith.constant 0 : index
    %0 = vector.load %arg3[%c0, %c0_0] : memref<16x20xf32, #tpu.memory_space<vmem>>, vector<16x20xf32>
    %c0_1 = arith.constant 0 : index
    %c0_2 = arith.constant 0 : index
    %1 = vector.load %arg4[%c0_1, %c0_2] : memref<1x20xf32, #tpu.memory_space<vmem>>, vector<1x20xf32>
    %c0_3 = arith.constant 0 : index
    %2 = memref.load %arg5[%c0_3] : memref<1xf32, #tpu.memory_space<smem>>
    %c0_4 = arith.constant 0 : index
    %c0_5 = arith.constant 0 : index
    %c0_6 = arith.constant 0 : index
    %c0_7 = arith.constant 0 : index
    %3 = vector.load %arg1[%c0_4, %c0_5, %c0_6, %c0_7] : memref<1x16x16x16xf32, #tpu.memory_space<vmem>>, vector<1x16x16x16xf32>
    %c0_8 = arith.constant 0 : index
    %c0_9 = arith.constant 0 : index
    %c0_10 = arith.constant 0 : index
    %c0_11 = arith.constant 0 : index
    %4 = vector.load %arg2[%c0_8, %c0_9, %c0_10, %c0_11] : memref<1x16x16x16xf32, #tpu.memory_space<vmem>>, vector<1x16x16x16xf32>
    %5 = vector.shape_cast %3 : vector<1x16x16x16xf32> to vector<256x16xf32>
    %cst = arith.constant dense<0.000000e+00> : vector<256x20xf32>
    %6 = tpu.matmul %5, %0, %cst {dimension_numbers = #tpu.dot_dimension_numbers<[1], [0], [0], [1], [0, 0, 1, 1], [], []>} : vector<256x16xf32>, vector<16x20xf32>, vector<256x20xf32> -> vector<256x20xf32>
    %7 = vector.broadcast %1 : vector<1x20xf32> to vector<256x20xf32>
    %8 = arith.addf %6, %7 : vector<256x20xf32>
    %9 = vector.shape_cast %8 : vector<256x20xf32> to vector<1x16x16x20xf32>
    %10 = vector.shape_cast %4 : vector<1x16x16x16xf32> to vector<256x16xf32>
    %cst_12 = arith.constant dense<0.000000e+00> : vector<256x20xf32>
    %11 = tpu.matmul %10, %0, %cst_12 {dimension_numbers = #tpu.dot_dimension_numbers<[1], [0], [0], [1], [0, 0, 1, 1], [], []>} : vector<256x16xf32>, vector<16x20xf32>, vector<256x20xf32> -> vector<256x20xf32>
    %12 = vector.broadcast %1 : vector<1x20xf32> to vector<256x20xf32>
    %13 = arith.addf %11, %12 : vector<256x20xf32>
    %14 = vector.shape_cast %13 : vector<256x20xf32> to vector<1x16x16x20xf32>
    %15 = tpu.iota {dimensions = array<i32: 0>} : vector<16x16xi32>
    %16 = tpu.iota {dimensions = array<i32: 1>} : vector<16x16xi32>
    %17 = arith.cmpi eq, %15, %16 : vector<16x16xi32>
    %cst_13 = arith.constant -1.000000e+30 : f32
    %cst_14 = arith.constant 0.000000e+00 : f32
    %18 = vector.broadcast %cst_13 : f32 to vector<16x16xf32>
    %19 = vector.broadcast %cst_14 : f32 to vector<16x16xf32>
    %20 = arith.select %17, %18, %19 : vector<16x16xi1>, vector<16x16xf32>
    %21 = vector.shape_cast %9 : vector<1x16x16x20xf32> to vector<16x16x20xf32>
    %22 = vector.shape_cast %14 : vector<1x16x16x20xf32> to vector<16x16x20xf32>
    %23 = vector.extract_strided_slice %21 {offsets = [0, 0, 0], sizes = [16, 16, 2], strides = [1, 1, 1]} : vector<16x16x20xf32> to vector<16x16x2xf32>
    %24 = vector.extract_strided_slice %21 {offsets = [0, 0, 2], sizes = [16, 16, 2], strides = [1, 1, 1]} : vector<16x16x20xf32> to vector<16x16x2xf32>
    %25 = vector.extract_strided_slice %21 {offsets = [0, 0, 4], sizes = [16, 16, 16], strides = [1, 1, 1]} : vector<16x16x20xf32> to vector<16x16x16xf32>
    %26 = vector.extract_strided_slice %22 {offsets = [0, 0, 0], sizes = [16, 16, 2], strides = [1, 1, 1]} : vector<16x16x20xf32> to vector<16x16x2xf32>
    %27 = vector.extract_strided_slice %22 {offsets = [0, 0, 2], sizes = [16, 16, 2], strides = [1, 1, 1]} : vector<16x16x20xf32> to vector<16x16x2xf32>
    %28 = vector.extract_strided_slice %22 {offsets = [0, 0, 4], sizes = [16, 16, 16], strides = [1, 1, 1]} : vector<16x16x20xf32> to vector<16x16x16xf32>
    %29 = vector.extract_strided_slice %26 {offsets = [0, 0, 0], sizes = [16, 16, 1], strides = [1, 1, 1]} : vector<16x16x2xf32> to vector<16x16x1xf32>
    %30 = vector.shape_cast %29 : vector<16x16x1xf32> to vector<16x16xf32>
    %31 = vector.shape_cast %30 : vector<16x16xf32> to vector<16x16x1xf32>
    %32 = vector.extract_strided_slice %27 {offsets = [0, 0, 0], sizes = [16, 16, 1], strides = [1, 1, 1]} : vector<16x16x2xf32> to vector<16x16x1xf32>
    %33 = vector.shape_cast %32 : vector<16x16x1xf32> to vector<16x16xf32>
    %34 = vector.shape_cast %33 : vector<16x16xf32> to vector<16x1x16xf32>
    %35 = vector.broadcast %31 : vector<16x16x1xf32> to vector<16x16x16xf32>
    %36 = vector.broadcast %34 : vector<16x1x16xf32> to vector<16x16x16xf32>
    %37 = arith.mulf %35, %36 : vector<16x16x16xf32>
    %38 = vector.extract_strided_slice %26 {offsets = [0, 0, 1], sizes = [16, 16, 1], strides = [1, 1, 1]} : vector<16x16x2xf32> to vector<16x16x1xf32>
    %39 = vector.shape_cast %38 : vector<16x16x1xf32> to vector<16x16xf32>
    %40 = vector.shape_cast %39 : vector<16x16xf32> to vector<16x16x1xf32>
    %41 = vector.extract_strided_slice %27 {offsets = [0, 0, 1], sizes = [16, 16, 1], strides = [1, 1, 1]} : vector<16x16x2xf32> to vector<16x16x1xf32>
    %42 = vector.shape_cast %41 : vector<16x16x1xf32> to vector<16x16xf32>
    %43 = vector.shape_cast %42 : vector<16x16xf32> to vector<16x1x16xf32>
    %44 = vector.broadcast %40 : vector<16x16x1xf32> to vector<16x16x16xf32>
    %45 = vector.broadcast %43 : vector<16x1x16xf32> to vector<16x16x16xf32>
    %46 = arith.mulf %44, %45 : vector<16x16x16xf32>
    %47 = arith.addf %37, %46 : vector<16x16x16xf32>
    %48 = vector.shape_cast %20 : vector<16x16xf32> to vector<1x16x16xf32>
    %49 = vector.broadcast %48 : vector<1x16x16xf32> to vector<16x16x16xf32>
    %50 = arith.addf %47, %49 : vector<16x16x16xf32>
    %51 = vector.extract_strided_slice %23 {offsets = [0, 0, 0], sizes = [16, 16, 1], strides = [1, 1, 1]} : vector<16x16x2xf32> to vector<16x16x1xf32>
    %52 = vector.shape_cast %51 : vector<16x16x1xf32> to vector<16x16xf32>
    %53 = vector.shape_cast %52 : vector<16x16xf32> to vector<16x16x1xf32>
    %54 = vector.extract_strided_slice %24 {offsets = [0, 0, 0], sizes = [16, 16, 1], strides = [1, 1, 1]} : vector<16x16x2xf32> to vector<16x16x1xf32>
    %55 = vector.shape_cast %54 : vector<16x16x1xf32> to vector<16x16xf32>
    %56 = vector.shape_cast %55 : vector<16x16xf32> to vector<16x1x16xf32>
    %57 = vector.broadcast %53 : vector<16x16x1xf32> to vector<16x16x16xf32>
    %58 = vector.broadcast %56 : vector<16x1x16xf32> to vector<16x16x16xf32>
    %59 = arith.mulf %57, %58 : vector<16x16x16xf32>
    %60 = vector.extract_strided_slice %23 {offsets = [0, 0, 1], sizes = [16, 16, 1], strides = [1, 1, 1]} : vector<16x16x2xf32> to vector<16x16x1xf32>
    %61 = vector.shape_cast %60 : vector<16x16x1xf32> to vector<16x16xf32>
    %62 = vector.shape_cast %61 : vector<16x16xf32> to vector<16x16x1xf32>
    %63 = vector.extract_strided_slice %24 {offsets = [0, 0, 1], sizes = [16, 16, 1], strides = [1, 1, 1]} : vector<16x16x2xf32> to vector<16x16x1xf32>
    %64 = vector.shape_cast %63 : vector<16x16x1xf32> to vector<16x16xf32>
    %65 = vector.shape_cast %64 : vector<16x16xf32> to vector<16x1x16xf32>
    %66 = vector.broadcast %62 : vector<16x16x1xf32> to vector<16x16x16xf32>
    %67 = vector.broadcast %65 : vector<16x1x16xf32> to vector<16x16x16xf32>
    %68 = arith.mulf %66, %67 : vector<16x16x16xf32>
    %69 = arith.addf %59, %68 : vector<16x16x16xf32>
    %cst_15 = arith.constant dense<0xFF800000> : vector<16x16xf32>
    %70 = vector.multi_reduction <maximumf>, %50, %cst_15 [2] : vector<16x16x16xf32> to vector<16x16xf32>
    %cst_16 = arith.constant dense<0xFF800000> : vector<16x16xf32>
    %71 = vector.multi_reduction <maximumf>, %69, %cst_16 [2] : vector<16x16x16xf32> to vector<16x16xf32>
    %72 = tpu.transpose %70, [1, 0] : vector<16x16xf32> -> vector<16x16xf32>
    %73 = arith.maximumf %71, %72 : vector<16x16xf32>
    %74 = tpu.transpose %73, [1, 0] : vector<16x16xf32> -> vector<16x16xf32>
    %75 = vector.shape_cast %74 : vector<16x16xf32> to vector<16x16x1xf32>
    %76 = vector.broadcast %75 : vector<16x16x1xf32> to vector<16x16x16xf32>
    %77 = arith.subf %50, %76 : vector<16x16x16xf32>
    %78 = math.exp %77 : vector<16x16x16xf32>
    %79 = vector.shape_cast %73 : vector<16x16xf32> to vector<16x16x1xf32>
    %80 = vector.broadcast %79 : vector<16x16x1xf32> to vector<16x16x16xf32>
    %81 = arith.subf %69, %80 : vector<16x16x16xf32>
    %82 = math.exp %81 : vector<16x16x16xf32>
    %cst_17 = arith.constant dense<0.000000e+00> : vector<16x16xf32>
    %83 = vector.multi_reduction <add>, %82, %cst_17 [2] : vector<16x16x16xf32> to vector<16x16xf32>
    %cst_18 = arith.constant dense<0.000000e+00> : vector<16x16xf32>
    %84 = vector.multi_reduction <add>, %78, %cst_18 [2] : vector<16x16x16xf32> to vector<16x16xf32>
    %85 = tpu.transpose %84, [1, 0] : vector<16x16xf32> -> vector<16x16xf32>
    %86 = arith.addf %83, %85 : vector<16x16xf32>
    %87 = tpu.reciprocal %86 {approx = true} : vector<16x16xf32> -> vector<16x16xf32>
    %88 = arith.mulf %86, %87 : vector<16x16xf32>
    %cst_19 = arith.constant 2.000000e+00 : f32
    %89 = vector.broadcast %cst_19 : f32 to vector<16x16xf32>
    %90 = arith.subf %89, %88 : vector<16x16xf32>
    %91 = arith.mulf %87, %90 : vector<16x16xf32>
    %92 = vector.broadcast %2 : f32 to vector<16x16xf32>
    %93 = arith.mulf %92, %91 : vector<16x16xf32>
    "tpu.trace_start"() <{level = 10 : i32, message = "whg,wgc->whc"}> : () -> ()
    %cst_20 = arith.constant dense<0.000000e+00> : vector<16x16x16xf32>
    %94 = tpu.matmul %78, %28, %cst_20 {dimension_numbers = #tpu.dot_dimension_numbers<[2], [1], [1], [2], [0, 0, 0, 1, 1, 2], [0], [0]>} : vector<16x16x16xf32>, vector<16x16x16xf32>, vector<16x16x16xf32> -> vector<16x16x16xf32>
    "tpu.trace_stop"() : () -> ()
    "tpu.trace_start"() <{level = 10 : i32, message = "hwu,huc->hwc"}> : () -> ()
    %cst_21 = arith.constant dense<0.000000e+00> : vector<16x16x16xf32>
    %95 = tpu.matmul %82, %25, %cst_21 {dimension_numbers = #tpu.dot_dimension_numbers<[2], [1], [1], [2], [0, 0, 0, 1, 1, 2], [0], [0]>} : vector<16x16x16xf32>, vector<16x16x16xf32>, vector<16x16x16xf32> -> vector<16x16x16xf32>
    "tpu.trace_stop"() : () -> ()
    %96 = vector.shape_cast %93 : vector<16x16xf32> to vector<16x16x1xf32>
    %97 = vector.broadcast %96 : vector<16x16x1xf32> to vector<16x16x16xf32>
    %98 = arith.mulf %97, %95 : vector<16x16x16xf32>
    %99 = vector.shape_cast %3 : vector<1x16x16x16xf32> to vector<16x16x16xf32>
    %100 = arith.addf %98, %99 : vector<16x16x16xf32>
    %c0_22 = arith.constant 0 : index
    %c0_23 = arith.constant 0 : index
    %c0_24 = arith.constant 0 : index
    %c0_25 = arith.constant 0 : index
    %101 = vector.load %arg6[%c0_22, %c0_23, %c0_24, %c0_25] : memref<1x16x16x16xf32, #tpu.memory_space<vmem>>, vector<1x16x16x16xf32>
    %102 = vector.shape_cast %101 : vector<1x16x16x16xf32> to vector<16x16x16xf32>
    %103 = vector.shape_cast %100 : vector<16x16x16xf32> to vector<1x16x16x16xf32>
    tpu.vector_store %arg6[%c0_22, %c0_23, %c0_24, %c0_25], %103 {strides = array<i32>} : memref<1x16x16x16xf32, #tpu.memory_space<vmem>>, vector<1x16x16x16xf32>,
    %104 = tpu.transpose %93, [1, 0] : vector<16x16xf32> -> vector<16x16xf32>
    %105 = vector.shape_cast %104 : vector<16x16xf32> to vector<16x16x1xf32>
    %106 = vector.broadcast %105 : vector<16x16x1xf32> to vector<16x16x16xf32>
    %107 = arith.mulf %106, %94 : vector<16x16x16xf32>
    %c0_26 = arith.constant 0 : index
    %c0_27 = arith.constant 0 : index
    %c0_28 = arith.constant 0 : index
    %c0_29 = arith.constant 0 : index
    %108 = vector.load %arg7[%c0_26, %c0_27, %c0_28, %c0_29] : memref<1x16x16x16xf32, #tpu.memory_space<vmem>>, vector<1x16x16x16xf32>
    %109 = vector.shape_cast %108 : vector<1x16x16x16xf32> to vector<16x16x16xf32>
    %110 = vector.shape_cast %107 : vector<16x16x16xf32> to vector<1x16x16x16xf32>
    tpu.vector_store %arg7[%c0_26, %c0_27, %c0_28, %c0_29], %110 {strides = array<i32>} : memref<1x16x16x16xf32, #tpu.memory_space<vmem>>, vector<1x16x16x16xf32>,
    return
  }
  func.func @transform_0(%arg0: i32) -> (i32, i32, i32, i32) {
    %c0_i32 = arith.constant 0 : i32
    %c0_i32_0 = arith.constant 0 : i32
    %c0_i32_1 = arith.constant 0 : i32
    %c0_i32_2 = arith.constant 0 : i32
    return %arg0, %c0_i32, %c0_i32_0, %c0_i32_1 : i32, i32, i32, i32
  }
  func.func @transform_1(%arg0: i32) -> (i32, i32, i32, i32) {
    %c0_i32 = arith.constant 0 : i32
    %c0_i32_0 = arith.constant 0 : i32
    %c0_i32_1 = arith.constant 0 : i32
    %c0_i32_2 = arith.constant 0 : i32
    return %arg0, %c0_i32, %c0_i32_0, %c0_i32_1 : i32, i32, i32, i32
  }
  func.func @transform_2(%arg0: i32) -> (i32, i32) {
    %c0_i32 = arith.constant 0 : i32
    %c0_i32_0 = arith.constant 0 : i32
    %c0_i32_1 = arith.constant 0 : i32
    return %c0_i32, %c0_i32_0 : i32, i32
  }
  func.func @transform_3(%arg0: i32) -> (i32, i32) {
    %c0_i32 = arith.constant 0 : i32
    %c0_i32_0 = arith.constant 0 : i32
    %c0_i32_1 = arith.constant 0 : i32
    return %c0_i32, %c0_i32_0 : i32, i32
  }
  func.func @transform_4(%arg0: i32) -> i32 {
    %c0_i32 = arith.constant 0 : i32
    %c0_i32_0 = arith.constant 0 : i32
    return %c0_i32 : i32
  }
  func.func @transform_5(%arg0: i32) -> (i32, i32, i32, i32) {
    %c0_i32 = arith.constant 0 : i32
    %c0_i32_0 = arith.constant 0 : i32
    %c0_i32_1 = arith.constant 0 : i32
    %c0_i32_2 = arith.constant 0 : i32
    return %arg0, %c0_i32, %c0_i32_0, %c0_i32_1 : i32, i32, i32, i32
  }
  func.func @transform_6(%arg0: i32) -> (i32, i32, i32, i32) {
    %c0_i32 = arith.constant 0 : i32
    %c0_i32_0 = arith.constant 0 : i32
    %c0_i32_1 = arith.constant 0 : i32
    %c0_i32_2 = arith.constant 0 : i32
    return %arg0, %c0_i32, %c0_i32_0, %c0_i32_1 : i32, i32, i32, i32
  }
}

</mosaic_0001>

<bundles_post_ra>
// kernel: cc_forward.1
= control target key start
LH: loop header
LB: loop body
LE: loop exit
PB: predicated region body
PF: predicated region fallthrough
CT: control target
= control target key end

     0   :  { %s10308_s23 = smov 0   ;;  %s14266_s0 = inlined_call_operand.vmem [shape: f32[2,16,16,16], index: 0, kind: input, shape index: {}, may-alias: {0,5}]   ;;  %s14267_s1 = inlined_call_operand.vmem [shape: f32[2,16,16,16], index: 1, kind: input, shape index: {}, may-alias: {1,6}]   ;;  %s14268_s2 = inlined_call_operand.vmem [shape: f32[16,20], index: 2, kind: input, shape index: {}]   ;;  %s14269_s3 = inlined_call_operand.vmem [shape: f32[1,20], index: 3, kind: input, shape index: {}]   ;;  %s14270_s4 = inlined_call_operand.<no memory space> [shape: f32[1], index: 4, kind: input, shape index: {}]   ;;  %s14271_s5 = inlined_call_operand.vmem [shape: f32[2,16,16,16], index: 5, kind: output, shape index: {0}, may-alias: {0,5}]   ;;  %s14272_s6 = inlined_call_operand.vmem [shape: f32[2,16,16,16], index: 6, kind: output, shape index: {1}, may-alias: {1,6}]  }
   0x1   :  { %12 = sst [smem:[#allocation2]] %s14270_s4 }
   0x2 LB: > { %s8998_s24 = sadd.s32 4294967295, %s10262_s23   ;;  %p9002_p0 = scmp.ge.s32.totalorder %s10262_s23, 1  ;;  %s10262_s23 = sphi %s10308_s23, %s18_s23  }
   0x3   : > { %p226_p1 = scmp.lt.s32.totalorder %s10262_s23, 3 }
   0x5   : > { %p227_p2 = pnand %p9002_p0, %p226_p1 }
   0x7   : > { %230 = sbr.rel (%p227_p2) target bundleno = 2977 (0xba1), region = 40 }
   0xe   : > { %v286_v0 = vld [vmem:[%s14268_s2] sm:$0xff]  ;;  %v287_v1 = vld [vmem:[%s14268_s2 + $0x8] sm:$0xff]  ;;  %p266_p3 = scmp.lt.s32.totalorder %s8998_s24, 1  ;;  %vm360_vm0 = vcmask 130048   ;;  %vm1277_vm1 = vcmask 130112   ;;  %vm1414_vm4 = vcmask 1041409  }
   0xf   : > { %v9670_v2 = vpack.c.bf16 %v287_v1, %v286_v0  ;;  %vm1415_vm5 = vcmask 1042434   ;;  %vm1417_vm6 = vcmask 1043459   ;;  %vm1419_vm7 = vcmask 1044484   ;;  %s10269_s13 = smov 124   ;;  %s289_s14 = sld [smem:[#allocation2]] }
  0x10   : > { %s15405_s24 = smov (!%p266_p3, %s8998_s24), 1  ;;  %vm1421_vm8 = vcmask 1045509   ;;  %vm1423_vm9 = vcmask 1046534   ;;  %vm1425_vm10 = vcmask 1047559  }
  0x11   : > { %9675 = vmatprep.subr.bf16.mxu1 %v9670_v2  ;;  %9671 = vmatprep.subr.bf16.mxu0 %v9670_v2  ;;  %s10322_s28 = sshll.u32 %s15405_s24, 8 }
  0x12   : > { %9677 = vmatpush3.bf16.msra.mxu1 %v9670_v2  ;;  %9673 = vmatpush3.bf16.msra.mxu0 %v9670_v2  ;;  %s10328_s7 = scalar_lea.vmem %s14266_s0, %s10322_s28  ;;  %s10334_s10 = scalar_lea.vmem %s14267_s1, %s10322_s28 }
  0x13   : > { %v322_v3 = vld [vmem:[%s10334_s10] sm:$0xff]  ;;  %v323_v4 = vld [vmem:[%s10334_s10 + $0x8] sm:$0xff]  ;;  %v324_v5 = vld [vmem:[%s10334_s10 + $0x10] sm:$0xff]  ;;  %s13945_s17 = scalar_lea.vmem %s14271_s5, %s10322_s28  ;;  %s14165_s20 = scalar_lea.vmem %s14272_s6, %s10322_s28 }
  0x14   : > { %9398 = vmatprep.mubr.msk.f32.mxu1 %vm360_vm0, %v322_v3  ;;  %v290_v6 = vld [vmem:[%s10328_s7] sm:$0xff]  ;;  %v10342_v7 = vld [vmem:[%s10328_s7 + $0x8] sm:$0xff]  ;;  %v10347_v8 = vld [vmem:[%s10328_s7 + $0x10] sm:$0xff]  ;;  %v14276_v3 = vmov 2  }
  0x15   : > { %14531 = vst [vmem:[#allocation3_spill] sm:$0xff] %v10342_v7  ;;  %9399 = vmatmul.mubr.msk.f32.vlgmr.msra.gmra.mrb[0].mxu1 %vm360_vm0, %v323_v4  ;;  %9346 = vmatprep.mubr.msk.f32.mxu0 %vm360_vm0, %v290_v6  ;;  %14532 = vst [vmem:[#allocation4_spill] sm:$0xff] %v10347_v8  ;;  %v325_v9 = vld [vmem:[%s10334_s10 + $0x18] sm:$0xff]  ;;  %v326_v10 = vld [vmem:[%s10334_s10 + $0x20] sm:$0xff] }
  0x16   : > { %9401 = vmatprep.mubr.msk.f32.mxu1 %vm360_vm0, %v324_v5  ;;  %9347 = vmatmul.mubr.msk.f32.vlgmr.msra.gmra.mrb[0].mxu0 %vm360_vm0, %v10342_v7  ;;  %v10357_v11 = vld [vmem:[%s10328_s7 + $0x18] sm:$0xff]  ;;  %v327_v12 = vld [vmem:[%s10334_s10 + $0x28] sm:$0xff]  ;;  %v328_v13 = vld [vmem:[%s10334_s10 + $0x30] sm:$0xff] }
  0x17   : > { %9349 = vmatprep.mubr.msk.f32.mxu0 %vm360_vm0, %v10347_v8  ;;  %14533 = vst [vmem:[#allocation5_spill] sm:$0xff] %v10357_v11  ;;  %v10366_v14 = vld [vmem:[%s10328_s7 + $0x20] sm:$0xff]  ;;  %v10369_v15 = vld [vmem:[%s10328_s7 + $0x28] sm:$0xff]  ;;  %v329_v16 = vld [vmem:[%s10334_s10 + $0x38] sm:$0xff]  ;;  %9820 = vset.pattern.permute.xlu1 %v14276_v3 }
  0x18   : > { %14534 = vst [vmem:[#allocation6_spill] sm:$0xff] %v10366_v14  ;;  %14535 = vst [vmem:[#allocation7_spill] sm:$0xff] %v10369_v15  ;;  %v330_v17 = vld [vmem:[%s10334_s10 + $0x40] sm:$0xff]  ;;  %v10380_v18 = vld [vmem:[%s10328_s7 + $0x30] sm:$0xff]  ;;  %9822 = vset.pattern.permute.xlu0 %v14276_v3 }
  0x19   : > { %9402 = vmatmul.mubr.msk.f32.gmra.mrb[2].mxu1 %vm360_vm0, %v325_v9  ;;  %14536 = vst [vmem:[#allocation8_spill] sm:$0xff] %v10380_v18  ;;  %v10385_v19 = vld [vmem:[%s10328_s7 + $0x38] sm:$0xff]  ;;  %v10388_v20 = vld [vmem:[%s10328_s7 + $0x40] sm:$0xff]  ;;  %v331_v21 = vld [vmem:[%s10334_s10 + $0x48] sm:$0xff] }
  0x1a   : > { %9404 = vmatprep.mubr.msk.f32.mxu1 %vm360_vm0, %v326_v10  ;;  %9350 = vmatmul.mubr.msk.f32.gmra.mrb[2].mxu0 %vm360_vm0, %v10357_v11  ;;  %14537 = vst [vmem:[#allocation9_spill] sm:$0xff] %v10385_v19  ;;  %14538 = vst [vmem:[#allocation10_spill] sm:$0xff] %v10388_v20  ;;  %v332_v22 = vld [vmem:[%s10334_s10 + $0x50] sm:$0xff]  ;;  %v10399_v23 = vld [vmem:[%s10328_s7 + $0x48] sm:$0xff] }
  0x1b   : > { %9352 = vmatprep.mubr.msk.f32.mxu0 %vm360_vm0, %v10366_v14  ;;  %14539 = vst [vmem:[#allocation11_spill] sm:$0xff] %v10399_v23  ;;  %v10402_v24 = vld [vmem:[%s10328_s7 + $0x50] sm:$0xff]  ;;  %v333_v25 = vld [vmem:[%s10334_s10 + $0x58] sm:$0xff]  ;;  %v334_v26 = vld [vmem:[%s10334_s10 + $0x60] sm:$0xff] }
  0x1c   : > { %14540 = vst [vmem:[#allocation12_spill] sm:$0xff] %v10402_v24  ;;  %v10413_v27 = vld [vmem:[%s10328_s7 + $0x58] sm:$0xff]  ;;  %v10416_v28 = vld [vmem:[%s10328_s7 + $0x60] sm:$0xff]  ;;  %v335_v29 = vld [vmem:[%s10334_s10 + $0x68] sm:$0xff] }
  0x1d   : > { %9405 = vmatmul.mubr.msk.f32.gmra.mrb[4].mxu1 %vm360_vm0, %v327_v12  ;;  %14541 = vst [vmem:[#allocation13_spill] sm:$0xff] %v10413_v27  ;;  %14542 = vst [vmem:[#allocation14_spill] sm:$0xff] %v10416_v28  ;;  %v336_v30 = vld [vmem:[%s10334_s10 + $0x70] sm:$0xff]  ;;  %v10427_v31 = vld [vmem:[%s10328_s7 + $0x68] sm:$0xff] }
  0x1e   : > { %9407 = vmatprep.mubr.msk.f32.mxu1 %vm360_vm0, %v328_v13  ;;  %9353 = vmatmul.mubr.msk.f32.gmra.mrb[4].mxu0 %vm360_vm0, %v10369_v15  ;;  %14543 = vst [vmem:[#allocation15_spill] sm:$0xff] %v10427_v31  ;;  %v10430_v32 = vld [vmem:[%s10328_s7 + $0x70] sm:$0xff]  ;;  %v337_v33 = vld [vmem:[%s10334_s10 + $0x78] sm:$0xff]  ;;  %v338_v34 = vld [vmem:[%s10334_s10 + $0x80] sm:$0xff] }
  0x1f   : > { %9355 = vmatprep.mubr.msk.f32.mxu0 %vm360_vm0, %v10380_v18  ;;  %14544 = vst [vmem:[#allocation16_spill] sm:$0xff] %v10430_v32  ;;  %v10441_v35 = vld [vmem:[%s10328_s7 + $0x78] sm:$0xff]  ;;  %v10444_v36 = vld [vmem:[%s10328_s7 + $0x80] sm:$0xff]  ;;  %v339_v37 = vld [vmem:[%s10334_s10 + $0x88] sm:$0xff] }
  0x20   : > { %14545 = vst [vmem:[#allocation17_spill] sm:$0xff] %v10441_v35  ;;  %14546 = vst [vmem:[#allocation18_spill] sm:$0xff] %v10444_v36  ;;  %v340_v38 = vld [vmem:[%s10334_s10 + $0x90] sm:$0xff]  ;;  %v10455_v39 = vld [vmem:[%s10328_s7 + $0x88] sm:$0xff] }
  0x21   : > { %9408 = vmatmul.mubr.msk.f32.gmra.mrb[6].mxu1 %vm360_vm0, %v329_v16  ;;  %14547 = vst [vmem:[#allocation19_spill] sm:$0xff] %v10455_v39  ;;  %v10458_v40 = vld [vmem:[%s10328_s7 + $0x90] sm:$0xff]  ;;  %v341_v41 = vld [vmem:[%s10334_s10 + $0x98] sm:$0xff]  ;;  %v342_v42 = vld [vmem:[%s10334_s10 + $0xa0] sm:$0xff] }
  0x22   : > { %9410 = vmatprep.mubr.msk.f32.mxu1 %vm360_vm0, %v330_v17  ;;  %9356 = vmatmul.mubr.msk.f32.gmra.mrb[6].mxu0 %vm360_vm0, %v10385_v19  ;;  %14548 = vst [vmem:[#allocation20_spill] sm:$0xff] %v10458_v40  ;;  %v10469_v43 = vld [vmem:[%s10328_s7 + $0x98] sm:$0xff]  ;;  %v10472_v44 = vld [vmem:[%s10328_s7 + $0xa0] sm:$0xff]  ;;  %v343_v45 = vld [vmem:[%s10334_s10 + $0xa8] sm:$0xff] }
  0x23   : > { %9358 = vmatprep.mubr.msk.f32.mxu0 %vm360_vm0, %v10388_v20  ;;  %14549 = vst [vmem:[#allocation21_spill] sm:$0xff] %v10469_v43  ;;  %14550 = vst [vmem:[#allocation22_spill] sm:$0xff] %v10472_v44  ;;  %v344_v46 = vld [vmem:[%s10334_s10 + $0xb0] sm:$0xff]  ;;  %v10483_v47 = vld [vmem:[%s10328_s7 + $0xa8] sm:$0xff] }
  0x24   : > { %14551 = vst [vmem:[#allocation23_spill] sm:$0xff] %v10483_v47  ;;  %v10486_v48 = vld [vmem:[%s10328_s7 + $0xb0] sm:$0xff]  ;;  %v345_v49 = vld [vmem:[%s10334_s10 + $0xb8] sm:$0xff]  ;;  %v346_v50 = vld [vmem:[%s10334_s10 + $0xc0] sm:$0xff] }
  0x25   : > { %9411 = vmatmul.mubr.msk.f32.gmra.mrb[8].mxu1 %vm360_vm0, %v331_v21  ;;  %14552 = vst [vmem:[#allocation24_spill] sm:$0xff] %v10486_v48  ;;  %v10497_v51 = vld [vmem:[%s10328_s7 + $0xb8] sm:$0xff]  ;;  %v10500_v52 = vld [vmem:[%s10328_s7 + $0xc0] sm:$0xff]  ;;  %v347_v53 = vld [vmem:[%s10334_s10 + $0xc8] sm:$0xff] }
  0x26   : > { %9413 = vmatprep.mubr.msk.f32.mxu1 %vm360_vm0, %v332_v22  ;;  %9359 = vmatmul.mubr.msk.f32.gmra.mrb[8].mxu0 %vm360_vm0, %v10399_v23  ;;  %14553 = vst [vmem:[#allocation25_spill] sm:$0xff] %v10497_v51  ;;  %14554 = vst [vmem:[#allocation26_spill] sm:$0xff] %v10500_v52  ;;  %v348_v54 = vld [vmem:[%s10334_s10 + $0xd0] sm:$0xff]  ;;  %v10511_v55 = vld [vmem:[%s10328_s7 + $0xc8] sm:$0xff]  ;;  %v14577_v23 = vmov 3  }
  0x27   : > { %9361 = vmatprep.mubr.msk.f32.mxu0 %vm360_vm0, %v10402_v24  ;;  %14555 = vst [vmem:[#allocation27_spill] sm:$0xff] %v10511_v55  ;;  %v10514_v56 = vld [vmem:[%s10328_s7 + $0xd0] sm:$0xff]  ;;  %v349_v57 = vld [vmem:[%s10334_s10 + $0xd8] sm:$0xff]  ;;  %v350_v58 = vld [vmem:[%s10334_s10 + $0xe0] sm:$0xff] }
  0x28   : > { %14556 = vst [vmem:[#allocation28_spill] sm:$0xff] %v10514_v56  ;;  %v10525_v59 = vld [vmem:[%s10328_s7 + $0xd8] sm:$0xff]  ;;  %v10528_v60 = vld [vmem:[%s10328_s7 + $0xe0] sm:$0xff]  ;;  %v351_v61 = vld [vmem:[%s10334_s10 + $0xe8] sm:$0xff] }
  0x29   : > { %9414 = vmatmul.mubr.msk.f32.gmra.mrb[10].mxu1 %vm360_vm0, %v333_v25  ;;  %14557 = vst [vmem:[#allocation29_spill] sm:$0xff] %v10525_v59  ;;  %14558 = vst [vmem:[#allocation30_spill] sm:$0xff] %v10528_v60  ;;  %v352_v62 = vld [vmem:[%s10334_s10 + $0xf0] sm:$0xff]  ;;  %v10539_v63 = vld [vmem:[%s10328_s7 + $0xe8] sm:$0xff] }
  0x2a   : > { %9416 = vmatprep.mubr.msk.f32.mxu1 %vm360_vm0, %v334_v26  ;;  %9362 = vmatmul.mubr.msk.f32.gmra.mrb[10].mxu0 %vm360_vm0, %v10413_v27  ;;  %14559 = vst [vmem:[#allocation31_spill] sm:$0xff] %v10539_v63  ;;  %v10542_v0 = vld [vmem:[%s10328_s7 + $0xf0] sm:$0xff]  ;;  %v353_v1 = vld [vmem:[%s10334_s10 + $0xf8] sm:$0xff]  ;;  %v10562_v4 = vld [vmem:[%s14269_s3] ss:$0 sm:$0xff] }
  0x2b   : > { %9364 = vmatprep.mubr.msk.f32.mxu0 %vm360_vm0, %v10416_v28  ;;  %14560 = vst [vmem:[#allocation32_spill] sm:$0xff] %v10542_v0  ;;  %v10552_v2 = vld [vmem:[%s10328_s7 + $0xf8] sm:$0xff] }
  0x2c   : > { %14561 = vst [vmem:[#allocation33_spill] sm:$0xff] %v10552_v2 }
  0x2d   : > { %9417 = vmatmul.mubr.msk.f32.gmra.mrb[12].mxu1 %vm360_vm0, %v335_v29  ;;  %v14283_v29 = vmov 3  }
  0x2e   : > { %9419 = vmatprep.mubr.msk.f32.mxu1 %vm360_vm0, %v336_v30  ;;  %9365 = vmatmul.mubr.msk.f32.gmra.mrb[12].mxu0 %vm360_vm0, %v10427_v31 }
  0x2f   : > { %9367 = vmatprep.mubr.msk.f32.mxu0 %vm360_vm0, %v10430_v32 }
  0x31   : > { %9420 = vmatmul.mubr.msk.f32.gmra.mrb[14].mxu1 %vm360_vm0, %v337_v33 }
  0x32   : > { %9422 = vmatprep.mubr.msk.f32.mxu1 %vm360_vm0, %v338_v34  ;;  %9368 = vmatmul.mubr.msk.f32.gmra.mrb[14].mxu0 %vm360_vm0, %v10441_v35  ;;  %v14575_v35 = vmov 1  }
  0x33   : > { %9370 = vmatprep.mubr.msk.f32.mxu0 %vm360_vm0, %v10444_v36 }
  0x35   : > { %9423 = vmatmul.mubr.msk.f32.gmra.mrb[16].mxu1 %vm360_vm0, %v339_v37 }
  0x36   : > { %9425 = vmatprep.mubr.msk.f32.mxu1 %vm360_vm0, %v340_v38  ;;  %9371 = vmatmul.mubr.msk.f32.gmra.mrb[16].mxu0 %vm360_vm0, %v10455_v39 }
  0x37   : > { %9373 = vmatprep.mubr.msk.f32.mxu0 %vm360_vm0, %v10458_v40 }
  0x39   : > { %9426 = vmatmul.mubr.msk.f32.gmra.mrb[18].mxu1 %vm360_vm0, %v341_v41  ;;  %v14280_v41 = vmov 1  }
  0x3a   : > { %9428 = vmatprep.mubr.msk.f32.mxu1 %vm360_vm0, %v342_v42  ;;  %9374 = vmatmul.mubr.msk.f32.gmra.mrb[18].mxu0 %vm360_vm0, %v10469_v43 }
  0x3b   : > { %9376 = vmatprep.mubr.msk.f32.mxu0 %vm360_vm0, %v10472_v44 }
  0x3d   : > { %9429 = vmatmul.mubr.msk.f32.gmra.mrb[20].mxu1 %vm360_vm0, %v343_v45 }
  0x3e   : > { %9431 = vmatprep.mubr.msk.f32.mxu1 %vm360_vm0, %v344_v46  ;;  %9377 = vmatmul.mubr.msk.f32.gmra.mrb[20].mxu0 %vm360_vm0, %v10483_v47 }
  0x3f   : > { %9379 = vmatprep.mubr.msk.f32.mxu0 %vm360_vm0, %v10486_v48 }
  0x41   : > { %9432 = vmatmul.mubr.msk.f32.gmra.mrb[22].mxu1 %vm360_vm0, %v345_v49 }
  0x42   : > { %9434 = vmatprep.mubr.msk.f32.mxu1 %vm360_vm0, %v346_v50  ;;  %9380 = vmatmul.mubr.msk.f32.gmra.mrb[22].mxu0 %vm360_vm0, %v10497_v51 }
  0x43   : > { %9382 = vmatprep.mubr.msk.f32.mxu0 %vm360_vm0, %v10500_v52 }
  0x45   : > { %9435 = vmatmul.mubr.msk.f32.gmra.mrb[24].mxu1 %vm360_vm0, %v347_v53 }
  0x46   : > { %9437 = vmatprep.mubr.msk.f32.mxu1 %vm360_vm0, %v348_v54  ;;  %9383 = vmatmul.mubr.msk.f32.gmra.mrb[24].mxu0 %vm360_vm0, %v10511_v55  ;;  %v14273_v54 = vmov 0  }
  0x47   : > { %9385 = vmatprep.mubr.msk.f32.mxu0 %vm360_vm0, %v10514_v56  ;;  %v14571_v56 = vmov 2  }
  0x49   : > { %9438 = vmatmul.mubr.msk.f32.gmra.mrb[26].mxu1 %vm360_vm0, %v349_v57 }
  0x4a   : > { %9440 = vmatprep.mubr.msk.f32.mxu1 %vm360_vm0, %v350_v58  ;;  %9386 = vmatmul.mubr.msk.f32.gmra.mrb[26].mxu0 %vm360_vm0, %v10525_v59 }
  0x4b   : > { %9388 = vmatprep.mubr.msk.f32.mxu0 %vm360_vm0, %v10528_v60 }
  0x4d   : > { %9441 = vmatmul.mubr.msk.f32.gmra.mrb[28].mxu1 %vm360_vm0, %v351_v61 }
  0x4e   : > { %9443 = vmatprep.mubr.msk.f32.mxu1 %vm360_vm0, %v352_v62  ;;  %9389 = vmatmul.mubr.msk.f32.gmra.mrb[28].mxu0 %vm360_vm0, %v10539_v63 }
  0x4f   : > { %9391 = vmatprep.mubr.msk.f32.mxu0 %vm360_vm0, %v10542_v0 }
  0x51   : > { %9444 = vmatmul.mubr.msk.f32.gmra.mrb[30].mxu1 %vm360_vm0, %v353_v1 }
  0x52   : > { %9392 = vmatmul.mubr.msk.f32.gmra.mrb[30].mxu0 %vm360_vm0, %v10552_v2  ;;  %v14570_v2 = vmov 0  }
  0xe8   : > { %v9400_v5 = vpop.f32.mrb[0].mxu1 }
  0xe9   : > { %v10565_v6 = vadd.f32 %v9400_v5, %v10562_v4  ;;  %v844_v9 = vpop.f32.mrb[1].mxu1  ;;  %v10567_v10 = vpop.f32.mrb[0].mxu0 }
  0xea   : > { %v10570_v12 = vadd.f32 %v10562_v4, %v844_v9  ;;  %v523_v13 = vpop.f32.mrb[1].mxu0 }
  0xeb   : > { %14562 = vst [vmem:[#allocation34_spill] sm:$0xff] %v10565_v6  ;;  %1176 = vperm.xlu1 %9820, %v10565_v6   ;;  %v10603_v49 = vadd.f32 %v10562_v4, %v523_v13 }
  0xec   : > { %14563 = vst [vmem:[#allocation35_spill] sm:$0xff] %v10570_v12  ;;  %1173 = vperm.xlu0 %9822, %v10570_v12   ;;  %v9403_v16 = vpop.f32.mrb[2].mxu1 }
  0xed   : > { %v854_v17 = vpop.f32.mrb[3].mxu1  ;;  %v9351_v21 = vpop.f32.mrb[2].mxu0  ;;  %v10575_v22 = vadd.f32 %v9403_v16, %v10562_v4  ;;  %14566 = vst [vmem:[#allocation38_spill] sm:$0xff] %v10603_v49 }
  0xee   : > { %v10578_v25 = vadd.f32 %v10562_v4, %v854_v17  ;;  %v10580_v26 = vpop.f32.mrb[3].mxu0 }
  0xef   : > { %14564 = vst [vmem:[#allocation36_spill] sm:$0xff] %v10575_v22  ;;  %9821 = vset.pattern.permute.xlu1 %v14283_v29  ;;  %v10717_v11 = vadd.f32 %v10562_v4, %v10580_v26 }
  0xf0   : > { %14565 = vst [vmem:[#allocation37_spill] sm:$0xff] %v10578_v25  ;;  %1697 = vperm.xlu1 %9821, %v10565_v6   ;;  %9824 = vset.pattern.permute.xlu0 %v14283_v29  ;;  %v9406_v30 = vpop.f32.mrb[4].mxu1 }
  0xf1   : > { %1694 = vperm.xlu0 %9824, %v10570_v12   ;;  %v10588_v34 = vpop.f32.mrb[5].mxu1  ;;  %v10590_v37 = vpop.f32.mrb[4].mxu0  ;;  %v10618_v62 = vadd.f32 %v9406_v30, %v10562_v4  ;;  %14580 = vst [vmem:[#allocation48_spill] sm:$0xff] %v10717_v11 }
  0xf2   : > { %v10592_v38 = vpop.f32.mrb[5].mxu0 }
  0xf3   : > { %14567 = vst [vmem:[#allocation39_spill] sm:$0xff] %v10618_v62 }
  0xf4   : > { %9823 = vset.pattern.permute.xlu1 %v14280_v41  ;;  %v9409_v42 = vpop.f32.mrb[6].mxu1 }
  0xf5   : > { %1566 = vperm.xlu1 %9823, %v10570_v12   ;;  %9826 = vset.pattern.permute.xlu0 %v14276_v3  ;;  %v10597_v45 = vpop.f32.mrb[7].mxu1  ;;  %v10599_v46 = vpop.f32.mrb[6].mxu0  ;;  %v10647_v0 = vadd.f32 %v9409_v42, %v10562_v4 }
  0xf6   : > { %1182 = vperm.xlu0 %9826, %v10575_v22   ;;  %v10605_v50 = vpop.f32.mrb[7].mxu0 }
  0xf7   : > { %14569 = vst [vmem:[#allocation41_spill] sm:$0xff] %v10647_v0 }
  0xf8   : > { %v9412_v53 = vpop.f32.mrb[8].mxu1 }
  0xf9   : > { %9825 = vset.pattern.permute.xlu1 %v14273_v54  ;;  %v10608_v57 = vpop.f32.mrb[9].mxu1  ;;  %v10610_v58 = vpop.f32.mrb[8].mxu0  ;;  %v10639_v54 = vadd.f32 %v9351_v21, %v10562_v4  ;;  %v10660_v52 = vadd.f32 %v9412_v53, %v10562_v4 }
  0xfa   : > { %9828 = vset.pattern.permute.xlu0 %v14283_v29  ;;  %2143 = vperm.xlu1 %9825, %v10603_v49   ;;  %v10614_v61 = vpop.f32.mrb[9].mxu0 }
  0xfb   : > { %1703 = vperm.xlu0 %9828, %v10575_v22   ;;  %14568 = vst [vmem:[#allocation40_spill] sm:$0xff] %v10639_v54  ;;  %14572 = vst [vmem:[#allocation42_spill] sm:$0xff] %v10660_v52 }
  0xfc   : > { %v9415_v1 = vpop.f32.mrb[10].mxu1 }
  0xfd   : > { %v10620_v5 = vpop.f32.mrb[11].mxu1  ;;  %v10622_v9 = vpop.f32.mrb[10].mxu0  ;;  %v10671_v44 = vadd.f32 %v9415_v1, %v10562_v4 }
  0xfe   : > { %1029 = vperm.xlu1 %9825, %v10575_v22   ;;  %v10625_v13 = vpop.f32.mrb[11].mxu0 }
  0xff   : > { %9834 = vset.pattern.permute.xlu0 %v14276_v3  ;;  %14573 = vst [vmem:[#allocation43_spill] sm:$0xff] %v10671_v44 }
 0x100   : > { %1188 = vperm.xlu0 %9834, %v10618_v62   ;;  %v9418_v16 = vpop.f32.mrb[12].mxu1 }
 0x101   : > { %v10629_v17 = vpop.f32.mrb[13].mxu1  ;;  %v10631_v33 = vpop.f32.mrb[12].mxu0  ;;  %v10683_v39 = vadd.f32 %v9418_v16, %v10562_v4 }
 0x102   : > { %9827 = vset.pattern.permute.xlu1 %v14280_v41  ;;  %v10634_v30 = vpop.f32.mrb[13].mxu0 }
 0x103   : > { %1578 = vperm.xlu1 %9827, %v10575_v22   ;;  %14574 = vst [vmem:[#allocation44_spill] sm:$0xff] %v10683_v39 }
 0x104   : > { %9836 = vset.pattern.permute.xlu0 %v14283_v29  ;;  %v9421_v60 = vpop.f32.mrb[14].mxu1 }
 0x105   : > { %1709 = vperm.xlu0 %9836, %v10618_v62   ;;  %v10642_v3 = vpop.f32.mrb[15].mxu1  ;;  %v10644_v63 = vpop.f32.mrb[14].mxu0  ;;  %v10695_v28 = vadd.f32 %v9421_v60, %v10562_v4 }
 0x106   : > { %v10649_v41 = vpop.f32.mrb[15].mxu0 }
 0x107   : > { %9829 = vset.pattern.permute.xlu1 %v14570_v2  ;;  %14576 = vst [vmem:[#allocation45_spill] sm:$0xff] %v10695_v28 }
 0x108   : > { %2158 = vperm.xlu1 %9829, %v10639_v54   ;;  %v9424_v29 = vpop.f32.mrb[16].mxu1 }
 0x109   : > { %9841 = vset.pattern.permute.xlu0 %v14571_v56  ;;  %v10654_v21 = vpop.f32.mrb[17].mxu1  ;;  %v10656_v59 = vpop.f32.mrb[16].mxu0  ;;  %v10706_v19 = vadd.f32 %v9424_v29, %v10562_v4 }
 0x10a   : > { %1194 = vperm.xlu0 %9841, %v10647_v0   ;;  %v10662_v42 = vpop.f32.mrb[17].mxu0 }
 0x10b   : > { %14578 = vst [vmem:[#allocation46_spill] sm:$0xff] %v10706_v19 }
 0x10c   : > { %1024 = vperm.xlu1 %9829, %v10578_v25   ;;  %v9427_v55 = vpop.f32.mrb[18].mxu1 }
 0x10d   : > { %v10665_v48 = vpop.f32.mrb[19].mxu1  ;;  %v10667_v51 = vpop.f32.mrb[18].mxu0  ;;  %v10721_v8 = vadd.f32 %v9427_v55, %v10562_v4 }
 0x10e   : > { %1200 = vperm.xlu0 %9841, %v10660_v52   ;;  %v10673_v47 = vpop.f32.mrb[19].mxu0 }
 0x10f   : > { %14581 = vst [vmem:[#allocation49_spill] sm:$0xff] %v10721_v8 }
 0x110   : > { %9830 = vset.pattern.permute.xlu1 %v14571_v56  ;;  %v9430_v53 = vpop.f32.mrb[20].mxu1 }
 0x111   : > { %1179 = vperm.xlu1 %9830, %v10578_v25   ;;  %v10677_v43 = vpop.f32.mrb[21].mxu1  ;;  %v10679_v40 = vpop.f32.mrb[20].mxu0  ;;  %v10733_v26 = vadd.f32 %v9430_v53, %v10562_v4  ;;  %v10751_v53 = vadd.f32 %v10590_v37, %v10562_v4 }
 0x112   : > { %1206 = vperm.xlu0 %9841, %v10671_v44   ;;  %v10685_v36 = vpop.f32.mrb[21].mxu0 }
 0x113   : > { %14583 = vst [vmem:[#allocation51_spill] sm:$0xff] %v10733_v26  ;;  %14586 = vst [vmem:[#allocation54_spill] sm:$0xff] %v10751_v53 }
 0x114   : > { %v9433_v1 = vpop.f32.mrb[22].mxu1 }
 0x115   : > { %9831 = vset.pattern.permute.xlu1 %v14575_v35  ;;  %v10688_v32 = vpop.f32.mrb[23].mxu1  ;;  %v10690_v31 = vpop.f32.mrb[22].mxu0 }
 0x116   : > { %1212 = vperm.xlu0 %9841, %v10683_v39   ;;  %1574 = vperm.xlu1 %9831, %v10578_v25   ;;  %v10697_v27 = vpop.f32.mrb[23].mxu0 }
 0x118   : > { %v9436_v16 = vpop.f32.mrb[24].mxu1 }
 0x119   : > { %v10699_v24 = vpop.f32.mrb[25].mxu1  ;;  %v10701_v20 = vpop.f32.mrb[24].mxu0 }
 0x11a   : > { %1218 = vperm.xlu0 %9841, %v10695_v28   ;;  %9832 = vset.pattern.permute.xlu1 %v14577_v23  ;;  %v10708_v18 = vpop.f32.mrb[25].mxu0 }
 0x11b   : > { %14579 = vst [vmem:[#allocation47_spill] sm:$0xff] %v10708_v18  ;;  %1700 = vperm.xlu1 %9832, %v10578_v25  }
 0x11c   : > { %v9439_v60 = vpop.f32.mrb[26].mxu1 }
 0x11d   : > { %v10711_v15 = vpop.f32.mrb[27].mxu1  ;;  %v10713_v14 = vpop.f32.mrb[26].mxu0 }
 0x11e   : > { %1224 = vperm.xlu0 %9841, %v10706_v19   ;;  %v10723_v29 = vpop.f32.mrb[27].mxu0 }
 0x11f   : > { %14582 = vst [vmem:[#allocation50_spill] sm:$0xff] %v10723_v29  ;;  %9833 = vset.pattern.permute.xlu1 %v14570_v2 }
 0x120   : > { %2153 = vperm.xlu1 %9833, %v10717_v11   ;;  %v9442_v7 = vpop.f32.mrb[28].mxu1  ;;  %v10744_v11 = vadd.f32 %v9433_v1, %v10562_v4  ;;  %v10760_v1 = vadd.f32 %v9439_v60, %v10562_v4  ;;  %v10799_v60 = vadd.f32 %v10610_v58, %v10562_v4  ;;  %v10820_v58 = vadd.f32 %v10644_v63, %v10562_v4 }
 0x121   : > { %v10727_v25 = vpop.f32.mrb[29].mxu1  ;;  %v10729_v22 = vpop.f32.mrb[28].mxu0  ;;  %v10769_v37 = vadd.f32 %v9442_v7, %v10562_v4  ;;  %v10787_v7 = vadd.f32 %v10599_v46, %v10562_v4  ;;  %v10806_v46 = vadd.f32 %v10622_v9, %v10562_v4  ;;  %v10826_v9 = vadd.f32 %v10656_v59, %v10562_v4 }
 0x122   : > { %1230 = vperm.xlu0 %9841, %v10721_v8   ;;  %v10735_v12 = vpop.f32.mrb[29].mxu0  ;;  %14585 = vst [vmem:[#allocation53_spill] sm:$0xff] %v10744_v11  ;;  %14588 = vst [vmem:[#allocation56_spill] sm:$0xff] %v10760_v1  ;;  %v10841_v59 = vadd.f32 %v10679_v40, %v10562_v4  ;;  %v10845_v63 = vadd.f32 %v10562_v4, %v10608_v57  ;;  %v10861_v40 = vadd.f32 %v10701_v20, %v10562_v4 }
 0x123   : > { %14584 = vst [vmem:[#allocation52_spill] sm:$0xff] %v10735_v12  ;;  %v10754_v12 = vadd.f32 %v9436_v16, %v10562_v4  ;;  %14590 = vst [vmem:[#allocation58_spill] sm:$0xff] %v10769_v37  ;;  %v10879_v20 = vadd.f32 %v10729_v22, %v10562_v4 }
 0x124   : > { %1039 = vperm.xlu1 %9833, %v10618_v62   ;;  %v9445_v55 = vpop.f32.mrb[30].mxu1  ;;  %14592 = vst [vmem:[#allocation60_spill] sm:$0xff] %v10787_v7  ;;  %14594 = vst [vmem:[#allocation62_spill] sm:$0xff] %v10799_v60 }
 0x125   : > { %v10738_v29 = vpop.f32.mrb[30].mxu0  ;;  %v10740_v18 = vpop.f32.mrb[31].mxu1  ;;  %14587 = vst [vmem:[#allocation55_spill] sm:$0xff] %v10754_v12  ;;  %v10774_v16 = vadd.f32 %v9445_v55, %v10562_v4  ;;  %14595 = vst [vmem:[#allocation63_spill] sm:$0xff] %v10806_v46  ;;  %v10834_v55 = vadd.f32 %v10667_v51, %v10562_v4  ;;  %v10852_v51 = vadd.f32 %v10690_v31, %v10562_v4 }
 0x126   : > { %1236 = vperm.xlu0 %9841, %v10733_v26   ;;  %14597 = vst [vmem:[#allocation65_spill] sm:$0xff] %v10820_v58  ;;  %14598 = vst [vmem:[#allocation66_spill] sm:$0xff] %v10826_v9  ;;  %v10869_v31 = vadd.f32 %v10713_v14, %v10562_v4 }
 0x127   : > { %14591 = vst [vmem:[#allocation59_spill] sm:$0xff] %v10774_v16  ;;  %14599 = vst [vmem:[#allocation67_spill] sm:$0xff] %v10834_v55 }
 0x128   : > { %9835 = vset.pattern.permute.xlu1 %v14575_v35  ;;  %14600 = vst [vmem:[#allocation68_spill] sm:$0xff] %v10841_v59  ;;  %14601 = vst [vmem:[#allocation69_spill] sm:$0xff] %v10845_v63 }
 0x129   : > { %1586 = vperm.xlu1 %9835, %v10618_v62   ;;  %v10764_v62 = vadd.f32 %v10562_v4, %v10588_v34  ;;  %v10794_v34 = vadd.f32 %v10562_v4, %v10597_v45  ;;  %v10813_v45 = vadd.f32 %v10631_v33, %v10562_v4  ;;  %v10829_v33 = vpop.f32.mrb[31].mxu0  ;;  %14602 = vst [vmem:[#allocation70_spill] sm:$0xff] %v10852_v51  ;;  %14604 = vst [vmem:[#allocation72_spill] sm:$0xff] %v10861_v40 }
 0x12a   : > { %1242 = vperm.xlu0 %9841, %v10744_v11   ;;  %14606 = vst [vmem:[#allocation74_spill] sm:$0xff] %v10869_v31  ;;  %14609 = vst [vmem:[#allocation77_spill] sm:$0xff] %v10879_v20 }
 0x12b   : > { %14589 = vst [vmem:[#allocation57_spill] sm:$0xff] %v10764_v62  ;;  %14593 = vst [vmem:[#allocation61_spill] sm:$0xff] %v10794_v34 }
 0x12c   : > { %14596 = vst [vmem:[#allocation64_spill] sm:$0xff] %v10813_v45 }
 0x12d   : > { %9837 = vset.pattern.permute.xlu1 %v14570_v2 }
 0x12e   : > { %1248 = vperm.xlu0 %9841, %v10754_v12   ;;  %2168 = vperm.xlu1 %9837, %v10751_v53  }
 0x132   : > { %1254 = vperm.xlu0 %9841, %v10760_v1   ;;  %9838 = vset.pattern.permute.xlu1 %v14571_v56 }
 0x133   : > { %1185 = vperm.xlu1 %9838, %v10764_v62  }
 0x136   : > { %1260 = vperm.xlu0 %9841, %v10769_v37  }
 0x137   : > { %9839 = vset.pattern.permute.xlu1 %v14577_v23 }
 0x138   : > { %1706 = vperm.xlu1 %9839, %v10764_v62  }
 0x13a   : > { %1266 = vperm.xlu0 %9841, %v10774_v16  }
 0x13c   : > { %9840 = vset.pattern.permute.xlu1 %v14570_v2 }
 0x13d   : > { %1049 = vperm.xlu1 %9840, %v10647_v0  }
 0x13e   : > { %2302 = vperm.xlu0 %9841, %v10603_v49  }
 0x141   : > { %9842 = vset.pattern.permute.xlu1 %v14575_v35 }
 0x142   : > { %2311 = vperm.xlu0 %9841, %v10639_v54   ;;  %1594 = vperm.xlu1 %9842, %v10647_v0  }
 0x146   : > { %2317 = vperm.xlu0 %9841, %v10751_v53   ;;  %9843 = vset.pattern.permute.xlu1 %v14570_v2 }
 0x147   : > { %2178 = vperm.xlu1 %9843, %v10787_v7  }
 0x14a   : > { %2323 = vperm.xlu0 %9841, %v10787_v7  }
 0x14b   : > { %9844 = vset.pattern.permute.xlu1 %v14571_v56 }
 0x14c   : > { %1191 = vperm.xlu1 %9844, %v10794_v34  }
 0x14e   : > { %2329 = vperm.xlu0 %9841, %v10799_v60  }
 0x150   : > { %9845 = vset.pattern.permute.xlu1 %v14577_v23 }
 0x151   : > { %1712 = vperm.xlu1 %9845, %v10794_v34  }
 0x152   : > { %2335 = vperm.xlu0 %9841, %v10806_v46  }
 0x155   : > { %9846 = vset.pattern.permute.xlu1 %v14570_v2 }
 0x156   : > { %2341 = vperm.xlu0 %9841, %v10813_v45   ;;  %1059 = vperm.xlu1 %9846, %v10660_v52  }
 0x15a   : > { %2347 = vperm.xlu0 %9841, %v10820_v58   ;;  %9847 = vset.pattern.permute.xlu1 %v14575_v35 }
 0x15b   : > { %1602 = vperm.xlu1 %9847, %v10660_v52  }
 0x15e   : > { %2353 = vperm.xlu0 %9841, %v10826_v9  }
 0x15f   : > { %9848 = vset.pattern.permute.xlu1 %v14570_v2 }
 0x160   : > { %2188 = vperm.xlu1 %9848, %v10799_v60  }
 0x162   : > { %2359 = vperm.xlu0 %9841, %v10834_v55  }
 0x164   : > { %9849 = vset.pattern.permute.xlu1 %v14571_v56 }
 0x165   : > { %1197 = vperm.xlu1 %9849, %v10845_v63  }
 0x166   : > { %2365 = vperm.xlu0 %9841, %v10841_v59  }
 0x169   : > { %9850 = vset.pattern.permute.xlu1 %v14577_v23 }
 0x16a   : > { %v10855_v55 = vpop.permute.xlu1 %1176  ;;  %2371 = vperm.xlu0 %9841, %v10852_v51   ;;  %1718 = vperm.xlu1 %9850, %v10845_v63  }
 0x16b   : > { %14603 = vst [vmem:[#allocation71_spill] sm:$0xff] %v10855_v55  ;;  %v10863_v57 = vpop.permute.xlu0 %1173 }
 0x16c   : > { %14605 = vst [vmem:[#allocation73_spill] sm:$0xff] %v10863_v57 }
 0x16e   : > { %2377 = vperm.xlu0 %9841, %v10861_v40   ;;  %9851 = vset.pattern.permute.xlu1 %v14570_v2 }
 0x16f   : > { %v10871_v59 = vpop.permute.xlu1 %1697  ;;  %1069 = vperm.xlu1 %9851, %v10671_v44  }
 0x170   : > { %14607 = vst [vmem:[#allocation75_spill] sm:$0xff] %v10871_v59  ;;  %v10874_v55 = vpop.permute.xlu0 %1694  ;;  %v10888_v59 = vadd.f32 %v10738_v29, %v10562_v4 }
 0x171   : > { %14608 = vst [vmem:[#allocation76_spill] sm:$0xff] %v10874_v55  ;;  %v10892_v55 = vadd.f32 %v10562_v4, %v10620_v5 }
 0x172   : > { %2383 = vperm.xlu0 %9841, %v10869_v31   ;;  %14611 = vst [vmem:[#allocation79_spill] sm:$0xff] %v10888_v59  ;;  %v1003_v31 = vlaneseq }
 0x173   : > { %9852 = vset.pattern.permute.xlu1 %v14575_v35  ;;  %14612 = vst [vmem:[#allocation80_spill] sm:$0xff] %v10892_v55 }
 0x174   : > { %v10882_v57 = vpop.permute.xlu1 %1566  ;;  %1610 = vperm.xlu1 %9852, %v10671_v44  }
 0x175   : > { %14610 = vst [vmem:[#allocation78_spill] sm:$0xff] %v10882_v57  ;;  %v1183_v14 = vpop.permute.xlu0 %1182 }
 0x176   : > { %2389 = vperm.xlu0 %9841, %v10879_v20  }
 0x178   : > { %9853 = vset.pattern.permute.xlu1 %v14571_v56 }
 0x179   : > { %1203 = vperm.xlu1 %9853, %v10892_v55   ;;  %v10896_v22 = vpop.permute.xlu1 %2143 }
 0x17a   : > { %14613 = vst [vmem:[#allocation81_spill] sm:$0xff] %v10896_v22  ;;  %2395 = vperm.xlu0 %9841, %v10888_v59   ;;  %v1704_v57 = vpop.permute.xlu0 %1703 }
 0x17d   : > { %9854 = vset.pattern.permute.xlu1 %v14577_v23  ;;  %v1030_v20 = vpop.permute.xlu1 %1029 }
 0x17e   : > { %9897 = vset.pattern.permute.xlu0 %v14575_v35  ;;  %1724 = vperm.xlu1 %9854, %v10892_v55  }
 0x17f   : > { %1570 = vperm.xlu0 %9897, %v10565_v6   ;;  %v10903_v5 = vpop.permute.xlu0 %1188 }
 0x180   : > { %14614 = vst [vmem:[#allocation82_spill] sm:$0xff] %v10903_v5  ;;  %v10919_v5 = vadd.f32 %v10562_v4, %v10629_v17 }
 0x182   : > { %9855 = vset.pattern.permute.xlu1 %v14570_v2  ;;  %v1579_v29 = vpop.permute.xlu1 %1578  ;;  %14618 = vst [vmem:[#allocation86_spill] sm:$0xff] %v10919_v5 }
 0x183   : > { %1582 = vperm.xlu0 %9897, %v10764_v62   ;;  %1079 = vperm.xlu1 %9855, %v10683_v39  }
 0x184   : > { %v10908_v22 = vpop.permute.xlu0 %1709 }
 0x185   : > { %14615 = vst [vmem:[#allocation83_spill] sm:$0xff] %v10908_v22 }
 0x187   : > { %1590 = vperm.xlu0 %9897, %v10794_v34   ;;  %9856 = vset.pattern.permute.xlu1 %v14575_v35  ;;  %v10912_v59 = vpop.permute.xlu1 %2158  ;;  %v10931_v34 = vshrl.u32 %v1003_v31, 7 }
 0x188   : > { %14616 = vst [vmem:[#allocation84_spill] sm:$0xff] %v10912_v59  ;;  %1618 = vperm.xlu1 %9856, %v10683_v39   ;;  %v10928_v59 = vand.u32 127, %v1003_v31 }
 0x189   : > { %v10915_v6 = vpop.permute.xlu0 %1194  ;;  %14622 = vst [vmem:[#allocation90_spill] sm:$0xff] %v10931_v34 }
 0x18a   : > { %14617 = vst [vmem:[#allocation85_spill] sm:$0xff] %v10915_v6  ;;  %14621 = vst [vmem:[#allocation89_spill] sm:$0xff] %v10928_v59 }
 0x18b   : > { %1598 = vperm.xlu0 %9897, %v10845_v63   ;;  %v10922_v62 = vpop.permute.xlu1 %1024 }
 0x18c   : > { %14619 = vst [vmem:[#allocation87_spill] sm:$0xff] %v10922_v62  ;;  %9857 = vset.pattern.permute.xlu1 %v14571_v56  ;;  %v1272_v62 = vadd.s32 4294967288, %v10928_v59 }
 0x18d   : > { %v10925_v22 = vpop.permute.xlu0 %1200  ;;  %1209 = vperm.xlu1 %9857, %v10919_v5  }
 0x18e   : > { %14620 = vst [vmem:[#allocation88_spill] sm:$0xff] %v10925_v22  ;;  %v10941_v22 = vadd.f32 %v10562_v4, %v10642_v3  ;;  %v10960_v3 = vadd.f32 %v10562_v4, %v10654_v21  ;;  %v10975_v21 = vadd.f32 %v10562_v4, %v10665_v48  ;;  %v10992_v48 = vadd.f32 %v10562_v4, %v10677_v43 }
 0x18f   : > { %1606 = vperm.xlu0 %9897, %v10892_v55   ;;  %v10945_v55 = vsub.s32 %v10928_v59, %v10931_v34 }
 0x190   : > { %v1180_v6 = vpop.permute.xlu1 %1179  ;;  %14624 = vst [vmem:[#allocation92_spill] sm:$0xff] %v10941_v22  ;;  %14627 = vst [vmem:[#allocation95_spill] sm:$0xff] %v10960_v3 }
 0x191   : > { %v10933_v17 = vpop.permute.xlu0 %1206  ;;  %9858 = vset.pattern.permute.xlu1 %v14577_v23  ;;  %v1282_v40 = vrot.slane %v1180_v6, %v10945_v55  ;;  %14630 = vst [vmem:[#allocation98_spill] sm:$0xff] %v10975_v21  ;;  %14634 = vst [vmem:[#allocation102_spill] sm:$0xff] %v10992_v48 }
 0x192   : > { %14623 = vst [vmem:[#allocation91_spill] sm:$0xff] %v10933_v17  ;;  %1730 = vperm.xlu1 %9858, %v10919_v5   ;;  %v10953_v17 = vsub.s32 %v1272_v62, %v10931_v34 }
 0x193   : > { %1614 = vperm.xlu0 %9897, %v10919_v5  }
 0x194   : > { %v1286_v59 = vrot.slane %v1183_v14, %v10953_v17  ;;  %v1805_v5 = vrot.slane %v1704_v57, %v10953_v17 }
 0x195   : > { %v10947_v31 = vpop.permute.xlu0 %1212  ;;  %v10949_v63 = vpop.permute.xlu1 %1574 }
 0x196   : > { %14625 = vst [vmem:[#allocation93_spill] sm:$0xff] %v10947_v31  ;;  %14626 = vst [vmem:[#allocation94_spill] sm:$0xff] %v10949_v63  ;;  %9859 = vset.pattern.permute.xlu1 %v14570_v2  ;;  %v10967_v62 = vsel %vm1277_vm1, %v1286_v59, %v1282_v40 }
 0x197   : > { %1622 = vperm.xlu0 %9897, %v10941_v22   ;;  %1089 = vperm.xlu1 %9859, %v10695_v28   ;;  %14629 = vst [vmem:[#allocation97_spill] sm:$0xff] %v10967_v62  ;;  %v1536_v59 = vmul.f32 %v10967_v62, %v1030_v20 }
 0x199   : > { %v10963_v31 = vpop.permute.xlu0 %1218 }
 0x19a   : > { %14628 = vst [vmem:[#allocation96_spill] sm:$0xff] %v10963_v31  ;;  %v1701_v63 = vpop.permute.xlu1 %1700 }
 0x19b   : > { %v1801_v6 = vrot.slane %v1701_v63, %v10945_v55  ;;  %1630 = vperm.xlu0 %9897, %v10960_v3   ;;  %9860 = vset.pattern.permute.xlu1 %v14575_v35 }
 0x19c   : > { %1626 = vperm.xlu1 %9860, %v10695_v28  }
 0x19d   : > { %v10978_v14 = vsel %vm1277_vm1, %v1805_v5, %v1801_v6  ;;  %v10980_v31 = vpop.permute.xlu0 %1224 }
 0x19e   : > { %14631 = vst [vmem:[#allocation99_spill] sm:$0xff] %v10980_v31  ;;  %v2048_v40 = vmul.f32 %v10978_v14, %v1579_v29  ;;  %v11002_v29 = vadd.f32 %v10562_v4, %v10688_v32  ;;  %v11022_v32 = vadd.f32 %v10562_v4, %v10711_v15  ;;  %v11043_v15 = vadd.f32 %v10562_v4, %v10740_v18 }
 0x19f   : > { %1638 = vperm.xlu0 %9897, %v10975_v21   ;;  %v10985_v63 = vpop.permute.xlu1 %2153 }
 0x1a0   : > { %14632 = vst [vmem:[#allocation100_spill] sm:$0xff] %v10985_v63  ;;  %9861 = vset.pattern.permute.xlu1 %v14571_v56  ;;  %v10988_v57 = vadd.f32 %v2048_v40, %v1536_v59  ;;  %14637 = vst [vmem:[#allocation105_spill] sm:$0xff] %v11002_v29  ;;  %v11013_v59 = vadd.f32 %v10562_v4, %v10699_v24  ;;  %v11033_v24 = vadd.f32 %v10562_v4, %v10727_v25 }
 0x1a1   : > { %v10994_v5 = vpop.permute.xlu0 %1230  ;;  %1215 = vperm.xlu1 %9861, %v10941_v22   ;;  %14642 = vst [vmem:[#allocation110_spill] sm:$0xff] %v11022_v32  ;;  %14647 = vst [vmem:[#allocation115_spill] sm:$0xff] %v11043_v15 }
 0x1a2   : > { %14633 = vst [vmem:[#allocation101_spill] sm:$0xff] %v10988_v57  ;;  %14635 = vst [vmem:[#allocation103_spill] sm:$0xff] %v10994_v5 }
 0x1a3   : > { %1646 = vperm.xlu0 %9897, %v10992_v48   ;;  %v10998_v20 = vpop.permute.xlu1 %1039  ;;  %14640 = vst [vmem:[#allocation108_spill] sm:$0xff] %v11013_v59  ;;  %14645 = vst [vmem:[#allocation113_spill] sm:$0xff] %v11033_v24 }
 0x1a4   : > { %14636 = vst [vmem:[#allocation104_spill] sm:$0xff] %v10998_v20 }
 0x1a5   : > { %v11004_v6 = vpop.permute.xlu0 %1236  ;;  %9862 = vset.pattern.permute.xlu1 %v14577_v23 }
 0x1a6   : > { %14638 = vst [vmem:[#allocation106_spill] sm:$0xff] %v11004_v6  ;;  %1736 = vperm.xlu1 %9862, %v10941_v22  }
 0x1a7   : > { %1654 = vperm.xlu0 %9897, %v11002_v29  }
 0x1a8   : > { %v11009_v43 = vpop.permute.xlu1 %1586 }
 0x1a9   : > { %14639 = vst [vmem:[#allocation107_spill] sm:$0xff] %v11009_v43  ;;  %v11015_v40 = vpop.permute.xlu0 %1242 }
 0x1aa   : > { %14641 = vst [vmem:[#allocation109_spill] sm:$0xff] %v11015_v40  ;;  %9863 = vset.pattern.permute.xlu1 %v14570_v2 }
 0x1ab   : > { %1662 = vperm.xlu0 %9897, %v11013_v59   ;;  %1099 = vperm.xlu1 %9863, %v10706_v19  }
 0x1ad   : > { %v11024_v63 = vpop.permute.xlu0 %1248  ;;  %v11026_v57 = vpop.permute.xlu1 %2168 }
 0x1ae   : > { %14643 = vst [vmem:[#allocation111_spill] sm:$0xff] %v11024_v63  ;;  %14644 = vst [vmem:[#allocation112_spill] sm:$0xff] %v11026_v57 }
 0x1af   : > { %1670 = vperm.xlu0 %9897, %v11022_v32   ;;  %9864 = vset.pattern.permute.xlu1 %v14575_v35 }
 0x1b0   : > { %1634 = vperm.xlu1 %9864, %v10706_v19  }
 0x1b1   : > { %v11035_v20 = vpop.permute.xlu0 %1254 }
 0x1b2   : > { %14646 = vst [vmem:[#allocation114_spill] sm:$0xff] %v11035_v20  ;;  %v11037_v43 = vpop.permute.xlu1 %1185  ;;  %v11053_v20 = vadd.f32 %v10567_v10, %v10562_v4  ;;  %v11073_v10 = vadd.f32 %v10562_v4, %v10605_v50  ;;  %v11094_v50 = vadd.f32 %v10562_v4, %v10625_v13 }
 0x1b3   : > { %1678 = vperm.xlu0 %9897, %v11033_v24  }
 0x1b4   : > { %9865 = vset.pattern.permute.xlu1 %v14571_v56  ;;  %14649 = vst [vmem:[#allocation117_spill] sm:$0xff] %v11053_v20  ;;  %14654 = vst [vmem:[#allocation122_spill] sm:$0xff] %v11073_v10 }
 0x1b5   : > { %v11045_v57 = vpop.permute.xlu0 %1260  ;;  %1221 = vperm.xlu1 %9865, %v10960_v3   ;;  %14660 = vst [vmem:[#allocation128_spill] sm:$0xff] %v11094_v50 }
 0x1b6   : > { %14648 = vst [vmem:[#allocation116_spill] sm:$0xff] %v11045_v57  ;;  %v11064_v57 = vadd.f32 %v10562_v4, %v10592_v38  ;;  %v11084_v38 = vadd.f32 %v10562_v4, %v10614_v61 }
 0x1b7   : > { %1686 = vperm.xlu0 %9897, %v11043_v15   ;;  %v11049_v25 = vpop.permute.xlu1 %1706 }
 0x1b8   : > { %14652 = vst [vmem:[#allocation120_spill] sm:$0xff] %v11064_v57  ;;  %14657 = vst [vmem:[#allocation125_spill] sm:$0xff] %v11084_v38 }
 0x1b9   : > { %v11055_v63 = vpop.permute.xlu0 %1266  ;;  %9866 = vset.pattern.permute.xlu1 %v14577_v23 }
 0x1ba   : > { %14650 = vst [vmem:[#allocation118_spill] sm:$0xff] %v11055_v63  ;;  %1742 = vperm.xlu1 %9866, %v10960_v3  }
 0x1bb   : > { %2690 = vperm.xlu0 %9897, %v11053_v20  }
 0x1bc   : > { %v11060_v18 = vpop.permute.xlu1 %1049 }
 0x1bd   : > { %14651 = vst [vmem:[#allocation119_spill] sm:$0xff] %v11060_v18  ;;  %v11066_v40 = vpop.permute.xlu0 %2302 }
 0x1be   : > { %14653 = vst [vmem:[#allocation121_spill] sm:$0xff] %v11066_v40  ;;  %9867 = vset.pattern.permute.xlu1 %v14570_v2 }
 0x1bf   : > { %2702 = vperm.xlu0 %9897, %v11064_v57   ;;  %1109 = vperm.xlu1 %9867, %v10721_v8  }
 0x1c1   : > { %v11075_v63 = vpop.permute.xlu0 %2311  ;;  %v11077_v6 = vpop.permute.xlu1 %1594 }
 0x1c2   : > { %14655 = vst [vmem:[#allocation123_spill] sm:$0xff] %v11075_v63  ;;  %14656 = vst [vmem:[#allocation124_spill] sm:$0xff] %v11077_v6 }
 0x1c3   : > { %2710 = vperm.xlu0 %9897, %v11073_v10   ;;  %9868 = vset.pattern.permute.xlu1 %v14575_v35 }
 0x1c4   : > { %1642 = vperm.xlu1 %9868, %v10721_v8  }
 0x1c5   : > { %v11086_v40 = vpop.permute.xlu0 %2317 }
 0x1c6   : > { %14658 = vst [vmem:[#allocation126_spill] sm:$0xff] %v11086_v40  ;;  %v11088_v18 = vpop.permute.xlu1 %2178  ;;  %v11104_v40 = vadd.f32 %v10562_v4, %v10634_v30  ;;  %v11124_v30 = vadd.f32 %v10562_v4, %v10662_v42  ;;  %v11145_v42 = vadd.f32 %v10562_v4, %v10685_v36 }
 0x1c7   : > { %14659 = vst [vmem:[#allocation127_spill] sm:$0xff] %v11088_v18  ;;  %2718 = vperm.xlu0 %9897, %v11084_v38  }
 0x1c8   : > { %9869 = vset.pattern.permute.xlu1 %v14571_v56  ;;  %14663 = vst [vmem:[#allocation131_spill] sm:$0xff] %v11104_v40  ;;  %14668 = vst [vmem:[#allocation136_spill] sm:$0xff] %v11124_v30 }
 0x1c9   : > { %v11096_v63 = vpop.permute.xlu0 %2323  ;;  %1227 = vperm.xlu1 %9869, %v10975_v21   ;;  %14674 = vst [vmem:[#allocation142_spill] sm:$0xff] %v11145_v42 }
 0x1ca   : > { %14661 = vst [vmem:[#allocation129_spill] sm:$0xff] %v11096_v63  ;;  %v11115_v63 = vadd.f32 %v10562_v4, %v10649_v41  ;;  %v11135_v41 = vadd.f32 %v10562_v4, %v10673_v47 }
 0x1cb   : > { %2726 = vperm.xlu0 %9897, %v11094_v50   ;;  %v11100_v61 = vpop.permute.xlu1 %1191 }
 0x1cc   : > { %14662 = vst [vmem:[#allocation130_spill] sm:$0xff] %v11100_v61  ;;  %14666 = vst [vmem:[#allocation134_spill] sm:$0xff] %v11115_v63 }
 0x1cd   : > { %v11106_v18 = vpop.permute.xlu0 %2329  ;;  %9870 = vset.pattern.permute.xlu1 %v14577_v23  ;;  %14671 = vst [vmem:[#allocation139_spill] sm:$0xff] %v11135_v41 }
 0x1ce   : > { %14664 = vst [vmem:[#allocation132_spill] sm:$0xff] %v11106_v18  ;;  %1748 = vperm.xlu1 %9870, %v10975_v21  }
 0x1cf   : > { %2734 = vperm.xlu0 %9897, %v11104_v40  }
 0x1d0   : > { %v11111_v13 = vpop.permute.xlu1 %1712 }
 0x1d1   : > { %14665 = vst [vmem:[#allocation133_spill] sm:$0xff] %v11111_v13  ;;  %v11117_v6 = vpop.permute.xlu0 %2335 }
 0x1d2   : > { %14667 = vst [vmem:[#allocation135_spill] sm:$0xff] %v11117_v6  ;;  %9871 = vset.pattern.permute.xlu1 %v14570_v2 }
 0x1d3   : > { %2742 = vperm.xlu0 %9897, %v11115_v63   ;;  %1119 = vperm.xlu1 %9871, %v10733_v26  }
 0x1d5   : > { %v11126_v18 = vpop.permute.xlu0 %2341  ;;  %v11128_v5 = vpop.permute.xlu1 %1059 }
 0x1d6   : > { %14669 = vst [vmem:[#allocation137_spill] sm:$0xff] %v11126_v18  ;;  %14670 = vst [vmem:[#allocation138_spill] sm:$0xff] %v11128_v5 }
 0x1d7   : > { %2750 = vperm.xlu0 %9897, %v11124_v30   ;;  %9872 = vset.pattern.permute.xlu1 %v14575_v35 }
 0x1d8   : > { %1650 = vperm.xlu1 %9872, %v10733_v26  }
 0x1d9   : > { %v11137_v6 = vpop.permute.xlu0 %2347 }
 0x1da   : > { %14672 = vst [vmem:[#allocation140_spill] sm:$0xff] %v11137_v6  ;;  %v11139_v31 = vpop.permute.xlu1 %1602  ;;  %v11155_v6 = vadd.f32 %v10562_v4, %v10697_v27  ;;  %v14683_v27 = vld [vmem:[#allocation50_spill] sm:$0xff] }
 0x1db   : > { %14673 = vst [vmem:[#allocation141_spill] sm:$0xff] %v11139_v31  ;;  %2758 = vperm.xlu0 %9897, %v11135_v41  }
 0x1dc   : > { %9873 = vset.pattern.permute.xlu1 %v14571_v56  ;;  %14677 = vst [vmem:[#allocation145_spill] sm:$0xff] %v11155_v6 }
 0x1dd   : > { %v11147_v18 = vpop.permute.xlu0 %2353  ;;  %1233 = vperm.xlu1 %9873, %v10992_v48  }
 0x1de   : > { %14675 = vst [vmem:[#allocation143_spill] sm:$0xff] %v11147_v18  ;;  %v14680_v18 = vld [vmem:[#allocation47_spill] sm:$0xff] }
 0x1df   : > { %2766 = vperm.xlu0 %9897, %v11145_v42   ;;  %v11151_v47 = vpop.permute.xlu1 %2188  ;;  %v11166_v31 = vadd.f32 %v10562_v4, %v14680_v18  ;;  %v14687_v18 = vld [vmem:[#allocation52_spill] sm:$0xff] }
 0x1e0   : > { %14676 = vst [vmem:[#allocation144_spill] sm:$0xff] %v11151_v47 }
 0x1e1   : > { %v11157_v5 = vpop.permute.xlu0 %2359  ;;  %9874 = vset.pattern.permute.xlu1 %v14577_v23  ;;  %14681 = vst [vmem:[#allocation47_spill] sm:$0xff] %v11166_v31 }
 0x1e2   : > { %14678 = vst [vmem:[#allocation146_spill] sm:$0xff] %v11157_v5  ;;  %1754 = vperm.xlu1 %9874, %v10992_v48   ;;  %v11175_v5 = vadd.f32 %v10562_v4, %v14683_v27  ;;  %v11196_v27 = vadd.f32 %v10562_v4, %v10829_v33 }
 0x1e3   : > { %2774 = vperm.xlu0 %9897, %v11155_v6  }
 0x1e4   : > { %v11162_v36 = vpop.permute.xlu1 %1197  ;;  %14684 = vst [vmem:[#allocation50_spill] sm:$0xff] %v11175_v5  ;;  %14691 = vst [vmem:[#allocation153_spill] sm:$0xff] %v11196_v27 }
 0x1e5   : > { %14679 = vst [vmem:[#allocation147_spill] sm:$0xff] %v11162_v36  ;;  %v11168_v13 = vpop.permute.xlu0 %2365 }
 0x1e6   : > { %14682 = vst [vmem:[#allocation148_spill] sm:$0xff] %v11168_v13  ;;  %9875 = vset.pattern.permute.xlu1 %v14570_v2  ;;  %v11186_v13 = vadd.f32 %v10562_v4, %v14687_v18 }
 0x1e7   : > { %2782 = vperm.xlu0 %9897, %v11166_v31   ;;  %1129 = vperm.xlu1 %9875, %v10744_v11  }
 0x1e8   : > { %14688 = vst [vmem:[#allocation52_spill] sm:$0xff] %v11186_v13 }
 0x1e9   : > { %v11177_v47 = vpop.permute.xlu0 %2371  ;;  %v11179_v61 = vpop.permute.xlu1 %1718 }
 0x1ea   : > { %14685 = vst [vmem:[#allocation149_spill] sm:$0xff] %v11177_v47  ;;  %14686 = vst [vmem:[#allocation150_spill] sm:$0xff] %v11179_v61 }
 0x1eb   : > { %2790 = vperm.xlu0 %9897, %v11175_v5   ;;  %9876 = vset.pattern.permute.xlu1 %v14575_v35 }
 0x1ec   : > { %1658 = vperm.xlu1 %9876, %v10744_v11  }
 0x1ed   : > { %v11188_v36 = vpop.permute.xlu0 %2377 }
 0x1ee   : > { %14689 = vst [vmem:[#allocation151_spill] sm:$0xff] %v11188_v36  ;;  %v11190_v62 = vpop.permute.xlu1 %1069 }
 0x1ef   : > { %14690 = vst [vmem:[#allocation152_spill] sm:$0xff] %v11190_v62  ;;  %2798 = vperm.xlu0 %9897, %v11186_v13  }
 0x1f0   : > { %9877 = vset.pattern.permute.xlu1 %v14571_v56 }
 0x1f1   : > { %v11198_v47 = vpop.permute.xlu0 %2383  ;;  %1239 = vperm.xlu1 %9877, %v11002_v29  }
 0x1f2   : > { %14692 = vst [vmem:[#allocation154_spill] sm:$0xff] %v11198_v47 }
 0x1f3   : > { %2806 = vperm.xlu0 %9897, %v11196_v27   ;;  %v11202_v18 = vpop.permute.xlu1 %1610 }
 0x1f4   : > { %14693 = vst [vmem:[#allocation155_spill] sm:$0xff] %v11202_v18 }
 0x1f5   : > { %v11204_v61 = vpop.permute.xlu0 %2389  ;;  %9878 = vset.pattern.permute.xlu1 %v14577_v23 }
 0x1f6   : > { %14694 = vst [vmem:[#allocation156_spill] sm:$0xff] %v11204_v61  ;;  %1760 = vperm.xlu1 %9878, %v11002_v29  }
 0x1f7   : > { %9899 = vset.pattern.permute.xlu0 %v14577_v23 }
 0x1f8   : > { %1715 = vperm.xlu0 %9899, %v10647_v0   ;;  %v11210_v4 = vpop.permute.xlu1 %1203 }
 0x1f9   : > { %v11212_v33 = vpop.permute.xlu0 %2395 }
 0x1fa   : > { %14695 = vst [vmem:[#allocation157_spill] sm:$0xff] %v11212_v33  ;;  %9879 = vset.pattern.permute.xlu1 %v14570_v2 }
 0x1fb   : > { %1139 = vperm.xlu1 %9879, %v10754_v12  }
 0x1fc   : > { %1721 = vperm.xlu0 %9899, %v10660_v52  }
 0x1fd   : > { %v11217_v47 = vpop.permute.xlu1 %1724 }
 0x1fe   : > { %v11219_v61 = vpop.permute.xlu0 %1570 }
 0x1ff   : > { %9880 = vset.pattern.permute.xlu1 %v14575_v35 }
 0x200   : > { %1727 = vperm.xlu0 %9899, %v10671_v44   ;;  %1666 = vperm.xlu1 %9880, %v10754_v12  }
 0x202   : > { %v11224_v0 = vpop.permute.xlu0 %1582  ;;  %v11226_v36 = vpop.permute.xlu1 %1079 }
 0x203   : > { %14696 = vst [vmem:[#allocation158_spill] sm:$0xff] %v11226_v36 }
 0x204   : > { %1733 = vperm.xlu0 %9899, %v10683_v39   ;;  %9881 = vset.pattern.permute.xlu1 %v14571_v56 }
 0x205   : > { %1245 = vperm.xlu1 %9881, %v11013_v59  }
 0x206   : > { %v11231_v52 = vpop.permute.xlu0 %1590 }
 0x207   : > { %v11233_v33 = vpop.permute.xlu1 %1618 }
 0x208   : > { %14697 = vst [vmem:[#allocation159_spill] sm:$0xff] %v11233_v33  ;;  %1739 = vperm.xlu0 %9899, %v10695_v28  }
 0x209   : > { %9882 = vset.pattern.permute.xlu1 %v14577_v23 }
 0x20a   : > { %v11237_v44 = vpop.permute.xlu0 %1598  ;;  %1766 = vperm.xlu1 %9882, %v11013_v59  }
 0x20c   : > { %1745 = vperm.xlu0 %9899, %v10706_v19   ;;  %v11241_v36 = vpop.permute.xlu1 %1209 }
 0x20d   : > { %14698 = vst [vmem:[#allocation160_spill] sm:$0xff] %v11241_v36 }
 0x20e   : > { %v11243_v39 = vpop.permute.xlu0 %1606  ;;  %9883 = vset.pattern.permute.xlu1 %v14570_v2 }
 0x20f   : > { %14699 = vst [vmem:[#allocation161_spill] sm:$0xff] %v11243_v39  ;;  %1149 = vperm.xlu1 %9883, %v10760_v1  }
 0x210   : > { %1751 = vperm.xlu0 %9899, %v10721_v8  }
 0x211   : > { %v11248_v33 = vpop.permute.xlu1 %1730 }
 0x212   : > { %14700 = vst [vmem:[#allocation162_spill] sm:$0xff] %v11248_v33  ;;  %v11250_v28 = vpop.permute.xlu0 %1614 }
 0x213   : > { %14701 = vst [vmem:[#allocation163_spill] sm:$0xff] %v11250_v28  ;;  %9884 = vset.pattern.permute.xlu1 %v14575_v35  ;;  %v14739_v28 = vld [vmem:[#allocation74_spill] sm:$0xff] }
 0x214   : > { %1757 = vperm.xlu0 %9899, %v10733_v26   ;;  %1674 = vperm.xlu1 %9884, %v10760_v1  }
 0x216   : > { %v11255_v19 = vpop.permute.xlu0 %1622  ;;  %v11257_v62 = vpop.permute.xlu1 %1089 }
 0x217   : > { %14702 = vst [vmem:[#allocation164_spill] sm:$0xff] %v11255_v19  ;;  %14703 = vst [vmem:[#allocation165_spill] sm:$0xff] %v11257_v62 }
 0x218   : > { %1763 = vperm.xlu0 %9899, %v10744_v11   ;;  %9885 = vset.pattern.permute.xlu1 %v14571_v56 }
 0x219   : > { %1251 = vperm.xlu1 %9885, %v11022_v32  }
 0x21a   : > { %v11262_v8 = vpop.permute.xlu0 %1630 }
 0x21b   : > { %14704 = vst [vmem:[#allocation166_spill] sm:$0xff] %v11262_v8  ;;  %v11264_v18 = vpop.permute.xlu1 %1626 }
 0x21c   : > { %14705 = vst [vmem:[#allocation167_spill] sm:$0xff] %v11264_v18  ;;  %1769 = vperm.xlu0 %9899, %v10754_v12  }
 0x21d   : > { %9886 = vset.pattern.permute.xlu1 %v14577_v23 }
 0x21e   : > { %v11268_v26 = vpop.permute.xlu0 %1638  ;;  %1772 = vperm.xlu1 %9886, %v11022_v32  }
 0x21f   : > { %14706 = vst [vmem:[#allocation168_spill] sm:$0xff] %v11268_v26 }
 0x220   : > { %1775 = vperm.xlu0 %9899, %v10760_v1   ;;  %v11272_v62 = vpop.permute.xlu1 %1215 }
 0x221   : > { %14707 = vst [vmem:[#allocation169_spill] sm:$0xff] %v11272_v62 }
 0x222   : > { %v11274_v11 = vpop.permute.xlu0 %1646  ;;  %9887 = vset.pattern.permute.xlu1 %v14570_v2 }
 0x223   : > { %14708 = vst [vmem:[#allocation170_spill] sm:$0xff] %v11274_v11  ;;  %1159 = vperm.xlu1 %9887, %v10769_v37  }
 0x224   : > { %1781 = vperm.xlu0 %9899, %v10769_v37  }
 0x225   : > { %v11279_v18 = vpop.permute.xlu1 %1736 }
 0x226   : > { %14709 = vst [vmem:[#allocation171_spill] sm:$0xff] %v11279_v18  ;;  %v11281_v12 = vpop.permute.xlu0 %1654 }
 0x227   : > { %14710 = vst [vmem:[#allocation172_spill] sm:$0xff] %v11281_v12  ;;  %9888 = vset.pattern.permute.xlu1 %v14575_v35 }
 0x228   : > { %1787 = vperm.xlu0 %9899, %v10774_v16   ;;  %1682 = vperm.xlu1 %9888, %v10769_v37  }
 0x22a   : > { %v11286_v1 = vpop.permute.xlu0 %1662  ;;  %v11288_v26 = vpop.permute.xlu1 %1099 }
 0x22b   : > { %14711 = vst [vmem:[#allocation173_spill] sm:$0xff] %v11286_v1  ;;  %14712 = vst [vmem:[#allocation174_spill] sm:$0xff] %v11288_v26 }
 0x22c   : > { %2814 = vperm.xlu0 %9899, %v10603_v49   ;;  %9889 = vset.pattern.permute.xlu1 %v14571_v56 }
 0x22d   : > { %1257 = vperm.xlu1 %9889, %v11033_v24  }
 0x22e   : > { %v11293_v11 = vpop.permute.xlu0 %1670 }
 0x22f   : > { %14713 = vst [vmem:[#allocation175_spill] sm:$0xff] %v11293_v11  ;;  %v11295_v8 = vpop.permute.xlu1 %1634 }
 0x230   : > { %14714 = vst [vmem:[#allocation176_spill] sm:$0xff] %v11295_v8  ;;  %2823 = vperm.xlu0 %9899, %v10639_v54  }
 0x231   : > { %9890 = vset.pattern.permute.xlu1 %v14577_v23 }
 0x232   : > { %v11299_v12 = vpop.permute.xlu0 %1678  ;;  %1778 = vperm.xlu1 %9890, %v11033_v24  }
 0x233   : > { %14715 = vst [vmem:[#allocation177_spill] sm:$0xff] %v11299_v12 }
 0x234   : > { %2829 = vperm.xlu0 %9899, %v10751_v53   ;;  %v11303_v37 = vpop.permute.xlu1 %1221 }
 0x235   : > { %14716 = vst [vmem:[#allocation178_spill] sm:$0xff] %v11303_v37 }
 0x236   : > { %v11305_v26 = vpop.permute.xlu0 %1686  ;;  %9891 = vset.pattern.permute.xlu1 %v14570_v2 }
 0x237   : > { %14717 = vst [vmem:[#allocation179_spill] sm:$0xff] %v11305_v26  ;;  %1169 = vperm.xlu1 %9891, %v10774_v16  }
 0x238   : > { %2835 = vperm.xlu0 %9899, %v10787_v7  }
 0x239   : > { %v11310_v8 = vpop.permute.xlu1 %1742 }
 0x23a   : > { %14718 = vst [vmem:[#allocation180_spill] sm:$0xff] %v11310_v8  ;;  %v11312_v11 = vpop.permute.xlu0 %2690 }
 0x23b   : > { %14719 = vst [vmem:[#allocation181_spill] sm:$0xff] %v11312_v11  ;;  %9892 = vset.pattern.permute.xlu1 %v14575_v35 }
 0x23c   : > { %2841 = vperm.xlu0 %9899, %v10799_v60   ;;  %1690 = vperm.xlu1 %9892, %v10774_v16  }
 0x23e   : > { %v11317_v12 = vpop.permute.xlu0 %2702  ;;  %v11319_v1 = vpop.permute.xlu1 %1109 }
 0x23f   : > { %14720 = vst [vmem:[#allocation182_spill] sm:$0xff] %v11317_v12  ;;  %14721 = vst [vmem:[#allocation183_spill] sm:$0xff] %v11319_v1 }
 0x240   : > { %2847 = vperm.xlu0 %9899, %v10806_v46   ;;  %9893 = vset.pattern.permute.xlu1 %v14571_v56 }
 0x241   : > { %1263 = vperm.xlu1 %9893, %v11043_v15  }
 0x242   : > { %v11324_v26 = vpop.permute.xlu0 %2710 }
 0x243   : > { %14722 = vst [vmem:[#allocation184_spill] sm:$0xff] %v11324_v26  ;;  %v11326_v19 = vpop.permute.xlu1 %1642 }
 0x244   : > { %14723 = vst [vmem:[#allocation185_spill] sm:$0xff] %v11326_v19  ;;  %2853 = vperm.xlu0 %9899, %v10813_v45  }
 0x245   : > { %9894 = vset.pattern.permute.xlu1 %v14577_v23 }
 0x246   : > { %v11330_v11 = vpop.permute.xlu0 %2718  ;;  %1784 = vperm.xlu1 %9894, %v11043_v15  }
 0x247   : > { %14724 = vst [vmem:[#allocation186_spill] sm:$0xff] %v11330_v11  ;;  %v14729_v11 = vld [vmem:[#allocation67_spill] sm:$0xff] }
 0x248   : > { %2859 = vperm.xlu0 %9899, %v10820_v58   ;;  %v11334_v16 = vpop.permute.xlu1 %1227 }
 0x249   : > { %14725 = vst [vmem:[#allocation187_spill] sm:$0xff] %v11334_v16 }
 0x24a   : > { %v11336_v12 = vpop.permute.xlu0 %2726  ;;  %9895 = vset.pattern.permute.xlu1 %v14570_v2 }
 0x24b   : > { %14726 = vst [vmem:[#allocation188_spill] sm:$0xff] %v11336_v12  ;;  %2198 = vperm.xlu1 %9895, %v10806_v46   ;;  %v14732_v12 = vld [vmem:[#allocation68_spill] sm:$0xff] }
 0x24c   : > { %2865 = vperm.xlu0 %9899, %v10826_v9  }
 0x24d   : > { %v11341_v26 = vpop.permute.xlu1 %1748 }
 0x24e   : > { %14727 = vst [vmem:[#allocation189_spill] sm:$0xff] %v11341_v26  ;;  %v11343_v1 = vpop.permute.xlu0 %2734  ;;  %v14736_v26 = vld [vmem:[#allocation72_spill] sm:$0xff] }
 0x24f   : > { %14728 = vst [vmem:[#allocation190_spill] sm:$0xff] %v11343_v1  ;;  %2208 = vperm.xlu1 %9895, %v10813_v45  }
 0x250   : > { %2871 = vperm.xlu0 %9899, %v14729_v11  }
 0x252   : > { %v11347_v19 = vpop.permute.xlu0 %2742  ;;  %v11349_v8 = vpop.permute.xlu1 %1119 }
 0x253   : > { %14730 = vst [vmem:[#allocation191_spill] sm:$0xff] %v11347_v19  ;;  %14731 = vst [vmem:[#allocation192_spill] sm:$0xff] %v11349_v8  ;;  %2218 = vperm.xlu1 %9895, %v10820_v58  }
 0x254   : > { %2877 = vperm.xlu0 %9899, %v14732_v12  }
 0x256   : > { %v11353_v16 = vpop.permute.xlu0 %2750 }
 0x257   : > { %14733 = vst [vmem:[#allocation193_spill] sm:$0xff] %v11353_v16  ;;  %2228 = vperm.xlu1 %9895, %v10826_v9   ;;  %v11356_v37 = vpop.permute.xlu1 %1650 }
 0x258   : > { %14734 = vst [vmem:[#allocation194_spill] sm:$0xff] %v11356_v37  ;;  %2883 = vperm.xlu0 %9899, %v10852_v51   ;;  %v14742_v37 = vld [vmem:[#allocation77_spill] sm:$0xff] }
 0x25a   : > { %v11359_v1 = vpop.permute.xlu0 %2758 }
 0x25b   : > { %14735 = vst [vmem:[#allocation195_spill] sm:$0xff] %v11359_v1  ;;  %2238 = vperm.xlu1 %9895, %v14729_v11  }
 0x25c   : > { %2889 = vperm.xlu0 %9899, %v14736_v26   ;;  %v11363_v19 = vpop.permute.xlu1 %1233 }
 0x25d   : > { %14737 = vst [vmem:[#allocation196_spill] sm:$0xff] %v11363_v19  ;;  %v14745_v19 = vld [vmem:[#allocation79_spill] sm:$0xff] }
 0x25e   : > { %v11365_v8 = vpop.permute.xlu0 %2766 }
 0x25f   : > { %14738 = vst [vmem:[#allocation197_spill] sm:$0xff] %v11365_v8  ;;  %2248 = vperm.xlu1 %9895, %v14732_v12  }
 0x260   : > { %2895 = vperm.xlu0 %9899, %v14739_v28  }
 0x261   : > { %v11369_v16 = vpop.permute.xlu1 %1754 }
 0x262   : > { %14740 = vst [vmem:[#allocation198_spill] sm:$0xff] %v11369_v16  ;;  %v11371_v18 = vpop.permute.xlu0 %2774 }
 0x263   : > { %14741 = vst [vmem:[#allocation199_spill] sm:$0xff] %v11371_v18  ;;  %2258 = vperm.xlu1 %9895, %v10852_v51   ;;  %v14748_v18 = vld [vmem:[#allocation35_spill] sm:$0xff] }
 0x264   : > { %2901 = vperm.xlu0 %9899, %v14742_v37  }
 0x266   : > { %v11375_v1 = vpop.permute.xlu0 %2782  ;;  %v11377_v62 = vpop.permute.xlu1 %1129 }
 0x267   : > { %14743 = vst [vmem:[#allocation200_spill] sm:$0xff] %v11375_v1  ;;  %14744 = vst [vmem:[#allocation201_spill] sm:$0xff] %v11377_v62  ;;  %2268 = vperm.xlu1 %9895, %v14736_v26   ;;  %v14751_v62 = vld [vmem:[#allocation34_spill] sm:$0xff] }
 0x268   : > { %2907 = vperm.xlu0 %9899, %v14745_v19  }
 0x26a   : > { %v11381_v8 = vpop.permute.xlu0 %2790 }
 0x26b   : > { %14746 = vst [vmem:[#allocation202_spill] sm:$0xff] %v11381_v8  ;;  %2278 = vperm.xlu1 %9895, %v14739_v28   ;;  %v11384_v39 = vpop.permute.xlu1 %1658  ;;  %v14753_v8 = vld [vmem:[#allocation57_spill] sm:$0xff] }
 0x26c   : > { %14747 = vst [vmem:[#allocation203_spill] sm:$0xff] %v11384_v39  ;;  %9901 = vset.pattern.permute.xlu0 %v14570_v2 }
 0x26d   : > { %1014 = vperm.xlu0 %9901, %v14748_v18   ;;  %v14755_v18 = vld [vmem:[#allocation61_spill] sm:$0xff] }
 0x26e   : > { %v11388_v16 = vpop.permute.xlu0 %2798 }
 0x26f   : > { %14749 = vst [vmem:[#allocation204_spill] sm:$0xff] %v11388_v16  ;;  %2288 = vperm.xlu1 %9895, %v14742_v37  }
 0x270   : > { %v11391_v1 = vpop.permute.xlu1 %1239 }
 0x271   : > { %14750 = vst [vmem:[#allocation205_spill] sm:$0xff] %v11391_v1  ;;  %1019 = vperm.xlu0 %9901, %v14751_v62   ;;  %v14757_v62 = vld [vmem:[#allocation48_spill] sm:$0xff] }
 0x272   : > { %v11394_v33 = vpop.permute.xlu0 %2806 }
 0x273   : > { %14752 = vst [vmem:[#allocation206_spill] sm:$0xff] %v11394_v33  ;;  %2298 = vperm.xlu1 %9895, %v14745_v19   ;;  %v14758_v33 = vld [vmem:[#allocation69_spill] sm:$0xff] }
 0x275   : > { %1034 = vperm.xlu0 %9901, %v14753_v8   ;;  %v11398_v36 = vpop.permute.xlu1 %1760 }
 0x276   : > { %14754 = vst [vmem:[#allocation207_spill] sm:$0xff] %v11398_v36  ;;  %v14760_v36 = vld [vmem:[#allocation80_spill] sm:$0xff] }
 0x277   : > { %v11400_v39 = vpop.permute.xlu0 %1715  ;;  %9896 = vset.pattern.permute.xlu1 %v14571_v56 }
 0x278   : > { %2305 = vperm.xlu1 %9896, %v11053_v20  }
 0x279   : > { %1044 = vperm.xlu0 %9901, %v14755_v18  }
 0x27a   : > { %v11405_v16 = vpop.permute.xlu1 %1139 }
 0x27b   : > { %14756 = vst [vmem:[#allocation208_spill] sm:$0xff] %v11405_v16  ;;  %v11407_v2 = vpop.permute.xlu0 %1721  ;;  %v14762_v16 = vld [vmem:[#allocation86_spill] sm:$0xff] }
 0x27c   : > { %2308 = vperm.xlu1 %9896, %v14757_v62  }
 0x27d   : > { %1054 = vperm.xlu0 %9901, %v14758_v33  }
 0x27f   : > { %v11411_v1 = vpop.permute.xlu0 %1727  ;;  %v11413_v8 = vpop.permute.xlu1 %1666 }
 0x280   : > { %14759 = vst [vmem:[#allocation209_spill] sm:$0xff] %v11413_v8  ;;  %2314 = vperm.xlu1 %9896, %v11064_v57  }
 0x281   : > { %1064 = vperm.xlu0 %9901, %v14760_v36  }
 0x283   : > { %v11417_v56 = vpop.permute.xlu0 %1733 }
 0x284   : > { %2320 = vperm.xlu1 %9896, %v11073_v10   ;;  %v11420_v18 = vpop.permute.xlu1 %1245 }
 0x285   : > { %14761 = vst [vmem:[#allocation210_spill] sm:$0xff] %v11420_v18  ;;  %1074 = vperm.xlu0 %9901, %v14762_v16  }
 0x287   : > { %v11423_v23 = vpop.permute.xlu0 %1739 }
 0x288   : > { %2326 = vperm.xlu1 %9896, %v11084_v38  }
 0x289   : > { %1084 = vperm.xlu0 %9901, %v10941_v22   ;;  %v11427_v33 = vpop.permute.xlu1 %1766 }
 0x28b   : > { %v11429_v8 = vpop.permute.xlu0 %1745 }
 0x28c   : > { %2332 = vperm.xlu1 %9896, %v11094_v50  }
 0x28d   : > { %1094 = vperm.xlu0 %9901, %v10960_v3  }
 0x28e   : > { %v11433_v36 = vpop.permute.xlu1 %1149 }
 0x28f   : > { %14763 = vst [vmem:[#allocation211_spill] sm:$0xff] %v11433_v36  ;;  %v11435_v10 = vpop.permute.xlu0 %1751 }
 0x290   : > { %2338 = vperm.xlu1 %9896, %v11104_v40  }
 0x291   : > { %1104 = vperm.xlu0 %9901, %v10975_v21  }
 0x293   : > { %v11439_v16 = vpop.permute.xlu0 %1757  ;;  %v11441_v18 = vpop.permute.xlu1 %1674 }
 0x294   : > { %14764 = vst [vmem:[#allocation212_spill] sm:$0xff] %v11441_v18  ;;  %2344 = vperm.xlu1 %9896, %v11115_v63  }
 0x295   : > { %1114 = vperm.xlu0 %9901, %v10992_v48  }
 0x297   : > { %v11445_v22 = vpop.permute.xlu0 %1763 }
 0x298   : > { %2350 = vperm.xlu1 %9896, %v11124_v30   ;;  %v11448_v3 = vpop.permute.xlu1 %1251 }
 0x299   : > { %1124 = vperm.xlu0 %9901, %v11002_v29  }
 0x29b   : > { %v11451_v36 = vpop.permute.xlu0 %1769 }
 0x29c   : > { %2356 = vperm.xlu1 %9896, %v11135_v41  }
 0x29d   : > { %1134 = vperm.xlu0 %9901, %v11013_v59   ;;  %v11455_v21 = vpop.permute.xlu1 %1772 }
 0x29f   : > { %v11457_v18 = vpop.permute.xlu0 %1775 }
 0x2a0   : > { %2362 = vperm.xlu1 %9896, %v11145_v42  }
 0x2a1   : > { %1144 = vperm.xlu0 %9901, %v11022_v32  }
 0x2a2   : > { %v11461_v48 = vpop.permute.xlu1 %1159 }
 0x2a3   : > { %14765 = vst [vmem:[#allocation213_spill] sm:$0xff] %v11461_v48  ;;  %v11463_v30 = vpop.permute.xlu0 %1781 }
 0x2a4   : > { %2368 = vperm.xlu1 %9896, %v11155_v6  }
 0x2a5   : > { %1154 = vperm.xlu0 %9901, %v11033_v24  }
 0x2a7   : > { %v11467_v29 = vpop.permute.xlu0 %1787  ;;  %v11469_v41 = vpop.permute.xlu1 %1682 }
 0x2a8   : > { %14766 = vst [vmem:[#allocation214_spill] sm:$0xff] %v11469_v41  ;;  %2374 = vperm.xlu1 %9896, %v11166_v31  }
 0x2a9   : > { %1164 = vperm.xlu0 %9901, %v11043_v15  }
 0x2ab   : > { %v11473_v59 = vpop.permute.xlu0 %2814 }
 0x2ac   : > { %14767 = vst [vmem:[#allocation215_spill] sm:$0xff] %v11473_v59  ;;  %2380 = vperm.xlu1 %9896, %v11175_v5   ;;  %v11476_v32 = vpop.permute.xlu1 %1257 }
 0x2ad   : > { %2148 = vperm.xlu0 %9901, %v11053_v20  }
 0x2af   : > { %v11479_v48 = vpop.permute.xlu0 %2823 }
 0x2b0   : > { %14768 = vst [vmem:[#allocation216_spill] sm:$0xff] %v11479_v48  ;;  %2386 = vperm.xlu1 %9896, %v11186_v13  }
 0x2b1   : > { %v11482_v24 = vpop.permute.xlu1 %1778 }
 0x2b3   : > { %v11484_v6 = vpop.permute.xlu0 %2829 }
 0x2b4   : > { %14769 = vst [vmem:[#allocation217_spill] sm:$0xff] %v11484_v6  ;;  %2392 = vperm.xlu1 %9896, %v11196_v27  }
 0x2b6   : > { %v11487_v41 = vpop.permute.xlu1 %1169 }
 0x2b7   : > { %14770 = vst [vmem:[#allocation218_spill] sm:$0xff] %v11487_v41  ;;  %v11489_v15 = vpop.permute.xlu0 %2835 }
 0x2b8   : > { %14771 = vst [vmem:[#allocation219_spill] sm:$0xff] %v11489_v15  ;;  %9898 = vset.pattern.permute.xlu1 %v14575_v35 }
 0x2b9   : > { %2686 = vperm.xlu1 %9898, %v10603_v49  }
 0x2bb   : > { %v11493_v59 = vpop.permute.xlu0 %2841  ;;  %v11495_v5 = vpop.permute.xlu1 %1690 }
 0x2bc   : > { %14772 = vst [vmem:[#allocation220_spill] sm:$0xff] %v11493_v59 }
 0x2bd   : > { %2694 = vperm.xlu1 %9898, %v14757_v62  }
 0x2bf   : > { %v11498_v48 = vpop.permute.xlu0 %2847 }
 0x2c0   : > { %14773 = vst [vmem:[#allocation221_spill] sm:$0xff] %v11498_v48  ;;  %v11500_v13 = vpop.permute.xlu1 %1263 }
 0x2c1   : > { %2698 = vperm.xlu1 %9898, %v10639_v54  }
 0x2c3   : > { %v11503_v6 = vpop.permute.xlu0 %2853 }
 0x2c4   : > { %14774 = vst [vmem:[#allocation222_spill] sm:$0xff] %v11503_v6 }
 0x2c5   : > { %2706 = vperm.xlu1 %9898, %v10751_v53   ;;  %v11506_v15 = vpop.permute.xlu1 %1784 }
 0x2c7   : > { %v11508_v35 = vpop.permute.xlu0 %2859 }
 0x2c8   : > { %14775 = vst [vmem:[#allocation223_spill] sm:$0xff] %v11508_v35 }
 0x2c9   : > { %2714 = vperm.xlu1 %9898, %v10787_v7  }
 0x2ca   : > { %v11511_v49 = vpop.permute.xlu1 %2198 }
 0x2cb   : > { %14776 = vst [vmem:[#allocation224_spill] sm:$0xff] %v11511_v49  ;;  %v11513_v59 = vpop.permute.xlu0 %2865 }
 0x2cc   : > { %14777 = vst [vmem:[#allocation225_spill] sm:$0xff] %v11513_v59 }
 0x2cd   : > { %2722 = vperm.xlu1 %9898, %v10799_v60  }
 0x2ce   : > { %v11516_v48 = vpop.permute.xlu1 %2208 }
 0x2cf   : > { %14778 = vst [vmem:[#allocation226_spill] sm:$0xff] %v11516_v48  ;;  %v11518_v41 = vpop.permute.xlu0 %2871 }
 0x2d0   : > { %14779 = vst [vmem:[#allocation227_spill] sm:$0xff] %v11518_v41 }
 0x2d1   : > { %2730 = vperm.xlu1 %9898, %v10806_v46  }
 0x2d2   : > { %v11521_v54 = vpop.permute.xlu1 %2218 }
 0x2d3   : > { %14780 = vst [vmem:[#allocation228_spill] sm:$0xff] %v11521_v54  ;;  %v11523_v53 = vpop.permute.xlu0 %2877  ;;  %v14799_v54 = vld [vmem:[#allocation89_spill] sm:$0xff] }
 0x2d4   : > { %14781 = vst [vmem:[#allocation229_spill] sm:$0xff] %v11523_v53  ;;  %vm1008_vm3 = vcmp.eq.s32.totalorder %v10931_v34, %v14799_v54 }
 0x2d5   : > { %2738 = vperm.xlu1 %9898, %v10813_v45  }
 0x2d6   : > { %v11526_v35 = vpop.permute.xlu1 %2228 }
 0x2d7   : > { %14782 = vst [vmem:[#allocation230_spill] sm:$0xff] %v11526_v35  ;;  %v11528_v7 = vpop.permute.xlu0 %2883 }
 0x2d8   : > { %14783 = vst [vmem:[#allocation231_spill] sm:$0xff] %v11528_v7 }
 0x2d9   : > { %2746 = vperm.xlu1 %9898, %v10820_v58  }
 0x2da   : > { %v11531_v59 = vpop.permute.xlu1 %2238 }
 0x2db   : > { %14784 = vst [vmem:[#allocation232_spill] sm:$0xff] %v11531_v59  ;;  %v11533_v60 = vpop.permute.xlu0 %2889 }
 0x2dc   : > { %14785 = vst [vmem:[#allocation233_spill] sm:$0xff] %v11533_v60 }
 0x2dd   : > { %2754 = vperm.xlu1 %9898, %v10826_v9   ;;  %v1005_v9 = vadd.s32 8, %v10931_v34 }
 0x2de   : > { %v11536_v41 = vpop.permute.xlu1 %2248 }
 0x2df   : > { %14786 = vst [vmem:[#allocation234_spill] sm:$0xff] %v11536_v41  ;;  %v11538_v46 = vpop.permute.xlu0 %2895  ;;  %vm1009_vm2 = vcmp.eq.s32.totalorder %v1005_v9, %v14799_v54 }
 0x2e0   : > { %14787 = vst [vmem:[#allocation235_spill] sm:$0xff] %v11538_v46  ;;  %v14793_v46 = vld [vmem:[#allocation71_spill] sm:$0xff] }
 0x2e1   : > { %2762 = vperm.xlu1 %9898, %v14729_v11   ;;  %v1276_v41 = vrot.slane %v14793_v46, %v10953_v17  ;;  %v14794_v11 = vld [vmem:[#allocation73_spill] sm:$0xff]  ;;  %v1810_v46 = vrot.slane %v11049_v25, %v10945_v55 }
 0x2e2   : > { %v11541_v53 = vpop.permute.xlu1 %2258 }
 0x2e3   : > { %14788 = vst [vmem:[#allocation236_spill] sm:$0xff] %v11541_v53  ;;  %v11543_v45 = vpop.permute.xlu0 %2901  ;;  %v1271_v53 = vrot.slane %v14794_v11, %v10945_v55 }
 0x2e4   : > { %14789 = vst [vmem:[#allocation237_spill] sm:$0xff] %v11543_v45  ;;  %v14795_v45 = vld [vmem:[#allocation75_spill] sm:$0xff] }
 0x2e5   : > { %2770 = vperm.xlu1 %9898, %v14732_v12   ;;  %v1796_v59 = vrot.slane %v14795_v45, %v10953_v17  ;;  %v14796_v12 = vld [vmem:[#allocation76_spill] sm:$0xff]  ;;  %v11580_v45 = vsel %vm1277_vm1, %v1276_v41, %v1271_v53  ;;  %v1823_v53 = vrot.slane %v11400_v39, %v10953_v17 }
 0x2e6   : > { %v11546_v7 = vpop.permute.xlu1 %2268 }
 0x2e7   : > { %14790 = vst [vmem:[#allocation238_spill] sm:$0xff] %v11546_v7  ;;  %v11548_v58 = vpop.permute.xlu0 %2907  ;;  %v1792_v7 = vrot.slane %v14796_v12, %v10945_v55  ;;  %v1291_v12 = vrot.slane %v11037_v43, %v10945_v55 }
 0x2e8   : > { %14791 = vst [vmem:[#allocation239_spill] sm:$0xff] %v11548_v58  ;;  %v14798_v58 = vld [vmem:[#allocation94_spill] sm:$0xff] }
 0x2e9   : > { %2778 = vperm.xlu1 %9898, %v10852_v51   ;;  %v11573_v11 = vsel %vm1277_vm1, %v1796_v59, %v1792_v7  ;;  %v14802_v7 = vld [vmem:[#allocation82_spill] sm:$0xff]  ;;  %v14803_v59 = vld [vmem:[#allocation83_spill] sm:$0xff] }
 0x2ea   : > { %v11551_v60 = vpop.permute.xlu1 %2278  ;;  %v2046_v48 = vmul.f32 %v11573_v11, %v11219_v61  ;;  %v1295_v43 = vrot.slane %v14802_v7, %v10953_v17  ;;  %v1814_v25 = vrot.slane %v14803_v59, %v10953_v17  ;;  %v14805_v7 = vld [vmem:[#allocation130_spill] sm:$0xff] }
 0x2eb   : > { %14792 = vst [vmem:[#allocation240_spill] sm:$0xff] %v11551_v60  ;;  %v2047_v60 = vmul.f32 %v10978_v14, %v14798_v58  ;;  %v14801_v58 = vld [vmem:[#allocation97_spill] sm:$0xff]  ;;  %v1300_v59 = vrot.slane %v14805_v7, %v10945_v55 }
 0x2ec   : > { %v11562_v35 = vpop.permute.xlu0 %1014  ;;  %v11613_v9 = vsel %vm1277_vm1, %v1295_v43, %v1291_v12  ;;  %v1832_v12 = vrot.slane %v11407_v2, %v10953_v17 }
 0x2ed   : > { %2786 = vperm.xlu1 %9898, %v14736_v26  }
 0x2ee   : > { %v11565_v51 = vpop.permute.xlu1 %2288 }
 0x2ef   : > { %14797 = vst [vmem:[#allocation71_spill] sm:$0xff] %v11565_v51  ;;  %v14800_v51 = vld [vmem:[#allocation87_spill] sm:$0xff] }
 0x2f0   : > { %v1020_v26 = vpop.permute.xlu0 %1019  ;;  %v1535_v14 = vmul.f32 %v14801_v58, %v14800_v51  ;;  %v10268_v51 = vmov 0.0  }
 0x2f1   : > { %v1534_v49 = vmul.f32 %v11580_v45, %v1020_v26  ;;  %2794 = vperm.xlu1 %9898, %v14739_v28   ;;  %v11598_v61 = vsel %vm1009_vm2, -1e+30, %v10268_v51  ;;  %v11603_v26 = vsel %vm1008_vm3, -1e+30, %v10268_v51  ;;  %v14806_v28 = vld [vmem:[#allocation133_spill] sm:$0xff] }
 0x2f2   : > { %v11594_v41 = vpop.permute.xlu1 %2298  ;;  %v2079_v58 = vadd.f32 %v2047_v60, %v1535_v14  ;;  %v1819_v39 = vrot.slane %v14806_v28, %v10945_v55  ;;  %v14808_v14 = vld [vmem:[#allocation85_spill] sm:$0xff] }
 0x2f3   : > { %14804 = vst [vmem:[#allocation73_spill] sm:$0xff] %v11594_v41  ;;  %v2078_v6 = vadd.f32 %v2046_v48, %v1534_v49  ;;  %v11610_v41 = vsel %vm1277_vm1, %v1814_v25, %v1810_v46  ;;  %v1304_v28 = vrot.slane %v14808_v14, %v10953_v17 }
 0x2f4   : > { %v1035_v49 = vpop.permute.xlu0 %1034  ;;  %v2049_v48 = vmul.f32 %v11610_v41, %v11224_v0  ;;  %v11625_v46 = vsel %vm1277_vm1, %v1823_v53, %v1819_v39  ;;  %v11634_v51 = vadd.f32 %v2079_v58, %v11603_v26  ;;  %v14812_v58 = vld [vmem:[#allocation88_spill] sm:$0xff] }
 0x2f5   : > { %v1537_v54 = vmul.f32 %v11613_v9, %v1035_v49  ;;  %2802 = vperm.xlu1 %9898, %v14742_v37   ;;  %v11620_v60 = vadd.f32 %v2078_v6, %v11598_v61  ;;  %v14810_v6 = vld [vmem:[#allocation147_spill] sm:$0xff]  ;;  %v14811_v49 = vld [vmem:[#allocation150_spill] sm:$0xff]  ;;  %v11641_v39 = vsel %vm1277_vm1, %v1304_v28, %v1300_v59 }
 0x2f6   : > { %14809 = vst [vmem:[#allocation76_spill] sm:$0xff] %v11634_v51  ;;  %v1309_v7 = vrot.slane %v14810_v6, %v10945_v55  ;;  %v1828_v14 = vrot.slane %v14811_v49, %v10945_v55  ;;  %v3235_v59 = vsel %vm360_vm0, %v11634_v51, -inf }
 0x2f7   : > { %14807 = vst [vmem:[#allocation75_spill] sm:$0xff] %v11620_v60  ;;  %v2081_v43 = vadd.f32 %v2049_v48, %v1537_v54  ;;  %v11629_v25 = vpop.permute.xlu1 %2305  ;;  %v3232_v0 = vsel %vm360_vm0, %v11620_v60, -inf  ;;  %v2051_v48 = vmul.f32 %v11625_v46, %v11231_v52  ;;  %v1313_v54 = vrot.slane %v14812_v58, %v10953_v17 }
 0x2f8   : > { %3233 = vmax.xlane.f32.xlu0 %v3232_v0  ;;  %v1045_v53 = vpop.permute.xlu0 %1044  ;;  %v11650_v6 = vsel %vm1277_vm1, %v1832_v12, %v1828_v14  ;;  %v1841_v0 = vrot.slane %v11411_v1, %v10953_v17  ;;  %v1318_v52 = vrot.slane %v11210_v4, %v10945_v55 }
 0x2f9   : > { %v1539_v2 = vmul.f32 %v11641_v39, %v1045_v53  ;;  %2810 = vperm.xlu1 %9898, %v14745_v19   ;;  %v11659_v28 = vadd.f32 %v2081_v43, %v11603_v26  ;;  %v1837_v53 = vrot.slane %v11217_v47, %v10945_v55  ;;  %v11666_v14 = vsel %vm1277_vm1, %v1313_v54, %v1309_v7  ;;  %v14815_v43 = vld [vmem:[#allocation91_spill] sm:$0xff] }
 0x2fa   : > { %v1322_v58 = vrot.slane %v14815_v43, %v10953_v17  ;;  %v1850_v47 = vrot.slane %v11417_v56, %v10953_v17 }
 0x2fb   : > { %v2083_v49 = vadd.f32 %v2051_v48, %v1539_v2  ;;  %v11654_v37 = vpop.permute.xlu1 %2308  ;;  %14813 = vst [vmem:[#allocation94_spill] sm:$0xff] %v11659_v28  ;;  %v2053_v2 = vmul.f32 %v11650_v6, %v11237_v44  ;;  %v14814_v48 = vmov 3   ;;  %v11675_v4 = vsel %vm1277_vm1, %v1841_v0, %v1837_v53  ;;  %v14818_v0 = vld [vmem:[#allocation162_spill] sm:$0xff] }
 0x2fc   : > { %v1055_v12 = vpop.permute.xlu0 %1054  ;;  %3236 = vmax.xlane.f32.xlu0 %v3235_v59  ;;  %v3241_v59 = vsel %vm360_vm0, %v11659_v28, -inf  ;;  %v1846_v53 = vrot.slane %v14818_v0, %v10945_v55  ;;  %v11692_v56 = vsel %vm1277_vm1, %v1322_v58, %v1318_v52 }
 0x2fd   : > { %v1541_v1 = vmul.f32 %v11666_v14, %v1055_v12  ;;  %9900 = vset.pattern.permute.xlu1 %v14814_v48  ;;  %v11685_v44 = vadd.f32 %v2083_v49, %v11603_v26  ;;  %v14817_v12 = vld [vmem:[#allocation160_spill] sm:$0xff] }
 0x2fe   : > { %2817 = vperm.xlu1 %9900, %v11053_v20   ;;  %v1327_v48 = vrot.slane %v14817_v12, %v10945_v55  ;;  %v14820_v20 = vld [vmem:[#allocation93_spill] sm:$0xff]  ;;  %v11700_v28 = vsel %vm1277_vm1, %v1850_v47, %v1846_v53  ;;  %v1859_v12 = vrot.slane %v11423_v23, %v10953_v17  ;;  %v14823_v47 = vld [vmem:[#allocation171_spill] sm:$0xff] }
 0x2ff   : > { %v2085_v7 = vadd.f32 %v2053_v2, %v1541_v1  ;;  %v11680_v54 = vpop.permute.xlu1 %2314  ;;  %14816 = vst [vmem:[#allocation89_spill] sm:$0xff] %v11685_v44  ;;  %v14819_v2 = vld [vmem:[#allocation161_spill] sm:$0xff]  ;;  %v1331_v49 = vrot.slane %v14820_v20, %v10953_v17  ;;  %v3247_v58 = vsel %vm360_vm0, %v11685_v44, -inf  ;;  %v1855_v53 = vrot.slane %v14823_v47, %v10945_v55  ;;  %v14825_v44 = vld [vmem:[#allocation96_spill] sm:$0xff] }
 0x300   : > { %v1065_v43 = vpop.permute.xlu0 %1064  ;;  %3242 = vmax.xlane.f32.xlu0 %v3241_v59  ;;  %v2055_v19 = vmul.f32 %v11675_v4, %v14819_v2 }
 0x301   : > { %v1543_v1 = vmul.f32 %v11692_v56, %v1065_v43  ;;  %v11710_v59 = vadd.f32 %v2085_v7, %v11603_v26  ;;  %v14822_v43 = vld [vmem:[#allocation169_spill] sm:$0xff]  ;;  %v11717_v23 = vsel %vm1277_vm1, %v1331_v49, %v1327_v48  ;;  %v1340_v7 = vrot.slane %v14825_v44, %v10953_v17 }
 0x302   : > { %2820 = vperm.xlu1 %9900, %v14757_v62   ;;  %v1336_v20 = vrot.slane %v14822_v43, %v10945_v55  ;;  %v11725_v51 = vsel %vm1277_vm1, %v1859_v12, %v1855_v53  ;;  %v1868_v43 = vrot.slane %v11429_v8, %v10953_v17  ;;  %v14828_v12 = vld [vmem:[#allocation180_spill] sm:$0xff] }
 0x303   : > { %v2087_v0 = vadd.f32 %v2055_v19, %v1543_v1  ;;  %v11705_v52 = vpop.permute.xlu1 %2320  ;;  %14821 = vst [vmem:[#allocation87_spill] sm:$0xff] %v11710_v59  ;;  %v14824_v1 = vld [vmem:[#allocation163_spill] sm:$0xff]  ;;  %v3253_v49 = vsel %vm360_vm0, %v11710_v59, -inf  ;;  %v1864_v53 = vrot.slane %v14828_v12, %v10945_v55  ;;  %v14831_v12 = vld [vmem:[#allocation122_spill] sm:$0xff] }
 0x304   : > { %v1075_v2 = vpop.permute.xlu0 %1074  ;;  %3248 = vmax.xlane.f32.xlu0 %v3247_v58  ;;  %v2057_v62 = vmul.f32 %v11700_v28, %v14824_v1  ;;  %v11742_v8 = vsel %vm1277_vm1, %v1340_v7, %v1336_v20  ;;  %v14830_v59 = vld [vmem:[#allocation99_spill] sm:$0xff] }
 0x305   : > { %v1545_v19 = vmul.f32 %v11717_v23, %v1075_v2  ;;  %v11735_v58 = vadd.f32 %v2087_v0, %v11603_v26  ;;  %v14827_v2 = vld [vmem:[#allocation178_spill] sm:$0xff]  ;;  %v1349_v0 = vrot.slane %v14830_v59, %v10953_v17  ;;  %v11750_v34 = vsel %vm1277_vm1, %v1868_v43, %v1864_v53  ;;  %v14835_v43 = vld [vmem:[#allocation189_spill] sm:$0xff] }
 0x306   : > { %2826 = vperm.xlu1 %9900, %v11064_v57   ;;  %v1345_v44 = vrot.slane %v14827_v2, %v10945_v55  ;;  %v1877_v2 = vrot.slane %v11435_v10, %v10953_v17  ;;  %v1873_v53 = vrot.slane %v14835_v43, %v10945_v55 }
 0x307   : > { %v2089_v47 = vadd.f32 %v2057_v62, %v1545_v19  ;;  %v11730_v48 = vpop.permute.xlu1 %2326  ;;  %14826 = vst [vmem:[#allocation97_spill] sm:$0xff] %v11735_v58  ;;  %v14829_v19 = vld [vmem:[#allocation164_spill] sm:$0xff]  ;;  %v3259_v7 = vsel %vm360_vm0, %v11735_v58, -inf  ;;  %v14837_v58 = vld [vmem:[#allocation103_spill] sm:$0xff] }
 0x308   : > { %v1085_v1 = vpop.permute.xlu0 %1084  ;;  %3254 = vmax.xlane.f32.xlu0 %v3253_v49  ;;  %v2059_v60 = vmul.f32 %v11725_v51, %v14829_v19  ;;  %v11767_v10 = vsel %vm1277_vm1, %v1349_v0, %v1345_v44 }
 0x309   : > { %v1547_v62 = vmul.f32 %v11742_v8, %v1085_v1  ;;  %v11760_v49 = vadd.f32 %v2089_v47, %v11603_v26  ;;  %v14834_v1 = vld [vmem:[#allocation187_spill] sm:$0xff]  ;;  %v1358_v47 = vrot.slane %v14837_v58, %v10953_v17 }
 0x30a   : > { %2832 = vperm.xlu1 %9900, %v14831_v12   ;;  %v1354_v59 = vrot.slane %v14834_v1, %v10945_v55  ;;  %v1886_v1 = vrot.slane %v11439_v16, %v10953_v17 }
 0x30b   : > { %v2091_v57 = vadd.f32 %v2059_v60, %v1547_v62  ;;  %v11755_v20 = vpop.permute.xlu1 %2332  ;;  %14833 = vst [vmem:[#allocation83_spill] sm:$0xff] %v11760_v49  ;;  %v14836_v62 = vld [vmem:[#allocation166_spill] sm:$0xff]  ;;  %v3265_v0 = vsel %vm360_vm0, %v11760_v49, -inf }
 0x30c   : > { %14832 = vst [vmem:[#allocation82_spill] sm:$0xff] %v11755_v20  ;;  %v1095_v19 = vpop.permute.xlu0 %1094  ;;  %3260 = vmax.xlane.f32.xlu0 %v3259_v7  ;;  %v2061_v12 = vmul.f32 %v11750_v34, %v14836_v62  ;;  %v11775_v20 = vsel %vm1277_vm1, %v1877_v2, %v1873_v53  ;;  %v14841_v2 = vld [vmem:[#allocation198_spill] sm:$0xff]  ;;  %v11792_v16 = vsel %vm1277_vm1, %v1358_v47, %v1354_v59 }
 0x30d   : > { %v1549_v60 = vmul.f32 %v11767_v10, %v1095_v19  ;;  %v11785_v7 = vadd.f32 %v2091_v57, %v11603_v26  ;;  %v14840_v19 = vld [vmem:[#allocation196_spill] sm:$0xff]  ;;  %v1882_v53 = vrot.slane %v14841_v2, %v10945_v55  ;;  %v14843_v49 = vld [vmem:[#allocation106_spill] sm:$0xff] }
 0x30e   : > { %2838 = vperm.xlu1 %9900, %v11084_v38   ;;  %v1363_v58 = vrot.slane %v14840_v19, %v10945_v55  ;;  %v1367_v57 = vrot.slane %v14843_v49, %v10953_v17  ;;  %v1895_v19 = vrot.slane %v11445_v22, %v10953_v17 }
 0x30f   : > { %v2093_v43 = vadd.f32 %v2061_v12, %v1549_v60  ;;  %v11780_v44 = vpop.permute.xlu1 %2338  ;;  %14839 = vst [vmem:[#allocation133_spill] sm:$0xff] %v11785_v7  ;;  %v14842_v60 = vld [vmem:[#allocation168_spill] sm:$0xff]  ;;  %v3271_v47 = vsel %vm360_vm0, %v11785_v7, -inf  ;;  %v14849_v7 = vld [vmem:[#allocation109_spill] sm:$0xff] }
 0x310   : > { %14838 = vst [vmem:[#allocation130_spill] sm:$0xff] %v11780_v44  ;;  %v1105_v62 = vpop.permute.xlu0 %1104  ;;  %3266 = vmax.xlane.f32.xlu0 %v3265_v0  ;;  %v2063_v38 = vmul.f32 %v11775_v20, %v14842_v60  ;;  %v11800_v44 = vsel %vm1277_vm1, %v1886_v1, %v1882_v53  ;;  %v14847_v1 = vld [vmem:[#allocation207_spill] sm:$0xff]  ;;  %v11817_v22 = vsel %vm1277_vm1, %v1367_v57, %v1363_v58 }
 0x311   : > { %v1551_v12 = vmul.f32 %v11792_v16, %v1105_v62  ;;  %v11810_v0 = vadd.f32 %v2093_v43, %v11603_v26  ;;  %v14846_v62 = vld [vmem:[#allocation205_spill] sm:$0xff]  ;;  %v1891_v53 = vrot.slane %v14847_v1, %v10945_v55  ;;  %v1376_v43 = vrot.slane %v14849_v7, %v10953_v17 }
 0x312   : > { %2844 = vperm.xlu1 %9900, %v11094_v50   ;;  %v1372_v49 = vrot.slane %v14846_v62, %v10945_v55  ;;  %v1904_v62 = vrot.slane %v11451_v36, %v10953_v17 }
 0x313   : > { %v2095_v2 = vadd.f32 %v2063_v38, %v1551_v12  ;;  %v11805_v59 = vpop.permute.xlu1 %2344  ;;  %14845 = vst [vmem:[#allocation147_spill] sm:$0xff] %v11810_v0  ;;  %v14848_v12 = vld [vmem:[#allocation170_spill] sm:$0xff]  ;;  %v3277_v57 = vsel %vm360_vm0, %v11810_v0, -inf  ;;  %v14853_v0 = vld [vmem:[#allocation111_spill] sm:$0xff] }
 0x314   : > { %14844 = vst [vmem:[#allocation85_spill] sm:$0xff] %v11805_v59  ;;  %v1115_v60 = vpop.permute.xlu0 %1114  ;;  %3272 = vmax.xlane.f32.xlu0 %v3271_v47  ;;  %v2065_v50 = vmul.f32 %v11800_v44, %v14848_v12  ;;  %v11825_v59 = vsel %vm1277_vm1, %v1895_v19, %v1891_v53  ;;  %v1900_v19 = vrot.slane %v11427_v33, %v10945_v55 }
 0x315   : > { %v1553_v38 = vmul.f32 %v11817_v22, %v1115_v60  ;;  %v11835_v47 = vadd.f32 %v2095_v2, %v11603_v26  ;;  %v14851_v60 = vld [vmem:[#allocation210_spill] sm:$0xff]  ;;  %v11842_v36 = vsel %vm1277_vm1, %v1376_v43, %v1372_v49  ;;  %v1385_v2 = vrot.slane %v14853_v0, %v10953_v17 }
 0x316   : > { %2850 = vperm.xlu1 %9900, %v11104_v40   ;;  %v1381_v7 = vrot.slane %v14851_v60, %v10945_v55  ;;  %v11850_v40 = vsel %vm1277_vm1, %v1904_v62, %v1900_v19  ;;  %v1913_v60 = vrot.slane %v11457_v18, %v10953_v17  ;;  %v1390_v0 = vrot.slane %v11448_v3, %v10945_v55 }
 0x317   : > { %v2097_v1 = vadd.f32 %v2065_v50, %v1553_v38  ;;  %v11830_v58 = vpop.permute.xlu1 %2350  ;;  %14850 = vst [vmem:[#allocation150_spill] sm:$0xff] %v11835_v47  ;;  %v14852_v38 = vld [vmem:[#allocation172_spill] sm:$0xff]  ;;  %v3283_v43 = vsel %vm360_vm0, %v11835_v47, -inf  ;;  %v1909_v62 = vrot.slane %v11455_v21, %v10945_v55  ;;  %v1918_v3 = vrot.slane %v11482_v24, %v10945_v55 }
 0x318   : > { %v1125_v53 = vpop.permute.xlu0 %1124  ;;  %3278 = vmax.xlane.f32.xlu0 %v3277_v57  ;;  %v2067_v12 = vmul.f32 %v11825_v59, %v14852_v38  ;;  %v11867_v18 = vsel %vm1277_vm1, %v1385_v2, %v1381_v7  ;;  %v14857_v21 = vld [vmem:[#allocation136_spill] sm:$0xff] }
 0x319   : > { %v1555_v50 = vmul.f32 %v11842_v36, %v1125_v53  ;;  %v11860_v57 = vadd.f32 %v2097_v1, %v11603_v26  ;;  %v11875_v47 = vsel %vm1277_vm1, %v1913_v60, %v1909_v62  ;;  %v1399_v60 = vrot.slane %v11476_v32, %v10945_v55  ;;  %v14861_v32 = vld [vmem:[#allocation139_spill] sm:$0xff] }
 0x31a   : > { %2856 = vperm.xlu1 %9900, %v11115_v63  }
 0x31b   : > { %v2099_v33 = vadd.f32 %v2067_v12, %v1555_v50  ;;  %v11855_v49 = vpop.permute.xlu1 %2356  ;;  %14854 = vst [vmem:[#allocation88_spill] sm:$0xff] %v11860_v57  ;;  %v14855_v50 = vld [vmem:[#allocation173_spill] sm:$0xff]  ;;  %v14856_v12 = vld [vmem:[#allocation114_spill] sm:$0xff]  ;;  %v3289_v2 = vsel %vm360_vm0, %v11860_v57, -inf }
 0x31c   : > { %v1135_v19 = vpop.permute.xlu0 %1134  ;;  %3284 = vmax.xlane.f32.xlu0 %v3283_v43  ;;  %v2069_v38 = vmul.f32 %v11850_v40, %v14855_v50  ;;  %v1394_v1 = vrot.slane %v14856_v12, %v10953_v17  ;;  %v14859_v50 = vld [vmem:[#allocation175_spill] sm:$0xff]  ;;  %v14860_v12 = vld [vmem:[#allocation116_spill] sm:$0xff] }
 0x31d   : > { %v1557_v53 = vmul.f32 %v11867_v18, %v1135_v19  ;;  %v11885_v43 = vadd.f32 %v2099_v33, %v11603_v26  ;;  %v1922_v19 = vrot.slane %v11463_v30, %v10953_v17  ;;  %v1403_v33 = vrot.slane %v14860_v12, %v10953_v17  ;;  %v14864_v12 = vld [vmem:[#allocation118_spill] sm:$0xff] }
 0x31e   : > { %2862 = vperm.xlu1 %9900, %v14857_v21   ;;  %v11892_v24 = vsel %vm1277_vm1, %v1394_v1, %v1390_v0  ;;  %v1927_v30 = vrot.slane %v11506_v15, %v10945_v55 }
 0x31f   : > { %v2101_v63 = vadd.f32 %v2069_v38, %v1557_v53  ;;  %v11880_v7 = vpop.permute.xlu1 %2362  ;;  %14858 = vst [vmem:[#allocation91_spill] sm:$0xff] %v11885_v43  ;;  %v2071_v38 = vmul.f32 %v11875_v47, %v14859_v50  ;;  %v11900_v57 = vsel %vm1277_vm1, %v1922_v19, %v1918_v3  ;;  %v3295_v1 = vsel %vm360_vm0, %v11885_v43, -inf  ;;  %v14863_v50 = vld [vmem:[#allocation177_spill] sm:$0xff] }
 0x320   : > { %v1145_v62 = vpop.permute.xlu0 %1144  ;;  %3290 = vmax.xlane.f32.xlu0 %v3289_v2  ;;  %v1408_v3 = vrot.slane %v11500_v13, %v10945_v55  ;;  %v11917_v15 = vsel %vm1277_vm1, %v1403_v33, %v1399_v60 }
 0x321   : > { %v1559_v53 = vmul.f32 %v11892_v24, %v1145_v62  ;;  %v11910_v2 = vadd.f32 %v2101_v63, %v11603_v26  ;;  %v1931_v62 = vrot.slane %v11467_v29, %v10953_v17  ;;  %v1412_v63 = vrot.slane %v14864_v12, %v10953_v17  ;;  %v14868_v12 = vld [vmem:[#allocation145_spill] sm:$0xff] }
 0x322   : > { %2868 = vperm.xlu1 %9900, %v14861_v32  }
 0x323   : > { %v2103_v21 = vadd.f32 %v2071_v38, %v1559_v53  ;;  %v11905_v0 = vpop.permute.xlu1 %2368  ;;  %14862 = vst [vmem:[#allocation160_spill] sm:$0xff] %v11910_v2  ;;  %v2073_v38 = vmul.f32 %v11900_v57, %v14863_v50  ;;  %v11925_v43 = vsel %vm1277_vm1, %v1931_v62, %v1927_v30  ;;  %v3301_v60 = vsel %vm360_vm0, %v11910_v2, -inf  ;;  %v14867_v30 = vld [vmem:[#allocation179_spill] sm:$0xff] }
 0x324   : > { %v1155_v19 = vpop.permute.xlu0 %1154  ;;  %3296 = vmax.xlane.f32.xlu0 %v3295_v1  ;;  %v2075_v62 = vmul.f32 %v11925_v43, %v14867_v30 }
 0x325   : > { %v1561_v53 = vmul.f32 %v11917_v15, %v1155_v19  ;;  %v11933_v33 = vadd.f32 %v2103_v21, %v11603_v26  ;;  %v11936_v19 = vsel %vm1277_vm1, %v1412_v63, %v1408_v3 }
 0x326   : > { %2874 = vperm.xlu1 %9900, %v11145_v42   ;;  %v14878_v42 = vld [vmem:[#allocation107_spill] sm:$0xff] }
 0x327   : > { %v2105_v29 = vadd.f32 %v2073_v38, %v1561_v53  ;;  %v11928_v13 = vpop.permute.xlu1 %2374  ;;  %14866 = vst [vmem:[#allocation161_spill] sm:$0xff] %v11933_v33  ;;  %v3307_v2 = vsel %vm360_vm0, %v11933_v33, -inf  ;;  %v2050_v32 = vmul.f32 %v11610_v41, %v14878_v42  ;;  %v14884_v42 = vld [vmem:[#allocation119_spill] sm:$0xff] }
 0x328   : > { %14865 = vst [vmem:[#allocation162_spill] sm:$0xff] %v11928_v13  ;;  %v1165_v1 = vpop.permute.xlu0 %1164  ;;  %3302 = vmax.xlane.f32.xlu0 %v3301_v60  ;;  %v1540_v41 = vmul.f32 %v11641_v39, %v14884_v42 }
 0x329   : > { %v1563_v50 = vmul.f32 %v11936_v19, %v1165_v1  ;;  %v11947_v21 = vadd.f32 %v2105_v29, %v11603_v26  ;;  %v14873_v1 = vld [vmem:[#allocation50_spill] sm:$0xff] }
 0x32a   : > { %2880 = vperm.xlu1 %9900, %v14868_v12  }
 0x32b   : > { %v2107_v53 = vadd.f32 %v2075_v62, %v1563_v50  ;;  %v11942_v38 = vpop.permute.xlu1 %2380  ;;  %14870 = vst [vmem:[#allocation169_spill] sm:$0xff] %v11947_v21  ;;  %v3313_v63 = vsel %vm360_vm0, %v11947_v21, -inf  ;;  %v14876_v21 = vmov 0  }
 0x32c   : > { %14869 = vst [vmem:[#allocation93_spill] sm:$0xff] %v11942_v38  ;;  %3308 = vmax.xlane.f32.xlu0 %v3307_v2  ;;  %v14875_v2 = vld [vmem:[#allocation52_spill] sm:$0xff] }
 0x32d   : > { %v11955_v60 = vadd.f32 %v2107_v53, %v11603_v26 }
 0x32e   : > { %2886 = vperm.xlu1 %9900, %v11166_v31  }
 0x32f   : > { %v11950_v3 = vpop.permute.xlu1 %2386  ;;  %14872 = vst [vmem:[#allocation163_spill] sm:$0xff] %v11955_v60  ;;  %v3319_v29 = vsel %vm360_vm0, %v11955_v60, -inf }
 0x330   : > { %14871 = vst [vmem:[#allocation171_spill] sm:$0xff] %v11950_v3  ;;  %3314 = vmax.xlane.f32.xlu0 %v3313_v63  ;;  %v14880_v3 = vld [vmem:[#allocation104_spill] sm:$0xff] }
 0x331   : > { %v1538_v38 = vmul.f32 %v11613_v9, %v14880_v3  ;;  %v14885_v9 = vld [vmem:[#allocation141_spill] sm:$0xff] }
 0x332   : > { %2892 = vperm.xlu1 %9900, %v14873_v1  }
 0x333   : > { %v11958_v50 = vpop.permute.xlu1 %2392 }
 0x334   : > { %14874 = vst [vmem:[#allocation96_spill] sm:$0xff] %v11958_v50  ;;  %3320 = vmax.xlane.f32.xlu0 %v3319_v29  ;;  %v1533_v29 = vmul.f32 %v11580_v45, %v11562_v35  ;;  %v14881_v35 = vld [vmem:[#allocation124_spill] sm:$0xff] }
 0x335   : > { %v2052_v45 = vmul.f32 %v11625_v46, %v14881_v35 }
 0x336   : > { %2898 = vperm.xlu1 %9900, %v14875_v2   ;;  %v14877_v2 = vld [vmem:[#allocation78_spill] sm:$0xff] }
 0x337   : > { %v2084_v35 = vadd.f32 %v2052_v45, %v1540_v41 }
 0x338   : > { %v11963_v30 = vpop.permute.xlu1 %2686 }
 0x33a   : > { %2904 = vperm.xlu1 %9900, %v11196_v27   ;;  %v2045_v27 = vmul.f32 %v11573_v11, %v14877_v2 }
 0x33c   : > { %v11966_v62 = vpop.permute.xlu1 %2694  ;;  %v2077_v12 = vadd.f32 %v2045_v27, %v1533_v29  ;;  %v14882_v27 = vld [vmem:[#allocation101_spill] sm:$0xff]  ;;  %v2082_v29 = vadd.f32 %v2050_v32, %v1538_v38 }
 0x33d   : > { %v12002_v2 = vadd.f32 %v14882_v27, %v11598_v61  ;;  %v14887_v27 = vld [vmem:[#allocation138_spill] sm:$0xff] }
 0x33e   : > { %9902 = vset.pattern.permute.xlu1 %v14876_v21  ;;  %v11990_v50 = vadd.f32 %v2077_v12, %v11603_v26  ;;  %v2054_v12 = vmul.f32 %v11650_v6, %v14885_v9  ;;  %v12013_v3 = vadd.f32 %v2082_v29, %v11598_v61  ;;  %v1542_v32 = vmul.f32 %v11666_v14, %v14887_v27  ;;  %v14890_v29 = vld [vmem:[#allocation152_spill] sm:$0xff] }
 0x33f   : > { %14883 = vst [vmem:[#allocation180_spill] sm:$0xff] %v12002_v2  ;;  %v3238_v46 = vsel %vm360_vm0, %v12002_v2, -inf  ;;  %v12024_v6 = vadd.f32 %v2084_v35, %v11598_v61  ;;  %v1544_v45 = vmul.f32 %v11692_v56, %v14890_v29  ;;  %v14893_v35 = vld [vmem:[#allocation158_spill] sm:$0xff] }
 0x340   : > { %v11969_v53 = vpop.permute.xlu1 %2698  ;;  %14879 = vst [vmem:[#allocation178_spill] sm:$0xff] %v11990_v50  ;;  %v3229_v11 = vsel %vm360_vm0, %v11990_v50, -inf  ;;  %14886 = vst [vmem:[#allocation164_spill] sm:$0xff] %v12013_v3  ;;  %v3244_v42 = vsel %vm360_vm0, %v12013_v3, -inf  ;;  %v2086_v9 = vadd.f32 %v2054_v12, %v1542_v32  ;;  %v1546_v12 = vmul.f32 %v11717_v23, %v14893_v35 }
 0x341   : > { %14889 = vst [vmem:[#allocation99_spill] sm:$0xff] %v12024_v6  ;;  %v3250_v27 = vsel %vm360_vm0, %v12024_v6, -inf }
 0x344   : > { %v11971_v63 = vpop.permute.xlu1 %2706 }
 0x348   : > { %v11973_v33 = vpop.permute.xlu1 %2714 }
 0x34c   : > { %v11975_v1 = vpop.permute.xlu1 %2722 }
 0x350   : > { %v11977_v60 = vpop.permute.xlu1 %2730 }
 0x354   : > { %v11983_v31 = vpop.permute.xlu1 %2738 }
 0x358   : > { %v11985_v21 = vpop.permute.xlu1 %2746 }
 0x35c   : > { %v11994_v13 = vpop.permute.xlu1 %2754 }
 0x35e   : > { %3230 = vmax.xlane.f32.xlu1 %v3229_v11  ;;  %v14888_v11 = vld [vmem:[#allocation155_spill] sm:$0xff] }
 0x35f   : > { %v2056_v39 = vmul.f32 %v11675_v4, %v14888_v11  ;;  %v12035_v4 = vadd.f32 %v2086_v9, %v11598_v61  ;;  %v14896_v9 = vld [vmem:[#allocation165_spill] sm:$0xff] }
 0x360   : > { %v12006_v26 = vpop.permute.xlu1 %2762 }
 0x361   : > { %14892 = vst [vmem:[#allocation187_spill] sm:$0xff] %v12035_v4  ;;  %v2088_v11 = vadd.f32 %v2056_v39, %v1544_v45  ;;  %v3256_v29 = vsel %vm360_vm0, %v12035_v4, -inf  ;;  %v1548_v39 = vmul.f32 %v11742_v8, %v14896_v9 }
 0x362   : > { %3239 = vmax.xlane.f32.xlu1 %v3238_v46  ;;  %v14891_v46 = vld [vmem:[#allocation159_spill] sm:$0xff] }
 0x363   : > { %v2058_v14 = vmul.f32 %v11700_v28, %v14891_v46  ;;  %v12046_v28 = vadd.f32 %v2088_v11, %v11598_v61  ;;  %v14899_v11 = vld [vmem:[#allocation174_spill] sm:$0xff] }
 0x364   : > { %v12017_v38 = vpop.permute.xlu1 %2770 }
 0x365   : > { %14895 = vst [vmem:[#allocation189_spill] sm:$0xff] %v12046_v28  ;;  %v2090_v46 = vadd.f32 %v2058_v14, %v1546_v12  ;;  %v3262_v35 = vsel %vm360_vm0, %v12046_v28, -inf  ;;  %v1550_v14 = vmul.f32 %v11767_v10, %v14899_v11  ;;  %v14982_v28 = vld [vmem:[#allocation239_spill] sm:$0xff] }
 0x366   : > { %3245 = vmax.xlane.f32.xlu1 %v3244_v42  ;;  %v14894_v42 = vld [vmem:[#allocation167_spill] sm:$0xff] }
 0x367   : > { %v2060_v56 = vmul.f32 %v11725_v51, %v14894_v42  ;;  %v12057_v51 = vadd.f32 %v2090_v46, %v11598_v61  ;;  %v14902_v46 = vld [vmem:[#allocation183_spill] sm:$0xff] }
 0x368   : > { %v12028_v41 = vpop.permute.xlu1 %2778 }
 0x369   : > { %14898 = vst [vmem:[#allocation166_spill] sm:$0xff] %v12057_v51  ;;  %v2092_v42 = vadd.f32 %v2060_v56, %v1548_v39  ;;  %v3268_v9 = vsel %vm360_vm0, %v12057_v51, -inf  ;;  %v1552_v56 = vmul.f32 %v11792_v16, %v14902_v46  ;;  %v14903_v39 = vld [vmem:[#allocation194_spill] sm:$0xff]  ;;  %v14906_v16 = vld [vmem:[#allocation121_spill] sm:$0xff] }
 0x36a   : > { %3251 = vmax.xlane.f32.xlu1 %v3250_v27  ;;  %v14897_v27 = vld [vmem:[#allocation176_spill] sm:$0xff]  ;;  %v14908_v51 = vld [vmem:[#allocation201_spill] sm:$0xff] }
 0x36b   : > { %v2062_v23 = vmul.f32 %v11750_v34, %v14897_v27  ;;  %v12068_v34 = vadd.f32 %v2092_v42, %v11598_v61  ;;  %v2404_v42 = vrot.slane %v11629_v25, %v10953_v17 }
 0x36c   : > { %v12039_v32 = vpop.permute.xlu1 %2786 }
 0x36d   : > { %14901 = vst [vmem:[#allocation103_spill] sm:$0xff] %v12068_v34  ;;  %v2094_v27 = vadd.f32 %v2062_v23, %v1550_v14  ;;  %v3274_v11 = vsel %vm360_vm0, %v12068_v34, -inf  ;;  %v14905_v23 = vld [vmem:[#allocation192_spill] sm:$0xff]  ;;  %v1556_v34 = vmul.f32 %v11842_v36, %v14908_v51  ;;  %v14911_v36 = vld [vmem:[#allocation123_spill] sm:$0xff] }
 0x36e   : > { %3257 = vmax.xlane.f32.xlu1 %v3256_v29  ;;  %v14900_v29 = vld [vmem:[#allocation185_spill] sm:$0xff]  ;;  %v1554_v14 = vmul.f32 %v11817_v22, %v14905_v23  ;;  %v14910_v22 = vld [vmem:[#allocation215_spill] sm:$0xff]  ;;  %v2413_v51 = vrot.slane %v14911_v36, %v10953_v17 }
 0x36f   : > { %v2064_v8 = vmul.f32 %v11775_v20, %v14900_v29  ;;  %v12079_v20 = vadd.f32 %v2094_v27, %v11598_v61 }
 0x370   : > { %v12050_v45 = vpop.permute.xlu1 %2794 }
 0x371   : > { %14904 = vst [vmem:[#allocation196_spill] sm:$0xff] %v12079_v20  ;;  %v2096_v29 = vadd.f32 %v2064_v8, %v1552_v56  ;;  %v3280_v8 = vsel %vm360_vm0, %v12079_v20, -inf  ;;  %v2912_v56 = vrot.slane %v14910_v22, %v10945_v55  ;;  %v14914_v22 = vld [vmem:[#allocation81_spill] sm:$0xff] }
 0x372   : > { %3263 = vmax.xlane.f32.xlu1 %v3262_v35  ;;  %v2066_v35 = vmul.f32 %v11800_v44, %v14903_v39  ;;  %v14907_v44 = vld [vmem:[#allocation203_spill] sm:$0xff] }
 0x373   : > { %v2068_v46 = vmul.f32 %v11825_v59, %v14907_v44  ;;  %v12094_v25 = vadd.f32 %v2096_v29, %v11598_v61 }
 0x374   : > { %v12061_v12 = vpop.permute.xlu1 %2802  ;;  %v2098_v39 = vadd.f32 %v2066_v35, %v1554_v14 }
 0x375   : > { %14909 = vst [vmem:[#allocation198_spill] sm:$0xff] %v12094_v25  ;;  %v2100_v29 = vadd.f32 %v2068_v46, %v1556_v34  ;;  %v14916_v34 = vld [vmem:[#allocation208_spill] sm:$0xff] }
 0x376   : > { %3269 = vmax.xlane.f32.xlu1 %v3268_v9  ;;  %v2400_v9 = vrot.slane %v14906_v16, %v10945_v55  ;;  %v12106_v14 = vadd.f32 %v2098_v39, %v11598_v61  ;;  %v14913_v16 = vld [vmem:[#allocation209_spill] sm:$0xff]  ;;  %v1558_v46 = vmul.f32 %v11867_v18, %v14916_v34  ;;  %v14920_v18 = vld [vmem:[#allocation211_spill] sm:$0xff] }
 0x377   : > { %v2070_v44 = vmul.f32 %v11850_v40, %v14913_v16  ;;  %v14918_v16 = vld [vmem:[#allocation212_spill] sm:$0xff] }
 0x378   : > { %v12074_v10 = vpop.permute.xlu1 %2810  ;;  %v2405_v23 = vsel %vm1277_vm1, %v2404_v42, %v2400_v9  ;;  %14912 = vst [vmem:[#allocation168_spill] sm:$0xff] %v12106_v14  ;;  %v3286_v42 = vsel %vm360_vm0, %v12094_v25, -inf  ;;  %v3292_v36 = vsel %vm360_vm0, %v12106_v14, -inf  ;;  %v14977_v25 = vld [vmem:[#allocation237_spill] sm:$0xff] }
 0x379   : > { %v2653_v20 = vmul.f32 %v2405_v23, %v14914_v22  ;;  %v2072_v22 = vmul.f32 %v11875_v47, %v14918_v16 }
 0x37a   : > { %3275 = vmax.xlane.f32.xlu1 %v3274_v11  ;;  %v2409_v11 = vrot.slane %v11654_v37, %v10945_v55 }
 0x37d   : > { %v2818_v27 = vpop.permute.xlu1 %2817 }
 0x37e   : > { %v2916_v59 = vrot.slane %v2818_v27, %v10953_v17  ;;  %3281 = vmax.xlane.f32.xlu1 %v3280_v8  ;;  %v14915_v27 = vld [vmem:[#allocation216_spill] sm:$0xff] }
 0x37f   : > { %v2925_v8 = vrot.slane %v14915_v27, %v10953_v17 }
 0x380   : > { %v2917_v35 = vsel %vm1277_vm1, %v2916_v59, %v2912_v56  ;;  %v2414_v56 = vsel %vm1277_vm1, %v2413_v51, %v2409_v11  ;;  %v2102_v51 = vadd.f32 %v2070_v44, %v1558_v46  ;;  %v14924_v46 = vld [vmem:[#allocation213_spill] sm:$0xff] }
 0x381   : > { %v2821_v37 = vpop.permute.xlu1 %2820  ;;  %v3165_v9 = vmul.f32 %v2917_v35, %v11963_v30  ;;  %v12126_v30 = vadd.f32 %v2100_v29, %v11598_v61 }
 0x382   : > { %v2921_v39 = vrot.slane %v2821_v37, %v10945_v55  ;;  %3287 = vmax.xlane.f32.xlu1 %v3286_v42  ;;  %v14919_v37 = vld [vmem:[#allocation100_spill] sm:$0xff]  ;;  %v12141_v47 = vadd.f32 %v2102_v51, %v11598_v61 }
 0x383   : > { %v12120_v40 = vadd.f32 %v3165_v9, %v2653_v20  ;;  %14917 = vst [vmem:[#allocation106_spill] sm:$0xff] %v12126_v30  ;;  %v2655_v42 = vmul.f32 %v2414_v56, %v14919_v37  ;;  %v1560_v20 = vmul.f32 %v11892_v24, %v14920_v18  ;;  %v3298_v34 = vsel %vm360_vm0, %v12126_v30, -inf }
 0x384   : > { %v2926_v59 = vsel %vm1277_vm1, %v2925_v8, %v2921_v39  ;;  %v14922_v8 = vld [vmem:[#allocation214_spill] sm:$0xff]  ;;  %14923 = vst [vmem:[#allocation207_spill] sm:$0xff] %v12141_v47  ;;  %v2076_v24 = vmul.f32 %v11925_v43, %v11495_v5  ;;  %v3304_v16 = vsel %vm360_vm0, %v12141_v47, -inf  ;;  %v2149_v43 = vpop.permute.xlu0 %2148 }
 0x385   : > { %v2827_v11 = vpop.permute.xlu1 %2826  ;;  %v3167_v27 = vmul.f32 %v2926_v59, %v11966_v62  ;;  %v2074_v39 = vmul.f32 %v11900_v57, %v14922_v8  ;;  %v2104_v44 = vadd.f32 %v2072_v22, %v1560_v20  ;;  %v1562_v62 = vmul.f32 %v11917_v15, %v14924_v46  ;;  %v14930_v46 = vld [vmem:[#allocation217_spill] sm:$0xff] }
 0x386   : > { %3293 = vmax.xlane.f32.xlu1 %v3292_v36 }
 0x387   : > { %v12134_v9 = vadd.f32 %v3167_v27, %v2655_v42  ;;  %v12150_v57 = vadd.f32 %v2104_v44, %v11598_v61  ;;  %v2106_v37 = vadd.f32 %v2074_v39, %v1562_v62  ;;  %v14926_v42 = vld [vmem:[#allocation218_spill] sm:$0xff]  ;;  %v14929_v39 = vld [vmem:[#allocation181_spill] sm:$0xff]  ;;  %v2654_v44 = vmul.f32 %v2405_v23, %v2149_v43 }
 0x388   : > { %v1564_v51 = vmul.f32 %v11936_v19, %v14926_v42  ;;  %v3166_v19 = vmul.f32 %v2917_v35, %v14929_v39  ;;  %v2934_v62 = vrot.slane %v14930_v46, %v10953_v17  ;;  %v14931_v35 = vld [vmem:[#allocation126_spill] sm:$0xff] }
 0x389   : > { %14921 = vst [vmem:[#allocation205_spill] sm:$0xff] %v12134_v9  ;;  %v2833_v29 = vpop.permute.xlu1 %2832  ;;  %14925 = vst [vmem:[#allocation170_spill] sm:$0xff] %v12150_v57  ;;  %v3310_v27 = vsel %vm360_vm0, %v12150_v57, -inf  ;;  %v12157_v15 = vadd.f32 %v2106_v37, %v11598_v61 }
 0x38a   : > { %3299 = vmax.xlane.f32.xlu1 %v3298_v34  ;;  %v2108_v5 = vadd.f32 %v2076_v24, %v1564_v51  ;;  %v2930_v34 = vrot.slane %v2827_v11, %v10945_v55  ;;  %v2418_v24 = vrot.slane %v11680_v54, %v10945_v55  ;;  %v12176_v42 = vadd.f32 %v3166_v19, %v2654_v44 }
 0x38b   : > { %14927 = vst [vmem:[#allocation109_spill] sm:$0xff] %v12157_v15  ;;  %v3316_v20 = vsel %vm360_vm0, %v12157_v15, -inf  ;;  %v2422_v11 = vrot.slane %v14931_v35, %v10953_v17  ;;  %v2939_v51 = vrot.slane %v2833_v29, %v10945_v55 }
 0x38c   : > { %v12164_v8 = vadd.f32 %v2108_v5, %v11598_v61  ;;  %v3168_v61 = vmul.f32 %v2926_v59, %v11969_v53  ;;  %v12182_v23 = vsel %vm1277_vm1, %v2934_v62, %v2930_v34  ;;  %v14933_v5 = vld [vmem:[#allocation219_spill] sm:$0xff]  ;;  %v2427_v53 = vrot.slane %v11705_v52, %v10945_v55  ;;  %v14936_v52 = vld [vmem:[#allocation112_spill] sm:$0xff] }
 0x38d   : > { %v2839_v36 = vpop.permute.xlu1 %2838  ;;  %v2943_v43 = vrot.slane %v14933_v5, %v10953_v17  ;;  %v3328_v39 = vsel %vm360_vm0, %v12176_v42, -inf  ;;  %v3170_v29 = vmul.f32 %v12182_v23, %v11971_v63  ;;  %v2436_v63 = vrot.slane %v11730_v48, %v10945_v55 }
 0x38e   : > { %3305 = vmax.xlane.f32.xlu1 %v3304_v16  ;;  %14928 = vst [vmem:[#allocation210_spill] sm:$0xff] %v12164_v8  ;;  %v3322_v37 = vsel %vm360_vm0, %v12164_v8, -inf  ;;  %v2948_v46 = vrot.slane %v2839_v36, %v10945_v55 }
 0x38f   : > { %v12204_v44 = vsel %vm1277_vm1, %v2943_v43, %v2939_v51  ;;  %v14938_v51 = vld [vmem:[#allocation132_spill] sm:$0xff] }
 0x390   : > { %v3172_v36 = vmul.f32 %v12204_v44, %v11973_v33  ;;  %v14941_v33 = vld [vmem:[#allocation82_spill] sm:$0xff] }
 0x391   : > { %v2845_v22 = vpop.permute.xlu1 %2844 }
 0x392   : > { %3311 = vmax.xlane.f32.xlu1 %v3310_v27  ;;  %v14932_v27 = vld [vmem:[#allocation84_spill] sm:$0xff]  ;;  %v2957_v5 = vrot.slane %v2845_v22, %v10945_v55 }
 0x393   : > { %v2656_v54 = vmul.f32 %v2414_v56, %v14932_v27  ;;  %v14935_v56 = vld [vmem:[#allocation129_spill] sm:$0xff]  ;;  %v2440_v27 = vrot.slane %v14938_v51, %v10953_v17 }
 0x394   : > { %v2431_v34 = vrot.slane %v14935_v56, %v10953_v17 }
 0x395   : > { %v12159_v18 = vpop.permute.xlu1 %2850  ;;  %v12197_v19 = vadd.f32 %v3168_v61, %v2656_v54  ;;  %v12233_v56 = vsel %vm1277_vm1, %v2440_v27, %v2436_v63  ;;  %v14944_v27 = vld [vmem:[#allocation222_spill] sm:$0xff] }
 0x396   : > { %3317 = vmax.xlane.f32.xlu1 %v3316_v20  ;;  %v12189_v20 = vsel %vm1277_vm1, %v2422_v11, %v2418_v24  ;;  %v14937_v24 = vld [vmem:[#allocation220_spill] sm:$0xff]  ;;  %v12212_v61 = vsel %vm1277_vm1, %v2431_v34, %v2427_v53  ;;  %v14939_v53 = vld [vmem:[#allocation127_spill] sm:$0xff]  ;;  %v2445_v34 = vrot.slane %v14941_v33, %v10945_v55  ;;  %v2966_v63 = vrot.slane %v12159_v18, %v10945_v55  ;;  %v14946_v33 = vld [vmem:[#allocation137_spill] sm:$0xff] }
 0x397   : > { %14934 = vst [vmem:[#allocation172_spill] sm:$0xff] %v12197_v19  ;;  %v2658_v62 = vmul.f32 %v12189_v20, %v14936_v52  ;;  %v3334_v35 = vsel %vm360_vm0, %v12197_v19, -inf  ;;  %v2660_v48 = vmul.f32 %v12212_v61, %v14939_v53 }
 0x399   : > { %v12172_v16 = vpop.permute.xlu1 %2856  ;;  %v12218_v11 = vadd.f32 %v3170_v29, %v2658_v62  ;;  %v12239_v52 = vadd.f32 %v3172_v36, %v2660_v48  ;;  %v14942_v62 = vld [vmem:[#allocation135_spill] sm:$0xff]  ;;  %v2970_v36 = vrot.slane %v14944_v27, %v10953_v17 }
 0x39a   : > { %3323 = vmax.xlane.f32.xlu1 %v3322_v37  ;;  %v2952_v37 = vrot.slane %v14937_v24, %v10953_v17  ;;  %v2449_v24 = vrot.slane %v14942_v62, %v10953_v17  ;;  %v14948_v27 = vld [vmem:[#allocation223_spill] sm:$0xff] }
 0x39b   : > { %v12268_v62 = vsel %vm1277_vm1, %v2970_v36, %v2966_v63 }
 0x39c   : > { %v12225_v54 = vsel %vm1277_vm1, %v2952_v37, %v2948_v46  ;;  %v3340_v46 = vsel %vm360_vm0, %v12218_v11, -inf  ;;  %v12255_v53 = vsel %vm1277_vm1, %v2449_v24, %v2445_v34  ;;  %v2975_v34 = vrot.slane %v12172_v16, %v10945_v55  ;;  %v14947_v24 = vld [vmem:[#allocation224_spill] sm:$0xff] }
 0x39d   : > { %v12193_v59 = vpop.permute.xlu1 %2862  ;;  %v3174_v22 = vmul.f32 %v12225_v54, %v11975_v1  ;;  %v14945_v1 = vld [vmem:[#allocation130_spill] sm:$0xff]  ;;  %v3178_v16 = vmul.f32 %v12268_v62, %v11983_v31  ;;  %v2472_v31 = vrot.slane %v11830_v58, %v10945_v55 }
 0x39e   : > { %3329 = vmax.xlane.f32.xlu1 %v3328_v39  ;;  %v14940_v39 = vld [vmem:[#allocation221_spill] sm:$0xff]  ;;  %v2454_v48 = vrot.slane %v14945_v1, %v10945_v55 }
 0x39f   : > { %v2961_v29 = vrot.slane %v14940_v39, %v10953_v17 }
 0x3a1   : > { %v2869_v43 = vpop.permute.xlu1 %2868  ;;  %v12246_v37 = vsel %vm1277_vm1, %v2961_v29, %v2957_v5  ;;  %v3346_v5 = vsel %vm360_vm0, %v12239_v52, -inf }
 0x3a2   : > { %3335 = vmax.xlane.f32.xlu1 %v3334_v35  ;;  %v14943_v35 = vld [vmem:[#allocation144_spill] sm:$0xff]  ;;  %v3176_v18 = vmul.f32 %v12246_v37, %v11977_v60  ;;  %v14949_v60 = vld [vmem:[#allocation85_spill] sm:$0xff] }
 0x3a3   : > { %v2662_v51 = vmul.f32 %v12233_v56, %v14943_v35  ;;  %v2664_v35 = vmul.f32 %v12255_v53, %v14947_v24  ;;  %v2463_v1 = vrot.slane %v14949_v60, %v10945_v55 }
 0x3a5   : > { %v2875_v39 = vpop.permute.xlu1 %2874  ;;  %v12261_v29 = vadd.f32 %v3174_v22, %v2662_v51  ;;  %v2979_v22 = vrot.slane %v14948_v27, %v10953_v17  ;;  %v12283_v36 = vadd.f32 %v3176_v18, %v2664_v35  ;;  %v14951_v27 = vld [vmem:[#allocation226_spill] sm:$0xff]  ;;  %v14952_v18 = vld [vmem:[#allocation225_spill] sm:$0xff] }
 0x3a6   : > { %3341 = vmax.xlane.f32.xlu1 %v3340_v46  ;;  %v2458_v46 = vrot.slane %v14946_v33, %v10953_v17  ;;  %v2988_v35 = vrot.slane %v14952_v18, %v10953_v17  ;;  %v14955_v18 = vld [vmem:[#allocation227_spill] sm:$0xff] }
 0x3a7   : > { %v3352_v63 = vsel %vm360_vm0, %v12261_v29, -inf  ;;  %v12290_v24 = vsel %vm1277_vm1, %v2979_v22, %v2975_v34  ;;  %v3358_v34 = vsel %vm360_vm0, %v12283_v36, -inf  ;;  %v2997_v15 = vrot.slane %v14955_v18, %v10953_v17  ;;  %v14959_v18 = vld [vmem:[#allocation229_spill] sm:$0xff] }
 0x3a8   : > { %v12277_v51 = vsel %vm1277_vm1, %v2458_v46, %v2454_v48  ;;  %v2984_v48 = vrot.slane %v12193_v59, %v10945_v55  ;;  %v3180_v59 = vmul.f32 %v12290_v24, %v11985_v21  ;;  %v2481_v21 = vrot.slane %v11855_v49, %v10945_v55 }
 0x3a9   : > { %v2881_v46 = vpop.permute.xlu1 %2880  ;;  %v2666_v60 = vmul.f32 %v12277_v51, %v14951_v27  ;;  %v3006_v57 = vrot.slane %v14959_v18, %v10953_v17  ;;  %v14963_v18 = vld [vmem:[#allocation231_spill] sm:$0xff] }
 0x3aa   : > { %3347 = vmax.xlane.f32.xlu1 %v3346_v5  ;;  %v14950_v5 = vld [vmem:[#allocation140_spill] sm:$0xff]  ;;  %v12312_v27 = vsel %vm1277_vm1, %v2988_v35, %v2984_v48 }
 0x3ab   : > { %v2467_v33 = vrot.slane %v14950_v5, %v10953_v17  ;;  %v12305_v22 = vadd.f32 %v3178_v16, %v2666_v60 }
 0x3ad   : > { %v12299_v8 = vsel %vm1277_vm1, %v2467_v33, %v2463_v1  ;;  %v2993_v1 = vrot.slane %v2869_v43, %v10945_v55  ;;  %v14954_v33 = vld [vmem:[#allocation228_spill] sm:$0xff]  ;;  %v2887_v60 = vpop.permute.xlu1 %2886  ;;  %v3364_v48 = vsel %vm360_vm0, %v12305_v22, -inf  ;;  %v3182_v43 = vmul.f32 %v12312_v27, %v11994_v13 }
 0x3ae   : > { %3353 = vmax.xlane.f32.xlu1 %v3352_v63  ;;  %v14953_v63 = vld [vmem:[#allocation143_spill] sm:$0xff]  ;;  %v2668_v58 = vmul.f32 %v12299_v8, %v14954_v33  ;;  %v2490_v13 = vrot.slane %v11880_v7, %v10945_v55 }
 0x3af   : > { %v2476_v5 = vrot.slane %v14953_v63, %v10953_v17  ;;  %v12333_v33 = vsel %vm1277_vm1, %v2997_v15, %v2993_v1  ;;  %v14961_v1 = vld [vmem:[#allocation148_spill] sm:$0xff] }
 0x3b0   : > { %v12326_v35 = vadd.f32 %v3180_v59, %v2668_v58 }
 0x3b1   : > { %v12320_v16 = vsel %vm1277_vm1, %v2476_v5, %v2472_v31  ;;  %v3002_v31 = vrot.slane %v2875_v39, %v10945_v55  ;;  %v14958_v5 = vld [vmem:[#allocation230_spill] sm:$0xff]  ;;  %v3184_v39 = vmul.f32 %v12333_v33, %v12006_v26  ;;  %v2499_v26 = vrot.slane %v11905_v0, %v10945_v55 }
 0x3b2   : > { %3359 = vmax.xlane.f32.xlu1 %v3358_v34  ;;  %14956 = vst [vmem:[#allocation111_spill] sm:$0xff] %v12326_v35  ;;  %v14957_v34 = vld [vmem:[#allocation146_spill] sm:$0xff]  ;;  %v2670_v49 = vmul.f32 %v12320_v16, %v14958_v5  ;;  %v3370_v58 = vsel %vm360_vm0, %v12326_v35, -inf  ;;  %v14962_v5 = vld [vmem:[#allocation232_spill] sm:$0xff] }
 0x3b3   : > { %v2485_v63 = vrot.slane %v14957_v34, %v10953_v17  ;;  %v12354_v34 = vsel %vm1277_vm1, %v3006_v57, %v3002_v31 }
 0x3b4   : > { %v12347_v15 = vadd.f32 %v3182_v43, %v2670_v49  ;;  %v3015_v43 = vrot.slane %v14963_v18, %v10953_v17  ;;  %v14967_v18 = vld [vmem:[#allocation233_spill] sm:$0xff] }
 0x3b5   : > { %v12341_v59 = vsel %vm1277_vm1, %v2485_v63, %v2481_v21  ;;  %v3011_v21 = vrot.slane %v2881_v46, %v10945_v55  ;;  %v2893_v63 = vpop.permute.xlu1 %2892  ;;  %v3186_v46 = vmul.f32 %v12354_v34, %v12017_v38  ;;  %v3024_v47 = vrot.slane %v14967_v18, %v10953_v17  ;;  %v14968_v38 = vld [vmem:[#allocation162_spill] sm:$0xff] }
 0x3b6   : > { %3365 = vmax.xlane.f32.xlu1 %v3364_v48  ;;  %14960 = vst [vmem:[#allocation173_spill] sm:$0xff] %v12347_v15  ;;  %v2494_v48 = vrot.slane %v14961_v1, %v10953_v17  ;;  %v2672_v7 = vmul.f32 %v12341_v59, %v14962_v5  ;;  %v3376_v57 = vsel %vm360_vm0, %v12347_v15, -inf }
 0x3b7   : > { %v12375_v5 = vsel %vm1277_vm1, %v3015_v43, %v3011_v21 }
 0x3b8   : > { %v12362_v49 = vsel %vm1277_vm1, %v2494_v48, %v2490_v13  ;;  %v12368_v31 = vadd.f32 %v3184_v39, %v2672_v7  ;;  %v3020_v13 = vrot.slane %v2887_v60, %v10945_v55  ;;  %v14966_v48 = vld [vmem:[#allocation234_spill] sm:$0xff]  ;;  %v2508_v7 = vrot.slane %v14968_v38, %v10945_v55  ;;  %v14972_v38 = vld [vmem:[#allocation235_spill] sm:$0xff] }
 0x3b9   : > { %v2674_v0 = vmul.f32 %v12362_v49, %v14966_v48  ;;  %v2899_v30 = vpop.permute.xlu1 %2898  ;;  %v3188_v60 = vmul.f32 %v12375_v5, %v12028_v41  ;;  %v3033_v14 = vrot.slane %v14972_v38, %v10953_v17  ;;  %v14973_v41 = vld [vmem:[#allocation93_spill] sm:$0xff]  ;;  %v14976_v38 = vld [vmem:[#allocation238_spill] sm:$0xff] }
 0x3ba   : > { %3371 = vmax.xlane.f32.xlu1 %v3370_v58  ;;  %14964 = vst [vmem:[#allocation114_spill] sm:$0xff] %v12368_v31  ;;  %v14965_v58 = vld [vmem:[#allocation149_spill] sm:$0xff]  ;;  %v3382_v21 = vsel %vm360_vm0, %v12368_v31, -inf  ;;  %v12396_v48 = vsel %vm1277_vm1, %v3024_v47, %v3020_v13  ;;  %v14975_v13 = vld [vmem:[#allocation154_spill] sm:$0xff] }
 0x3bb   : > { %v2503_v1 = vrot.slane %v14965_v58, %v10953_v17  ;;  %v12389_v43 = vadd.f32 %v3186_v46, %v2674_v0  ;;  %v2517_v0 = vrot.slane %v14973_v41, %v10945_v55 }
 0x3bd   : > { %v12383_v39 = vsel %vm1277_vm1, %v2503_v1, %v2499_v26  ;;  %14969 = vst [vmem:[#allocation175_spill] sm:$0xff] %v12389_v43  ;;  %v3029_v26 = vrot.slane %v2893_v63, %v10945_v55  ;;  %v14971_v1 = vld [vmem:[#allocation236_spill] sm:$0xff]  ;;  %v3190_v63 = vmul.f32 %v12396_v48, %v12039_v32  ;;  %v14978_v32 = vld [vmem:[#allocation171_spill] sm:$0xff] }
 0x3be   : > { %3377 = vmax.xlane.f32.xlu1 %v3376_v57  ;;  %v14970_v57 = vld [vmem:[#allocation151_spill] sm:$0xff]  ;;  %v2676_v18 = vmul.f32 %v12383_v39, %v14971_v1  ;;  %v2526_v4 = vrot.slane %v14978_v32, %v10945_v55 }
 0x3bf   : > { %v2512_v58 = vrot.slane %v14970_v57, %v10953_v17  ;;  %v3388_v57 = vsel %vm360_vm0, %v12389_v43, -inf  ;;  %v12417_v1 = vsel %vm1277_vm1, %v3033_v14, %v3029_v26 }
 0x3c0   : > { %v12410_v47 = vadd.f32 %v3188_v60, %v2676_v18  ;;  %v3042_v60 = vrot.slane %v14977_v25, %v10953_v17 }
 0x3c1   : > { %v12404_v46 = vsel %vm1277_vm1, %v2512_v58, %v2508_v7  ;;  %v3038_v7 = vrot.slane %v2899_v30, %v10945_v55  ;;  %v2905_v58 = vpop.permute.xlu1 %2904  ;;  %v3192_v30 = vmul.f32 %v12417_v1, %v12050_v45  ;;  %v14983_v45 = vld [vmem:[#allocation96_spill] sm:$0xff] }
 0x3c2   : > { %3383 = vmax.xlane.f32.xlu1 %v3382_v21  ;;  %14974 = vst [vmem:[#allocation116_spill] sm:$0xff] %v12410_v47  ;;  %v2521_v21 = vrot.slane %v14975_v13, %v10953_v17  ;;  %v2678_v41 = vmul.f32 %v12404_v46, %v14976_v38  ;;  %v3394_v14 = vsel %vm360_vm0, %v12410_v47, -inf  ;;  %v3047_v25 = vrot.slane %v2905_v58, %v10945_v55 }
 0x3c3   : > { %v12438_v38 = vsel %vm1277_vm1, %v3042_v60, %v3038_v7  ;;  %v2535_v6 = vrot.slane %v14983_v45, %v10945_v55 }
 0x3c4   : > { %v12425_v18 = vsel %vm1277_vm1, %v2521_v21, %v2517_v0  ;;  %v12431_v26 = vadd.f32 %v3190_v63, %v2678_v41  ;;  %v3234_v0 = vpop.xlane.xlu0 %3233  ;;  %v14981_v21 = vld [vmem:[#allocation240_spill] sm:$0xff]  ;;  %v3051_v63 = vrot.slane %v14982_v28, %v10953_v17  ;;  %v3194_v58 = vmul.f32 %v12438_v38, %v12061_v12 }
 0x3c5   : > { %v2680_v32 = vmul.f32 %v12425_v18, %v14981_v21  ;;  %v3460_v31 = vrot.slane %v3234_v0, %v10953_v17 }
 0x3c6   : > { %3389 = vmax.xlane.f32.xlu1 %v3388_v57  ;;  %14979 = vst [vmem:[#allocation177_spill] sm:$0xff] %v12431_v26  ;;  %v14980_v57 = vld [vmem:[#allocation156_spill] sm:$0xff]  ;;  %v3400_v7 = vsel %vm360_vm0, %v12431_v26, -inf  ;;  %v12459_v21 = vsel %vm1277_vm1, %v3051_v63, %v3047_v25 }
 0x3c7   : > { %v2530_v13 = vrot.slane %v14980_v57, %v10953_v17  ;;  %v12452_v60 = vadd.f32 %v3192_v30, %v2680_v32  ;;  %v3196_v12 = vmul.f32 %v12459_v21, %v12074_v10 }
 0x3c8   : > { %v3237_v45 = vpop.xlane.xlu0 %3236 }
 0x3c9   : > { %v12446_v41 = vsel %vm1277_vm1, %v2530_v13, %v2526_v4  ;;  %14984 = vst [vmem:[#allocation118_spill] sm:$0xff] %v12452_v60  ;;  %v14986_v4 = vld [vmem:[#allocation71_spill] sm:$0xff]  ;;  %v3406_v30 = vsel %vm360_vm0, %v12452_v60, -inf }
 0x3ca   : > { %3395 = vmax.xlane.f32.xlu1 %v3394_v14  ;;  %v14985_v14 = vld [vmem:[#allocation157_spill] sm:$0xff]  ;;  %v2682_v28 = vmul.f32 %v12446_v41, %v14986_v4 }
 0x3cb   : > { %v2539_v57 = vrot.slane %v14985_v14, %v10953_v17  ;;  %v14988_v14 = vld [vmem:[#allocation73_spill] sm:$0xff] }
 0x3cc   : > { %v12468_v32 = vadd.f32 %v3194_v58, %v2682_v28 }
 0x3cd   : > { %v12464_v13 = vsel %vm1277_vm1, %v2539_v57, %v2535_v6  ;;  %v3243_v6 = vpop.xlane.xlu0 %3242 }
 0x3ce   : > { %3401 = vmax.xlane.f32.xlu1 %v3400_v7  ;;  %14987 = vst [vmem:[#allocation179_spill] sm:$0xff] %v12468_v32  ;;  %v2684_v25 = vmul.f32 %v12464_v13, %v14988_v14  ;;  %v3412_v63 = vsel %vm360_vm0, %v12468_v32, -inf  ;;  %v3474_v26 = vrot.slane %v3243_v6, %v10945_v55 }
 0x3d0   : > { %v12476_v7 = vadd.f32 %v3196_v12, %v2684_v25 }
 0x3d1   : > { %v3249_v58 = vpop.xlane.xlu0 %3248 }
 0x3d2   : > { %3407 = vmax.xlane.f32.xlu1 %v3406_v30  ;;  %14989 = vst [vmem:[#allocation78_spill] sm:$0xff] %v12476_v7  ;;  %v3418_v57 = vsel %vm360_vm0, %v12476_v7, -inf  ;;  %v3465_v7 = vrot.slane %v3237_v45, %v10945_v55  ;;  %v3483_v15 = vrot.slane %v3249_v58, %v10945_v55 }
 0x3d5   : > { %v3255_v4 = vpop.xlane.xlu0 %3254 }
 0x3d6   : > { %3413 = vmax.xlane.f32.xlu1 %v3412_v63  ;;  %v3492_v45 = vrot.slane %v3255_v4, %v10945_v55 }
 0x3d9   : > { %v3261_v28 = vpop.xlane.xlu0 %3260 }
 0x3da   : > { %3419 = vmax.xlane.f32.xlu1 %v3418_v57  ;;  %v3501_v6 = vrot.slane %v3261_v28, %v10945_v55 }
 0x3dd   : > { %v3267_v10 = vpop.xlane.xlu0 %3266 }
 0x3de   : > { %v3510_v58 = vrot.slane %v3267_v10, %v10945_v55 }
 0x3e1   : > { %v3273_v50 = vpop.xlane.xlu0 %3272 }
 0x3e5   : > { %v12480_v19 = vpop.xlane.xlu0 %3278 }
 0x3e9   : > { %v3285_v47 = vpop.xlane.xlu0 %3284 }
 0x3eb   : > { %v3231_v3 = vpop.xlane.xlu1 %3230 }
 0x3ec   : > { %v3456_v57 = vrot.slane %v3231_v3, %v10945_v55 }
 0x3ee   : > { %v3461_v35 = vsel %vm1277_vm1, %v3460_v31, %v3456_v57 }
 0x3ef   : > { %v3240_v30 = vpop.xlane.xlu1 %3239 }
 0x3f0   : > { %v3469_v12 = vrot.slane %v3240_v30, %v10953_v17 }
 0x3f2   : > { %v3470_v30 = vsel %vm1277_vm1, %v3469_v12, %v3465_v7 }
 0x3f3   : > { %v3246_v2 = vpop.xlane.xlu1 %3245  ;;  %v3597_v7 = vsel %vm1414_vm4, %v3470_v30, %v3461_v35 }
 0x3f4   : > { %v3478_v25 = vrot.slane %v3246_v2, %v10953_v17 }
 0x3f6   : > { %v3479_v3 = vsel %vm1277_vm1, %v3478_v25, %v3474_v26  ;;  %v3291_v25 = vpop.xlane.xlu0 %3290 }
 0x3f7   : > { %v3252_v14 = vpop.xlane.xlu1 %3251  ;;  %v3598_v12 = vsel %vm1415_vm5, %v3479_v3, %v3597_v7 }
 0x3f8   : > { %v3487_v60 = vrot.slane %v3252_v14, %v10953_v17 }
 0x3fb   : > { %v3258_v32 = vpop.xlane.xlu1 %3257 }
 0x3fc   : > { %v3496_v43 = vrot.slane %v3258_v32, %v10953_v17  ;;  %v3488_v32 = vsel %vm1277_vm1, %v3487_v60, %v3483_v15  ;;  %v3519_v60 = vrot.slane %v3273_v50, %v10945_v55 }
 0x3fd   : > { %v3599_v28 = vsel %vm1417_vm6, %v3488_v32, %v3598_v12 }
 0x3fe   : > { %v3497_v4 = vsel %vm1277_vm1, %v3496_v43, %v3492_v45  ;;  %v3297_v45 = vpop.xlane.xlu0 %3296 }
 0x3ff   : > { %v3264_v63 = vpop.xlane.xlu1 %3263  ;;  %v3600_v10 = vsel %vm1419_vm7, %v3497_v4, %v3599_v28 }
 0x400   : > { %v3505_v2 = vrot.slane %v3264_v63, %v10953_v17 }
 0x402   : > { %v3506_v26 = vsel %vm1277_vm1, %v3505_v2, %v3501_v6 }
 0x403   : > { %v3270_v14 = vpop.xlane.xlu1 %3269  ;;  %v3601_v43 = vsel %vm1421_vm8, %v3506_v26, %v3600_v10  ;;  %v3537_v26 = vrot.slane %v3285_v47, %v10945_v55  ;;  %v3528_v10 = vrot.slane %v12480_v19, %v10945_v55 }
 0x404   : > { %v3514_v0 = vrot.slane %v3270_v14, %v10953_v17  ;;  %v3303_v14 = vpop.xlane.xlu0 %3302 }
 0x406   : > { %v3515_v31 = vsel %vm1277_vm1, %v3514_v0, %v3510_v58 }
 0x407   : > { %v3276_v15 = vpop.xlane.xlu1 %3275  ;;  %v3602_v57 = vsel %vm1423_vm9, %v3515_v31, %v3601_v43 }
 0x408   : > { %v3523_v35 = vrot.slane %v3276_v15, %v10953_v17  ;;  %v3309_v32 = vpop.xlane.xlu0 %3308  ;;  %v3546_v15 = vrot.slane %v3291_v25, %v10945_v55 }
 0x40a   : > { %v3524_v63 = vsel %vm1277_vm1, %v3523_v35, %v3519_v60  ;;  %v3555_v35 = vrot.slane %v3297_v45, %v10945_v55 }
 0x40b   : > { %v3282_v30 = vpop.xlane.xlu1 %3281  ;;  %v3603_v2 = vsel %vm1425_vm10, %v3524_v63, %v3602_v57  ;;  %v3564_v57 = vrot.slane %v3303_v14, %v10945_v55 }
 0x40c   : > { %3613 = vxpose.xlu0.b32.start [1/2] (short) (narrow) %v3603_v2, 16  ;;  %v3315_v7 = vpop.xlane.xlu0 %3314  ;;  %v3532_v28 = vrot.slane %v3282_v30, %v10953_v17  ;;  %v3573_v2 = vrot.slane %v3309_v32, %v10945_v55 }
 0x40d   : > { %v3582_v19 = vrot.slane %v3315_v7, %v10945_v55 }
 0x40e   : > { %v3533_v25 = vsel %vm1277_vm1, %v3532_v28, %v3528_v10 }
 0x40f   : > { %v3288_v3 = vpop.xlane.xlu1 %3287 }
 0x410   : > { %v3541_v58 = vrot.slane %v3288_v3, %v10953_v17  ;;  %v3321_v45 = vpop.xlane.xlu0 %3320 }
 0x412   : > { %v3542_v43 = vsel %vm1277_vm1, %v3541_v58, %v3537_v26  ;;  %v3591_v26 = vrot.slane %v3321_v45, %v10945_v55  ;;  %v15001_v45 = vld [vmem:[#allocation50_spill] sm:$0xff] }
 0x413   : > { %v3294_v6 = vpop.xlane.xlu1 %3293 }
 0x414   : > { %v3550_v4 = vrot.slane %v3294_v6, %v10953_v17 }
 0x416   : > { %v3551_v47 = vsel %vm1277_vm1, %v3550_v4, %v3546_v15 }
 0x417   : > { %v3300_v50 = vpop.xlane.xlu1 %3299 }
 0x418   : > { %v3559_v31 = vrot.slane %v3300_v50, %v10953_v17  ;;  %v3604_v50 = vsel %vm1414_vm4, %v3542_v43, %v3533_v25  ;;  %v14991_v43 = vld [vmem:[#allocation122_spill] sm:$0xff]  ;;  %v14997_v25 = vld [vmem:[#allocation139_spill] sm:$0xff] }
 0x419   : > { %v3605_v14 = vsel %vm1415_vm5, %v3551_v47, %v3604_v50  ;;  %v14994_v47 = vld [vmem:[#allocation131_spill] sm:$0xff]  ;;  %v15002_v50 = vld [vmem:[#allocation52_spill] sm:$0xff] }
 0x41a   : > { %v3560_v3 = vsel %vm1277_vm1, %v3559_v31, %v3555_v35  ;;  %v14990_v35 = vld [vmem:[#allocation120_spill] sm:$0xff] }
 0x41b   : > { %v3306_v0 = vpop.xlane.xlu1 %3305  ;;  %v3606_v4 = vsel %vm1417_vm6, %v3560_v3, %v3605_v14  ;;  %v14998_v3 = vld [vmem:[#allocation142_spill] sm:$0xff] }
 0x41c   : > { %v3568_v60 = vrot.slane %v3306_v0, %v10953_v17  ;;  %v15004_v14 = vld [vmem:[#allocation90_spill] sm:$0xff] }
 0x41e   : > { %v3569_v0 = vsel %vm1277_vm1, %v3568_v60, %v3564_v57  ;;  %v14993_v57 = vld [vmem:[#allocation128_spill] sm:$0xff] }
 0x41f   : > { %v3312_v12 = vpop.xlane.xlu1 %3311  ;;  %v3607_v28 = vsel %vm1419_vm7, %v3569_v0, %v3606_v4  ;;  %v15003_v0 = vld [vmem:[#allocation153_spill] sm:$0xff]  ;;  %v3325_v4 = vsel %vm360_vm0, %v12120_v40, -inf }
 0x420   : > { %v3577_v63 = vrot.slane %v3312_v12, %v10953_v17 }
 0x422   : > { %v3578_v58 = vsel %vm1277_vm1, %v3577_v63, %v3573_v2  ;;  %v14992_v63 = vld [vmem:[#allocation125_spill] sm:$0xff]  ;;  %v14996_v2 = vld [vmem:[#allocation136_spill] sm:$0xff] }
 0x423   : > { %v3318_v30 = vpop.xlane.xlu1 %3317  ;;  %v3608_v31 = vsel %vm1421_vm8, %v3578_v58, %v3607_v28  ;;  %v12560_v58 = vsub.s32 0, %v15004_v14  ;;  %v12568_v28 = vsub.s32 1, %v15004_v14 }
 0x424   : > { %v3586_v6 = vrot.slane %v3318_v30, %v10953_v17  ;;  %v14995_v30 = vld [vmem:[#allocation134_spill] sm:$0xff] }
 0x425   : > { %15005 = vst [vmem:[#allocation107_spill] sm:$0xff] %v12560_v58  ;;  %15006 = vst [vmem:[#allocation104_spill] sm:$0xff] %v12568_v28 }
 0x426   : > { %v3587_v32 = vsel %vm1277_vm1, %v3586_v6, %v3582_v19  ;;  %v14999_v6 = vld [vmem:[#allocation145_spill] sm:$0xff]  ;;  %v15000_v19 = vld [vmem:[#allocation47_spill] sm:$0xff] }
 0x427   : > { %v3324_v12 = vpop.xlane.xlu1 %3323  ;;  %v3609_v60 = vsel %vm1423_vm9, %v3587_v32, %v3608_v31  ;;  %v12572_v31 = vsub.s32 2, %v15004_v14 }
 0x428   : > { %v3595_v7 = vrot.slane %v3324_v12, %v10953_v17 }
 0x429   : > { %15007 = vst [vmem:[#allocation124_spill] sm:$0xff] %v12572_v31 }
 0x42a   : > { %v3596_v15 = vsel %vm1277_vm1, %v3595_v7, %v3591_v26  ;;  %v3331_v26 = vsel %vm360_vm0, %v12134_v9, -inf }
 0x42b   : > { %v3610_v10 = vsel %vm1425_vm10, %v3596_v15, %v3609_v60  ;;  %v12576_v60 = vsub.s32 3, %v15004_v14 }
 0x42c   : > { %3614 = vxpose.xlu0.b32.end [2/2] (short) (narrow) %v3610_v10, 16  ;;  %v12578_v10 = vpop.xlane.xlu1 %3329 }
 0x42d   : > { %15008 = vst [vmem:[#allocation101_spill] sm:$0xff] %v12576_v60 }
 0x455   : > { %2163 = vperm.xlu0 %9901, %v14990_v35  }
 0x459   : > { %2173 = vperm.xlu0 %9901, %v14991_v43   ;;  %v15012_v43 = vld [vmem:[#allocation182_spill] sm:$0xff] }
 0x45d   : > { %2183 = vperm.xlu0 %9901, %v14992_v63  }
 0x461   : > { %2193 = vperm.xlu0 %9901, %v14993_v57  }
 0x465   : > { %2203 = vperm.xlu0 %9901, %v14994_v47  }
 0x469   : > { %2213 = vperm.xlu0 %9901, %v14995_v30  }
 0x46d   : > { %2223 = vperm.xlu0 %9901, %v14996_v2  }
 0x471   : > { %2233 = vperm.xlu0 %9901, %v14997_v25   ;;  %v12601_v25 = vsub.s32 6, %v15004_v14 }
 0x473   : > { %15011 = vst [vmem:[#allocation138_spill] sm:$0xff] %v12601_v25 }
 0x475   : > { %2243 = vperm.xlu0 %9901, %v14998_v3  }
 0x479   : > { %2253 = vperm.xlu0 %9901, %v14999_v6  }
 0x47d   : > { %2263 = vperm.xlu0 %9901, %v15000_v19   ;;  %v3169_v19 = vmul.f32 %v12182_v23, %v15012_v43 }
 0x481   : > { %2273 = vperm.xlu0 %9901, %v15001_v45  }
 0x485   : > { %2283 = vperm.xlu0 %9901, %v15002_v50   ;;  %v12590_v50 = vsub.s32 5, %v15004_v14 }
 0x487   : > { %15010 = vst [vmem:[#allocation141_spill] sm:$0xff] %v12590_v50 }
 0x489   : > { %2293 = vperm.xlu0 %9901, %v15003_v0  }
 0x4a8   : > { %3326 = vmax.xlane.f32.xlu0 %v3325_v4  ;;  %v3629_v32 = vpop.trf.xlu0 }
 0x4a9   : > { %v3650_v12 = vrot.slane %v3629_v32, %v12560_v58  ;;  %v3661_v7 = vrot.slane %v3629_v32, %v12568_v28  ;;  %v3672_v15 = vrot.slane %v3629_v32, %v12572_v31  ;;  %v3683_v4 = vrot.slane %v3629_v32, %v12576_v60 }
 0x4aa   : > { %v3716_v57 = vrot.slane %v3629_v32, %v12601_v25 }
 0x4ab   : > { %3652 = vbcast.lane.b32.xlu1 %v3650_v12, 256 }
 0x4ac   : > { %3332 = vmax.xlane.f32.xlu0 %v3331_v26  ;;  %v12584_v26 = vpop.xlane.xlu1 %3335  ;;  %v12596_v45 = vpop.trf.xlu0 }
 0x4af   : > { %3656 = vbcast.lane.b32.xlu1 %v3650_v12, 264  ;;  %v12582_v12 = vsub.s32 4, %v15004_v14 }
 0x4b0   : > { %v12592_v0 = vpop.xlane.xlu1 %3341 }
 0x4b1   : > { %15009 = vst [vmem:[#allocation119_spill] sm:$0xff] %v12582_v12 }
 0x4b3   : > { %3663 = vbcast.lane.b32.xlu1 %v3661_v7, 256 }
 0x4b4   : > { %v12598_v6 = vpop.xlane.xlu1 %3347 }
 0x4b7   : > { %3667 = vbcast.lane.b32.xlu1 %v3661_v7, 264  ;;  %v12587_v7 = vrot.slane %v3629_v32, %v12582_v12 }
 0x4b8   : > { %v12607_v3 = vpop.xlane.xlu1 %3353 }
 0x4bb   : > { %3674 = vbcast.lane.b32.xlu1 %v3672_v15, 256 }
 0x4bf   : > { %3678 = vbcast.lane.b32.xlu1 %v3672_v15, 264  ;;  %v3705_v15 = vrot.slane %v3629_v32, %v12590_v50 }
 0x4c3   : > { %3685 = vbcast.lane.b32.xlu1 %v3683_v4, 256 }
 0x4c7   : > { %3689 = vbcast.lane.b32.xlu1 %v3683_v4, 264 }
 0x4cb   : > { %3696 = vbcast.lane.b32.xlu1 %v12587_v7, 256 }
 0x4cf   : > { %3707 = vbcast.lane.b32.xlu1 %v3705_v15, 256 }
 0x4d3   : > { %3711 = vbcast.lane.b32.xlu1 %v3705_v15, 264  ;;  %v15013_v15 = vld [vmem:[#allocation184_spill] sm:$0xff] }
 0x4d4   : > { %v2164_v4 = vpop.permute.xlu0 %2163  ;;  %v3171_v9 = vmul.f32 %v12204_v44, %v15013_v15 }
 0x4d5   : > { %v2657_v30 = vmul.f32 %v12189_v20, %v2164_v4  ;;  %v12617_v20 = vsub.s32 7, %v15004_v14  ;;  %v12621_v4 = vpop.xlane.xlu1 %3359 }
 0x4d7   : > { %3718 = vbcast.lane.b32.xlu1 %v3716_v57, 256  ;;  %v12609_v2 = vadd.f32 %v3169_v19, %v2657_v30  ;;  %15014 = vst [vmem:[#allocation155_spill] sm:$0xff] %v12617_v20  ;;  %v15015_v19 = vld [vmem:[#allocation186_spill] sm:$0xff] }
 0x4d8   : > { %v2174_v47 = vpop.permute.xlu0 %2173  ;;  %v3173_v44 = vmul.f32 %v12225_v54, %v15015_v19 }
 0x4d9   : > { %v2659_v63 = vmul.f32 %v12212_v61, %v2174_v47  ;;  %v3337_v35 = vsel %vm360_vm0, %v12609_v2, -inf  ;;  %v3727_v47 = vrot.slane %v3629_v32, %v12617_v20  ;;  %v12636_v15 = vpop.xlane.xlu1 %3365 }
 0x4da   : > { %3338 = vmax.xlane.f32.xlu0 %v3337_v35 }
 0x4db   : > { %3722 = vbcast.lane.b32.xlu1 %v3716_v57, 264  ;;  %v12619_v23 = vadd.f32 %v3171_v9, %v2659_v63  ;;  %v15016_v57 = vld [vmem:[#allocation188_spill] sm:$0xff] }
 0x4dc   : > { %v2184_v43 = vpop.permute.xlu0 %2183 }
 0x4dd   : > { %v2661_v30 = vmul.f32 %v12233_v56, %v2184_v43  ;;  %v3343_v61 = vsel %vm360_vm0, %v12619_v23, -inf  ;;  %v3175_v56 = vmul.f32 %v12246_v37, %v15016_v57 }
 0x4de   : > { %3344 = vmax.xlane.f32.xlu0 %v3343_v61  ;;  %v15017_v61 = vld [vmem:[#allocation190_spill] sm:$0xff] }
 0x4df   : > { %3729 = vbcast.lane.b32.xlu1 %v3727_v47, 256  ;;  %v12629_v14 = vadd.f32 %v3173_v44, %v2661_v30  ;;  %v3177_v19 = vmul.f32 %v12268_v62, %v15017_v61 }
 0x4e0   : > { %v2194_v35 = vpop.permute.xlu0 %2193 }
 0x4e1   : > { %v2663_v9 = vmul.f32 %v12255_v53, %v2194_v35  ;;  %v3349_v63 = vsel %vm360_vm0, %v12629_v14, -inf  ;;  %v3738_v53 = vrot.slane %v12596_v45, %v12560_v58 }
 0x4e2   : > { %3350 = vmax.xlane.f32.xlu0 %v3349_v63 }
 0x4e3   : > { %3733 = vbcast.lane.b32.xlu1 %v3727_v47, 264  ;;  %v12638_v32 = vadd.f32 %v3175_v56, %v2663_v9  ;;  %v12649_v47 = vpop.xlane.xlu1 %3371  ;;  %v15018_v9 = vld [vmem:[#allocation191_spill] sm:$0xff] }
 0x4e4   : > { %v2204_v54 = vpop.permute.xlu0 %2203  ;;  %v3179_v63 = vmul.f32 %v12290_v24, %v15018_v9 }
 0x4e5   : > { %v2665_v43 = vmul.f32 %v12277_v51, %v2204_v54  ;;  %v3355_v30 = vsel %vm360_vm0, %v12638_v32, -inf }
 0x4e6   : > { %3356 = vmax.xlane.f32.xlu0 %v3355_v30 }
 0x4e7   : > { %3740 = vbcast.lane.b32.xlu1 %v3738_v53, 256  ;;  %v12647_v37 = vadd.f32 %v3177_v19, %v2665_v43  ;;  %v3749_v43 = vrot.slane %v12596_v45, %v12568_v28  ;;  %v12665_v61 = vpop.xlane.xlu1 %3377 }
 0x4e8   : > { %v2214_v44 = vpop.permute.xlu0 %2213 }
 0x4e9   : > { %v2667_v35 = vmul.f32 %v12299_v8, %v2214_v44  ;;  %v3361_v51 = vsel %vm360_vm0, %v12647_v37, -inf  ;;  %v15020_v8 = vld [vmem:[#allocation193_spill] sm:$0xff]  ;;  %v15022_v44 = vld [vmem:[#allocation195_spill] sm:$0xff] }
 0x4ea   : > { %3362 = vmax.xlane.f32.xlu0 %v3361_v51  ;;  %v3181_v30 = vmul.f32 %v12312_v27, %v15020_v8 }
 0x4eb   : > { %3744 = vbcast.lane.b32.xlu1 %v3738_v53, 264  ;;  %v12656_v57 = vadd.f32 %v3179_v63, %v2667_v35  ;;  %v3183_v35 = vmul.f32 %v12333_v33, %v15022_v44  ;;  %v12676_v9 = vpop.xlane.xlu1 %3383 }
 0x4ec   : > { %v2224_v62 = vpop.permute.xlu0 %2223 }
 0x4ed   : > { %15019 = vst [vmem:[#allocation152_spill] sm:$0xff] %v12656_v57  ;;  %v2669_v56 = vmul.f32 %v12320_v16, %v2224_v62  ;;  %v3367_v54 = vsel %vm360_vm0, %v12656_v57, -inf }
 0x4ee   : > { %3368 = vmax.xlane.f32.xlu0 %v3367_v54 }
 0x4ef   : > { %3751 = vbcast.lane.b32.xlu1 %v3749_v43, 256  ;;  %v12667_v24 = vadd.f32 %v3181_v30, %v2669_v56  ;;  %v15024_v56 = vld [vmem:[#allocation197_spill] sm:$0xff] }
 0x4f0   : > { %v2234_v53 = vpop.permute.xlu0 %2233  ;;  %v3185_v54 = vmul.f32 %v12354_v34, %v15024_v56 }
 0x4f1   : > { %15021 = vst [vmem:[#allocation159_spill] sm:$0xff] %v12667_v24  ;;  %v2671_v19 = vmul.f32 %v12341_v59, %v2234_v53  ;;  %v3373_v16 = vsel %vm360_vm0, %v12667_v24, -inf  ;;  %v3760_v59 = vrot.slane %v12596_v45, %v12572_v31  ;;  %v15026_v53 = vld [vmem:[#allocation199_spill] sm:$0xff] }
 0x4f2   : > { %3374 = vmax.xlane.f32.xlu0 %v3373_v16  ;;  %v12694_v16 = vpop.xlane.xlu1 %3389 }
 0x4f3   : > { %3755 = vbcast.lane.b32.xlu1 %v3749_v43, 264  ;;  %v12674_v51 = vadd.f32 %v3183_v35, %v2671_v19  ;;  %v3187_v19 = vmul.f32 %v12375_v5, %v15026_v53 }
 0x4f4   : > { %v2244_v27 = vpop.permute.xlu0 %2243 }
 0x4f5   : > { %15023 = vst [vmem:[#allocation158_spill] sm:$0xff] %v12674_v51  ;;  %v2673_v63 = vmul.f32 %v12362_v49, %v2244_v27  ;;  %v3379_v62 = vsel %vm360_vm0, %v12674_v51, -inf  ;;  %v3771_v49 = vrot.slane %v12596_v45, %v12576_v60  ;;  %v3782_v27 = vrot.slane %v12596_v45, %v12582_v12 }
 0x4f6   : > { %3380 = vmax.xlane.f32.xlu0 %v3379_v62 }
 0x4f7   : > { %3766 = vbcast.lane.b32.xlu1 %v3760_v59, 264  ;;  %v12685_v33 = vadd.f32 %v3185_v54, %v2673_v63  ;;  %v15028_v63 = vld [vmem:[#allocation200_spill] sm:$0xff]  ;;  %v12707_v54 = vpop.xlane.xlu1 %3395 }
 0x4f8   : > { %v2254_v43 = vpop.permute.xlu0 %2253  ;;  %v3189_v62 = vmul.f32 %v12396_v48, %v15028_v63 }
 0x4f9   : > { %15025 = vst [vmem:[#allocation167_spill] sm:$0xff] %v12685_v33  ;;  %v2675_v8 = vmul.f32 %v12383_v39, %v2254_v43  ;;  %v3385_v30 = vsel %vm360_vm0, %v12685_v33, -inf }
 0x4fa   : > { %3386 = vmax.xlane.f32.xlu0 %v3385_v30  ;;  %v15030_v30 = vld [vmem:[#allocation202_spill] sm:$0xff] }
 0x4fb   : > { %3777 = vbcast.lane.b32.xlu1 %v3771_v49, 264  ;;  %v12696_v34 = vadd.f32 %v3187_v19, %v2675_v8  ;;  %v3793_v8 = vrot.slane %v12596_v45, %v12590_v50  ;;  %v3191_v53 = vmul.f32 %v12417_v1, %v15030_v30  ;;  %v15034_v30 = vld [vmem:[#allocation206_spill] sm:$0xff] }
 0x4fc   : > { %v2264_v44 = vpop.permute.xlu0 %2263 }
 0x4fd   : > { %15027 = vst [vmem:[#allocation165_spill] sm:$0xff] %v12696_v34  ;;  %v2677_v35 = vmul.f32 %v12404_v46, %v2264_v44  ;;  %v3391_v39 = vsel %vm360_vm0, %v12696_v34, -inf }
 0x4fe   : > { %3392 = vmax.xlane.f32.xlu0 %v3391_v39  ;;  %v15032_v39 = vld [vmem:[#allocation204_spill] sm:$0xff] }
 0x4ff   : > { %3788 = vbcast.lane.b32.xlu1 %v3782_v27, 264  ;;  %v12705_v5 = vadd.f32 %v3189_v62, %v2677_v35  ;;  %v3193_v63 = vmul.f32 %v12438_v38, %v15032_v39  ;;  %v12725_v62 = vpop.xlane.xlu1 %3401 }
 0x500   : > { %v2274_v56 = vpop.permute.xlu0 %2273 }
 0x501   : > { %15029 = vst [vmem:[#allocation176_spill] sm:$0xff] %v12705_v5  ;;  %v2679_v43 = vmul.f32 %v12425_v18, %v2274_v56  ;;  %v3397_v46 = vsel %vm360_vm0, %v12705_v5, -inf  ;;  %v3804_v18 = vrot.slane %v12596_v45, %v12601_v25 }
 0x502   : > { %3398 = vmax.xlane.f32.xlu0 %v3397_v46  ;;  %v3815_v46 = vrot.slane %v12596_v45, %v12617_v20 }
 0x503   : > { %3799 = vbcast.lane.b32.xlu1 %v3793_v8, 264  ;;  %v12716_v48 = vadd.f32 %v3191_v53, %v2679_v43  ;;  %v3195_v53 = vmul.f32 %v12459_v21, %v15034_v30 }
 0x504   : > { %v2284_v19 = vpop.permute.xlu0 %2283 }
 0x505   : > { %15031 = vst [vmem:[#allocation174_spill] sm:$0xff] %v12716_v48  ;;  %v2681_v44 = vmul.f32 %v12446_v41, %v2284_v19  ;;  %v3403_v35 = vsel %vm360_vm0, %v12716_v48, -inf  ;;  %v12738_v19 = vpop.xlane.xlu1 %3407 }
 0x506   : > { %3404 = vmax.xlane.f32.xlu0 %v3403_v35 }
 0x507   : > { %3810 = vbcast.lane.b32.xlu1 %v3804_v18, 264  ;;  %v12727_v1 = vadd.f32 %v3193_v63, %v2681_v44 }
 0x508   : > { %v2294_v56 = vpop.permute.xlu0 %2293 }
 0x509   : > { %15033 = vst [vmem:[#allocation185_spill] sm:$0xff] %v12727_v1  ;;  %v2683_v43 = vmul.f32 %v12464_v13, %v2294_v56  ;;  %v3409_v41 = vsel %vm360_vm0, %v12727_v1, -inf  ;;  %v12742_v13 = vpop.xlane.xlu1 %3413 }
 0x50a   : > { %3410 = vmax.xlane.f32.xlu0 %v3409_v41 }
 0x50b   : > { %3821 = vbcast.lane.b32.xlu1 %v3815_v46, 264  ;;  %v12736_v38 = vadd.f32 %v3195_v53, %v2683_v43 }
 0x50d   : > { %15035 = vst [vmem:[#allocation183_spill] sm:$0xff] %v12736_v38  ;;  %v3415_v44 = vsel %vm360_vm0, %v12736_v38, -inf  ;;  %v12744_v35 = vpop.xlane.xlu1 %3419 }
 0x50e   : > { %3416 = vmax.xlane.f32.xlu0 %v3415_v44 }
 0x51d   : > { %v3653_v39 = vpop.permute.xlu1 %3652 }
 0x521   : > { %v3657_v63 = vpop.permute.xlu1 %3656 }
 0x522   : > { %v3856_v45 = vmax.f32 %v12578_v10, %v3657_v63 }
 0x524   : > { %3700 = vbcast.lane.b32.xlu0 %v12587_v7, 264  ;;  %3923 = vperm.xlu1 %9902, %v3856_v45  }
 0x525   : > { %v3664_v21 = vpop.permute.xlu1 %3663 }
 0x528   : > { %3762 = vbcast.lane.b32.xlu0 %v3760_v59, 256 }
 0x529   : > { %v3668_v56 = vpop.permute.xlu1 %3667 }
 0x52a   : > { %v3858_v7 = vmax.f32 %v12584_v26, %v3668_v56 }
 0x52c   : > { %3773 = vbcast.lane.b32.xlu0 %v3771_v49, 256 }
 0x52d   : > { %v3675_v43 = vpop.permute.xlu1 %3674 }
 0x530   : > { %3784 = vbcast.lane.b32.xlu0 %v3782_v27, 256 }
 0x531   : > { %v3679_v44 = vpop.permute.xlu1 %3678 }
 0x532   : > { %v3860_v59 = vmax.f32 %v12592_v0, %v3679_v44 }
 0x534   : > { %3795 = vbcast.lane.b32.xlu0 %v3793_v8, 256 }
 0x535   : > { %v3327_v41 = vpop.xlane.xlu0 %3326  ;;  %v3686_v10 = vpop.permute.xlu1 %3685 }
 0x536   : > { %v3855_v38 = vmax.f32 %v3327_v41, %v3653_v39 }
 0x538   : > { %3806 = vbcast.lane.b32.xlu0 %v3804_v18, 256 }
 0x539   : > { %v3333_v30 = vpop.xlane.xlu0 %3332  ;;  %v3690_v49 = vpop.permute.xlu1 %3689 }
 0x53a   : > { %v3857_v53 = vmax.f32 %v3333_v30, %v3664_v21  ;;  %v3862_v27 = vmax.f32 %v12598_v6, %v3690_v49 }
 0x53c   : > { %3817 = vbcast.lane.b32.xlu0 %v3815_v46, 256  ;;  %3926 = vperm.xlu1 %9902, %v3857_v53  }
 0x53d   : > { %v3697_v8 = vpop.permute.xlu1 %3696 }
 0x540   : > { %3920 = vperm.xlu0 %9901, %v3855_v38  }
 0x541   : > { %v3708_v18 = vpop.permute.xlu1 %3707 }
 0x544   : > { %3929 = vperm.xlu0 %9901, %v3858_v7  }
 0x545   : > { %v3712_v63 = vpop.permute.xlu1 %3711 }
 0x548   : > { %3935 = vperm.xlu0 %9901, %v3860_v59  }
 0x549   : > { %v3719_v45 = vpop.permute.xlu1 %3718 }
 0x54c   : > { %3941 = vperm.xlu0 %9901, %v3862_v27  }
 0x54d   : > { %v3723_v21 = vpop.permute.xlu1 %3722 }
 0x551   : > { %v3730_v38 = vpop.permute.xlu1 %3729 }
 0x555   : > { %v3734_v0 = vpop.permute.xlu1 %3733 }
 0x559   : > { %v3741_v6 = vpop.permute.xlu1 %3740 }
 0x55d   : > { %v3745_v1 = vpop.permute.xlu1 %3744 }
 0x567   : > { %v3339_v46 = vpop.xlane.xlu0 %3338 }
 0x568   : > { %v3859_v30 = vmax.f32 %v3339_v46, %v3675_v43 }
 0x56a   : > { %3932 = vperm.xlu1 %9902, %v3859_v30  }
 0x56b   : > { %v3345_v39 = vpop.xlane.xlu0 %3344 }
 0x56c   : > { %v3861_v41 = vmax.f32 %v3345_v39, %v3686_v10  ;;  %v3752_v10 = vpop.permute.xlu1 %3751 }
 0x56e   : > { %3938 = vperm.xlu1 %9902, %v3861_v41  }
 0x56f   : > { %v3351_v26 = vpop.xlane.xlu0 %3350 }
 0x570   : > { %v3863_v56 = vmax.f32 %v3351_v26, %v3697_v8 }
 0x572   : > { %3944 = vperm.xlu1 %9902, %v3863_v56  }
 0x573   : > { %v3357_v53 = vpop.xlane.xlu0 %3356 }
 0x574   : > { %v3865_v44 = vmax.f32 %v3357_v53, %v3708_v18 }
 0x576   : > { %3950 = vperm.xlu1 %9902, %v3865_v44  }
 0x577   : > { %v3363_v7 = vpop.xlane.xlu0 %3362 }
 0x578   : > { %v3867_v59 = vmax.f32 %v3363_v7, %v3719_v45  ;;  %v3866_v7 = vmax.f32 %v12621_v4, %v3712_v63  ;;  %v3872_v4 = vmax.f32 %v12665_v61, %v3745_v1 }
 0x57a   : > { %3956 = vperm.xlu1 %9902, %v3867_v59  }
 0x57b   : > { %v3369_v49 = vpop.xlane.xlu0 %3368 }
 0x57c   : > { %v3869_v27 = vmax.f32 %v3369_v49, %v3730_v38 }
 0x57e   : > { %3962 = vperm.xlu1 %9902, %v3869_v27   ;;  %v3868_v27 = vmax.f32 %v12636_v15, %v3723_v21 }
 0x57f   : > { %v3375_v43 = vpop.xlane.xlu0 %3374 }
 0x580   : > { %v3871_v46 = vmax.f32 %v3375_v43, %v3741_v6  ;;  %v3756_v6 = vpop.permute.xlu1 %3755 }
 0x581   : > { %v3874_v15 = vmax.f32 %v12676_v9, %v3756_v6 }
 0x582   : > { %3968 = vperm.xlu1 %9902, %v3871_v46  }
 0x583   : > { %v3381_v30 = vpop.xlane.xlu0 %3380 }
 0x584   : > { %v3873_v39 = vmax.f32 %v3381_v30, %v3752_v10  ;;  %v3767_v46 = vpop.permute.xlu1 %3766  ;;  %v3870_v30 = vmax.f32 %v12649_v47, %v3734_v0 }
 0x585   : > { %v3876_v47 = vmax.f32 %v12694_v16, %v3767_v46 }
 0x586   : > { %3974 = vperm.xlu1 %9902, %v3873_v39  }
 0x587   : > { %v3387_v8 = vpop.xlane.xlu0 %3386 }
 0x58b   : > { %v3393_v41 = vpop.xlane.xlu0 %3392 }
 0x58f   : > { %v3399_v26 = vpop.xlane.xlu0 %3398 }
 0x593   : > { %v3405_v18 = vpop.xlane.xlu0 %3404 }
 0x597   : > { %v3411_v56 = vpop.xlane.xlu0 %3410 }
 0x59b   : > { %v3417_v53 = vpop.xlane.xlu0 %3416 }
 0x59f   : > { %v3701_v44 = vpop.permute.xlu0 %3700 }
 0x5a0   : > { %v3864_v45 = vmax.f32 %v12607_v3, %v3701_v44 }
 0x5a2   : > { %3947 = vperm.xlu0 %9901, %v3864_v45  }
 0x5a3   : > { %v3763_v38 = vpop.permute.xlu0 %3762 }
 0x5a4   : > { %v3875_v59 = vmax.f32 %v3387_v8, %v3763_v38  ;;  %v3778_v8 = vpop.permute.xlu1 %3777 }
 0x5a6   : > { %3953 = vperm.xlu0 %9901, %v3866_v7   ;;  %3980 = vperm.xlu1 %9902, %v3875_v59  }
 0x5a7   : > { %v3774_v49 = vpop.permute.xlu0 %3773 }
 0x5a8   : > { %v3877_v43 = vmax.f32 %v3393_v41, %v3774_v49  ;;  %v3789_v41 = vpop.permute.xlu1 %3788 }
 0x5a9   : > { %v3880_v1 = vmax.f32 %v12725_v62, %v3789_v41 }
 0x5aa   : > { %3959 = vperm.xlu0 %9901, %v3868_v27   ;;  %3986 = vperm.xlu1 %9902, %v3877_v43  }
 0x5ab   : > { %v3785_v10 = vpop.permute.xlu0 %3784 }
 0x5ac   : > { %v3879_v39 = vmax.f32 %v3399_v26, %v3785_v10  ;;  %v3878_v26 = vmax.f32 %v12707_v54, %v3778_v8  ;;  %v3800_v61 = vpop.permute.xlu1 %3799 }
 0x5ad   : > { %v3882_v9 = vmax.f32 %v12738_v19, %v3800_v61 }
 0x5ae   : > { %3965 = vperm.xlu0 %9901, %v3870_v30   ;;  %3992 = vperm.xlu1 %9902, %v3879_v39  }
 0x5af   : > { %v3796_v3 = vpop.permute.xlu0 %3795 }
 0x5b0   : > { %v3881_v63 = vmax.f32 %v3405_v18, %v3796_v3  ;;  %v3811_v18 = vpop.permute.xlu1 %3810 }
 0x5b2   : > { %3971 = vperm.xlu0 %9901, %v3872_v4   ;;  %3998 = vperm.xlu1 %9902, %v3881_v63  }
 0x5b3   : > { %v3807_v44 = vpop.permute.xlu0 %3806 }
 0x5b4   : > { %v3883_v21 = vmax.f32 %v3411_v56, %v3807_v44  ;;  %v3884_v56 = vmax.f32 %v12742_v13, %v3811_v18  ;;  %v3822_v38 = vpop.permute.xlu1 %3821 }
 0x5b5   : > { %v3886_v16 = vmax.f32 %v12744_v35, %v3822_v38 }
 0x5b6   : > { %4004 = vperm.xlu1 %9902, %v3883_v21   ;;  %3977 = vperm.xlu0 %9901, %v3874_v15  }
 0x5b7   : > { %v3818_v45 = vpop.permute.xlu0 %3817 }
 0x5b8   : > { %v3885_v0 = vmax.f32 %v3417_v53, %v3818_v45  ;;  %v12763_v53 = vpop.permute.xlu1 %3923 }
 0x5b9   : > { %v4022_v21 = vrot.slane %v12763_v53, %v10953_v17 }
 0x5ba   : > { %4010 = vperm.xlu1 %9902, %v3885_v0   ;;  %3983 = vperm.xlu0 %9901, %v3876_v47  }
 0x5bc   : > { %v12765_v7 = vpop.permute.xlu1 %3926 }
 0x5bd   : > { %v4027_v4 = vrot.slane %v12765_v7, %v10945_v55 }
 0x5be   : > { %3989 = vperm.xlu0 %9901, %v3878_v26  }
 0x5bf   : > { %v12771_v62 = vpop.permute.xlu0 %3920 }
 0x5c0   : > { %v4018_v63 = vrot.slane %v12771_v62, %v10945_v55 }
 0x5c2   : > { %3995 = vperm.xlu0 %9901, %v3880_v1   ;;  %v4023_v18 = vsel %vm1277_vm1, %v4022_v21, %v4018_v63 }
 0x5c3   : > { %v12775_v19 = vpop.permute.xlu0 %3929 }
 0x5c4   : > { %v4031_v30 = vrot.slane %v12775_v19, %v10953_v17 }
 0x5c6   : > { %4001 = vperm.xlu0 %9901, %v3882_v9   ;;  %v4032_v41 = vsel %vm1277_vm1, %v4031_v30, %v4027_v4 }
 0x5c7   : > { %v12779_v49 = vpop.permute.xlu0 %3935 }
 0x5c8   : > { %v4040_v44 = vrot.slane %v12779_v49, %v10953_v17 }
 0x5ca   : > { %4007 = vperm.xlu0 %9901, %v3884_v56  }
 0x5cb   : > { %v12783_v27 = vpop.permute.xlu0 %3941 }
 0x5cc   : > { %v4049_v45 = vrot.slane %v12783_v27, %v10953_v17 }
 0x5ce   : > { %4013 = vperm.xlu0 %9901, %v3886_v16   ;;  %v4159_v16 = vsel %vm1414_vm4, %v4032_v41, %v4023_v18 }
 0x5e9   : > { %v12767_v54 = vpop.permute.xlu1 %3932 }
 0x5ea   : > { %v4036_v39 = vrot.slane %v12767_v54, %v10945_v55 }
 0x5ec   : > { %v4041_v0 = vsel %vm1277_vm1, %v4040_v44, %v4036_v39 }
 0x5ed   : > { %v12769_v59 = vpop.permute.xlu1 %3938  ;;  %v4160_v4 = vsel %vm1415_vm5, %v4041_v0, %v4159_v16 }
 0x5ee   : > { %v4045_v8 = vrot.slane %v12769_v59, %v10945_v55 }
 0x5f0   : > { %v4050_v9 = vsel %vm1277_vm1, %v4049_v45, %v4045_v8 }
 0x5f1   : > { %v12773_v6 = vpop.permute.xlu1 %3944  ;;  %v4161_v63 = vsel %vm1417_vm6, %v4050_v9, %v4160_v4 }
 0x5f2   : > { %v4054_v26 = vrot.slane %v12773_v6, %v10945_v55 }
 0x5f5   : > { %v12777_v13 = vpop.permute.xlu1 %3950 }
 0x5f6   : > { %v4063_v56 = vrot.slane %v12777_v13, %v10945_v55 }
 0x5f9   : > { %v12781_v35 = vpop.permute.xlu1 %3956 }
 0x5fa   : > { %v4072_v30 = vrot.slane %v12781_v35, %v10945_v55 }
 0x5fd   : > { %v12785_v43 = vpop.permute.xlu1 %3962 }
 0x5fe   : > { %15036 = vst [vmem:[#allocation194_spill] sm:$0xff] %v12785_v43  ;;  %v4081_v41 = vrot.slane %v12785_v43, %v10945_v55 }
 0x601   : > { %v12789_v10 = vpop.permute.xlu1 %3968 }
 0x602   : > { %15037 = vst [vmem:[#allocation192_spill] sm:$0xff] %v12789_v10  ;;  %v4090_v5 = vrot.slane %v12789_v10, %v10945_v55 }
 0x605   : > { %v12817_v61 = vpop.permute.xlu1 %3974 }
 0x606   : > { %15038 = vst [vmem:[#allocation121_spill] sm:$0xff] %v12817_v61 }
 0x621   : > { %v12787_v46 = vpop.permute.xlu0 %3947 }
 0x622   : > { %v4058_v15 = vrot.slane %v12787_v46, %v10953_v17 }
 0x624   : > { %v4059_v39 = vsel %vm1277_vm1, %v4058_v15, %v4054_v26 }
 0x625   : > { %v12795_v3 = vpop.permute.xlu0 %3953  ;;  %v12834_v8 = vpop.permute.xlu1 %3980  ;;  %v4162_v15 = vsel %vm1419_vm7, %v4059_v39, %v4161_v63 }
 0x626   : > { %v4067_v47 = vrot.slane %v12795_v3, %v10953_v17  ;;  %15039 = vst [vmem:[#allocation203_spill] sm:$0xff] %v12834_v8 }
 0x628   : > { %v4068_v44 = vsel %vm1277_vm1, %v4067_v47, %v4063_v56 }
 0x629   : > { %v12819_v1 = vpop.permute.xlu0 %3959  ;;  %v4163_v0 = vsel %vm1421_vm8, %v4068_v44, %v4162_v15 }
 0x62a   : > { %v4076_v38 = vrot.slane %v12819_v1, %v10953_v17 }
 0x62c   : > { %v4077_v45 = vsel %vm1277_vm1, %v4076_v38, %v4072_v30  ;;  %v12850_v38 = vpop.permute.xlu1 %3986 }
 0x62d   : > { %v12836_v21 = vpop.permute.xlu0 %3965  ;;  %v4164_v26 = vsel %vm1423_vm9, %v4077_v45, %v4163_v0  ;;  %15040 = vst [vmem:[#allocation201_spill] sm:$0xff] %v12850_v38  ;;  %v4099_v0 = vrot.slane %v12817_v61, %v10945_v55  ;;  %v4117_v34 = vrot.slane %v12850_v38, %v10945_v55 }
 0x62e   : > { %v4085_v18 = vrot.slane %v12836_v21, %v10953_v17 }
 0x630   : > { %v4086_v47 = vsel %vm1277_vm1, %v4085_v18, %v4081_v41  ;;  %v12854_v30 = vpop.permute.xlu1 %3992 }
 0x631   : > { %v12847_v9 = vpop.permute.xlu0 %3971  ;;  %v4165_v56 = vsel %vm1425_vm10, %v4086_v47, %v4164_v26  ;;  %15041 = vst [vmem:[#allocation215_spill] sm:$0xff] %v12854_v30  ;;  %v4126_v61 = vrot.slane %v12854_v30, %v10945_v55 }
 0x632   : > { %4175 = vxpose.xlu1.b32.start [1/2] (short) (narrow) %v4165_v56, 16  ;;  %v4094_v47 = vrot.slane %v12847_v9, %v10953_v17  ;;  %v4108_v56 = vrot.slane %v12834_v8, %v10945_v55 }
 0x634   : > { %v12860_v44 = vpop.permute.xlu1 %3998  ;;  %v4095_v57 = vsel %vm1277_vm1, %v4094_v47, %v4090_v5 }
 0x635   : > { %v12852_v16 = vpop.permute.xlu0 %3977  ;;  %15042 = vst [vmem:[#allocation123_spill] sm:$0xff] %v12860_v44  ;;  %v4135_v10 = vrot.slane %v12860_v44, %v10945_v55 }
 0x636   : > { %v4103_v45 = vrot.slane %v12852_v16, %v10953_v17 }
 0x638   : > { %v12866_v41 = vpop.permute.xlu1 %4004  ;;  %v4104_v33 = vsel %vm1277_vm1, %v4103_v45, %v4099_v0 }
 0x639   : > { %v12856_v4 = vpop.permute.xlu0 %3983  ;;  %v4166_v0 = vsel %vm1414_vm4, %v4104_v33, %v4095_v57  ;;  %v4144_v38 = vrot.slane %v12866_v41, %v10945_v55 }
 0x63a   : > { %v4112_v18 = vrot.slane %v12856_v4, %v10953_v17 }
 0x63c   : > { %v4113_v24 = vsel %vm1277_vm1, %v4112_v18, %v4108_v56  ;;  %v12903_v30 = vpop.permute.xlu1 %4010 }
 0x63d   : > { %v12858_v39 = vpop.permute.xlu0 %3989  ;;  %v4167_v56 = vsel %vm1415_vm5, %v4113_v24, %v4166_v0  ;;  %v4153_v57 = vrot.slane %v12903_v30, %v10945_v55 }
 0x63e   : > { %v4121_v26 = vrot.slane %v12858_v39, %v10953_v17 }
 0x640   : > { %v4122_v43 = vsel %vm1277_vm1, %v4121_v26, %v4117_v34 }
 0x641   : > { %v12862_v63 = vpop.permute.xlu0 %3995  ;;  %v4168_v47 = vsel %vm1417_vm6, %v4122_v43, %v4167_v56 }
 0x642   : > { %v4130_v48 = vrot.slane %v12862_v63, %v10953_v17 }
 0x644   : > { %v4131_v18 = vsel %vm1277_vm1, %v4130_v48, %v4126_v61 }
 0x645   : > { %v12870_v15 = vpop.permute.xlu0 %4001  ;;  %v4169_v26 = vsel %vm1419_vm7, %v4131_v18, %v4168_v47 }
 0x646   : > { %v4139_v51 = vrot.slane %v12870_v15, %v10953_v17 }
 0x648   : > { %v4140_v5 = vsel %vm1277_vm1, %v4139_v51, %v4135_v10 }
 0x649   : > { %v12892_v8 = vpop.permute.xlu0 %4007  ;;  %v4170_v48 = vsel %vm1421_vm8, %v4140_v5, %v4169_v26 }
 0x64a   : > { %v4148_v45 = vrot.slane %v12892_v8, %v10953_v17 }
 0x64c   : > { %v4149_v34 = vsel %vm1277_vm1, %v4148_v45, %v4144_v38 }
 0x64d   : > { %v12909_v44 = vpop.permute.xlu0 %4013  ;;  %v4171_v51 = vsel %vm1423_vm9, %v4149_v34, %v4170_v48 }
 0x64e   : > { %v4157_v33 = vrot.slane %v12909_v44, %v10953_v17 }
 0x650   : > { %v4158_v24 = vsel %vm1277_vm1, %v4157_v33, %v4153_v57 }
 0x651   : > { %v4172_v43 = vsel %vm1425_vm10, %v4158_v24, %v4171_v51  ;;  %v4512_v51 = vsub.f32 %v12176_v42, %v12763_v53  ;;  %v4520_v42 = vsub.f32 %v12261_v29, %v12787_v46  ;;  %v15043_v46 = vld [vmem:[#allocation111_spill] sm:$0xff] }
 0x652   : > { %4176 = vxpose.xlu1.b32.end [2/2] (short) (narrow) %v4172_v43, 16 }
 0x6ce   : > { %v4191_v10 = vpop.trf.xlu1 }
 0x6cf   : > { %v4265_v61 = vrot.slane %v4191_v10, %v12590_v50  ;;  %v4210_v38 = vrot.slane %v4191_v10, %v12560_v58  ;;  %v4221_v56 = vrot.slane %v4191_v10, %v12568_v28  ;;  %v4232_v34 = vrot.slane %v4191_v10, %v12572_v31 }
 0x6d0   : > { %v4243_v26 = vrot.slane %v4191_v10, %v12576_v60  ;;  %v4254_v24 = vrot.slane %v4191_v10, %v12582_v12  ;;  %v4276_v43 = vrot.slane %v4191_v10, %v12601_v25 }
 0x6d1   : > { %4271 = vbcast.lane.b32.xlu1 %v4265_v61, 264  ;;  %4212 = vbcast.lane.b32.xlu0 %v4210_v38, 256 }
 0x6d2   : > { %v4192_v45 = vpop.trf.xlu1 }
 0x6d3   : > { %v4309_v0 = vrot.slane %v4192_v45, %v12568_v28  ;;  %v12925_v18 = vrot.slane %v4192_v45, %v12572_v31  ;;  %v12930_v5 = vrot.slane %v4192_v45, %v12576_v60  ;;  %v12934_v47 = vrot.slane %v4192_v45, %v12582_v12  ;;  %v15105_v60 = vld [vmem:[#allocation196_spill] sm:$0xff] }
 0x6d4   : > { %v12939_v57 = vrot.slane %v4192_v45, %v12590_v50  ;;  %v12943_v33 = vrot.slane %v4192_v45, %v12601_v25  ;;  %v12948_v48 = vrot.slane %v4192_v45, %v12617_v20  ;;  %v4287_v50 = vrot.slane %v4191_v10, %v12617_v20 }
 0x6d5   : > { %4216 = vbcast.lane.b32.xlu0 %v4210_v38, 264  ;;  %4315 = vbcast.lane.b32.xlu1 %v4309_v0, 264  ;;  %v4545_v38 = vmul.f32 1.442695, %v4512_v51  ;;  %v4298_v53 = vrot.slane %v4192_v45, %v12560_v58 }
 0x6d7   : > { %10063 = vpow2.f32 %v4545_v38 }
 0x6d9   : > { %4223 = vbcast.lane.b32.xlu0 %v4221_v56, 256  ;;  %4326 = vbcast.lane.b32.xlu1 %v12925_v18, 264 }
 0x6dd   : > { %4227 = vbcast.lane.b32.xlu0 %v4221_v56, 264  ;;  %4337 = vbcast.lane.b32.xlu1 %v12930_v5, 264  ;;  %v4516_v56 = vsub.f32 %v12218_v11, %v12779_v49  ;;  %v4522_v11 = vsub.f32 %v12283_v36, %v12795_v3  ;;  %v4526_v36 = vsub.f32 %v15043_v46, %v12836_v21  ;;  %v15053_v46 = vld [vmem:[#allocation118_spill] sm:$0xff] }
 0x6e1   : > { %4234 = vbcast.lane.b32.xlu0 %v4232_v34, 256  ;;  %4348 = vbcast.lane.b32.xlu1 %v12934_v47, 264  ;;  %v12965_v49 = vpop.eup %10063 }
 0x6e2   : > { %v4610_v10 = vsel %vm360_vm0, %v12965_v49, 0.0 }
 0x6e5   : > { %4238 = vbcast.lane.b32.xlu0 %v4232_v34, 264  ;;  %4359 = vbcast.lane.b32.xlu1 %v12939_v57, 264  ;;  %v4553_v34 = vmul.f32 1.442695, %v4516_v56  ;;  %v15046_v56 = vld [vmem:[#allocation114_spill] sm:$0xff] }
 0x6e7   : > { %10065 = vpow2.f32 %v4553_v34  ;;  %v4530_v34 = vsub.f32 %v15046_v56, %v12852_v16 }
 0x6e9   : > { %4245 = vbcast.lane.b32.xlu0 %v4243_v26, 256  ;;  %4370 = vbcast.lane.b32.xlu1 %v12943_v33, 264 }
 0x6ed   : > { %4249 = vbcast.lane.b32.xlu0 %v4243_v26, 264  ;;  %4381 = vbcast.lane.b32.xlu1 %v12948_v48, 264  ;;  %v4518_v26 = vsub.f32 %v12239_v52, %v12783_v27  ;;  %v4565_v52 = vmul.f32 1.442695, %v4522_v11  ;;  %v4524_v27 = vsub.f32 %v12305_v22, %v12819_v1  ;;  %v4573_v22 = vmul.f32 1.442695, %v4526_v36 }
 0x6ee   : > { %v15045_v1 = vld [vmem:[#allocation173_spill] sm:$0xff]  ;;  %v4538_v36 = vsub.f32 %v15053_v46, %v12870_v15 }
 0x6ef   : > { %v4528_v51 = vsub.f32 %v15045_v1, %v12847_v9  ;;  %v4581_v9 = vmul.f32 1.442695, %v4530_v34 }
 0x6f1   : > { %4256 = vbcast.lane.b32.xlu0 %v4254_v24, 256  ;;  %v12971_v29 = vpop.eup %10065  ;;  %v4577_v21 = vmul.f32 1.442695, %v4528_v51 }
 0x6f2   : > { %v4622_v3 = vsel %vm360_vm0, %v12971_v29, 0.0 }
 0x6f5   : > { %4260 = vbcast.lane.b32.xlu0 %v4254_v24, 264  ;;  %v4561_v24 = vmul.f32 1.442695, %v4520_v42 }
 0x6f9   : > { %4267 = vbcast.lane.b32.xlu0 %v4265_v61, 256  ;;  %v4557_v61 = vmul.f32 1.442695, %v4518_v26 }
 0x6fb   : > { %10067 = vpow2.f32 %v4557_v61  ;;  %v15048_v61 = vld [vmem:[#allocation175_spill] sm:$0xff] }
 0x6fc   : > { %10069 = vpow2.f32 %v4561_v24  ;;  %v4532_v42 = vsub.f32 %v15048_v61, %v12856_v4  ;;  %v15049_v24 = vld [vmem:[#allocation116_spill] sm:$0xff]  ;;  %v15060_v61 = vld [vmem:[#allocation205_spill] sm:$0xff] }
 0x6fd   : > { %4278 = vbcast.lane.b32.xlu0 %v4276_v43, 256  ;;  %10071 = vpow2.f32 %v4565_v52  ;;  %v4534_v11 = vsub.f32 %v15049_v24, %v12858_v39 }
 0x6fe   : > { %v4585_v16 = vmul.f32 1.442695, %v4532_v42 }
 0x6ff   : > { %v4589_v4 = vmul.f32 1.442695, %v4534_v11 }
 0x701   : > { %4282 = vbcast.lane.b32.xlu0 %v4276_v43, 264 }
 0x705   : > { %4289 = vbcast.lane.b32.xlu0 %v4287_v50, 256  ;;  %v12977_v45 = vpop.eup %10067 }
 0x706   : > { %15044 = vst [vmem:[#allocation209_spill] sm:$0xff] %v12977_v45  ;;  %v4628_v43 = vsel %vm360_vm0, %v12977_v45, 0.0  ;;  %v12983_v38 = vpop.eup %10069  ;;  %v15154_v45 = vld [vmem:[#allocation55_spill] sm:$0xff] }
 0x707   : > { %v12990_v26 = vpop.eup %10071 }
 0x708   : > { %15047 = vst [vmem:[#allocation81_spill] sm:$0xff] %v12990_v26 }
 0x709   : > { %4293 = vbcast.lane.b32.xlu0 %v4287_v50, 264  ;;  %v4569_v50 = vmul.f32 1.442695, %v4524_v27  ;;  %v15051_v27 = vld [vmem:[#allocation177_spill] sm:$0xff] }
 0x70b   : > { %10073 = vpow2.f32 %v4569_v50 }
 0x70c   : > { %10075 = vpow2.f32 %v4573_v22  ;;  %v15055_v22 = vld [vmem:[#allocation179_spill] sm:$0xff] }
 0x70d   : > { %4300 = vbcast.lane.b32.xlu0 %v4298_v53, 256  ;;  %10077 = vpow2.f32 %v4577_v21  ;;  %v4540_v1 = vsub.f32 %v15055_v22, %v12892_v8  ;;  %v4511_v8 = vsub.f32 %v12120_v40, %v12771_v62  ;;  %v15062_v62 = vld [vmem:[#allocation172_spill] sm:$0xff] }
 0x70e   : > { %10079 = vpow2.f32 %v4581_v9  ;;  %v4514_v24 = vsub.f32 %v15062_v62, %v12775_v19 }
 0x70f   : > { %10081 = vpow2.f32 %v4585_v16  ;;  %v4601_v15 = vmul.f32 1.442695, %v4540_v1  ;;  %v4543_v42 = vmul.f32 1.442695, %v4511_v8 }
 0x710   : > { %10083 = vpow2.f32 %v4589_v4  ;;  %v4515_v4 = vsub.f32 %v12609_v2, %v12767_v54  ;;  %v15066_v2 = vld [vmem:[#allocation75_spill] sm:$0xff] }
 0x711   : > { %4611 = vadd.xlane.f32.xlu1 %v4610_v10  ;;  %4304 = vbcast.lane.b32.xlu0 %v4298_v53, 264  ;;  %v4536_v10 = vsub.f32 %v15051_v27, %v12862_v63  ;;  %v4597_v63 = vmul.f32 1.442695, %v4538_v36  ;;  %v4517_v36 = vsub.f32 %v12619_v23, %v12769_v59 }
 0x712   : > { %v4551_v19 = vmul.f32 1.442695, %v4515_v4 }
 0x713   : > { %v4593_v39 = vmul.f32 1.442695, %v4536_v10  ;;  %v15064_v10 = vld [vmem:[#allocation178_spill] sm:$0xff] }
 0x715   : > { %4623 = vadd.xlane.f32.xlu1 %v4622_v3  ;;  %4311 = vbcast.lane.b32.xlu0 %v4309_v0, 256  ;;  %v4634_v0 = vsel %vm360_vm0, %v12983_v38, 0.0  ;;  %v12997_v53 = vpop.eup %10073  ;;  %10085 = vpow2.f32 %v4593_v39 }
 0x716   : > { %v13004_v52 = vpop.eup %10075  ;;  %10087 = vpow2.f32 %v4597_v63 }
 0x717   : > { %15050 = vst [vmem:[#allocation216_spill] sm:$0xff] %v13004_v52  ;;  %v13011_v50 = vpop.eup %10077  ;;  %10089 = vpow2.f32 %v4601_v15  ;;  %v4519_v15 = vsub.f32 %v12629_v14, %v12773_v6 }
 0x718   : > { %15052 = vst [vmem:[#allocation208_spill] sm:$0xff] %v13011_v50  ;;  %v13018_v3 = vpop.eup %10079 }
 0x719   : > { %4629 = vadd.xlane.f32.xlu1 %v4628_v43  ;;  %4322 = vbcast.lane.b32.xlu0 %v12925_v18, 256  ;;  %v4640_v18 = vsel %vm360_vm0, %v12990_v26, 0.0  ;;  %15054 = vst [vmem:[#allocation212_spill] sm:$0xff] %v13018_v3  ;;  %v13025_v51 = vpop.eup %10081  ;;  %v15057_v43 = vld [vmem:[#allocation78_spill] sm:$0xff] }
 0x71a   : > { %15056 = vst [vmem:[#allocation100_spill] sm:$0xff] %v13025_v51  ;;  %v4542_v21 = vsub.f32 %v15057_v43, %v12909_v44  ;;  %v4670_v56 = vsel %vm360_vm0, %v13025_v51, 0.0  ;;  %v4513_v44 = vsub.f32 %v15060_v61, %v12765_v7  ;;  %v4549_v7 = vmul.f32 1.442695, %v4514_v24 }
 0x71b   : > { %v4523_v24 = vsub.f32 %v12647_v37, %v12781_v35 }
 0x71c   : > { %v4605_v34 = vmul.f32 1.442695, %v4542_v21  ;;  %v4547_v40 = vmul.f32 1.442695, %v4513_v44 }
 0x71d   : > { %4635 = vadd.xlane.f32.xlu1 %v4634_v0  ;;  %4333 = vbcast.lane.b32.xlu0 %v12930_v5, 256  ;;  %v4646_v5 = vsel %vm360_vm0, %v12997_v53, 0.0 }
 0x71e   : > { %10091 = vpow2.f32 %v4605_v34  ;;  %v4559_v34 = vmul.f32 1.442695, %v4519_v15 }
 0x71f   : > { %10093 = vpow2.f32 %v4543_v42  ;;  %v15070_v42 = vld [vmem:[#allocation180_spill] sm:$0xff] }
 0x720   : > { %10095 = vpow2.f32 %v4547_v40 }
 0x721   : > { %4641 = vadd.xlane.f32.xlu1 %v4640_v18  ;;  %4344 = vbcast.lane.b32.xlu0 %v12934_v47, 256  ;;  %v4652_v47 = vsel %vm360_vm0, %v13004_v52, 0.0  ;;  %10097 = vpow2.f32 %v4549_v7 }
 0x725   : > { %4647 = vadd.xlane.f32.xlu1 %v4646_v5  ;;  %4355 = vbcast.lane.b32.xlu0 %v12939_v57, 256  ;;  %v4658_v57 = vsel %vm360_vm0, %v13011_v50, 0.0 }
 0x729   : > { %4653 = vadd.xlane.f32.xlu1 %v4652_v47  ;;  %4366 = vbcast.lane.b32.xlu0 %v12943_v33, 256  ;;  %v4664_v33 = vsel %vm360_vm0, %v13018_v3, 0.0 }
 0x72d   : > { %4659 = vadd.xlane.f32.xlu1 %v4658_v57  ;;  %4377 = vbcast.lane.b32.xlu0 %v12948_v48, 256  ;;  %v13031_v48 = vpop.eup %10083 }
 0x72e   : > { %15058 = vst [vmem:[#allocation211_spill] sm:$0xff] %v13031_v48  ;;  %v4676_v0 = vsel %vm360_vm0, %v13031_v48, 0.0  ;;  %v13037_v9 = vpop.eup %10085 }
 0x72f   : > { %15059 = vst [vmem:[#allocation214_spill] sm:$0xff] %v13037_v9  ;;  %v4682_v18 = vsel %vm360_vm0, %v13037_v9, 0.0  ;;  %v13043_v16 = vpop.eup %10087 }
 0x730   : > { %15061 = vst [vmem:[#allocation213_spill] sm:$0xff] %v13043_v16  ;;  %v4688_v11 = vsel %vm360_vm0, %v13043_v16, 0.0  ;;  %v13049_v5 = vpop.eup %10089 }
 0x731   : > { %4665 = vadd.xlane.f32.xlu1 %v4664_v33  ;;  %15063 = vst [vmem:[#allocation218_spill] sm:$0xff] %v13049_v5  ;;  %v4694_v39 = vsel %vm360_vm0, %v13049_v5, 0.0  ;;  %v13056_v46 = vpop.eup %10091  ;;  %v4555_v33 = vmul.f32 1.442695, %v4517_v36 }
 0x732   : > { %15065 = vst [vmem:[#allocation181_spill] sm:$0xff] %v13056_v46  ;;  %v13060_v22 = vpop.eup %10093  ;;  %v4700_v1 = vsel %vm360_vm0, %v13056_v46, 0.0 }
 0x733   : > { %v4607_v23 = vsel %vm360_vm0, %v13060_v22, 0.0  ;;  %v13069_v59 = vpop.eup %10095 }
 0x734   : > { %15067 = vst [vmem:[#allocation217_spill] sm:$0xff] %v13069_v59  ;;  %v4613_v14 = vsel %vm360_vm0, %v13069_v59, 0.0  ;;  %v13076_v6 = vpop.eup %10097 }
 0x735   : > { %4671 = vadd.xlane.f32.xlu1 %v4670_v56  ;;  %v15068_v56 = vld [vmem:[#allocation76_spill] sm:$0xff]  ;;  %15069 = vst [vmem:[#allocation126_spill] sm:$0xff] %v13076_v6 }
 0x739   : > { %4677 = vadd.xlane.f32.xlu1 %v4676_v0  ;;  %v4521_v0 = vsub.f32 %v12638_v32, %v12777_v13  ;;  %v4616_v13 = vsel %vm360_vm0, %v13076_v6, 0.0 }
 0x73b   : > { %v4563_v62 = vmul.f32 1.442695, %v4521_v0  ;;  %v15077_v0 = vld [vmem:[#allocation121_spill] sm:$0xff] }
 0x73d   : > { %4683 = vadd.xlane.f32.xlu1 %v4682_v18 }
 0x741   : > { %4689 = vadd.xlane.f32.xlu1 %v4688_v11 }
 0x743   : > { %v4213_v27 = vpop.permute.xlu0 %4212 }
 0x744   : > { %v4383_v47 = vsub.f32 %v15064_v10, %v4213_v27  ;;  %v4567_v27 = vmul.f32 1.442695, %v4523_v24  ;;  %v15071_v10 = vld [vmem:[#allocation194_spill] sm:$0xff]  ;;  %v15080_v24 = vld [vmem:[#allocation99_spill] sm:$0xff] }
 0x745   : > { %4695 = vadd.xlane.f32.xlu1 %v4694_v39 }
 0x746   : > { %v4415_v57 = vmul.f32 1.442695, %v4383_v47  ;;  %v15072_v47 = vld [vmem:[#allocation152_spill] sm:$0xff] }
 0x747   : > { %v4217_v63 = vpop.permute.xlu0 %4216  ;;  %v4525_v37 = vsub.f32 %v15072_v47, %v15071_v10  ;;  %v15082_v10 = vld [vmem:[#allocation167_spill] sm:$0xff] }
 0x748   : > { %10099 = vpow2.f32 %v4415_v57  ;;  %v4384_v54 = vsub.f32 %v15066_v2, %v4217_v63  ;;  %v15074_v57 = vld [vmem:[#allocation164_spill] sm:$0xff] }
 0x749   : > { %4701 = vadd.xlane.f32.xlu1 %v4700_v1  ;;  %10101 = vpow2.f32 %v4551_v19  ;;  %v15075_v1 = vld [vmem:[#allocation192_spill] sm:$0xff] }
 0x74a   : > { %v4417_v43 = vmul.f32 1.442695, %v4384_v54  ;;  %v4571_v54 = vmul.f32 1.442695, %v4525_v37 }
 0x74b   : > { %v4224_v21 = vpop.permute.xlu0 %4223 }
 0x74c   : > { %10103 = vpow2.f32 %v4417_v43  ;;  %v4385_v8 = vsub.f32 %v15068_v56, %v4224_v21  ;;  %4608 = vadd.xlane.f32.xlu0 %v4607_v23 }
 0x74d   : > { %10105 = vpow2.f32 %v4555_v33  ;;  %v15076_v33 = vld [vmem:[#allocation159_spill] sm:$0xff] }
 0x74e   : > { %v4419_v61 = vmul.f32 1.442695, %v4385_v8  ;;  %v4527_v15 = vsub.f32 %v15076_v33, %v15075_v1 }
 0x74f   : > { %v4228_v44 = vpop.permute.xlu0 %4227 }
 0x750   : > { %10107 = vpow2.f32 %v4419_v61  ;;  %v4386_v18 = vsub.f32 %v15070_v42, %v4228_v44  ;;  %4614 = vadd.xlane.f32.xlu0 %v4613_v14  ;;  %v15078_v61 = vld [vmem:[#allocation158_spill] sm:$0xff] }
 0x751   : > { %10109 = vpow2.f32 %v4559_v34  ;;  %v4575_v34 = vmul.f32 1.442695, %v4527_v15  ;;  %v4529_v44 = vsub.f32 %v15078_v61, %v15077_v0 }
 0x752   : > { %v13079_v40 = vpop.eup %10099  ;;  %v4421_v11 = vmul.f32 1.442695, %v4386_v18 }
 0x753   : > { %9450 = vmatprep.mubr.msk.f32.mxu0 %vm360_vm0, %v13079_v40  ;;  %v13085_v32 = vpop.permute.xlu0 %4234  ;;  %v13089_v7 = vpop.eup %10101 }
 0x754   : > { %10111 = vpow2.f32 %v4421_v11  ;;  %4617 = vadd.xlane.f32.xlu0 %v4616_v13  ;;  %v4619_v19 = vsel %vm360_vm0, %v13089_v7, 0.0  ;;  %v4579_v13 = vmul.f32 1.442695, %v4529_v44 }
 0x755   : > { %10113 = vpow2.f32 %v4563_v62 }
 0x756   : > { %v13091_v4 = vpop.eup %10103  ;;  %10115 = vpow2.f32 %v4567_v27  ;;  %v15081_v27 = vld [vmem:[#allocation203_spill] sm:$0xff] }
 0x757   : > { %v4239_v35 = vpop.permute.xlu0 %4238  ;;  %v4706_v39 = vsel %vm360_vm0, %v13091_v4, 0.0  ;;  %v13099_v36 = vpop.eup %10105  ;;  %v4531_v47 = vsub.f32 %v15082_v10, %v15081_v27 }
 0x758   : > { %15073 = vst [vmem:[#allocation84_spill] sm:$0xff] %v13099_v36  ;;  %v4388_v63 = vsub.f32 %v15074_v57, %v4239_v35  ;;  %4707 = vadd.xlane.f32.xlu1 %v4706_v39  ;;  %4620 = vadd.xlane.f32.xlu0 %v4619_v19  ;;  %v4625_v23 = vsel %vm360_vm0, %v13099_v36, 0.0  ;;  %v4272_v35 = vpop.permute.xlu1 %4271 }
 0x759   : > { %v4583_v15 = vmul.f32 1.442695, %v4531_v47 }
 0x75a   : > { %v13102_v2 = vpop.eup %10107  ;;  %v4425_v43 = vmul.f32 1.442695, %v4388_v63  ;;  %v15083_v63 = vld [vmem:[#allocation201_spill] sm:$0xff] }
 0x75b   : > { %9457 = vmatprep.mubr.msk.f32.mxu1 %vm360_vm0, %v13102_v2  ;;  %v13108_v21 = vpop.permute.xlu0 %4245  ;;  %v13112_v56 = vpop.eup %10109 }
 0x75c   : > { %10117 = vpow2.f32 %v4425_v43  ;;  %4626 = vadd.xlane.f32.xlu0 %v4625_v23  ;;  %v4631_v18 = vsel %vm360_vm0, %v13112_v56, 0.0  ;;  %v15085_v43 = vld [vmem:[#allocation189_spill] sm:$0xff] }
 0x75d   : > { %10119 = vpow2.f32 %v4571_v54  ;;  %v15084_v54 = vld [vmem:[#allocation165_spill] sm:$0xff]  ;;  %v4394_v23 = vsub.f32 %v15085_v43, %v4272_v35 }
 0x75e   : > { %v13114_v8 = vpop.eup %10111  ;;  %10121 = vpow2.f32 %v4575_v34  ;;  %v4533_v1 = vsub.f32 %v15084_v54, %v15083_v63  ;;  %v15091_v54 = vld [vmem:[#allocation123_spill] sm:$0xff] }
 0x75f   : > { %v4250_v14 = vpop.permute.xlu0 %4249  ;;  %v4712_v42 = vsel %vm360_vm0, %v13114_v8, 0.0  ;;  %v13122_v62 = vpop.eup %10113  ;;  %v4437_v27 = vmul.f32 1.442695, %v4394_v23 }
 0x760   : > { %15079 = vst [vmem:[#allocation219_spill] sm:$0xff] %v13122_v62  ;;  %v4390_v11 = vsub.f32 %v15080_v24, %v4250_v14  ;;  %4713 = vadd.xlane.f32.xlu1 %v4712_v42  ;;  %4632 = vadd.xlane.f32.xlu0 %v4631_v18  ;;  %v4637_v19 = vsel %vm360_vm0, %v13122_v62, 0.0  ;;  %v13131_v57 = vpop.eup %10115  ;;  %v15087_v14 = vld [vmem:[#allocation187_spill] sm:$0xff]  ;;  %v4587_v18 = vmul.f32 1.442695, %v4533_v1  ;;  %v15092_v1 = vld [vmem:[#allocation174_spill] sm:$0xff] }
 0x761   : > { %v4643_v61 = vsel %vm360_vm0, %v13131_v57, 0.0  ;;  %v15088_v24 = vld [vmem:[#allocation215_spill] sm:$0xff]  ;;  %v15153_v62 = vld [vmem:[#allocation108_spill] sm:$0xff] }
 0x762   : > { %v4429_v37 = vmul.f32 1.442695, %v4390_v11  ;;  %v15089_v11 = vld [vmem:[#allocation176_spill] sm:$0xff] }
 0x763   : > { %v13127_v39 = vpop.permute.xlu0 %4256 }
 0x764   : > { %10123 = vpow2.f32 %v4429_v37  ;;  %4638 = vadd.xlane.f32.xlu0 %v4637_v19 }
 0x765   : > { %10125 = vpow2.f32 %v4579_v13  ;;  %v4535_v13 = vsub.f32 %v15089_v11, %v15088_v24 }
 0x766   : > { %v13135_v33 = vpop.eup %10117  ;;  %10127 = vpow2.f32 %v4583_v15  ;;  %v4537_v15 = vsub.f32 %v15092_v1, %v15091_v54 }
 0x767   : > { %v4261_v34 = vpop.permute.xlu0 %4260  ;;  %v4718_v0 = vsel %vm360_vm0, %v13135_v33, 0.0  ;;  %v13142_v44 = vpop.eup %10119  ;;  %v4591_v63 = vmul.f32 1.442695, %v4535_v13 }
 0x768   : > { %15086 = vst [vmem:[#allocation129_spill] sm:$0xff] %v13142_v44  ;;  %v4392_v42 = vsub.f32 %v15087_v14, %v4261_v34  ;;  %4719 = vadd.xlane.f32.xlu1 %v4718_v0  ;;  %4644 = vadd.xlane.f32.xlu0 %v4643_v61  ;;  %v4649_v37 = vsel %vm360_vm0, %v13142_v44, 0.0  ;;  %v13151_v35 = vpop.eup %10121  ;;  %v4595_v61 = vmul.f32 1.442695, %v4537_v15  ;;  %v15094_v14 = vld [vmem:[#allocation185_spill] sm:$0xff]  ;;  %v15148_v44 = vld [vmem:[#allocation46_spill] sm:$0xff] }
 0x769   : > { %15090 = vst [vmem:[#allocation112_spill] sm:$0xff] %v13151_v35  ;;  %v4655_v34 = vsel %vm360_vm0, %v13151_v35, 0.0 }
 0x76a   : > { %v4433_v10 = vmul.f32 1.442695, %v4392_v42  ;;  %v4539_v42 = vsub.f32 %v15094_v14, %v12866_v41 }
 0x76b   : > { %v13147_v47 = vpop.permute.xlu0 %4267 }
 0x76c   : > { %10129 = vpow2.f32 %v4433_v10  ;;  %4650 = vadd.xlane.f32.xlu0 %v4649_v37  ;;  %v4599_v54 = vmul.f32 1.442695, %v4539_v42 }
 0x76d   : > { %10131 = vpow2.f32 %v4587_v18  ;;  %v4316_v18 = vpop.permute.xlu1 %4315 }
 0x76e   : > { %v13153_v19 = vpop.eup %10123  ;;  %10133 = vpow2.f32 %v4437_v27  ;;  %v15096_v27 = vld [vmem:[#allocation166_spill] sm:$0xff] }
 0x76f   : > { %v13157_v43 = vpop.permute.xlu0 %4278  ;;  %v4724_v23 = vsel %vm360_vm0, %v13153_v19, 0.0  ;;  %v13163_v0 = vpop.eup %10125  ;;  %10135 = vpow2.f32 %v4591_v63  ;;  %v15097_v63 = vld [vmem:[#allocation183_spill] sm:$0xff] }
 0x770   : > { %15093 = vst [vmem:[#allocation220_spill] sm:$0xff] %v13163_v0  ;;  %4725 = vadd.xlane.f32.xlu1 %v4724_v23  ;;  %4656 = vadd.xlane.f32.xlu0 %v4655_v34  ;;  %v4661_v11 = vsel %vm360_vm0, %v13163_v0, 0.0  ;;  %v13169_v13 = vpop.eup %10127  ;;  %10137 = vpow2.f32 %v4595_v61  ;;  %v4541_v1 = vsub.f32 %v15097_v63, %v12903_v30  ;;  %v15100_v63 = vld [vmem:[#allocation103_spill] sm:$0xff] }
 0x771   : > { %15095 = vst [vmem:[#allocation132_spill] sm:$0xff] %v13169_v13  ;;  %v4667_v14 = vsel %vm360_vm0, %v13169_v13, 0.0 }
 0x772   : > { %v4603_v61 = vmul.f32 1.442695, %v4541_v1 }
 0x773   : > { %v4283_v24 = vpop.permute.xlu0 %4282 }
 0x774   : > { %v4396_v10 = vsub.f32 %v15096_v27, %v4283_v24  ;;  %4662 = vadd.xlane.f32.xlu0 %v4661_v11  ;;  %v4327_v11 = vpop.permute.xlu1 %4326 }
 0x776   : > { %v13172_v37 = vpop.eup %10129  ;;  %v4441_v15 = vmul.f32 1.442695, %v4396_v10 }
 0x777   : > { %v13176_v23 = vpop.eup %10131  ;;  %v13178_v41 = vpop.permute.xlu0 %4289  ;;  %v4730_v34 = vsel %vm360_vm0, %v13172_v37, 0.0 }
 0x778   : > { %15098 = vst [vmem:[#allocation127_spill] sm:$0xff] %v13176_v23  ;;  %v13184_v24 = vpop.eup %10133  ;;  %10139 = vpow2.f32 %v4441_v15  ;;  %4731 = vadd.xlane.f32.xlu1 %v4730_v34  ;;  %4668 = vadd.xlane.f32.xlu0 %v4667_v14  ;;  %v4673_v42 = vsel %vm360_vm0, %v13176_v23, 0.0  ;;  %v4338_v46 = vpop.permute.xlu1 %4337  ;;  %v15102_v14 = vld [vmem:[#allocation198_spill] sm:$0xff] }
 0x779   : > { %10141 = vpow2.f32 %v4599_v54  ;;  %v4736_v27 = vsel %vm360_vm0, %v13184_v24, 0.0  ;;  %v13190_v10 = vpop.eup %10135  ;;  %v4402_v20 = vsub.f32 %v15102_v14, %v4316_v18 }
 0x77a   : > { %15099 = vst [vmem:[#allocation221_spill] sm:$0xff] %v13190_v10  ;;  %10143 = vpow2.f32 %v4603_v61  ;;  %v4679_v54 = vsel %vm360_vm0, %v13190_v10, 0.0  ;;  %v13197_v1 = vpop.eup %10137 }
 0x77b   : > { %v4294_v30 = vpop.permute.xlu0 %4293  ;;  %15101 = vst [vmem:[#allocation82_spill] sm:$0xff] %v13197_v1  ;;  %v4453_v18 = vmul.f32 1.442695, %v4402_v20 }
 0x77c   : > { %v4398_v5 = vsub.f32 %v15100_v63, %v4294_v30  ;;  %4674 = vadd.xlane.f32.xlu0 %v4673_v42  ;;  %4737 = vadd.xlane.f32.xlu1 %v4736_v27  ;;  %v15103_v30 = vld [vmem:[#allocation94_spill] sm:$0xff]  ;;  %v4349_v28 = vpop.permute.xlu1 %4348 }
 0x77d   : > { %v4387_v42 = vsub.f32 %v15103_v30, %v13085_v32  ;;  %v15107_v32 = vld [vmem:[#allocation89_spill] sm:$0xff] }
 0x77e   : > { %v4445_v15 = vmul.f32 1.442695, %v4398_v5  ;;  %v4685_v5 = vsel %vm360_vm0, %v13197_v1, 0.0  ;;  %v4389_v30 = vsub.f32 %v15107_v32, %v13108_v21 }
 0x77f   : > { %v13193_v34 = vpop.permute.xlu0 %4300  ;;  %v4423_v31 = vmul.f32 1.442695, %v4387_v42  ;;  %v15110_v42 = vld [vmem:[#allocation87_spill] sm:$0xff] }
 0x780   : > { %10145 = vpow2.f32 %v4445_v15  ;;  %4680 = vadd.xlane.f32.xlu0 %v4679_v54  ;;  %v15106_v54 = vld [vmem:[#allocation168_spill] sm:$0xff]  ;;  %v4360_v20 = vpop.permute.xlu1 %4359  ;;  %v4391_v21 = vsub.f32 %v15110_v42, %v13127_v39  ;;  %v4703_v39 = vsel %vm360_vm0, %v13079_v40, 0.0 }
 0x781   : > { %v4404_v14 = vsub.f32 %v15106_v54, %v4327_v11  ;;  %v4427_v11 = vmul.f32 1.442695, %v4389_v30 }
 0x782   : > { %v13200_v25 = vpop.eup %10139 }
 0x783   : > { %v4305_v27 = vpop.permute.xlu0 %4304  ;;  %v4742_v61 = vsel %vm360_vm0, %v13200_v25, 0.0  ;;  %v13208_v63 = vpop.eup %10141  ;;  %v4457_v1 = vmul.f32 1.442695, %v4404_v14 }
 0x784   : > { %15104 = vst [vmem:[#allocation135_spill] sm:$0xff] %v13208_v63  ;;  %v4400_v15 = vsub.f32 %v15105_v60, %v4305_v27  ;;  %4686 = vadd.xlane.f32.xlu0 %v4685_v5  ;;  %4743 = vadd.xlane.f32.xlu1 %v4742_v61  ;;  %v4691_v12 = vsel %vm360_vm0, %v13208_v63, 0.0  ;;  %v13216_v16 = vpop.eup %10143  ;;  %v15109_v60 = vld [vmem:[#allocation106_spill] sm:$0xff]  ;;  %v4371_v32 = vpop.permute.xlu1 %4370 }
 0x785   : > { %15108 = vst [vmem:[#allocation144_spill] sm:$0xff] %v13216_v16  ;;  %v4406_v27 = vsub.f32 %v15109_v60, %v4338_v46  ;;  %v4697_v61 = vsel %vm360_vm0, %v13216_v16, 0.0  ;;  %v15113_v60 = vld [vmem:[#allocation170_spill] sm:$0xff] }
 0x786   : > { %v4449_v58 = vmul.f32 1.442695, %v4400_v15  ;;  %v4410_v42 = vsub.f32 %v15113_v60, %v4360_v20 }
 0x787   : > { %v4312_v14 = vpop.permute.xlu0 %4311 }
 0x788   : > { %10147 = vpow2.f32 %v4449_v58  ;;  %4692 = vadd.xlane.f32.xlu0 %v4691_v12  ;;  %v4461_v58 = vmul.f32 1.442695, %v4406_v27  ;;  %v15111_v12 = vld [vmem:[#allocation207_spill] sm:$0xff]  ;;  %v4469_v20 = vmul.f32 1.442695, %v4410_v42 }
 0x789   : > { %10149 = vpow2.f32 %v4453_v18  ;;  %v4408_v46 = vsub.f32 %v15111_v12, %v4349_v28  ;;  %v4431_v18 = vmul.f32 1.442695, %v4391_v21  ;;  %v15114_v28 = vld [vmem:[#allocation83_spill] sm:$0xff] }
 0x78a   : > { %v13219_v5 = vpop.eup %10145  ;;  %10151 = vpow2.f32 %v4423_v31  ;;  %v15112_v31 = vld [vmem:[#allocation97_spill] sm:$0xff]  ;;  %v4395_v27 = vsub.f32 %v15114_v28, %v13157_v43 }
 0x78b   : > { %v4748_v15 = vsel %vm360_vm0, %v13219_v5, 0.0  ;;  %10153 = vpow2.f32 %v4457_v1  ;;  %v4393_v54 = vsub.f32 %v15112_v31, %v13147_v47  ;;  %v4465_v30 = vmul.f32 1.442695, %v4408_v46  ;;  %v4323_v12 = vpop.permute.xlu0 %4322  ;;  %v4382_v46 = vpop.permute.xlu1 %4381 }
 0x78c   : > { %4698 = vadd.xlane.f32.xlu0 %v4697_v61  ;;  %4749 = vadd.xlane.f32.xlu1 %v4748_v15  ;;  %10155 = vpow2.f32 %v4427_v11  ;;  %v4709_v47 = vsel %vm360_vm0, %v13102_v2, 0.0  ;;  %v15115_v15 = vld [vmem:[#allocation109_spill] sm:$0xff]  ;;  %v4439_v43 = vmul.f32 1.442695, %v4395_v27 }
 0x78d   : > { %10157 = vpow2.f32 %v4461_v58  ;;  %v4435_v1 = vmul.f32 1.442695, %v4393_v54  ;;  %v4412_v58 = vsub.f32 %v15115_v15, %v4371_v32 }
 0x78e   : > { %10159 = vpow2.f32 %v4431_v18  ;;  %v15116_v18 = vld [vmem:[#allocation133_spill] sm:$0xff] }
 0x78f   : > { %10161 = vpow2.f32 %v4465_v30  ;;  %v4397_v31 = vsub.f32 %v15116_v18, %v13178_v41  ;;  %v4473_v32 = vmul.f32 1.442695, %v4412_v58  ;;  %v15117_v30 = vld [vmem:[#allocation210_spill] sm:$0xff]  ;;  %v15118_v41 = vld [vmem:[#allocation147_spill] sm:$0xff] }
 0x790   : > { %4704 = vadd.xlane.f32.xlu0 %v4703_v39  ;;  %10163 = vpow2.f32 %v4435_v1  ;;  %v4414_v42 = vsub.f32 %v15117_v30, %v4382_v46  ;;  %v4399_v28 = vsub.f32 %v15118_v41, %v13193_v34  ;;  %v15120_v46 = vld [vmem:[#allocation150_spill] sm:$0xff] }
 0x791   : > { %10165 = vpow2.f32 %v4469_v20  ;;  %v4443_v1 = vmul.f32 1.442695, %v4397_v31 }
 0x792   : > { %v13233_v61 = vpop.eup %10147  ;;  %10167 = vpow2.f32 %v4439_v43  ;;  %v4477_v20 = vmul.f32 1.442695, %v4414_v42  ;;  %v4447_v58 = vmul.f32 1.442695, %v4399_v28  ;;  %v4401_v43 = vsub.f32 %v15120_v46, %v4312_v14  ;;  %v15121_v42 = vld [vmem:[#allocation88_spill] sm:$0xff] }
 0x793   : > { %v13237_v11 = vpop.eup %10149  ;;  %v4754_v40 = vsel %vm360_vm0, %v13233_v61, 0.0  ;;  %10169 = vpow2.f32 %v4473_v32 }
 0x794   : > { %v13243_v21 = vpop.eup %10151  ;;  %4710 = vadd.xlane.f32.xlu0 %v4709_v47  ;;  %4755 = vadd.xlane.f32.xlu1 %v4754_v40  ;;  %v4760_v39 = vsel %vm360_vm0, %v13237_v11, 0.0  ;;  %v4334_v47 = vpop.permute.xlu0 %4333  ;;  %10171 = vpow2.f32 %v4443_v1  ;;  %v4451_v32 = vmul.f32 1.442695, %v4401_v43  ;;  %v4403_v1 = vsub.f32 %v15121_v42, %v4323_v12 }
 0x795   : > { %v13248_v54 = vpop.eup %10153  ;;  %v4715_v2 = vsel %vm360_vm0, %v13243_v21, 0.0  ;;  %10173 = vpow2.f32 %v4477_v20  ;;  %v15123_v20 = vld [vmem:[#allocation91_spill] sm:$0xff] }
 0x796   : > { %v13254_v60 = vpop.eup %10155  ;;  %v4766_v15 = vsel %vm360_vm0, %v13248_v54, 0.0  ;;  %10175 = vpow2.f32 %v4447_v58  ;;  %v4405_v46 = vsub.f32 %v15123_v20, %v4334_v47 }
 0x797   : > { %v13259_v27 = vpop.eup %10157  ;;  %v4721_v40 = vsel %vm360_vm0, %v13254_v60, 0.0  ;;  %10177 = vpow2.f32 %v4451_v32 }
 0x798   : > { %4716 = vadd.xlane.f32.xlu0 %v4715_v2  ;;  %4761 = vadd.xlane.f32.xlu1 %v4760_v39  ;;  %15119 = vst [vmem:[#allocation222_spill] sm:$0xff] %v13259_v27  ;;  %v13265_v18 = vpop.eup %10159  ;;  %v4772_v2 = vsel %vm360_vm0, %v13259_v27, 0.0  ;;  %v4345_v30 = vpop.permute.xlu0 %4344  ;;  %v4459_v32 = vmul.f32 1.442695, %v4405_v46  ;;  %v15128_v46 = vld [vmem:[#allocation161_spill] sm:$0xff] }
 0x799   : > { %v13268_v34 = vpop.eup %10161  ;;  %v4727_v31 = vsel %vm360_vm0, %v13265_v18, 0.0 }
 0x79a   : > { %v13274_v39 = vpop.eup %10163  ;;  %v4778_v28 = vsel %vm360_vm0, %v13268_v34, 0.0 }
 0x79b   : > { %v13277_v41 = vpop.eup %10165  ;;  %v4733_v14 = vsel %vm360_vm0, %v13274_v39, 0.0 }
 0x79c   : > { %4722 = vadd.xlane.f32.xlu0 %v4721_v40  ;;  %4767 = vadd.xlane.f32.xlu1 %v4766_v15  ;;  %15122 = vst [vmem:[#allocation130_spill] sm:$0xff] %v13277_v41  ;;  %v13283_v40 = vpop.eup %10167  ;;  %v4455_v15 = vmul.f32 1.442695, %v4403_v1  ;;  %v4356_v43 = vpop.permute.xlu0 %4355  ;;  %v15125_v1 = vld [vmem:[#allocation160_spill] sm:$0xff] }
 0x79d   : > { %v13286_v58 = vpop.eup %10169 }
 0x79e   : > { %v13288_v12 = vpop.xlane.xlu1 %4611  ;;  %v13294_v42 = vpop.eup %10171  ;;  %10179 = vpow2.f32 %v4455_v15  ;;  %v4790_v20 = vsel %vm360_vm0, %v13286_v58, 0.0 }
 0x79f   : > { %15124 = vst [vmem:[#allocation137_spill] sm:$0xff] %v13288_v12  ;;  %v13297_v47 = vpop.eup %10173  ;;  %10181 = vpow2.f32 %v4459_v32 }
 0x7a0   : > { %4728 = vadd.xlane.f32.xlu0 %v4727_v31  ;;  %4773 = vadd.xlane.f32.xlu1 %v4772_v2  ;;  %v4739_v31 = vsel %vm360_vm0, %v13283_v40, 0.0  ;;  %v4784_v2 = vsel %vm360_vm0, %v13277_v41, 0.0  ;;  %15126 = vst [vmem:[#allocation224_spill] sm:$0xff] %v13297_v47  ;;  %v13303_v12 = vpop.eup %10175  ;;  %v4367_v16 = vpop.permute.xlu0 %4366 }
 0x7a2   : > { %v13305_v48 = vpop.xlane.xlu1 %4623 }
 0x7a3   : > { %15127 = vst [vmem:[#allocation223_spill] sm:$0xff] %v13305_v48 }
 0x7a4   : > { %4734 = vadd.xlane.f32.xlu0 %v4733_v14  ;;  %4779 = vadd.xlane.f32.xlu1 %v4778_v28  ;;  %v4407_v14 = vsub.f32 %v15125_v1, %v4345_v30  ;;  %v4745_v28 = vsel %vm360_vm0, %v13294_v42, 0.0  ;;  %v4751_v30 = vsel %vm360_vm0, %v13303_v12, 0.0  ;;  %v13312_v1 = vpop.eup %10177  ;;  %v4378_v3 = vpop.permute.xlu0 %4377 }
 0x7a6   : > { %v4463_v15 = vmul.f32 1.442695, %v4407_v14  ;;  %v13315_v48 = vpop.xlane.xlu1 %4629 }
 0x7a7   : > { %15130 = vst [vmem:[#allocation85_spill] sm:$0xff] %v13315_v48 }
 0x7a8   : > { %4740 = vadd.xlane.f32.xlu0 %v4739_v31  ;;  %4785 = vadd.xlane.f32.xlu1 %v4784_v2  ;;  %v4409_v31 = vsub.f32 %v15128_v46, %v4356_v43  ;;  %v4796_v2 = vsel %vm360_vm0, %v13297_v47, 0.0  ;;  %10183 = vpow2.f32 %v4463_v15  ;;  %v4757_v43 = vsel %vm360_vm0, %v13312_v1, 0.0  ;;  %v13319_v32 = vpop.eup %10179  ;;  %v15131_v46 = vld [vmem:[#allocation163_spill] sm:$0xff] }
 0x7a9   : > { %v4413_v0 = vsub.f32 %v15131_v46, %v4378_v3  ;;  %v13324_v15 = vpop.eup %10181 }
 0x7aa   : > { %15132 = vst [vmem:[#allocation140_spill] sm:$0xff] %v13324_v15 }
 0x7ac   : > { %4746 = vadd.xlane.f32.xlu0 %v4745_v28  ;;  %4791 = vadd.xlane.f32.xlu1 %v4790_v20  ;;  %v4467_v28 = vmul.f32 1.442695, %v4409_v31  ;;  %v15129_v20 = vld [vmem:[#allocation169_spill] sm:$0xff]  ;;  %v4475_v31 = vmul.f32 1.442695, %v4413_v0 }
 0x7ad   : > { %v4411_v23 = vsub.f32 %v15129_v20, %v4367_v16  ;;  %v13326_v16 = vpop.xlane.xlu1 %4635 }
 0x7ae   : > { %10185 = vpow2.f32 %v4467_v28  ;;  %15133 = vst [vmem:[#allocation226_spill] sm:$0xff] %v13326_v16  ;;  %v15135_v28 = vld [vmem:[#allocation35_spill] sm:$0xff] }
 0x7af   : > { %v4471_v14 = vmul.f32 1.442695, %v4411_v23 }
 0x7b0   : > { %4752 = vadd.xlane.f32.xlu0 %v4751_v30  ;;  %4797 = vadd.xlane.f32.xlu1 %v4796_v2  ;;  %v4763_v30 = vsel %vm360_vm0, %v13319_v32, 0.0  ;;  %v4769_v2 = vsel %vm360_vm0, %v13324_v15, 0.0 }
 0x7b1   : > { %10187 = vpow2.f32 %v4471_v14  ;;  %v13332_v23 = vpop.xlane.xlu1 %4641  ;;  %v15138_v14 = vld [vmem:[#allocation57_spill] sm:$0xff] }
 0x7b2   : > { %v13330_v20 = vpop.eup %10183  ;;  %10189 = vpow2.f32 %v4475_v31  ;;  %15134 = vst [vmem:[#allocation225_spill] sm:$0xff] %v13332_v23 }
 0x7b3   : > { %v4775_v3 = vsel %vm360_vm0, %v13330_v20, 0.0 }
 0x7b4   : > { %4758 = vadd.xlane.f32.xlu0 %v4757_v43  ;;  %v15136_v43 = vld [vmem:[#allocation34_spill] sm:$0xff] }
 0x7b5   : > { %v9903_v46 = vpack.i.bf16 %v15136_v43, %v15135_v28  ;;  %v13347_v23 = vpop.xlane.xlu1 %4647  ;;  %v15142_v43 = vld [vmem:[#allocation42_spill] sm:$0xff] }
 0x7b6   : > { %15140 = vst [vmem:[#allocation228_spill] sm:$0xff] %v13347_v23 }
 0x7b8   : > { %4764 = vadd.xlane.f32.xlu0 %v4763_v30  ;;  %v13338_v30 = vpop.eup %10185 }
 0x7b9   : > { %15137 = vst [vmem:[#allocation143_spill] sm:$0xff] %v13338_v30  ;;  %v4781_v0 = vsel %vm360_vm0, %v13338_v30, 0.0  ;;  %v13357_v52 = vpop.xlane.xlu1 %4653 }
 0x7ba   : > { %15144 = vst [vmem:[#allocation146_spill] sm:$0xff] %v13357_v52 }
 0x7bb   : > { %v13345_v48 = vpop.eup %10187 }
 0x7bc   : > { %4770 = vadd.xlane.f32.xlu0 %v4769_v2  ;;  %v15139_v2 = vld [vmem:[#allocation39_spill] sm:$0xff]  ;;  %v4787_v28 = vsel %vm360_vm0, %v13345_v48, 0.0 }
 0x7bd   : > { %v9913_v31 = vpack.i.bf16 %v15139_v2, %v15138_v14  ;;  %v15145_v14 = vld [vmem:[#allocation86_spill] sm:$0xff]  ;;  %v15146_v2 = vld [vmem:[#allocation44_spill] sm:$0xff] }
 0x7be   : > { %v9933_v23 = vpack.i.bf16 %v15146_v2, %v15145_v14  ;;  %v9963_v14 = vpack.i.bf16 %v15154_v45, %v15153_v62  ;;  %v15163_v45 = vld [vmem:[#allocation36_spill] sm:$0xff]  ;;  %v15164_v62 = vld [vmem:[#allocation37_spill] sm:$0xff] }
 0x7c0   : > { %4776 = vadd.xlane.f32.xlu0 %v4775_v3  ;;  %v15141_v3 = vld [vmem:[#allocation69_spill] sm:$0xff] }
 0x7c1   : > { %9904 = vrot.lane.b32.xlu1 %v9903_v46, %s10269_s13  ;;  %v9923_v16 = vpack.i.bf16 %v15142_v43, %v15141_v3  ;;  %v13354_v46 = vpop.eup %10189  ;;  %v13366_v3 = vpop.xlane.xlu1 %4659 }
 0x7c2   : > { %15143 = vst [vmem:[#allocation227_spill] sm:$0xff] %v13354_v46  ;;  %15149 = vst [vmem:[#allocation230_spill] sm:$0xff] %v13366_v3 }
 0x7c4   : > { %4782 = vadd.xlane.f32.xlu0 %v4781_v0  ;;  %v4793_v0 = vsel %vm360_vm0, %v13354_v46, 0.0 }
 0x7c5   : > { %9914 = vrot.lane.b32.xlu1 %v9913_v31, %s10269_s13  ;;  %v15147_v31 = vld [vmem:[#allocation95_spill] sm:$0xff]  ;;  %v13372_v52 = vpop.xlane.xlu1 %4665 }
 0x7c6   : > { %v9943_v26 = vpack.i.bf16 %v15148_v44, %v15147_v31  ;;  %15152 = vst [vmem:[#allocation229_spill] sm:$0xff] %v13372_v52  ;;  %v15157_v44 = vld [vmem:[#allocation58_spill] sm:$0xff] }
 0x7c8   : > { %4788 = vadd.xlane.f32.xlu0 %v4787_v28  ;;  %v15150_v28 = vld [vmem:[#allocation102_spill] sm:$0xff] }
 0x7c9   : > { %9924 = vrot.lane.b32.xlu1 %v9923_v16, %s10269_s13  ;;  %v15151_v16 = vld [vmem:[#allocation51_spill] sm:$0xff]  ;;  %v13381_v31 = vpop.xlane.xlu1 %4671 }
 0x7ca   : > { %v9953_v43 = vpack.i.bf16 %v15151_v16, %v15150_v28  ;;  %15158 = vst [vmem:[#allocation232_spill] sm:$0xff] %v13381_v31  ;;  %v15160_v28 = vld [vmem:[#allocation38_spill] sm:$0xff]  ;;  %v15161_v16 = vld [vmem:[#allocation117_spill] sm:$0xff] }
 0x7cc   : > { %4794 = vadd.xlane.f32.xlu0 %v4793_v0 }
 0x7cd   : > { %9934 = vrot.lane.b32.xlu1 %v9933_v23, %s10269_s13  ;;  %v15156_v23 = vld [vmem:[#allocation113_spill] sm:$0xff]  ;;  %v13395_v3 = vpop.xlane.xlu1 %4677 }
 0x7ce   : > { %v9973_v2 = vpack.i.bf16 %v15157_v44, %v15156_v23  ;;  %15166 = vst [vmem:[#allocation234_spill] sm:$0xff] %v13395_v3  ;;  %v15167_v23 = vld [vmem:[#allocation120_spill] sm:$0xff]  ;;  %v15168_v44 = vld [vmem:[#allocation54_spill] sm:$0xff] }
 0x7cf   : > { %v9993_v31 = vpack.i.bf16 %v15168_v44, %v15167_v23  ;;  %v15181_v44 = vld [vmem:[#allocation45_spill] sm:$0xff] }
 0x7d1   : > { %9944 = vrot.lane.b32.xlu1 %v9943_v26, %s10269_s13 }
 0x7d5   : > { %9954 = vrot.lane.b32.xlu1 %v9953_v43, %s10269_s13  ;;  %v9983_v43 = vpack.i.bf16 %v15161_v16, %v15160_v28  ;;  %v15172_v28 = vld [vmem:[#allocation125_spill] sm:$0xff]  ;;  %v15173_v16 = vld [vmem:[#allocation62_spill] sm:$0xff] }
 0x7d9   : > { %v13376_v0 = vpop.xlane.xlu0 %4608  ;;  %9964 = vrot.lane.b32.xlu1 %v9963_v14, %s10269_s13  ;;  %v15165_v14 = vpack.i.bf16 %v15163_v45, %v15164_v62  ;;  %v15175_v45 = vld [vmem:[#allocation43_spill] sm:$0xff] }
 0x7da   : > { %15155 = vst [vmem:[#allocation148_spill] sm:$0xff] %v13376_v0  ;;  %v15170_v0 = vld [vmem:[#allocation41_spill] sm:$0xff] }
 0x7dd   : > { %v13383_v26 = vpop.xlane.xlu0 %4614  ;;  %9974 = vrot.lane.b32.xlu1 %v9973_v2, %s10269_s13 }
 0x7de   : > { %15159 = vst [vmem:[#allocation231_spill] sm:$0xff] %v13383_v26  ;;  %v15169_v26 = vld [vmem:[#allocation61_spill] sm:$0xff] }
 0x7df   : > { %v9918_v2 = vpack.i.bf16 %v15170_v0, %v15169_v26  ;;  %v15178_v0 = vld [vmem:[#allocation131_spill] sm:$0xff]  ;;  %v15179_v26 = vld [vmem:[#allocation64_spill] sm:$0xff] }
 0x7e0   : > { %v10013_v23 = vpack.i.bf16 %v15179_v26, %v15178_v0  ;;  %v15189_v0 = vld [vmem:[#allocation142_spill] sm:$0xff]  ;;  %v15190_v26 = vld [vmem:[#allocation68_spill] sm:$0xff] }
 0x7e1   : > { %v13388_v52 = vpop.xlane.xlu0 %4617  ;;  %9984 = vrot.lane.b32.xlu1 %v9983_v43, %s10269_s13  ;;  %v10003_v43 = vpack.i.bf16 %v15173_v16, %v15172_v28  ;;  %v15184_v28 = vld [vmem:[#allocation136_spill] sm:$0xff]  ;;  %v15185_v16 = vld [vmem:[#allocation66_spill] sm:$0xff] }
 0x7e2   : > { %15162 = vst [vmem:[#allocation149_spill] sm:$0xff] %v13388_v52  ;;  %9909 = vrot.lane.b32.xlu0 %v15165_v14, %s10269_s13  ;;  %v15174_v52 = vld [vmem:[#allocation80_spill] sm:$0xff]  ;;  %v13409_v14 = vpop.xlane.xlu1 %4683 }
 0x7e3   : > { %v9928_v62 = vpack.i.bf16 %v15175_v45, %v15174_v52  ;;  %15176 = vst [vmem:[#allocation162_spill] sm:$0xff] %v13409_v14  ;;  %v10023_v45 = vpack.i.bf16 %v15185_v16, %v15184_v28  ;;  %v15187_v14 = vld [vmem:[#allocation49_spill] sm:$0xff]  ;;  %v15196_v28 = vld [vmem:[#allocation72_spill] sm:$0xff] }
 0x7e5   : > { %v13401_v36 = vpop.xlane.xlu0 %4620  ;;  %9994 = vrot.lane.b32.xlu1 %v9993_v31, %s10269_s13  ;;  %v15180_v31 = vld [vmem:[#allocation92_spill] sm:$0xff] }
 0x7e6   : > { %15171 = vst [vmem:[#allocation233_spill] sm:$0xff] %v13401_v36  ;;  %9919 = vrot.lane.b32.xlu0 %v9918_v2, %s10269_s13  ;;  %v9938_v2 = vpack.i.bf16 %v15181_v44, %v15180_v31  ;;  %v13423_v52 = vpop.xlane.xlu1 %4689  ;;  %v10033_v31 = vpack.i.bf16 %v15190_v26, %v15189_v0  ;;  %v15192_v44 = vld [vmem:[#allocation53_spill] sm:$0xff]  ;;  %v15201_v26 = vld [vmem:[#allocation115_spill] sm:$0xff] }
 0x7e7   : > { %15183 = vst [vmem:[#allocation235_spill] sm:$0xff] %v13423_v52 }
 0x7e9   : > { %v13411_v3 = vpop.xlane.xlu0 %4626  ;;  %10004 = vrot.lane.b32.xlu1 %v10003_v43, %s10269_s13  ;;  %v15186_v43 = vld [vmem:[#allocation98_spill] sm:$0xff] }
 0x7ea   : > { %15177 = vst [vmem:[#allocation151_spill] sm:$0xff] %v13411_v3  ;;  %9929 = vrot.lane.b32.xlu0 %v9928_v62, %s10269_s13  ;;  %v9948_v62 = vpack.i.bf16 %v15187_v14, %v15186_v43  ;;  %v15195_v14 = vld [vmem:[#allocation47_spill] sm:$0xff]  ;;  %v15198_v43 = vld [vmem:[#allocation56_spill] sm:$0xff] }
 0x7eb   : > { %v10043_v16 = vpack.i.bf16 %v15196_v28, %v15195_v14  ;;  %v15204_v14 = vld [vmem:[#allocation48_spill] sm:$0xff] }
 0x7ec   : > { %v15205_v28 = vld [vmem:[#allocation40_spill] sm:$0xff] }
 0x7ed   : > { %v13419_v36 = vpop.xlane.xlu0 %4632  ;;  %10014 = vrot.lane.b32.xlu1 %v10013_v23, %s10269_s13  ;;  %v15191_v23 = vld [vmem:[#allocation105_spill] sm:$0xff] }
 0x7ee   : > { %15182 = vst [vmem:[#allocation236_spill] sm:$0xff] %v13419_v36  ;;  %9939 = vrot.lane.b32.xlu0 %v9938_v2, %s10269_s13  ;;  %v9958_v2 = vpack.i.bf16 %v15192_v44, %v15191_v23  ;;  %v13437_v36 = vpop.xlane.xlu1 %4695  ;;  %v15202_v23 = vld [vmem:[#allocation59_spill] sm:$0xff] }
 0x7ef   : > { %15193 = vst [vmem:[#allocation154_spill] sm:$0xff] %v13437_v36  ;;  %v9978_v44 = vpack.i.bf16 %v15202_v23, %v15201_v26  ;;  %v9988_v36 = vpack.i.bf16 %v15205_v28, %v15204_v14  ;;  %v15210_v23 = vld [vmem:[#allocation128_spill] sm:$0xff]  ;;  %v15213_v28 = vld [vmem:[#allocation134_spill] sm:$0xff] }
 0x7f1   : > { %v13429_v3 = vpop.xlane.xlu0 %4638  ;;  %10024 = vrot.lane.b32.xlu1 %v10023_v45, %s10269_s13  ;;  %v15197_v45 = vld [vmem:[#allocation110_spill] sm:$0xff] }
 0x7f2   : > { %15188 = vst [vmem:[#allocation93_spill] sm:$0xff] %v13429_v3  ;;  %9949 = vrot.lane.b32.xlu0 %v9948_v62, %s10269_s13  ;;  %v9968_v62 = vpack.i.bf16 %v15198_v43, %v15197_v45  ;;  %v13451_v0 = vpop.xlane.xlu1 %4701  ;;  %v15207_v43 = vld [vmem:[#allocation122_spill] sm:$0xff] }
 0x7f3   : > { %15200 = vst [vmem:[#allocation171_spill] sm:$0xff] %v13451_v0 }
 0x7f5   : > { %v13439_v52 = vpop.xlane.xlu0 %4644  ;;  %10034 = vrot.lane.b32.xlu1 %v10033_v31, %s10269_s13 }
 0x7f6   : > { %15194 = vst [vmem:[#allocation238_spill] sm:$0xff] %v13439_v52  ;;  %9959 = vrot.lane.b32.xlu0 %v9958_v2, %s10269_s13  ;;  %v4708_v2 = vpop.xlane.xlu1 %4707 }
 0x7f7   : > { %v4838_v50 = vrot.slane %v4708_v2, %v10953_v17 }
 0x7f9   : > { %v13447_v3 = vpop.xlane.xlu0 %4650  ;;  %10044 = vrot.lane.b32.xlu1 %v10043_v16, %s10269_s13 }
 0x7fa   : > { %15199 = vst [vmem:[#allocation237_spill] sm:$0xff] %v13447_v3  ;;  %9969 = vrot.lane.b32.xlu0 %v9968_v62, %s10269_s13  ;;  %v4714_v16 = vpop.xlane.xlu1 %4713  ;;  %v15208_v62 = vld [vmem:[#allocation60_spill] sm:$0xff] }
 0x7fb   : > { %v9998_v3 = vpack.i.bf16 %v15208_v62, %v15207_v43  ;;  %v15216_v62 = vld [vmem:[#allocation139_spill] sm:$0xff]  ;;  %v4847_v46 = vrot.slane %v4714_v16, %v10953_v17 }
 0x7fd   : > { %v13455_v31 = vpop.xlane.xlu0 %4656 }
 0x7fe   : > { %15203 = vst [vmem:[#allocation156_spill] sm:$0xff] %v13455_v31  ;;  %9979 = vrot.lane.b32.xlu0 %v9978_v44, %s10269_s13  ;;  %v4720_v26 = vpop.xlane.xlu1 %4719  ;;  %v15211_v31 = vld [vmem:[#allocation63_spill] sm:$0xff] }
 0x7ff   : > { %v10008_v44 = vpack.i.bf16 %v15211_v31, %v15210_v23  ;;  %v15219_v31 = vld [vmem:[#allocation145_spill] sm:$0xff]  ;;  %v15220_v23 = vld [vmem:[#allocation70_spill] sm:$0xff]  ;;  %v4856_v13 = vrot.slane %v4720_v26, %v10953_v17 }
 0x801   : > { %v13460_v45 = vpop.xlane.xlu0 %4662 }
 0x802   : > { %15206 = vst [vmem:[#allocation240_spill] sm:$0xff] %v13460_v45  ;;  %9989 = vrot.lane.b32.xlu0 %v9988_v36, %s10269_s13  ;;  %v4726_v14 = vpop.xlane.xlu1 %4725  ;;  %v15214_v45 = vld [vmem:[#allocation65_spill] sm:$0xff] }
 0x803   : > { %v10018_v36 = vpack.i.bf16 %v15214_v45, %v15213_v28  ;;  %v15222_v45 = vld [vmem:[#allocation50_spill] sm:$0xff]  ;;  %v4865_v27 = vrot.slane %v4726_v14, %v10953_v17 }
 0x804   : > { %v15223_v28 = vld [vmem:[#allocation74_spill] sm:$0xff] }
 0x805   : > { %v13465_v0 = vpop.xlane.xlu0 %4668 }
 0x806   : > { %15209 = vst [vmem:[#allocation239_spill] sm:$0xff] %v13465_v0  ;;  %9999 = vrot.lane.b32.xlu0 %v9998_v3, %s10269_s13  ;;  %v4732_v43 = vpop.xlane.xlu1 %4731  ;;  %v15217_v0 = vld [vmem:[#allocation67_spill] sm:$0xff] }
 0x807   : > { %v10028_v3 = vpack.i.bf16 %v15217_v0, %v15216_v62  ;;  %v4874_v35 = vrot.slane %v4732_v43, %v10953_v17 }
 0x809   : > { %v13470_v52 = vpop.xlane.xlu0 %4674 }
 0x80a   : > { %15212 = vst [vmem:[#allocation96_spill] sm:$0xff] %v13470_v52  ;;  %10009 = vrot.lane.b32.xlu0 %v10008_v44, %s10269_s13  ;;  %v10038_v52 = vpack.i.bf16 %v15220_v23, %v15219_v31  ;;  %v4738_v44 = vpop.xlane.xlu1 %4737 }
 0x80d   : > { %v13475_v6 = vpop.xlane.xlu0 %4680 }
 0x80e   : > { %15215 = vst [vmem:[#allocation157_spill] sm:$0xff] %v13475_v6  ;;  %10019 = vrot.lane.b32.xlu0 %v10018_v36, %s10269_s13  ;;  %v10048_v6 = vpack.i.bf16 %v15223_v28, %v15222_v45 }
 0x811   : > { %v13480_v63 = vpop.xlane.xlu0 %4686  ;;  %v4744_v36 = vpop.xlane.xlu1 %4743 }
 0x812   : > { %15218 = vst [vmem:[#allocation71_spill] sm:$0xff] %v13480_v63  ;;  %10029 = vrot.lane.b32.xlu0 %v10028_v3, %s10269_s13  ;;  %v4892_v14 = vrot.slane %v4744_v36, %v10953_v17 }
 0x815   : > { %v13485_v59 = vpop.xlane.xlu0 %4692 }
 0x816   : > { %15221 = vst [vmem:[#allocation73_spill] sm:$0xff] %v13485_v59  ;;  %10039 = vrot.lane.b32.xlu0 %v10038_v52, %s10269_s13 }
 0x819   : > { %v13490_v9 = vpop.xlane.xlu0 %4698  ;;  %v4750_v0 = vpop.xlane.xlu1 %4749 }
 0x81a   : > { %15224 = vst [vmem:[#allocation90_spill] sm:$0xff] %v13490_v9  ;;  %10049 = vrot.lane.b32.xlu0 %v10048_v6, %s10269_s13 }
 0x81d   : > { %v4705_v62 = vpop.xlane.xlu0 %4704 }
 0x81e   : > { %v4834_v51 = vrot.slane %v4705_v62, %v10945_v55 }
 0x820   : > { %v4839_v26 = vsel %vm1277_vm1, %v4838_v50, %v4834_v51  ;;  %v4901_v51 = vrot.slane %v4750_v0, %v10953_v17 }
 0x821   : > { %v4711_v63 = vpop.xlane.xlu0 %4710  ;;  %v13493_v3 = vpop.xlane.xlu1 %4755 }
 0x822   : > { %v4843_v45 = vrot.slane %v4711_v63, %v10945_v55 }
 0x824   : > { %v4848_v63 = vsel %vm1277_vm1, %v4847_v46, %v4843_v45 }
 0x825   : > { %v4717_v47 = vpop.xlane.xlu0 %4716  ;;  %v13495_v31 = vpop.xlane.xlu1 %4761  ;;  %v4975_v46 = vsel %vm1414_vm4, %v4848_v63, %v4839_v26 }
 0x826   : > { %v4852_v28 = vrot.slane %v4717_v47, %v10945_v55 }
 0x828   : > { %v4857_v16 = vsel %vm1277_vm1, %v4856_v13, %v4852_v28 }
 0x829   : > { %v4723_v23 = vpop.xlane.xlu0 %4722  ;;  %v13497_v59 = vpop.xlane.xlu1 %4767  ;;  %v4976_v43 = vsel %vm1415_vm5, %v4857_v16, %v4975_v46 }
 0x82a   : > { %v4861_v41 = vrot.slane %v4723_v23, %v10945_v55  ;;  %v4883_v23 = vrot.slane %v4738_v44, %v10953_v17 }
 0x82d   : > { %v4729_v52 = vpop.xlane.xlu0 %4728  ;;  %v13499_v10 = vpop.xlane.xlu1 %4773 }
 0x82e   : > { %v4870_v30 = vrot.slane %v4729_v52, %v10945_v55  ;;  %v4866_v52 = vsel %vm1277_vm1, %v4865_v27, %v4861_v41 }
 0x82f   : > { %v4977_v45 = vsel %vm1417_vm6, %v4866_v52, %v4976_v43 }
 0x831   : > { %v4735_v9 = vpop.xlane.xlu0 %4734  ;;  %v13503_v6 = vpop.xlane.xlu1 %4779 }
 0x832   : > { %v4879_v47 = vrot.slane %v4735_v9, %v10945_v55  ;;  %v4875_v9 = vsel %vm1277_vm1, %v4874_v35, %v4870_v30 }
 0x833   : > { %v4978_v27 = vsel %vm1419_vm7, %v4875_v9, %v4977_v45 }
 0x834   : > { %v4884_v13 = vsel %vm1277_vm1, %v4883_v23, %v4879_v47 }
 0x835   : > { %v4741_v15 = vpop.xlane.xlu0 %4740  ;;  %v13516_v62 = vpop.xlane.xlu1 %4785 }
 0x836   : > { %v4888_v2 = vrot.slane %v4741_v15, %v10945_v55  ;;  %v4979_v15 = vsel %vm1421_vm8, %v4884_v13, %v4978_v27 }
 0x838   : > { %v4893_v44 = vsel %vm1277_vm1, %v4892_v14, %v4888_v2 }
 0x839   : > { %v4747_v28 = vpop.xlane.xlu0 %4746  ;;  %v13529_v50 = vpop.xlane.xlu1 %4791  ;;  %v4980_v30 = vsel %vm1423_vm9, %v4893_v44, %v4979_v15 }
 0x83a   : > { %v4897_v41 = vrot.slane %v4747_v28, %v10945_v55 }
 0x83c   : > { %v4902_v35 = vsel %vm1277_vm1, %v4901_v51, %v4897_v41 }
 0x83d   : > { %v4753_v36 = vpop.xlane.xlu0 %4752  ;;  %v13537_v63 = vpop.xlane.xlu1 %4797  ;;  %v4981_v47 = vsel %vm1425_vm10, %v4902_v35, %v4980_v30 }
 0x83e   : > { %4991 = vxpose.xlu0.b32.start [1/2] (short) (narrow) %v4981_v47, 16  ;;  %v4906_v47 = vrot.slane %v4753_v36, %v10945_v55  ;;  %v4928_v36 = vrot.slane %v13497_v59, %v10953_v17  ;;  %v4955_v59 = vrot.slane %v13516_v62, %v10953_v17 }
 0x841   : > { %v4759_v16 = vpop.xlane.xlu0 %4758  ;;  %v9905_v23 = vpop.permute.xlu1 %9904 }
 0x842   : > { %v9907_v26 = vunpack.i.h.bf16 %v9905_v23  ;;  %v9906_v0 = vunpack.i.l.bf16 %v9905_v23 }
 0x844   : > { %v9678_v52 = vpack.c.bf16 %v9907_v26, %v9906_v0  ;;  %v4919_v0 = vrot.slane %v13495_v31, %v10953_v17  ;;  %v4937_v31 = vrot.slane %v13499_v10, %v10953_v17 }
 0x845   : > { %v4765_v2 = vpop.xlane.xlu0 %4764  ;;  %v9915_v14 = vpop.permute.xlu1 %9914 }
 0x846   : > { %v9917_v46 = vunpack.i.h.bf16 %v9915_v14  ;;  %v9916_v9 = vunpack.i.l.bf16 %v9915_v14  ;;  %9679 = vmatprep.subr.bf16.mxu0 %v9678_v52 }
 0x847   : > { %9681 = vmatpush3.bf16.msra.mxu0 %v9678_v52 }
 0x848   : > { %v9686_v43 = vpack.c.bf16 %v9917_v46, %v9916_v9 }
 0x849   : > { %v4771_v13 = vpop.xlane.xlu0 %4770  ;;  %v9925_v45 = vpop.permute.xlu1 %9924 }
 0x84a   : > { %v9927_v44 = vunpack.i.h.bf16 %v9925_v45  ;;  %v9926_v28 = vunpack.i.l.bf16 %v9925_v45  ;;  %9451 = vmatmul.mubr.msk.f32.vlgmr.msra.gmra.mrb[32].mxu0 %vm360_vm0, %v13091_v4  ;;  %9687 = vmatprep.subr.bf16.mxu0 %v9686_v43  ;;  %v4915_v4 = vrot.slane %v4759_v16, %v10945_v55  ;;  %v4933_v52 = vrot.slane %v4771_v13, %v10945_v55 }
 0x84b   : > { %9689 = vmatpush3.bf16.msra.mxu0 %v9686_v43  ;;  %9464 = vmatprep.mubr.msk.f32.mxu0 %vm360_vm0, %v13243_v21  ;;  %v4924_v21 = vrot.slane %v4765_v2, %v10945_v55 }
 0x84c   : > { %v9694_v51 = vpack.c.bf16 %v9927_v44, %v9926_v28  ;;  %v4920_v2 = vsel %vm1277_vm1, %v4919_v0, %v4915_v4  ;;  %v4938_v45 = vsel %vm1277_vm1, %v4937_v31, %v4933_v52 }
 0x84d   : > { %v4777_v27 = vpop.xlane.xlu0 %4776  ;;  %v9935_v41 = vpop.permute.xlu1 %9934  ;;  %v4929_v43 = vsel %vm1277_vm1, %v4928_v36, %v4924_v21 }
 0x84e   : > { %v9937_v15 = vunpack.i.h.bf16 %v9935_v41  ;;  %v9936_v35 = vunpack.i.l.bf16 %v9935_v41  ;;  %9465 = vmatmul.mubr.msk.f32.vlgmr.msra.gmra.mrb[34].mxu0 %vm360_vm0, %v13135_v33  ;;  %9695 = vmatprep.subr.bf16.mxu0 %v9694_v51  ;;  %v4942_v16 = vrot.slane %v4777_v27, %v10945_v55 }
 0x84f   : > { %9697 = vmatpush3.bf16.msra.mxu0 %v9694_v51  ;;  %9478 = vmatprep.mubr.msk.f32.mxu0 %vm360_vm0, %v13265_v18  ;;  %v4910_v18 = vrot.slane %v13493_v3, %v10953_v17  ;;  %v4946_v3 = vrot.slane %v13503_v6, %v10953_v17  ;;  %v4964_v6 = vrot.slane %v13529_v50, %v10953_v17 }
 0x850   : > { %v9702_v30 = vpack.c.bf16 %v9937_v15, %v9936_v35 }
 0x851   : > { %v4783_v23 = vpop.xlane.xlu0 %4782  ;;  %v9945_v26 = vpop.permute.xlu1 %9944  ;;  %v4911_v9 = vsel %vm1277_vm1, %v4910_v18, %v4906_v47  ;;  %v4947_v51 = vsel %vm1277_vm1, %v4946_v3, %v4942_v16 }
 0x852   : > { %v9947_v33 = vunpack.i.h.bf16 %v9945_v26  ;;  %v9946_v14 = vunpack.i.l.bf16 %v9945_v26  ;;  %9479 = vmatmul.mubr.msk.f32.vlgmr.msra.gmra.mrb[36].mxu0 %vm360_vm0, %v13172_v37  ;;  %9703 = vmatprep.subr.bf16.mxu0 %v9702_v30  ;;  %v4951_v37 = vrot.slane %v4783_v23, %v10945_v55  ;;  %v4982_v62 = vsel %vm1414_vm4, %v4920_v2, %v4911_v9 }
 0x853   : > { %9705 = vmatpush3.bf16.msra.mxu0 %v9702_v30  ;;  %9492 = vmatprep.mubr.msk.f32.mxu0 %vm360_vm0, %v13283_v40  ;;  %v4983_v27 = vsel %vm1415_vm5, %v4929_v43, %v4982_v62 }
 0x854   : > { %v9710_v46 = vpack.c.bf16 %v9947_v33, %v9946_v14  ;;  %v4956_v41 = vsel %vm1277_vm1, %v4955_v59, %v4951_v37  ;;  %v4984_v35 = vsel %vm1417_vm6, %v4938_v45, %v4983_v27 }
 0x855   : > { %v4789_v13 = vpop.xlane.xlu0 %4788  ;;  %v9955_v40 = vpop.permute.xlu1 %9954  ;;  %v4985_v47 = vsel %vm1419_vm7, %v4947_v51, %v4984_v35 }
 0x856   : > { %v4960_v10 = vrot.slane %v4789_v13, %v10945_v55  ;;  %v9957_v44 = vunpack.i.h.bf16 %v9955_v40  ;;  %v9956_v28 = vunpack.i.l.bf16 %v9955_v40  ;;  %9493 = vmatmul.mubr.msk.f32.vlgmr.msra.gmra.mrb[38].mxu0 %vm360_vm0, %v13200_v25  ;;  %9711 = vmatprep.subr.bf16.mxu0 %v9710_v46  ;;  %v4973_v25 = vrot.slane %v13537_v63, %v10953_v17 }
 0x857   : > { %9713 = vmatpush3.bf16.msra.mxu0 %v9710_v46  ;;  %9506 = vmatprep.mubr.msk.f32.mxu0 %vm360_vm0, %v13303_v12  ;;  %v4986_v26 = vsel %vm1421_vm8, %v4956_v41, %v4985_v47 }
 0x858   : > { %v9718_v15 = vpack.c.bf16 %v9957_v44, %v9956_v28  ;;  %v4965_v50 = vsel %vm1277_vm1, %v4964_v6, %v4960_v10 }
 0x859   : > { %v4795_v4 = vpop.xlane.xlu0 %4794  ;;  %v9965_v30 = vpop.permute.xlu1 %9964  ;;  %v4987_v0 = vsel %vm1423_vm9, %v4965_v50, %v4986_v26 }
 0x85a   : > { %v4969_v21 = vrot.slane %v4795_v4, %v10945_v55  ;;  %v9967_v23 = vunpack.i.h.bf16 %v9965_v30  ;;  %v9966_v12 = vunpack.i.l.bf16 %v9965_v30  ;;  %9507 = vmatmul.mubr.msk.f32.vlgmr.msra.gmra.mrb[40].mxu0 %vm360_vm0, %v13233_v61  ;;  %9719 = vmatprep.subr.bf16.mxu0 %v9718_v15 }
 0x85b   : > { %9721 = vmatpush3.bf16.msra.mxu0 %v9718_v15  ;;  %9520 = vmatprep.mubr.msk.f32.mxu0 %vm360_vm0, %v13319_v32 }
 0x85c   : > { %v4974_v63 = vsel %vm1277_vm1, %v4973_v25, %v4969_v21  ;;  %v9726_v52 = vpack.c.bf16 %v9967_v23, %v9966_v12 }
 0x85d   : > { %v9910_v33 = vpop.permute.xlu0 %9909  ;;  %v9975_v14 = vpop.permute.xlu1 %9974  ;;  %v4988_v18 = vsel %vm1425_vm10, %v4974_v63, %v4987_v0  ;;  %v15225_v0 = vld [vmem:[#allocation140_spill] sm:$0xff] }
 0x85e   : > { %v9912_v36 = vunpack.i.h.bf16 %v9910_v33  ;;  %v9911_v16 = vunpack.i.l.bf16 %v9910_v33  ;;  %v9977_v31 = vunpack.i.h.bf16 %v9975_v14  ;;  %v9976_v61 = vunpack.i.l.bf16 %v9975_v14  ;;  %4992 = vxpose.xlu0.b32.end [2/2] (short) (narrow) %v4988_v18, 16  ;;  %9521 = vmatmul.mubr.msk.f32.vlgmr.msra.gmra.mrb[42].mxu0 %vm360_vm0, %v13248_v54  ;;  %v15226_v33 = vld [vmem:[#allocation112_spill] sm:$0xff] }
 0x85f   : > { %9727 = vmatprep.subr.bf16.mxu0 %v9726_v52  ;;  %9534 = vmatprep.mubr.msk.f32.mxu0 %vm360_vm0, %v13330_v20 }
 0x860   : > { %9729 = vmatpush3.bf16.msra.mxu0 %v9726_v52  ;;  %v9682_v32 = vpack.c.bf16 %v9912_v36, %v9911_v16  ;;  %v9734_v2 = vpack.c.bf16 %v9977_v31, %v9976_v61  ;;  %v15227_v16 = vld [vmem:[#allocation222_spill] sm:$0xff] }
 0x861   : > { %v9920_v37 = vpop.permute.xlu0 %9919  ;;  %v9985_v46 = vpop.permute.xlu1 %9984 }
 0x862   : > { %v9922_v3 = vunpack.i.h.bf16 %v9920_v37  ;;  %v9921_v59 = vunpack.i.l.bf16 %v9920_v37  ;;  %v9987_v9 = vunpack.i.h.bf16 %v9985_v46  ;;  %v9986_v43 = vunpack.i.l.bf16 %v9985_v46  ;;  %9683 = vmatprep.subr.bf16.mxu1 %v9682_v32  ;;  %9735 = vmatprep.subr.bf16.mxu0 %v9734_v2  ;;  %v15230_v37 = vld [vmem:[#allocation132_spill] sm:$0xff] }
 0x863   : > { %9535 = vmatmul.mubr.msk.f32.vlgmr.msra.gmra.mrb[44].mxu0 %vm360_vm0, %v13268_v34  ;;  %9685 = vmatpush3.bf16.msra.mxu1 %v9682_v32  ;;  %v15229_v32 = vld [vmem:[#allocation143_spill] sm:$0xff] }
 0x864   : > { %v9742_v54 = vpack.c.bf16 %v9987_v9, %v9986_v43  ;;  %9737 = vmatpush3.bf16.msra.mxu0 %v9734_v2  ;;  %9548 = vmatprep.mubr.msk.f32.mxu0 %vm360_vm0, %v13345_v48  ;;  %v9690_v20 = vpack.c.bf16 %v9922_v3, %v9921_v59  ;;  %v15231_v59 = vld [vmem:[#allocation130_spill] sm:$0xff]  ;;  %v15232_v9 = vld [vmem:[#allocation100_spill] sm:$0xff] }
 0x865   : > { %v9930_v13 = vpop.permute.xlu0 %9929  ;;  %v9995_v40 = vpop.permute.xlu1 %9994 }
 0x866   : > { %v9932_v45 = vunpack.i.h.bf16 %v9930_v13  ;;  %v9931_v10 = vunpack.i.l.bf16 %v9930_v13  ;;  %v9997_v44 = vunpack.i.h.bf16 %v9995_v40  ;;  %v9996_v28 = vunpack.i.l.bf16 %v9995_v40  ;;  %9458 = vmatmul.mubr.msk.f32.vlgmr.msra.gmra.mrb[32].mxu1 %vm360_vm0, %v13114_v8  ;;  %9691 = vmatprep.subr.bf16.mxu1 %v9690_v20  ;;  %v15234_v13 = vld [vmem:[#allocation221_spill] sm:$0xff] }
 0x867   : > { %9549 = vmatmul.mubr.msk.f32.vlgmr.msra.gmra.mrb[46].mxu0 %vm360_vm0, %v13286_v58  ;;  %9743 = vmatprep.subr.bf16.mxu0 %v9742_v54 }
 0x868   : > { %9693 = vmatpush3.bf16.msra.mxu1 %v9690_v20  ;;  %9471 = vmatprep.mubr.msk.f32.mxu1 %vm360_vm0, %v13254_v60  ;;  %v9698_v48 = vpack.c.bf16 %v9932_v45, %v9931_v10  ;;  %v9750_v34 = vpack.c.bf16 %v9997_v44, %v9996_v28  ;;  %v15235_v10 = vld [vmem:[#allocation224_spill] sm:$0xff]  ;;  %v15236_v44 = vld [vmem:[#allocation214_spill] sm:$0xff] }
 0x869   : > { %9745 = vmatpush3.bf16.msra.mxu0 %v9742_v54  ;;  %9562 = vmatprep.mubr.msk.f32.mxu0 %vm360_vm0, %v13060_v22  ;;  %v9940_v6 = vpop.permute.xlu0 %9939  ;;  %v10005_v62 = vpop.permute.xlu1 %10004  ;;  %v15233_v54 = vld [vmem:[#allocation227_spill] sm:$0xff] }
 0x86a   : > { %v9942_v51 = vunpack.i.h.bf16 %v9940_v6  ;;  %v9941_v27 = vunpack.i.l.bf16 %v9940_v6  ;;  %v10007_v8 = vunpack.i.h.bf16 %v10005_v62  ;;  %v10006_v41 = vunpack.i.l.bf16 %v10005_v62  ;;  %9699 = vmatprep.subr.bf16.mxu1 %v9698_v48  ;;  %9751 = vmatprep.subr.bf16.mxu0 %v9750_v34 }
 0x86b   : > { %9472 = vmatmul.mubr.msk.f32.vlgmr.msra.gmra.mrb[34].mxu1 %vm360_vm0, %v13153_v19 }
 0x86c   : > { %9563 = vmatmul.mubr.msk.f32.vlgmr.msra.gmra.mrb[48].mxu0 %vm360_vm0, %v12965_v49  ;;  %9701 = vmatpush3.bf16.msra.mxu1 %v9698_v48  ;;  %v9706_v60 = vpack.c.bf16 %v9942_v51, %v9941_v27  ;;  %v9758_v58 = vpack.c.bf16 %v10007_v8, %v10006_v41  ;;  %v15237_v48 = vld [vmem:[#allocation217_spill] sm:$0xff]  ;;  %v15239_v27 = vld [vmem:[#allocation126_spill] sm:$0xff]  ;;  %v15240_v8 = vld [vmem:[#allocation84_spill] sm:$0xff] }
 0x86d   : > { %9485 = vmatprep.mubr.msk.f32.mxu1 %vm360_vm0, %v13274_v39  ;;  %9753 = vmatpush3.bf16.msra.mxu0 %v9750_v34  ;;  %v9950_v22 = vpop.permute.xlu0 %9949  ;;  %v10015_v15 = vpop.permute.xlu1 %10014  ;;  %v15238_v34 = vld [vmem:[#allocation135_spill] sm:$0xff] }
 0x86e   : > { %9576 = vmatprep.mubr.msk.f32.mxu0 %vm360_vm0, %v13089_v7  ;;  %v9952_v25 = vunpack.i.h.bf16 %v9950_v22  ;;  %v9951_v35 = vunpack.i.l.bf16 %v9950_v22  ;;  %v10017_v50 = vunpack.i.h.bf16 %v10015_v15  ;;  %v10016_v4 = vunpack.i.l.bf16 %v10015_v15  ;;  %9707 = vmatprep.subr.bf16.mxu1 %v9706_v60  ;;  %v15241_v15 = vld [vmem:[#allocation209_spill] sm:$0xff] }
 0x86f   : > { %9486 = vmatmul.mubr.msk.f32.vlgmr.msra.gmra.mrb[36].mxu1 %vm360_vm0, %v13184_v24  ;;  %9759 = vmatprep.subr.bf16.mxu0 %v9758_v58 }
 0x870   : > { %9577 = vmatmul.mubr.msk.f32.vlgmr.msra.gmra.mrb[50].mxu0 %vm360_vm0, %v12971_v29  ;;  %9709 = vmatpush3.bf16.msra.mxu1 %v9706_v60  ;;  %v9714_v49 = vpack.c.bf16 %v9952_v25, %v9951_v35  ;;  %v9766_v19 = vpack.c.bf16 %v10017_v50, %v10016_v4  ;;  %v15242_v25 = vld [vmem:[#allocation219_spill] sm:$0xff] }
 0x871   : > { %9499 = vmatprep.mubr.msk.f32.mxu1 %vm360_vm0, %v13294_v42  ;;  %9761 = vmatpush3.bf16.msra.mxu0 %v9758_v58  ;;  %v9960_v7 = vpop.permute.xlu0 %9959  ;;  %v10025_v39 = vpop.permute.xlu1 %10024 }
 0x872   : > { %9590 = vmatprep.mubr.msk.f32.mxu0 %vm360_vm0, %v13112_v56  ;;  %v9962_v30 = vunpack.i.h.bf16 %v9960_v7  ;;  %v9961_v47 = vunpack.i.l.bf16 %v9960_v7  ;;  %v10027_v21 = vunpack.i.h.bf16 %v10025_v39  ;;  %v10026_v24 = vunpack.i.l.bf16 %v10025_v39  ;;  %9715 = vmatprep.subr.bf16.mxu1 %v9714_v49  ;;  %v15244_v7 = vld [vmem:[#allocation129_spill] sm:$0xff] }
 0x873   : > { %9500 = vmatmul.mubr.msk.f32.vlgmr.msra.gmra.mrb[38].mxu1 %vm360_vm0, %v13219_v5  ;;  %9767 = vmatprep.subr.bf16.mxu0 %v9766_v19 }
 0x874   : > { %9591 = vmatmul.mubr.msk.f32.vlgmr.msra.gmra.mrb[52].mxu0 %vm360_vm0, %v12983_v38  ;;  %9717 = vmatpush3.bf16.msra.mxu1 %v9714_v49  ;;  %v9722_v29 = vpack.c.bf16 %v9962_v30, %v9961_v47  ;;  %v9774_v42 = vpack.c.bf16 %v10027_v21, %v10026_v24  ;;  %v15245_v24 = vld [vmem:[#allocation216_spill] sm:$0xff] }
 0x875   : > { %9513 = vmatprep.mubr.msk.f32.mxu1 %vm360_vm0, %v13312_v1  ;;  %9769 = vmatpush3.bf16.msra.mxu0 %v9766_v19  ;;  %v9970_v56 = vpop.permute.xlu0 %9969  ;;  %v10035_v23 = vpop.permute.xlu1 %10034  ;;  %v15243_v19 = vld [vmem:[#allocation81_spill] sm:$0xff] }
 0x876   : > { %9604 = vmatprep.mubr.msk.f32.mxu0 %vm360_vm0, %v13131_v57  ;;  %v9972_v12 = vunpack.i.h.bf16 %v9970_v56  ;;  %v9971_v26 = vunpack.i.l.bf16 %v9970_v56  ;;  %v10037_v63 = vunpack.i.h.bf16 %v10035_v23  ;;  %v10036_v5 = vunpack.i.l.bf16 %v10035_v23  ;;  %9723 = vmatprep.subr.bf16.mxu1 %v9722_v29 }
 0x877   : > { %9514 = vmatmul.mubr.msk.f32.vlgmr.msra.gmra.mrb[40].mxu1 %vm360_vm0, %v13237_v11  ;;  %9775 = vmatprep.subr.bf16.mxu0 %v9774_v42 }
 0x878   : > { %9605 = vmatmul.mubr.msk.f32.vlgmr.msra.gmra.mrb[54].mxu0 %vm360_vm0, %v12997_v53  ;;  %9725 = vmatpush3.bf16.msra.mxu1 %v9722_v29  ;;  %v9730_v38 = vpack.c.bf16 %v9972_v12, %v9971_v26  ;;  %v9782_v1 = vpack.c.bf16 %v10037_v63, %v10036_v5  ;;  %v15228_v53 = vld [vmem:[#allocation208_spill] sm:$0xff]  ;;  %v15248_v63 = vld [vmem:[#allocation127_spill] sm:$0xff] }
 0x879   : > { %9527 = vmatprep.mubr.msk.f32.mxu1 %vm360_vm0, %v15225_v0  ;;  %9777 = vmatpush3.bf16.msra.mxu0 %v9774_v42  ;;  %v9980_v57 = vpop.permute.xlu0 %9979  ;;  %v10045_v52 = vpop.permute.xlu1 %10044  ;;  %v15246_v29 = vld [vmem:[#allocation220_spill] sm:$0xff]  ;;  %v15251_v0 = vld [vmem:[#allocation213_spill] sm:$0xff] }
 0x87a   : > { %9618 = vmatprep.mubr.msk.f32.mxu0 %vm360_vm0, %v15226_v33  ;;  %v9982_v14 = vunpack.i.h.bf16 %v9980_v57  ;;  %v9981_v18 = vunpack.i.l.bf16 %v9980_v57  ;;  %v10047_v36 = vunpack.i.h.bf16 %v10045_v52  ;;  %v10046_v11 = vunpack.i.l.bf16 %v10045_v52  ;;  %9731 = vmatprep.subr.bf16.mxu1 %v9730_v38  ;;  %v15247_v26 = vld [vmem:[#allocation212_spill] sm:$0xff]  ;;  %v15253_v33 = vld [vmem:[#allocation119_spill] sm:$0xff] }
 0x87b   : > { %9528 = vmatmul.mubr.msk.f32.vlgmr.msra.gmra.mrb[42].mxu1 %vm360_vm0, %v15227_v16  ;;  %9783 = vmatprep.subr.bf16.mxu0 %v9782_v1  ;;  %v15252_v57 = vld [vmem:[#allocation144_spill] sm:$0xff] }
 0x87c   : > { %9619 = vmatmul.mubr.msk.f32.vlgmr.msra.gmra.mrb[56].mxu0 %vm360_vm0, %v15228_v53  ;;  %9733 = vmatpush3.bf16.msra.mxu1 %v9730_v38  ;;  %v9738_v31 = vpack.c.bf16 %v9982_v14, %v9981_v18  ;;  %v9790_v61 = vpack.c.bf16 %v10047_v36, %v10046_v11  ;;  %v15249_v38 = vld [vmem:[#allocation211_spill] sm:$0xff]  ;;  %v15255_v16 = vld [vmem:[#allocation124_spill] sm:$0xff] }
 0x87d   : > { %9541 = vmatprep.mubr.msk.f32.mxu1 %vm360_vm0, %v15229_v32  ;;  %9785 = vmatpush3.bf16.msra.mxu0 %v9782_v1  ;;  %v9990_v2 = vpop.permute.xlu0 %9989  ;;  %v15250_v1 = vld [vmem:[#allocation82_spill] sm:$0xff]  ;;  %v15254_v18 = vld [vmem:[#allocation107_spill] sm:$0xff]  ;;  %v15257_v32 = vld [vmem:[#allocation104_spill] sm:$0xff] }
 0x87e   : > { %9632 = vmatprep.mubr.msk.f32.mxu0 %vm360_vm0, %v15230_v37  ;;  %v9992_v46 = vunpack.i.h.bf16 %v9990_v2  ;;  %v9991_v3 = vunpack.i.l.bf16 %v9990_v2  ;;  %9739 = vmatprep.subr.bf16.mxu1 %v9738_v31 }
 0x87f   : > { %9542 = vmatmul.mubr.msk.f32.vlgmr.msra.gmra.mrb[44].mxu1 %vm360_vm0, %v15231_v59  ;;  %9791 = vmatprep.subr.bf16.mxu0 %v9790_v61 }
 0x880   : > { %9633 = vmatmul.mubr.msk.f32.vlgmr.msra.gmra.mrb[58].mxu0 %vm360_vm0, %v15232_v9  ;;  %9741 = vmatpush3.bf16.msra.mxu1 %v9738_v31  ;;  %v9746_v43 = vpack.c.bf16 %v9992_v46, %v9991_v3  ;;  %v15256_v31 = vld [vmem:[#allocation101_spill] sm:$0xff]  ;;  %v15259_v9 = vld [vmem:[#allocation138_spill] sm:$0xff] }
 0x881   : > { %9555 = vmatprep.mubr.msk.f32.mxu1 %vm360_vm0, %v15233_v54  ;;  %9793 = vmatpush3.bf16.msra.mxu0 %v9790_v61  ;;  %v10000_v20 = vpop.permute.xlu0 %9999  ;;  %v15258_v46 = vld [vmem:[#allocation141_spill] sm:$0xff]  ;;  %v15260_v54 = vld [vmem:[#allocation155_spill] sm:$0xff] }
 0x882   : > { %9646 = vmatprep.mubr.msk.f32.mxu0 %vm360_vm0, %v15234_v13  ;;  %v10002_v40 = vunpack.i.h.bf16 %v10000_v20  ;;  %v10001_v45 = vunpack.i.l.bf16 %v10000_v20  ;;  %9747 = vmatprep.subr.bf16.mxu1 %v9746_v43 }
 0x883   : > { %9556 = vmatmul.mubr.msk.f32.vlgmr.msra.gmra.mrb[46].mxu1 %vm360_vm0, %v15235_v10 }
 0x884   : > { %9647 = vmatmul.mubr.msk.f32.vlgmr.msra.gmra.mrb[60].mxu0 %vm360_vm0, %v15236_v44  ;;  %9749 = vmatpush3.bf16.msra.mxu1 %v9746_v43  ;;  %v9754_v28 = vpack.c.bf16 %v10002_v40, %v10001_v45  ;;  %v15261_v40 = vld [vmem:[#allocation153_spill] sm:$0xff]  ;;  %v15262_v45 = vld [vmem:[#allocation79_spill] sm:$0xff] }
 0x885   : > { %9569 = vmatprep.mubr.msk.f32.mxu1 %vm360_vm0, %v15237_v48  ;;  %9660 = vmatprep.mubr.msk.f32.mxu0 %vm360_vm0, %v15238_v34  ;;  %v10010_v6 = vpop.permute.xlu0 %10009  ;;  %v10058_v10 = vpack.i.bf16 %v15262_v45, %v15261_v40 }
 0x886   : > { %v10012_v62 = vunpack.i.h.bf16 %v10010_v6  ;;  %v10011_v51 = vunpack.i.l.bf16 %v10010_v6  ;;  %9755 = vmatprep.subr.bf16.mxu1 %v9754_v28 }
 0x887   : > { %9570 = vmatmul.mubr.msk.f32.vlgmr.msra.gmra.mrb[48].mxu1 %vm360_vm0, %v15239_v27 }
 0x888   : > { %9757 = vmatpush3.bf16.msra.mxu1 %v9754_v28  ;;  %9583 = vmatprep.mubr.msk.f32.mxu1 %vm360_vm0, %v15240_v8  ;;  %v9762_v41 = vpack.c.bf16 %v10012_v62, %v10011_v51 }
 0x889   : > { %v10020_v60 = vpop.permute.xlu0 %10019 }
 0x88a   : > { %v10022_v58 = vunpack.i.h.bf16 %v10020_v60  ;;  %v10021_v22 = vunpack.i.l.bf16 %v10020_v60  ;;  %9763 = vmatprep.subr.bf16.mxu1 %v9762_v41 }
 0x88b   : > { %9584 = vmatmul.mubr.msk.f32.vlgmr.msra.gmra.mrb[50].mxu1 %vm360_vm0, %v15241_v15 }
 0x88c   : > { %9765 = vmatpush3.bf16.msra.mxu1 %v9762_v41  ;;  %9597 = vmatprep.mubr.msk.f32.mxu1 %vm360_vm0, %v15242_v25  ;;  %v9770_v35 = vpack.c.bf16 %v10022_v58, %v10021_v22 }
 0x88d   : > { %v10030_v50 = vpop.permute.xlu0 %10029 }
 0x88e   : > { %v10032_v4 = vunpack.i.h.bf16 %v10030_v50  ;;  %v10031_v49 = vunpack.i.l.bf16 %v10030_v50  ;;  %9771 = vmatprep.subr.bf16.mxu1 %v9770_v35 }
 0x88f   : > { %9598 = vmatmul.mubr.msk.f32.vlgmr.msra.gmra.mrb[52].mxu1 %vm360_vm0, %v15243_v19 }
 0x890   : > { %9773 = vmatpush3.bf16.msra.mxu1 %v9770_v35  ;;  %9611 = vmatprep.mubr.msk.f32.mxu1 %vm360_vm0, %v15244_v7  ;;  %v9778_v39 = vpack.c.bf16 %v10032_v4, %v10031_v49 }
 0x891   : > { %v10040_v30 = vpop.permute.xlu0 %10039 }
 0x892   : > { %v10042_v47 = vunpack.i.h.bf16 %v10040_v30  ;;  %v10041_v21 = vunpack.i.l.bf16 %v10040_v30  ;;  %9779 = vmatprep.subr.bf16.mxu1 %v9778_v39 }
 0x893   : > { %9612 = vmatmul.mubr.msk.f32.vlgmr.msra.gmra.mrb[54].mxu1 %vm360_vm0, %v15245_v24 }
 0x894   : > { %9781 = vmatpush3.bf16.msra.mxu1 %v9778_v39  ;;  %9625 = vmatprep.mubr.msk.f32.mxu1 %vm360_vm0, %v15246_v29  ;;  %v9786_v42 = vpack.c.bf16 %v10042_v47, %v10041_v21  ;;  %v15283_v29 = vld [vmem:[#allocation52_spill] sm:$0xff] }
 0x895   : > { %v10050_v56 = vpop.permute.xlu0 %10049 }
 0x896   : > { %v10052_v23 = vunpack.i.h.bf16 %v10050_v56  ;;  %v10051_v12 = vunpack.i.l.bf16 %v10050_v56  ;;  %9787 = vmatprep.subr.bf16.mxu1 %v9786_v42 }
 0x897   : > { %9626 = vmatmul.mubr.msk.f32.vlgmr.msra.gmra.mrb[56].mxu1 %vm360_vm0, %v15247_v26 }
 0x898   : > { %9789 = vmatpush3.bf16.msra.mxu1 %v9786_v42  ;;  %9639 = vmatprep.mubr.msk.f32.mxu1 %vm360_vm0, %v15248_v63  ;;  %v9794_v5 = vpack.c.bf16 %v10052_v23, %v10051_v12  ;;  %v15284_v42 = vld [vmem:[#allocation77_spill] sm:$0xff] }
 0x899   : > { %v10053_v56 = vpack.i.bf16 %v15284_v42, %v15283_v29 }
 0x89a   : > { %9795 = vmatprep.subr.bf16.mxu1 %v9794_v5 }
 0x89b   : > { %9640 = vmatmul.mubr.msk.f32.vlgmr.msra.gmra.mrb[58].mxu1 %vm360_vm0, %v15249_v38 }
 0x89c   : > { %9797 = vmatpush3.bf16.msra.mxu1 %v9794_v5  ;;  %9653 = vmatprep.mubr.msk.f32.mxu1 %vm360_vm0, %v15250_v1 }
 0x89f   : > { %9654 = vmatmul.mubr.msk.f32.vlgmr.msra.gmra.mrb[60].mxu1 %vm360_vm0, %v15251_v0 }
 0x8a0   : > { %9667 = vmatprep.mubr.msk.f32.mxu1 %vm360_vm0, %v15252_v57 }
 0x8da   : > { %v5007_v52 = vpop.trf.xlu0 }
 0x8db   : > { %v5072_v14 = vrot.slane %v5007_v52, %v15253_v33  ;;  %v5028_v36 = vrot.slane %v5007_v52, %v15254_v18  ;;  %v5039_v2 = vrot.slane %v5007_v52, %v15257_v32  ;;  %v5050_v59 = vrot.slane %v5007_v52, %v15255_v16 }
 0x8dc   : > { %v5061_v13 = vrot.slane %v5007_v52, %v15256_v31  ;;  %v5083_v44 = vrot.slane %v5007_v52, %v15258_v46  ;;  %v5094_v28 = vrot.slane %v5007_v52, %v15259_v9  ;;  %v5105_v48 = vrot.slane %v5007_v52, %v15260_v54 }
 0x8dd   : > { %5078 = vbcast.lane.b32.xlu0 %v5072_v14, 264  ;;  %5030 = vbcast.lane.b32.xlu1 %v5028_v36, 256 }
 0x8de   : > { %v5008_v11 = vpop.trf.xlu0 }
 0x8df   : > { %v5138_v53 = vrot.slane %v5008_v11, %v15255_v16  ;;  %v5149_v61 = vrot.slane %v5008_v11, %v15256_v31  ;;  %v5160_v37 = vrot.slane %v5008_v11, %v15253_v33  ;;  %v5171_v3 = vrot.slane %v5008_v11, %v15258_v46 }
 0x8e0   : > { %v5182_v43 = vrot.slane %v5008_v11, %v15259_v9  ;;  %v5193_v20 = vrot.slane %v5008_v11, %v15260_v54  ;;  %v5116_v34 = vrot.slane %v5008_v11, %v15254_v18  ;;  %v5127_v51 = vrot.slane %v5008_v11, %v15257_v32  ;;  %v15310_v32 = vld [vmem:[#allocation225_spill] sm:$0xff] }
 0x8e1   : > { %5034 = vbcast.lane.b32.xlu1 %v5028_v36, 264  ;;  %5144 = vbcast.lane.b32.xlu0 %v5138_v53, 264 }
 0x8e5   : > { %5041 = vbcast.lane.b32.xlu1 %v5039_v2, 256  ;;  %5155 = vbcast.lane.b32.xlu0 %v5149_v61, 264 }
 0x8e9   : > { %5045 = vbcast.lane.b32.xlu1 %v5039_v2, 264  ;;  %5166 = vbcast.lane.b32.xlu0 %v5160_v37, 264 }
 0x8ed   : > { %5052 = vbcast.lane.b32.xlu1 %v5050_v59, 256  ;;  %5177 = vbcast.lane.b32.xlu0 %v5171_v3, 264 }
 0x8f1   : > { %5056 = vbcast.lane.b32.xlu1 %v5050_v59, 264  ;;  %5188 = vbcast.lane.b32.xlu0 %v5182_v43, 264 }
 0x8f5   : > { %5063 = vbcast.lane.b32.xlu1 %v5061_v13, 256  ;;  %5199 = vbcast.lane.b32.xlu0 %v5193_v20, 264 }
 0x8f9   : > { %5067 = vbcast.lane.b32.xlu1 %v5061_v13, 264  ;;  %10059 = vrot.lane.b32.xlu0 %v10058_v10, %s10269_s13 }
 0x8fd   : > { %5074 = vbcast.lane.b32.xlu1 %v5072_v14, 256 }
 0x901   : > { %5085 = vbcast.lane.b32.xlu1 %v5083_v44, 256 }
 0x905   : > { %5089 = vbcast.lane.b32.xlu1 %v5083_v44, 264 }
 0x909   : > { %5096 = vbcast.lane.b32.xlu1 %v5094_v28, 256 }
 0x90d   : > { %5100 = vbcast.lane.b32.xlu1 %v5094_v28, 264 }
 0x911   : > { %5107 = vbcast.lane.b32.xlu1 %v5105_v48, 256 }
 0x915   : > { %5111 = vbcast.lane.b32.xlu1 %v5105_v48, 264  ;;  %v15296_v48 = vld [vmem:[#allocation137_spill] sm:$0xff] }
 0x919   : > { %5118 = vbcast.lane.b32.xlu1 %v5116_v34, 256 }
 0x91d   : > { %5122 = vbcast.lane.b32.xlu1 %v5116_v34, 264  ;;  %v13717_v6 = vpop.f32.mrb[32].mxu0 }
 0x91e   : > { %15263 = vst [vmem:[#allocation182_spill] sm:$0xff] %v13717_v6  ;;  %v13719_v62 = vpop.f32.mrb[33].mxu0  ;;  %v15305_v6 = vld [vmem:[#allocation85_spill] sm:$0xff] }
 0x91f   : > { %15264 = vst [vmem:[#allocation184_spill] sm:$0xff] %v13719_v62 }
 0x921   : > { %5129 = vbcast.lane.b32.xlu1 %v5127_v51, 256  ;;  %v13722_v27 = vpop.f32.mrb[34].mxu0 }
 0x922   : > { %15265 = vst [vmem:[#allocation186_spill] sm:$0xff] %v13722_v27  ;;  %v13724_v8 = vpop.f32.mrb[35].mxu0 }
 0x923   : > { %15266 = vst [vmem:[#allocation188_spill] sm:$0xff] %v13724_v8  ;;  %v15303_v8 = vld [vmem:[#allocation226_spill] sm:$0xff] }
 0x925   : > { %5133 = vbcast.lane.b32.xlu1 %v5127_v51, 264  ;;  %v13726_v41 = vpop.f32.mrb[36].mxu0 }
 0x926   : > { %15267 = vst [vmem:[#allocation190_spill] sm:$0xff] %v13726_v41  ;;  %v13728_v60 = vpop.f32.mrb[37].mxu0 }
 0x927   : > { %15268 = vst [vmem:[#allocation191_spill] sm:$0xff] %v13728_v60 }
 0x929   : > { %5140 = vbcast.lane.b32.xlu1 %v5138_v53, 256  ;;  %v13730_v58 = vpop.f32.mrb[38].mxu0 }
 0x92a   : > { %15269 = vst [vmem:[#allocation193_spill] sm:$0xff] %v13730_v58  ;;  %v13732_v22 = vpop.f32.mrb[39].mxu0  ;;  %v13833_v58 = vstv %s289_s14 }
 0x92b   : > { %15270 = vst [vmem:[#allocation195_spill] sm:$0xff] %v13732_v22 }
 0x92d   : > { %5151 = vbcast.lane.b32.xlu1 %v5149_v61, 256  ;;  %v13734_v15 = vpop.f32.mrb[40].mxu0 }
 0x92e   : > { %15271 = vst [vmem:[#allocation197_spill] sm:$0xff] %v13734_v15  ;;  %v13736_v25 = vpop.f32.mrb[41].mxu0 }
 0x92f   : > { %15272 = vst [vmem:[#allocation199_spill] sm:$0xff] %v13736_v25 }
 0x931   : > { %5162 = vbcast.lane.b32.xlu1 %v5160_v37, 256  ;;  %v13738_v35 = vpop.f32.mrb[42].mxu0 }
 0x932   : > { %15273 = vst [vmem:[#allocation200_spill] sm:$0xff] %v13738_v35  ;;  %v13740_v50 = vpop.f32.mrb[43].mxu0  ;;  %v15300_v35 = vld [vmem:[#allocation149_spill] sm:$0xff] }
 0x933   : > { %15274 = vst [vmem:[#allocation202_spill] sm:$0xff] %v13740_v50 }
 0x935   : > { %5173 = vbcast.lane.b32.xlu1 %v5171_v3, 256 }
 0x936   : > { %v13742_v4 = vpop.f32.mrb[44].mxu0 }
 0x937   : > { %15275 = vst [vmem:[#allocation204_spill] sm:$0xff] %v13742_v4  ;;  %v13744_v49 = vpop.f32.mrb[45].mxu0 }
 0x938   : > { %15276 = vst [vmem:[#allocation206_spill] sm:$0xff] %v13744_v49 }
 0x939   : > { %v13746_v19 = vpop.f32.mrb[32].mxu1  ;;  %5184 = vbcast.lane.b32.xlu1 %v5182_v43, 256  ;;  %v15293_v43 = vld [vmem:[#allocation148_spill] sm:$0xff] }
 0x93a   : > { %15277 = vst [vmem:[#allocation111_spill] sm:$0xff] %v13746_v19  ;;  %v13748_v7 = vpop.f32.mrb[46].mxu0  ;;  %v13750_v39 = vpop.f32.mrb[33].mxu1 }
 0x93b   : > { %15278 = vst [vmem:[#allocation173_spill] sm:$0xff] %v13748_v7  ;;  %15279 = vst [vmem:[#allocation114_spill] sm:$0xff] %v13750_v39  ;;  %v13752_v30 = vpop.f32.mrb[47].mxu0  ;;  %v15299_v7 = vld [vmem:[#allocation231_spill] sm:$0xff] }
 0x93c   : > { %15280 = vst [vmem:[#allocation175_spill] sm:$0xff] %v13752_v30  ;;  %v15302_v30 = vld [vmem:[#allocation223_spill] sm:$0xff] }
 0x93d   : > { %5195 = vbcast.lane.b32.xlu1 %v5193_v20, 256 }
 0x93e   : > { %v13754_v47 = vpop.f32.mrb[34].mxu1 }
 0x93f   : > { %15281 = vst [vmem:[#allocation116_spill] sm:$0xff] %v13754_v47  ;;  %v13756_v21 = vpop.f32.mrb[48].mxu0  ;;  %v13758_v24 = vpop.f32.mrb[35].mxu1 }
 0x940   : > { %15282 = vst [vmem:[#allocation177_spill] sm:$0xff] %v13758_v24  ;;  %v13762_v23 = vpop.f32.mrb[49].mxu0 }
 0x941   : > { %10054 = vrot.lane.b32.xlu1 %v10053_v56, %s10269_s13 }
 0x942   : > { %v13765_v12 = vpop.f32.mrb[36].mxu1 }
 0x943   : > { %15285 = vst [vmem:[#allocation118_spill] sm:$0xff] %v13765_v12  ;;  %v13767_v26 = vpop.f32.mrb[50].mxu0  ;;  %v13769_v63 = vpop.f32.mrb[37].mxu1  ;;  %v15301_v12 = vld [vmem:[#allocation233_spill] sm:$0xff] }
 0x944   : > { %15286 = vst [vmem:[#allocation179_spill] sm:$0xff] %v13769_v63  ;;  %v13771_v5 = vpop.f32.mrb[51].mxu0 }
 0x946   : > { %v13773_v38 = vpop.f32.mrb[38].mxu1 }
 0x947   : > { %15287 = vst [vmem:[#allocation78_spill] sm:$0xff] %v13773_v38  ;;  %v13775_v1 = vpop.f32.mrb[52].mxu0  ;;  %v13777_v0 = vpop.f32.mrb[39].mxu1 }
 0x948   : > { %15288 = vst [vmem:[#allocation205_spill] sm:$0xff] %v13777_v0  ;;  %v13779_v57 = vpop.f32.mrb[53].mxu0 }
 0x94a   : > { %v13781_v52 = vpop.f32.mrb[40].mxu1 }
 0x94b   : > { %15289 = vst [vmem:[#allocation172_spill] sm:$0xff] %v13781_v52  ;;  %v13783_v14 = vpop.f32.mrb[54].mxu0  ;;  %v13785_v36 = vpop.f32.mrb[41].mxu1 }
 0x94c   : > { %15290 = vst [vmem:[#allocation178_spill] sm:$0xff] %v13785_v36  ;;  %v13787_v11 = vpop.f32.mrb[55].mxu0 }
 0x94e   : > { %v13789_v53 = vpop.f32.mrb[42].mxu1 }
 0x94f   : > { %15291 = vst [vmem:[#allocation75_spill] sm:$0xff] %v13789_v53  ;;  %v13791_v61 = vpop.f32.mrb[56].mxu0  ;;  %v13793_v2 = vpop.f32.mrb[43].mxu1 }
 0x950   : > { %15292 = vst [vmem:[#allocation76_spill] sm:$0xff] %v13793_v2  ;;  %v13795_v37 = vpop.f32.mrb[57].mxu0  ;;  %v5079_v3 = vpop.permute.xlu0 %5078  ;;  %v15304_v2 = vld [vmem:[#allocation151_spill] sm:$0xff] }
 0x951   : > { %v5031_v59 = vpop.permute.xlu1 %5030 }
 0x952   : > { %v5233_v20 = vadd.f32 %v5031_v59, %v15293_v43  ;;  %v13798_v13 = vpop.f32.mrb[44].mxu1 }
 0x953   : > { %15294 = vst [vmem:[#allocation180_spill] sm:$0xff] %v13798_v13  ;;  %v13800_v40 = vpop.f32.mrb[58].mxu0  ;;  %v13802_v45 = vpop.f32.mrb[45].mxu1 }
 0x954   : > { %15295 = vst [vmem:[#allocation194_spill] sm:$0xff] %v13802_v45  ;;  %10191 = vrcp.f32 %v5233_v20  ;;  %v13804_v10 = vpop.f32.mrb[59].mxu0  ;;  %v13806_v44 = vpop.permute.xlu0 %5144 }
 0x955   : > { %v5035_v28 = vpop.permute.xlu1 %5034 }
 0x956   : > { %v5234_v34 = vadd.f32 %v5035_v28, %v15296_v48  ;;  %v13809_v51 = vpop.f32.mrb[46].mxu1 }
 0x957   : > { %15297 = vst [vmem:[#allocation152_spill] sm:$0xff] %v13809_v51  ;;  %v13811_v29 = vpop.f32.mrb[60].mxu0  ;;  %v13813_v42 = vpop.f32.mrb[47].mxu1 }
 0x958   : > { %15298 = vst [vmem:[#allocation164_spill] sm:$0xff] %v13813_v42  ;;  %10193 = vrcp.f32 %v5234_v34  ;;  %v13815_v56 = vpop.f32.mrb[61].mxu0  ;;  %v13817_v59 = vpop.permute.xlu0 %5155 }
 0x959   : > { %v5042_v43 = vpop.permute.xlu1 %5041 }
 0x95a   : > { %v5235_v13 = vadd.f32 %v5042_v43, %v15299_v7  ;;  %v13820_v4 = vpop.f32.mrb[48].mxu1 }
 0x95b   : > { %v13822_v53 = vpop.f32.mrb[49].mxu1 }
 0x95c   : > { %10195 = vrcp.f32 %v5235_v13  ;;  %v13824_v28 = vpop.permute.xlu0 %5166 }
 0x95d   : > { %v5046_v48 = vpop.permute.xlu1 %5045 }
 0x95e   : > { %v10192_v51 = vpop.eup %10191  ;;  %v5236_v52 = vadd.f32 %v5046_v48, %v15300_v35  ;;  %v13827_v36 = vpop.f32.mrb[50].mxu1 }
 0x95f   : > { %v5297_v15 = vmul.f32 %v10192_v51, %v5233_v20  ;;  %v13829_v25 = vpop.f32.mrb[51].mxu1 }
 0x960   : > { %10197 = vrcp.f32 %v5236_v52  ;;  %v13831_v38 = vpop.permute.xlu0 %5177 }
 0x961   : > { %v5329_v7 = vsub.f32 2.0, %v5297_v15  ;;  %v5053_v43 = vpop.permute.xlu1 %5052 }
 0x962   : > { %v10194_v0 = vpop.eup %10193  ;;  %v5237_v63 = vadd.f32 %v5053_v43, %v15301_v12  ;;  %v13836_v41 = vpop.f32.mrb[52].mxu1  ;;  %v5242_v12 = vadd.f32 %v5079_v3, %v15303_v8 }
 0x963   : > { %v5361_v60 = vmul.f32 %v10192_v51, %v5329_v7  ;;  %v5298_v47 = vmul.f32 %v10194_v0, %v5234_v34  ;;  %v13838_v35 = vpop.f32.mrb[53].mxu1 }
 0x964   : > { %10199 = vrcp.f32 %v5237_v63  ;;  %v13840_v20 = vpop.permute.xlu0 %5188 }
 0x965   : > { %v5330_v48 = vsub.f32 2.0, %v5298_v47  ;;  %v5057_v42 = vpop.permute.xlu1 %5056  ;;  %v5394_v24 = vmul.f32 %v13833_v58, %v5361_v60 }
 0x966   : > { %v10196_v15 = vpop.eup %10195  ;;  %v5238_v27 = vadd.f32 %v5057_v42, %v15302_v30  ;;  %v13844_v45 = vpop.f32.mrb[54].mxu1 }
 0x967   : > { %v5362_v43 = vmul.f32 %v10194_v0, %v5330_v48  ;;  %v5299_v49 = vmul.f32 %v10196_v15, %v5235_v13  ;;  %8212 = vperm.xlu1 %9902, %v5394_v24   ;;  %v13847_v34 = vpop.f32.mrb[55].mxu1 }
 0x968   : > { %10201 = vrcp.f32 %v5238_v27  ;;  %v13849_v51 = vpop.permute.xlu0 %5199 }
 0x969   : > { %v5331_v7 = vsub.f32 2.0, %v5299_v49  ;;  %v5064_v47 = vpop.permute.xlu1 %5063  ;;  %v5395_v19 = vmul.f32 %v13833_v58, %v5362_v43  ;;  %10203 = vrcp.f32 %v5242_v12 }
 0x96a   : > { %v10198_v60 = vpop.eup %10197  ;;  %v5239_v39 = vadd.f32 %v5064_v47, %v15304_v2  ;;  %v13853_v30 = vpop.f32.mrb[56].mxu1 }
 0x96b   : > { %v5363_v42 = vmul.f32 %v10196_v15, %v5331_v7  ;;  %v5300_v8 = vmul.f32 %v10198_v60, %v5236_v52  ;;  %8217 = vperm.xlu0 %9901, %v5395_v19   ;;  %v13855_v0 = vpop.f32.mrb[57].mxu1 }
 0x96c   : > { %10205 = vrcp.f32 %v5239_v39  ;;  %v10060_v24 = vpop.permute.xlu0 %10059 }
 0x96d   : > { %v5396_v3 = vmul.f32 %v13833_v58, %v5363_v42  ;;  %v5332_v13 = vsub.f32 2.0, %v5300_v8  ;;  %v10062_v49 = vunpack.i.h.bf16 %v10060_v24  ;;  %v10061_v48 = vunpack.i.l.bf16 %v10060_v24  ;;  %v5068_v50 = vpop.permute.xlu1 %5067  ;;  %v15306_v24 = vld [vmem:[#allocation236_spill] sm:$0xff] }
 0x96e   : > { %v10200_v43 = vpop.eup %10199  ;;  %v5240_v22 = vadd.f32 %v5068_v50, %v15305_v6  ;;  %v13859_v2 = vpop.f32.mrb[58].mxu1 }
 0x96f   : > { %v5364_v47 = vmul.f32 %v10198_v60, %v5332_v13  ;;  %v5301_v62 = vmul.f32 %v10200_v43, %v5237_v63  ;;  %v9802_v15 = vpack.c.bf16 %v10062_v49, %v10061_v48  ;;  %8222 = vperm.xlu1 %9902, %v5396_v3   ;;  %v13861_v19 = vpop.f32.mrb[59].mxu1 }
 0x970   : > { %10207 = vrcp.f32 %v5240_v22 }
 0x971   : > { %v5397_v52 = vmul.f32 %v13833_v58, %v5364_v47  ;;  %v5333_v7 = vsub.f32 2.0, %v5301_v62  ;;  %v5075_v42 = vpop.permute.xlu1 %5074  ;;  %9803 = vmatprep.subr.bf16.mxu1 %v9802_v15  ;;  %v15308_v62 = vld [vmem:[#allocation181_spill] sm:$0xff] }
 0x972   : > { %v10202_v8 = vpop.eup %10201  ;;  %v5241_v54 = vadd.f32 %v5075_v42, %v15306_v24  ;;  %v13865_v46 = vpop.f32.mrb[60].mxu1  ;;  %9805 = vmatpush3.bf16.msra.mxu1 %v9802_v15  ;;  %v15309_v47 = vld [vmem:[#allocation93_spill] sm:$0xff] }
 0x973   : > { %v5365_v6 = vmul.f32 %v10200_v43, %v5333_v7  ;;  %v5302_v50 = vmul.f32 %v10202_v8, %v5238_v27  ;;  %8227 = vperm.xlu0 %9901, %v5397_v52   ;;  %v13867_v63 = vpop.f32.mrb[61].mxu1  ;;  %v10204_v60 = vpop.eup %10203 }
 0x974   : > { %15307 = vst [vmem:[#allocation192_spill] sm:$0xff] %v13867_v63  ;;  %10209 = vrcp.f32 %v5241_v54  ;;  %v5306_v27 = vmul.f32 %v10204_v60, %v5242_v12 }
 0x975   : > { %v5398_v3 = vmul.f32 %v13833_v58, %v5365_v6  ;;  %v5334_v13 = vsub.f32 2.0, %v5302_v50  ;;  %v5086_v49 = vpop.permute.xlu1 %5085  ;;  %9668 = vmatmul.mubr.msk.f32.vlgmr.msra.gmra.mrb[62].mxu1 %vm360_vm0, %v15308_v62 }
 0x976   : > { %v10206_v48 = vpop.eup %10205  ;;  %v5243_v42 = vadd.f32 %v5086_v49, %v15309_v47  ;;  %v5338_v62 = vsub.f32 2.0, %v5306_v27 }
 0x977   : > { %v5366_v24 = vmul.f32 %v10202_v8, %v5334_v13  ;;  %v5303_v33 = vmul.f32 %v10206_v48, %v5239_v39  ;;  %8232 = vperm.xlu1 %9902, %v5398_v3   ;;  %v15311_v3 = vld [vmem:[#allocation238_spill] sm:$0xff] }
 0x978   : > { %10211 = vrcp.f32 %v5243_v42 }
 0x979   : > { %v5399_v43 = vmul.f32 %v13833_v58, %v5366_v24  ;;  %v5335_v15 = vsub.f32 2.0, %v5303_v33  ;;  %v5090_v52 = vpop.permute.xlu1 %5089  ;;  %v5370_v33 = vmul.f32 %v10204_v60, %v5338_v62 }
 0x97a   : > { %v10208_v7 = vpop.eup %10207  ;;  %v5244_v6 = vadd.f32 %v5090_v52, %v15310_v32 }
 0x97b   : > { %v5367_v50 = vmul.f32 %v10206_v48, %v5335_v15  ;;  %v5304_v31 = vmul.f32 %v10208_v7, %v5240_v22  ;;  %8237 = vperm.xlu0 %9901, %v5399_v43   ;;  %v15312_v43 = vld [vmem:[#allocation228_spill] sm:$0xff] }
 0x97c   : > { %10213 = vrcp.f32 %v5244_v6 }
 0x97d   : > { %v5400_v16 = vmul.f32 %v13833_v58, %v5367_v50  ;;  %v5336_v49 = vsub.f32 2.0, %v5304_v31  ;;  %v5097_v8 = vpop.permute.xlu1 %5096  ;;  %v5403_v31 = vmul.f32 %v13833_v58, %v5370_v33 }
 0x97e   : > { %v10210_v39 = vpop.eup %10209  ;;  %v5245_v13 = vadd.f32 %v5097_v8, %v15311_v3 }
 0x97f   : > { %v5368_v12 = vmul.f32 %v10208_v7, %v5336_v49  ;;  %v5305_v47 = vmul.f32 %v10210_v39, %v5241_v54  ;;  %8242 = vperm.xlu1 %9902, %v5400_v16   ;;  %v15313_v49 = vld [vmem:[#allocation237_spill] sm:$0xff] }
 0x980   : > { %10215 = vrcp.f32 %v5245_v13 }
 0x981   : > { %v5401_v24 = vmul.f32 %v13833_v58, %v5368_v12  ;;  %v5337_v32 = vsub.f32 2.0, %v5305_v47  ;;  %v5101_v48 = vpop.permute.xlu1 %5100  ;;  %v15314_v47 = vld [vmem:[#allocation146_spill] sm:$0xff] }
 0x982   : > { %v10212_v22 = vpop.eup %10211  ;;  %v5246_v15 = vadd.f32 %v5101_v48, %v15312_v43 }
 0x983   : > { %v5369_v27 = vmul.f32 %v10210_v39, %v5337_v32  ;;  %v5307_v52 = vmul.f32 %v10212_v22, %v5243_v42  ;;  %8247 = vperm.xlu0 %9901, %v5401_v24  }
 0x984   : > { %10217 = vrcp.f32 %v5246_v15 }
 0x985   : > { %v5402_v50 = vmul.f32 %v13833_v58, %v5369_v27  ;;  %v5339_v7 = vsub.f32 2.0, %v5307_v52  ;;  %v5108_v54 = vpop.permute.xlu1 %5107 }
 0x986   : > { %v10214_v16 = vpop.eup %10213  ;;  %v5247_v60 = vadd.f32 %v5108_v54, %v15313_v49 }
 0x987   : > { %v5371_v62 = vmul.f32 %v10212_v22, %v5339_v7  ;;  %v5308_v8 = vmul.f32 %v10214_v16, %v5244_v6  ;;  %8257 = vperm.xlu0 %9901, %v5403_v31   ;;  %8252 = vperm.xlu1 %9902, %v5402_v50   ;;  %v15315_v6 = vld [vmem:[#allocation156_spill] sm:$0xff] }
 0x988   : > { %10219 = vrcp.f32 %v5247_v60 }
 0x989   : > { %v5404_v3 = vmul.f32 %v13833_v58, %v5371_v62  ;;  %v5340_v39 = vsub.f32 2.0, %v5308_v8  ;;  %v5112_v42 = vpop.permute.xlu1 %5111  ;;  %v15317_v8 = vld [vmem:[#allocation232_spill] sm:$0xff] }
 0x98a   : > { %v10216_v12 = vpop.eup %10215  ;;  %v5248_v24 = vadd.f32 %v5112_v42, %v15314_v47 }
 0x98b   : > { %v5372_v33 = vmul.f32 %v10214_v16, %v5340_v39  ;;  %v5309_v32 = vmul.f32 %v10216_v12, %v5245_v13  ;;  %8262 = vperm.xlu1 %9902, %v5404_v3   ;;  %v15316_v16 = vld [vmem:[#allocation230_spill] sm:$0xff]  ;;  %v5254_v3 = vadd.f32 %v13806_v44, %v15317_v8 }
 0x98c   : > { %10221 = vrcp.f32 %v5248_v24 }
 0x98d   : > { %v5405_v48 = vmul.f32 %v13833_v58, %v5372_v33  ;;  %v5341_v43 = vsub.f32 2.0, %v5309_v32  ;;  %v5119_v27 = vpop.permute.xlu1 %5118  ;;  %v15318_v32 = vld [vmem:[#allocation240_spill] sm:$0xff] }
 0x98e   : > { %v10218_v22 = vpop.eup %10217  ;;  %v5249_v52 = vadd.f32 %v5119_v27, %v15315_v6 }
 0x98f   : > { %v5373_v31 = vmul.f32 %v10216_v12, %v5341_v43  ;;  %v5310_v50 = vmul.f32 %v10218_v22, %v5246_v15  ;;  %8267 = vperm.xlu0 %9901, %v5405_v48   ;;  %v15319_v43 = vld [vmem:[#allocation234_spill] sm:$0xff] }
 0x990   : > { %10223 = vrcp.f32 %v5249_v52  ;;  %v5256_v27 = vadd.f32 %v13817_v59, %v15319_v43 }
 0x991   : > { %v5406_v7 = vmul.f32 %v13833_v58, %v5373_v31  ;;  %v5342_v54 = vsub.f32 2.0, %v5310_v50  ;;  %v5123_v49 = vpop.permute.xlu1 %5122 }
 0x992   : > { %v10220_v62 = vpop.eup %10219  ;;  %v5250_v13 = vadd.f32 %v5123_v49, %v15316_v16  ;;  %v15321_v49 = vld [vmem:[#allocation162_spill] sm:$0xff] }
 0x993   : > { %v5374_v39 = vmul.f32 %v10218_v22, %v5342_v54  ;;  %v5311_v42 = vmul.f32 %v10220_v62, %v5247_v60  ;;  %8272 = vperm.xlu1 %9902, %v5406_v7   ;;  %v15320_v7 = vld [vmem:[#allocation229_spill] sm:$0xff]  ;;  %v5258_v16 = vadd.f32 %v13824_v28, %v15321_v49 }
 0x994   : > { %10225 = vrcp.f32 %v5250_v13 }
 0x995   : > { %v5407_v47 = vmul.f32 %v13833_v58, %v5374_v39  ;;  %v5343_v12 = vsub.f32 2.0, %v5311_v42  ;;  %v5130_v15 = vpop.permute.xlu1 %5129  ;;  %10227 = vrcp.f32 %v5254_v3 }
 0x996   : > { %v10222_v33 = vpop.eup %10221  ;;  %v5251_v48 = vadd.f32 %v5130_v15, %v15318_v32  ;;  %v15323_v15 = vld [vmem:[#allocation235_spill] sm:$0xff] }
 0x997   : > { %v5375_v6 = vmul.f32 %v10220_v62, %v5343_v12  ;;  %v5312_v31 = vmul.f32 %v10222_v33, %v5248_v24  ;;  %8277 = vperm.xlu0 %9901, %v5407_v47   ;;  %v15322_v47 = vld [vmem:[#allocation239_spill] sm:$0xff]  ;;  %v5260_v32 = vadd.f32 %v13831_v38, %v15323_v15 }
 0x998   : > { %10229 = vrcp.f32 %v5251_v48 }
 0x999   : > { %v5408_v44 = vmul.f32 %v13833_v58, %v5375_v6  ;;  %v5344_v60 = vsub.f32 2.0, %v5312_v31  ;;  %v5134_v22 = vpop.permute.xlu1 %5133  ;;  %10231 = vrcp.f32 %v5256_v27 }
 0x99a   : > { %v10224_v50 = vpop.eup %10223  ;;  %v5252_v54 = vadd.f32 %v5134_v22, %v15320_v7  ;;  %v15325_v7 = vld [vmem:[#allocation154_spill] sm:$0xff] }
 0x99b   : > { %v5376_v8 = vmul.f32 %v10222_v33, %v5344_v60  ;;  %v5313_v39 = vmul.f32 %v10224_v50, %v5249_v52  ;;  %8282 = vperm.xlu1 %9902, %v5408_v44   ;;  %v15324_v60 = vld [vmem:[#allocation96_spill] sm:$0xff]  ;;  %v13906_v49 = vadd.f32 %v13840_v20, %v15325_v7 }
 0x99c   : > { %10233 = vrcp.f32 %v5252_v54 }
 0x99d   : > { %v5409_v59 = vmul.f32 %v13833_v58, %v5376_v8  ;;  %v5345_v24 = vsub.f32 2.0, %v5313_v39  ;;  %v5141_v62 = vpop.permute.xlu1 %5140  ;;  %10235 = vrcp.f32 %v5258_v16 }
 0x99e   : > { %v10226_v42 = vpop.eup %10225  ;;  %v5253_v12 = vadd.f32 %v5141_v62, %v15322_v47  ;;  %v15326_v47 = vld [vmem:[#allocation157_spill] sm:$0xff] }
 0x99f   : > { %v5377_v43 = vmul.f32 %v10224_v50, %v5345_v24  ;;  %v5314_v6 = vmul.f32 %v10226_v42, %v5250_v13  ;;  %8287 = vperm.xlu0 %9901, %v5409_v59   ;;  %v10228_v28 = vpop.eup %10227 }
 0x9a0   : > { %10237 = vrcp.f32 %v5253_v12  ;;  %v5318_v13 = vmul.f32 %v10228_v28, %v5254_v3 }
 0x9a1   : > { %v5410_v52 = vmul.f32 %v13833_v58, %v5377_v43  ;;  %v5346_v33 = vsub.f32 2.0, %v5314_v6  ;;  %v5152_v31 = vpop.permute.xlu1 %5151  ;;  %10239 = vrcp.f32 %v5260_v32  ;;  %v15327_v43 = vld [vmem:[#allocation171_spill] sm:$0xff] }
 0x9a2   : > { %v10230_v44 = vpop.eup %10229  ;;  %v5255_v22 = vadd.f32 %v5152_v31, %v15324_v60  ;;  %v13913_v6 = vadd.f32 %v13849_v51, %v15327_v43 }
 0x9a3   : > { %v5378_v8 = vmul.f32 %v10226_v42, %v5346_v33  ;;  %v5315_v39 = vmul.f32 %v10230_v44, %v5251_v48  ;;  %8292 = vperm.xlu1 %9902, %v5410_v52   ;;  %v10232_v38 = vpop.eup %10231  ;;  %v5350_v52 = vsub.f32 2.0, %v5318_v13 }
 0x9a4   : > { %10241 = vrcp.f32 %v5255_v22  ;;  %v5320_v3 = vmul.f32 %v10232_v38, %v5256_v27 }
 0x9a5   : > { %v5411_v50 = vmul.f32 %v13833_v58, %v5378_v8  ;;  %v5347_v59 = vsub.f32 2.0, %v5315_v39  ;;  %v5163_v24 = vpop.permute.xlu1 %5162  ;;  %10243 = vrcp.f32 %v13906_v49  ;;  %v15328_v8 = vld [vmem:[#allocation71_spill] sm:$0xff] }
 0x9a6   : > { %v10234_v62 = vpop.eup %10233  ;;  %v5257_v15 = vadd.f32 %v5163_v24, %v15326_v47 }
 0x9a7   : > { %v5379_v20 = vmul.f32 %v10230_v44, %v5347_v59  ;;  %v5316_v42 = vmul.f32 %v10234_v62, %v5252_v54  ;;  %8297 = vperm.xlu0 %9901, %v5411_v50   ;;  %v10236_v48 = vpop.eup %10235  ;;  %v5382_v44 = vmul.f32 %v10228_v28, %v5350_v52  ;;  %v5352_v50 = vsub.f32 2.0, %v5320_v3 }
 0x9a8   : > { %10245 = vrcp.f32 %v5257_v15  ;;  %v5322_v51 = vmul.f32 %v10236_v48, %v5258_v16 }
 0x9a9   : > { %v5412_v33 = vmul.f32 %v13833_v58, %v5379_v20  ;;  %v5348_v31 = vsub.f32 2.0, %v5316_v42  ;;  %v5174_v60 = vpop.permute.xlu1 %5173  ;;  %10247 = vrcp.f32 %v13913_v6  ;;  %v15329_v20 = vld [vmem:[#allocation73_spill] sm:$0xff]  ;;  %v5415_v16 = vmul.f32 %v13833_v58, %v5382_v44 }
 0x9aa   : > { %v10238_v7 = vpop.eup %10237  ;;  %v5259_v39 = vadd.f32 %v5174_v60, %v15328_v8  ;;  %v5354_v60 = vsub.f32 2.0, %v5322_v51 }
 0x9ab   : > { %v5380_v24 = vmul.f32 %v10234_v62, %v5348_v31  ;;  %v5317_v47 = vmul.f32 %v10238_v7, %v5253_v12  ;;  %8302 = vperm.xlu1 %9902, %v5412_v33   ;;  %v10240_v54 = vpop.eup %10239  ;;  %v5384_v62 = vmul.f32 %v10232_v38, %v5352_v50  ;;  %v15330_v31 = vld [vmem:[#allocation90_spill] sm:$0xff] }
 0x9ac   : > { %10249 = vrcp.f32 %v5259_v39  ;;  %v5324_v8 = vmul.f32 %v10240_v54, %v5260_v32 }
 0x9ad   : > { %v5413_v13 = vmul.f32 %v13833_v58, %v5380_v24  ;;  %v5349_v27 = vsub.f32 2.0, %v5317_v47  ;;  %v5185_v59 = vpop.permute.xlu1 %5184  ;;  %v5417_v51 = vmul.f32 %v13833_v58, %v5384_v62 }
 0x9ae   : > { %v10242_v43 = vpop.eup %10241  ;;  %v5261_v42 = vadd.f32 %v5185_v59, %v15329_v20 }
 0x9af   : > { %v5381_v18 = vmul.f32 %v10238_v7, %v5349_v27  ;;  %v5319_v9 = vmul.f32 %v10242_v43, %v5255_v22  ;;  %8307 = vperm.xlu0 %9901, %v5413_v13   ;;  %v10244_v12 = vpop.eup %10243  ;;  %v5386_v22 = vmul.f32 %v10236_v48, %v5354_v60  ;;  %v5356_v7 = vsub.f32 2.0, %v5324_v8 }
 0x9b0   : > { %10251 = vrcp.f32 %v5261_v42  ;;  %v5326_v44 = vmul.f32 %v10244_v12, %v13906_v49 }
 0x9b1   : > { %v5414_v28 = vmul.f32 %v13833_v58, %v5381_v18  ;;  %v5351_v52 = vsub.f32 2.0, %v5319_v9  ;;  %v5196_v3 = vpop.permute.xlu1 %5195  ;;  %v5388_v48 = vmul.f32 %v10240_v54, %v5356_v7 }
 0x9b2   : > { %v10246_v33 = vpop.eup %10245  ;;  %v5263_v24 = vadd.f32 %v5196_v3, %v15330_v31  ;;  %v5358_v60 = vsub.f32 2.0, %v5326_v44 }
 0x9b3   : > { %v5383_v47 = vmul.f32 %v10242_v43, %v5351_v52  ;;  %v5321_v63 = vmul.f32 %v10246_v33, %v5257_v15  ;;  %8317 = vperm.xlu0 %9901, %v5415_v16   ;;  %8312 = vperm.xlu1 %9902, %v5414_v28   ;;  %v10248_v32 = vpop.eup %10247  ;;  %v5419_v15 = vmul.f32 %v13833_v58, %v5386_v22  ;;  %v15331_v22 = vld [vmem:[#allocation218_spill] sm:$0xff] }
 0x9b4   : > { %10253 = vrcp.f32 %v5263_v24  ;;  %v5328_v8 = vmul.f32 %v10248_v32, %v13913_v6  ;;  %v5390_v52 = vmul.f32 %v10244_v12, %v5358_v60 }
 0x9b5   : > { %v5416_v38 = vmul.f32 %v13833_v58, %v5383_v47  ;;  %v5353_v18 = vsub.f32 2.0, %v5321_v63  ;;  %v10055_v9 = vpop.permute.xlu1 %10054 }
 0x9b6   : > { %v10250_v50 = vpop.eup %10249  ;;  %v10057_v13 = vunpack.i.h.bf16 %v10055_v9  ;;  %v10056_v27 = vunpack.i.l.bf16 %v10055_v9  ;;  %v5360_v3 = vsub.f32 2.0, %v5328_v8  ;;  %v15334_v8 = vld [vmem:[#allocation5_spill] sm:$0xff] }
 0x9b7   : > { %v5385_v59 = vmul.f32 %v10246_v33, %v5353_v18  ;;  %v5323_v43 = vmul.f32 %v10250_v50, %v5259_v39  ;;  %8327 = vperm.xlu0 %9901, %v5417_v51   ;;  %8322 = vperm.xlu1 %9902, %v5416_v38   ;;  %v5421_v39 = vmul.f32 %v13833_v58, %v5388_v48 }
 0x9b8   : > { %v9798_v20 = vpack.c.bf16 %v10057_v13, %v10056_v27  ;;  %v5392_v7 = vmul.f32 %v10248_v32, %v5360_v3  ;;  %v10255_v32 = vld [vmem:[%s10328_s7] sm:$0xff] }
 0x9b9   : > { %v5418_v49 = vmul.f32 %v13833_v58, %v5385_v59  ;;  %v5355_v16 = vsub.f32 2.0, %v5323_v43 }
 0x9ba   : > { %v10252_v62 = vpop.eup %10251  ;;  %9799 = vmatprep.subr.bf16.mxu0 %v9798_v20  ;;  %v5425_v38 = vmul.f32 %v13833_v58, %v5392_v7 }
 0x9bb   : > { %v5387_v63 = vmul.f32 %v10250_v50, %v5355_v16  ;;  %v5325_v28 = vmul.f32 %v10252_v62, %v5261_v42  ;;  %8337 = vperm.xlu0 %9901, %v5419_v15   ;;  %8332 = vperm.xlu1 %9902, %v5418_v49   ;;  %v5423_v42 = vmul.f32 %v13833_v58, %v5390_v52  ;;  %v15333_v15 = vld [vmem:[#allocation4_spill] sm:$0xff] }
 0x9bc   : > { %9801 = vmatpush3.bf16.msra.mxu0 %v9798_v20 }
 0x9bd   : > { %v5420_v54 = vmul.f32 %v13833_v58, %v5387_v63  ;;  %v5357_v33 = vsub.f32 2.0, %v5325_v28 }
 0x9be   : > { %v10254_v31 = vpop.eup %10253 }
 0x9bf   : > { %v5389_v47 = vmul.f32 %v10252_v62, %v5357_v33  ;;  %v5327_v6 = vmul.f32 %v10254_v31, %v5263_v24  ;;  %9661 = vmatmul.mubr.msk.f32.vlgmr.msra.gmra.mrb[62].mxu0 %vm360_vm0, %v15331_v22  ;;  %8347 = vperm.xlu0 %9901, %v5421_v39   ;;  %v15335_v62 = vld [vmem:[#allocation6_spill] sm:$0xff]  ;;  %v15336_v39 = vld [vmem:[#allocation7_spill] sm:$0xff] }
 0x9c0   : > { %8342 = vperm.xlu1 %9902, %v5420_v54   ;;  %v15337_v54 = vld [vmem:[#allocation8_spill] sm:$0xff] }
 0x9c1   : > { %v5422_v51 = vmul.f32 %v13833_v58, %v5389_v47  ;;  %v5359_v12 = vsub.f32 2.0, %v5327_v6  ;;  %v15338_v47 = vld [vmem:[#allocation9_spill] sm:$0xff] }
 0x9c3   : > { %v5391_v44 = vmul.f32 %v10254_v31, %v5359_v12  ;;  %8357 = vperm.xlu0 %9901, %v5423_v42   ;;  %v15340_v12 = vld [vmem:[#allocation10_spill] sm:$0xff] }
 0x9c4   : > { %8352 = vperm.xlu1 %9902, %v5422_v51  }
 0x9c5   : > { %v5424_v24 = vmul.f32 %v13833_v58, %v5391_v44 }
 0x9c7   : > { %8367 = vperm.xlu0 %9901, %v5425_v38  }
 0x9c8   : > { %8362 = vperm.xlu1 %9902, %v5424_v24   ;;  %v15341_v24 = vld [vmem:[#allocation12_spill] sm:$0xff] }
 0x9e6   : > { %v13937_v18 = vpop.permute.xlu1 %8212 }
 0x9e7   : > { %v8370_v9 = vmul.f32 %v13937_v18, %v13762_v23  ;;  %v15332_v23 = vld [vmem:[#allocation3_spill] sm:$0xff] }
 0x9e9   : > { %v8402_v50 = vadd.f32 %v10255_v32, %v8370_v9 }
 0x9ea   : > { %v13948_v13 = vpop.permute.xlu0 %8217 }
 0x9eb   : > { %8434 = vst.msk [vmem:[%s13945_s17] sm:$0xff] %vm360_vm0, %v8402_v50  ;;  %v8371_v58 = vmul.f32 %v13756_v21, %v13948_v13 }
 0x9ed   : > { %v8403_v27 = vadd.f32 %v8371_v58, %v15332_v23 }
 0x9ee   : > { %v8223_v59 = vpop.permute.xlu1 %8222 }
 0x9ef   : > { %8435 = vst.msk [vmem:[%s13945_s17 + $0x8] sm:$0xff] %vm360_vm0, %v8403_v27  ;;  %v8372_v43 = vmul.f32 %v8223_v59, %v13822_v53 }
 0x9f1   : > { %v8404_v48 = vadd.f32 %v8372_v43, %v15333_v15  ;;  %v15343_v43 = vld [vmem:[#allocation14_spill] sm:$0xff] }
 0x9f2   : > { %v8228_v20 = vpop.permute.xlu0 %8227 }
 0x9f3   : > { %8436 = vst.msk [vmem:[%s13945_s17 + $0x10] sm:$0xff] %vm360_vm0, %v8404_v48  ;;  %v8373_v60 = vmul.f32 %v13820_v4, %v8228_v20  ;;  %v8482_v27 = vrot.slane %v8228_v20, %v10953_v17 }
 0x9f5   : > { %v8405_v49 = vadd.f32 %v8373_v60, %v15334_v8  ;;  %v8473_v60 = vrot.slane %v13948_v13, %v10953_v17  ;;  %v8478_v8 = vrot.slane %v8223_v59, %v10945_v55 }
 0x9f6   : > { %v8233_v16 = vpop.permute.xlu1 %8232 }
 0x9f7   : > { %8437 = vst.msk [vmem:[%s13945_s17 + $0x18] sm:$0xff] %vm360_vm0, %v8405_v49  ;;  %v8374_v21 = vmul.f32 %v8233_v16, %v13771_v5  ;;  %v8487_v20 = vrot.slane %v8233_v16, %v10945_v55  ;;  %v8483_v13 = vsel %vm1277_vm1, %v8482_v27, %v8478_v8  ;;  %v15348_v27 = vld [vmem:[#allocation19_spill] sm:$0xff] }
 0x9f9   : > { %v8406_v63 = vadd.f32 %v8374_v21, %v15335_v62 }
 0x9fa   : > { %v8238_v28 = vpop.permute.xlu0 %8237 }
 0x9fb   : > { %8438 = vst.msk [vmem:[%s13945_s17 + $0x20] sm:$0xff] %vm360_vm0, %v8406_v63  ;;  %v8375_v53 = vmul.f32 %v13767_v26, %v8238_v28 }
 0x9fd   : > { %v8407_v52 = vadd.f32 %v8375_v53, %v15336_v39 }
 0x9fe   : > { %v8243_v3 = vpop.permute.xlu1 %8242 }
 0x9ff   : > { %8439 = vst.msk [vmem:[%s13945_s17 + $0x28] sm:$0xff] %vm360_vm0, %v8407_v52  ;;  %v8376_v4 = vmul.f32 %v8243_v3, %v13829_v25  ;;  %v15339_v25 = vld [vmem:[#allocation11_spill] sm:$0xff]  ;;  %v8496_v59 = vrot.slane %v8243_v3, %v10945_v55 }
 0xa01   : > { %v8408_v33 = vadd.f32 %v8376_v4, %v15337_v54 }
 0xa02   : > { %v8248_v5 = vpop.permute.xlu0 %8247 }
 0xa03   : > { %8440 = vst.msk [vmem:[%s13945_s17 + $0x30] sm:$0xff] %vm360_vm0, %v8408_v33  ;;  %v8377_v31 = vmul.f32 %v13827_v36, %v8248_v5 }
 0xa05   : > { %v8409_v6 = vadd.f32 %v8377_v31, %v15338_v47 }
 0xa06   : > { %v8258_v26 = vpop.permute.xlu0 %8257  ;;  %v8253_v22 = vpop.permute.xlu1 %8252 }
 0xa07   : > { %8441 = vst.msk [vmem:[%s13945_s17 + $0x38] sm:$0xff] %vm360_vm0, %v8409_v6  ;;  %v8379_v42 = vmul.f32 %v13775_v1, %v8258_v26  ;;  %v8378_v7 = vmul.f32 %v8253_v22, %v13779_v57  ;;  %v15342_v57 = vld [vmem:[#allocation13_spill] sm:$0xff]  ;;  %v8509_v21 = vrot.slane %v8258_v26, %v10953_v17  ;;  %v8505_v62 = vrot.slane %v8253_v22, %v10945_v55  ;;  %v15345_v6 = vld [vmem:[#allocation16_spill] sm:$0xff] }
 0xa09   : > { %v8411_v51 = vadd.f32 %v8379_v42, %v15339_v25  ;;  %v8410_v44 = vadd.f32 %v8378_v7, %v15340_v12  ;;  %v8510_v33 = vsel %vm1277_vm1, %v8509_v21, %v8505_v62  ;;  %v15351_v21 = vld [vmem:[#allocation23_spill] sm:$0xff] }
 0xa0a   : > { %v8263_v38 = vpop.permute.xlu1 %8262 }
 0xa0b   : > { %8443 = vst.msk [vmem:[%s13945_s17 + $0x48] sm:$0xff] %vm360_vm0, %v8411_v51  ;;  %8442 = vst.msk [vmem:[%s13945_s17 + $0x40] sm:$0xff] %vm360_vm0, %v8410_v44  ;;  %v8380_v36 = vmul.f32 %v8263_v38, %v13838_v35  ;;  %v8491_v35 = vrot.slane %v8238_v28, %v10953_v17  ;;  %v15344_v28 = vld [vmem:[#allocation15_spill] sm:$0xff]  ;;  %v8514_v4 = vrot.slane %v8263_v38, %v10945_v55  ;;  %v15346_v38 = vld [vmem:[#allocation17_spill] sm:$0xff] }
 0xa0d   : > { %v8412_v9 = vadd.f32 %v8380_v36, %v15341_v24  ;;  %v8492_v39 = vsel %vm1277_vm1, %v8491_v35, %v8487_v20 }
 0xa0e   : > { %v8268_v32 = vpop.permute.xlu0 %8267 }
 0xa0f   : > { %8444 = vst.msk [vmem:[%s13945_s17 + $0x50] sm:$0xff] %vm360_vm0, %v8412_v9  ;;  %v8381_v1 = vmul.f32 %v13836_v41, %v8268_v32  ;;  %v8500_v41 = vrot.slane %v8248_v5, %v10953_v17  ;;  %v8518_v63 = vrot.slane %v8268_v32, %v10953_v17 }
 0xa11   : > { %v8413_v50 = vadd.f32 %v8381_v1, %v15342_v57  ;;  %v8501_v16 = vsel %vm1277_vm1, %v8500_v41, %v8496_v59  ;;  %v8519_v47 = vsel %vm1277_vm1, %v8518_v63, %v8514_v4  ;;  %v15347_v57 = vld [vmem:[#allocation18_spill] sm:$0xff]  ;;  %v15350_v41 = vld [vmem:[#allocation21_spill] sm:$0xff] }
 0xa12   : > { %v8273_v58 = vpop.permute.xlu1 %8272 }
 0xa13   : > { %8445 = vst.msk [vmem:[%s13945_s17 + $0x58] sm:$0xff] %vm360_vm0, %v8413_v50  ;;  %v8382_v23 = vmul.f32 %v8273_v58, %v13787_v11  ;;  %v8469_v11 = vrot.slane %v13937_v18, %v10945_v55  ;;  %v8523_v5 = vrot.slane %v8273_v58, %v10945_v55 }
 0xa15   : > { %v8414_v15 = vadd.f32 %v8382_v23, %v15343_v43  ;;  %v8474_v18 = vsel %vm1277_vm1, %v8473_v60, %v8469_v11 }
 0xa16   : > { %v8278_v48 = vpop.permute.xlu0 %8277  ;;  %v8610_v54 = vsel %vm1414_vm4, %v8483_v13, %v8474_v18  ;;  %v15352_v13 = vld [vmem:[#allocation22_spill] sm:$0xff] }
 0xa17   : > { %8446 = vst.msk [vmem:[%s13945_s17 + $0x60] sm:$0xff] %vm360_vm0, %v8414_v15  ;;  %v8383_v49 = vmul.f32 %v13783_v14, %v8278_v48  ;;  %v8527_v14 = vrot.slane %v8278_v48, %v10953_v17  ;;  %v8611_v31 = vsel %vm1415_vm5, %v8492_v39, %v8610_v54  ;;  %v15353_v39 = vld [vmem:[#allocation25_spill] sm:$0xff]  ;;  %v15356_v54 = vld [vmem:[#allocation26_spill] sm:$0xff] }
 0xa18   : > { %v8612_v22 = vsel %vm1417_vm6, %v8501_v16, %v8611_v31 }
 0xa19   : > { %v8415_v53 = vadd.f32 %v8383_v49, %v15344_v28  ;;  %v8528_v42 = vsel %vm1277_vm1, %v8527_v14, %v8523_v5 }
 0xa1a   : > { %v8283_v52 = vpop.permute.xlu1 %8282 }
 0xa1b   : > { %8447 = vst.msk [vmem:[%s13945_s17 + $0x68] sm:$0xff] %vm360_vm0, %v8415_v53  ;;  %v8384_v3 = vmul.f32 %v8283_v52, %v13847_v34  ;;  %v8613_v34 = vsel %vm1419_vm7, %v8510_v33, %v8612_v22  ;;  %v8532_v25 = vrot.slane %v8283_v52, %v10945_v55 }
 0xa1c   : > { %v8614_v44 = vsel %vm1421_vm8, %v8519_v47, %v8613_v34 }
 0xa1d   : > { %v8416_v26 = vadd.f32 %v8384_v3, %v15345_v6  ;;  %v8615_v9 = vsel %vm1423_vm9, %v8528_v42, %v8614_v44  ;;  %v15355_v3 = vld [vmem:[#allocation27_spill] sm:$0xff]  ;;  %v15358_v44 = vld [vmem:[#allocation29_spill] sm:$0xff] }
 0xa1e   : > { %v8288_v7 = vpop.permute.xlu0 %8287 }
 0xa1f   : > { %8448 = vst.msk [vmem:[%s13945_s17 + $0x70] sm:$0xff] %vm360_vm0, %v8416_v26  ;;  %v8385_v51 = vmul.f32 %v13844_v45, %v8288_v7  ;;  %v8536_v12 = vrot.slane %v8288_v7, %v10953_v17  ;;  %v15357_v7 = vld [vmem:[#allocation192_spill] sm:$0xff] }
 0xa21   : > { %v8417_v36 = vadd.f32 %v8385_v51, %v15346_v38  ;;  %v8537_v24 = vsel %vm1277_vm1, %v8536_v12, %v8532_v25 }
 0xa22   : > { %v14043_v32 = vpop.permute.xlu1 %8292  ;;  %v8616_v1 = vsel %vm1425_vm10, %v8537_v24, %v8615_v9  ;;  %v15359_v24 = vld [vmem:[#allocation28_spill] sm:$0xff] }
 0xa23   : > { %8449 = vst.msk [vmem:[%s13945_s17 + $0x78] sm:$0xff] %vm360_vm0, %v8417_v36  ;;  %v8386_v45 = vmul.f32 %v14043_v32, %v13795_v37  ;;  %8626 = vxpose.xlu1.b32.start [1/2] (short) (narrow) %v8616_v1, 16  ;;  %v15349_v37 = vld [vmem:[#allocation20_spill] sm:$0xff]  ;;  %v8541_v25 = vrot.slane %v14043_v32, %v10945_v55 }
 0xa25   : > { %v8418_v50 = vadd.f32 %v8386_v45, %v15347_v57 }
 0xa26   : > { %v14051_v58 = vpop.permute.xlu0 %8297 }
 0xa27   : > { %8450 = vst.msk [vmem:[%s13945_s17 + $0x80] sm:$0xff] %vm360_vm0, %v8418_v50  ;;  %v8387_v23 = vmul.f32 %v13791_v61, %v14051_v58  ;;  %v8545_v31 = vrot.slane %v14051_v58, %v10953_v17 }
 0xa29   : > { %v8419_v43 = vadd.f32 %v8387_v23, %v15348_v27  ;;  %v8546_v58 = vsel %vm1277_vm1, %v8545_v31, %v8541_v25  ;;  %v15366_v31 = vld [vmem:[#allocation124_spill] sm:$0xff] }
 0xa2a   : > { %v8303_v15 = vpop.permute.xlu1 %8302 }
 0xa2b   : > { %8451 = vst.msk [vmem:[%s13945_s17 + $0x88] sm:$0xff] %vm360_vm0, %v8419_v43  ;;  %v8388_v35 = vmul.f32 %v8303_v15, %v13855_v0  ;;  %v8550_v26 = vrot.slane %v8303_v15, %v10945_v55 }
 0xa2d   : > { %v8420_v48 = vadd.f32 %v8388_v35, %v15349_v37 }
 0xa2e   : > { %v8308_v60 = vpop.permute.xlu0 %8307 }
 0xa2f   : > { %8452 = vst.msk [vmem:[%s13945_s17 + $0x90] sm:$0xff] %vm360_vm0, %v8420_v48  ;;  %v8389_v8 = vmul.f32 %v13853_v30, %v8308_v60  ;;  %v8554_v33 = vrot.slane %v8308_v60, %v10953_v17 }
 0xa31   : > { %v8421_v49 = vadd.f32 %v8389_v8, %v15350_v41  ;;  %v8555_v38 = vsel %vm1277_vm1, %v8554_v33, %v8550_v26 }
 0xa32   : > { %v8318_v11 = vpop.permute.xlu0 %8317  ;;  %v8313_v61 = vpop.permute.xlu1 %8312  ;;  %v8617_v43 = vsel %vm1414_vm4, %v8555_v38, %v8546_v58  ;;  %v15373_v58 = vld [vmem:[#allocation195_spill] sm:$0xff] }
 0xa33   : > { %8453 = vst.msk [vmem:[%s13945_s17 + $0x98] sm:$0xff] %vm360_vm0, %v8421_v49  ;;  %v8391_v20 = vmul.f32 %v13800_v40, %v8318_v11  ;;  %v8390_v0 = vmul.f32 %v8313_v61, %v13804_v10  ;;  %v15354_v40 = vld [vmem:[#allocation24_spill] sm:$0xff]  ;;  %v8563_v47 = vrot.slane %v8318_v11, %v10953_v17  ;;  %v8559_v6 = vrot.slane %v8313_v61, %v10945_v55 }
 0xa35   : > { %v8423_v62 = vadd.f32 %v8391_v20, %v15351_v21  ;;  %v8422_v59 = vadd.f32 %v8390_v0, %v15352_v13  ;;  %v8564_v57 = vsel %vm1277_vm1, %v8563_v47, %v8559_v6  ;;  %v15367_v6 = vld [vmem:[#allocation101_spill] sm:$0xff] }
 0xa36   : > { %v8328_v63 = vpop.permute.xlu0 %8327  ;;  %v8323_v28 = vpop.permute.xlu1 %8322  ;;  %v8618_v35 = vsel %vm1415_vm5, %v8564_v57, %v8617_v43 }
 0xa37   : > { %8455 = vst.msk [vmem:[%s13945_s17 + $0xa8] sm:$0xff] %vm360_vm0, %v8423_v62  ;;  %8454 = vst.msk [vmem:[%s13945_s17 + $0xa0] sm:$0xff] %vm360_vm0, %v8422_v59  ;;  %v8393_v30 = vmul.f32 %v13859_v2, %v8328_v63  ;;  %v8392_v53 = vmul.f32 %v8323_v28, %v13861_v19  ;;  %v8572_v22 = vrot.slane %v8328_v63, %v10953_v17 }
 0xa38   : > { %v8568_v42 = vrot.slane %v8323_v28, %v10945_v55  ;;  %v15360_v28 = vld [vmem:[#allocation33_spill] sm:$0xff] }
 0xa39   : > { %v8425_v14 = vadd.f32 %v8393_v30, %v15353_v39  ;;  %v8424_v10 = vadd.f32 %v8392_v53, %v15354_v40  ;;  %v15361_v53 = vld [vmem:[#allocation32_spill] sm:$0xff] }
 0xa3a   : > { %v8338_v52 = vpop.permute.xlu0 %8337  ;;  %v8333_v18 = vpop.permute.xlu1 %8332  ;;  %v8573_v23 = vsel %vm1277_vm1, %v8572_v22, %v8568_v42  ;;  %v15369_v22 = vld [vmem:[#allocation119_spill] sm:$0xff] }
 0xa3b   : > { %8457 = vst.msk [vmem:[%s13945_s17 + $0xb8] sm:$0xff] %vm360_vm0, %v8425_v14  ;;  %8456 = vst.msk [vmem:[%s13945_s17 + $0xb0] sm:$0xff] %vm360_vm0, %v8424_v10  ;;  %v8395_v16 = vmul.f32 %v13811_v29, %v8338_v52  ;;  %v8394_v4 = vmul.f32 %v8333_v18, %v13815_v56  ;;  %v8581_v51 = vrot.slane %v8338_v52, %v10953_v17  ;;  %v15362_v52 = vld [vmem:[#allocation31_spill] sm:$0xff] }
 0xa3c   : > { %v8577_v12 = vrot.slane %v8333_v18, %v10945_v55  ;;  %v8619_v60 = vsel %vm1417_vm6, %v8573_v23, %v8618_v35 }
 0xa3d   : > { %v8427_v2 = vadd.f32 %v8395_v16, %v15355_v3  ;;  %v8426_v19 = vadd.f32 %v8394_v4, %v15356_v54  ;;  %v15363_v16 = vld [vmem:[#allocation30_spill] sm:$0xff] }
 0xa3e   : > { %v8348_v5 = vpop.permute.xlu0 %8347  ;;  %v8582_v15 = vsel %vm1277_vm1, %v8581_v51, %v8577_v12  ;;  %v15371_v12 = vld [vmem:[#allocation155_spill] sm:$0xff] }
 0xa3f   : > { %8459 = vst.msk [vmem:[%s13945_s17 + $0xc8] sm:$0xff] %vm360_vm0, %v8427_v2  ;;  %8458 = vst.msk [vmem:[%s13945_s17 + $0xc0] sm:$0xff] %vm360_vm0, %v8426_v19  ;;  %v8397_v29 = vmul.f32 %v13865_v46, %v8348_v5  ;;  %v8343_v56 = vpop.permute.xlu1 %8342  ;;  %v8590_v36 = vrot.slane %v8348_v5, %v10953_v17  ;;  %v8620_v11 = vsel %vm1419_vm7, %v8582_v15, %v8619_v60  ;;  %v15364_v2 = vld [vmem:[#allocation138_spill] sm:$0xff]  ;;  %v15365_v19 = vld [vmem:[#allocation107_spill] sm:$0xff] }
 0xa40   : > { %v8396_v34 = vmul.f32 %v8343_v56, %v15357_v7  ;;  %v8586_v1 = vrot.slane %v8343_v56, %v10945_v55  ;;  %v15368_v56 = vld [vmem:[#allocation104_spill] sm:$0xff]  ;;  %v15370_v7 = vld [vmem:[#allocation141_spill] sm:$0xff]  ;;  %v15374_v15 = vld [vmem:[#allocation182_spill] sm:$0xff] }
 0xa41   : > { %v8429_v46 = vadd.f32 %v8397_v29, %v15358_v44 }
 0xa42   : > { %v8428_v9 = vadd.f32 %v8396_v34, %v15359_v24  ;;  %v8358_v45 = vpop.permute.xlu0 %8357  ;;  %v8591_v37 = vsel %vm1277_vm1, %v8590_v36, %v8586_v1 }
 0xa43   : > { %8461 = vst.msk [vmem:[%s13945_s17 + $0xd8] sm:$0xff] %vm360_vm0, %v8429_v46  ;;  %v8599_v32 = vrot.slane %v8358_v45, %v10953_v17  ;;  %v8353_v50 = vpop.permute.xlu1 %8352  ;;  %v8621_v0 = vsel %vm1421_vm8, %v8591_v37, %v8620_v11  ;;  %v15375_v37 = vld [vmem:[#allocation202_spill] sm:$0xff]  ;;  %v15377_v11 = vld [vmem:[#allocation76_spill] sm:$0xff] }
 0xa44   : > { %8460 = vst.msk [vmem:[%s13945_s17 + $0xd0] sm:$0xff] %vm360_vm0, %v8428_v9  ;;  %v8595_v27 = vrot.slane %v8353_v50, %v10945_v55 }
 0xa46   : > { %v8368_v48 = vpop.permute.xlu0 %8367  ;;  %v8600_v8 = vsel %vm1277_vm1, %v8599_v32, %v8595_v27  ;;  %v15372_v32 = vld [vmem:[#allocation184_spill] sm:$0xff] }
 0xa47   : > { %v8608_v41 = vrot.slane %v8368_v48, %v10953_v17  ;;  %v8363_v49 = vpop.permute.xlu1 %8362  ;;  %v8622_v63 = vsel %vm1423_vm9, %v8600_v8, %v8621_v0 }
 0xa48   : > { %v8604_v61 = vrot.slane %v8363_v49, %v10945_v55  ;;  %v9669_v20 = vpop.f32.mrb[62].mxu1 }
 0xa49   : > { %v8401_v21 = vmul.f32 %v9669_v20, %v8368_v48  ;;  %v8201_v62 = vpop.f32.mrb[63].mxu1 }
 0xa4a   : > { %v8609_v13 = vsel %vm1277_vm1, %v8608_v41, %v8604_v61  ;;  %v8400_v59 = vmul.f32 %v8363_v49, %v8201_v62  ;;  %v15376_v41 = vld [vmem:[#allocation114_spill] sm:$0xff] }
 0xa4b   : > { %v8433_v17 = vadd.f32 %v8401_v21, %v15360_v28  ;;  %v8623_v30 = vsel %vm1425_vm10, %v8609_v13, %v8622_v63  ;;  %v15378_v21 = vld [vmem:[#allocation111_spill] sm:$0xff]  ;;  %v15379_v13 = vld [vmem:[#allocation206_spill] sm:$0xff] }
 0xa4c   : > { %v8432_v39 = vadd.f32 %v8400_v59, %v15361_v53  ;;  %8627 = vxpose.xlu1.b32.end [2/2] (short) (narrow) %v8623_v30, 16  ;;  %v15381_v53 = vld [vmem:[#allocation194_spill] sm:$0xff] }
 0xa4d   : > { %8465 = vst.msk [vmem:[%s13945_s17 + $0xf8] sm:$0xff] %vm360_vm0, %v8433_v17  ;;  %v15380_v17 = vld [vmem:[#allocation188_spill] sm:$0xff] }
 0xa4e   : > { %8464 = vst.msk [vmem:[%s13945_s17 + $0xf0] sm:$0xff] %vm360_vm0, %v8432_v39 }
 0xa92   : > { %v9662_v55 = vpop.f32.mrb[62].mxu0 }
 0xa93   : > { %v8399_v14 = vmul.f32 %v9662_v55, %v8358_v45  ;;  %v8114_v40 = vpop.f32.mrb[63].mxu0 }
 0xa94   : > { %v8398_v10 = vmul.f32 %v8353_v50, %v8114_v40  ;;  %v15382_v40 = vld [vmem:[#allocation186_spill] sm:$0xff] }
 0xa95   : > { %v8431_v18 = vadd.f32 %v8399_v14, %v15362_v52  ;;  %v15383_v52 = vld [vmem:[#allocation175_spill] sm:$0xff] }
 0xa96   : > { %v8430_v4 = vadd.f32 %v8398_v10, %v15363_v16 }
 0xa97   : > { %8463 = vst.msk [vmem:[%s13945_s17 + $0xe8] sm:$0xff] %vm360_vm0, %v8431_v18 }
 0xa98   : > { %8462 = vst.msk [vmem:[%s13945_s17 + $0xe0] sm:$0xff] %vm360_vm0, %v8430_v4 }
 0xac8   : > { %v8642_v3 = vpop.trf.xlu1 }
 0xac9   : > { %v8727_v54 = vrot.slane %v8642_v3, %v15364_v2  ;;  %v8661_v33 = vrot.slane %v8642_v3, %v15365_v19  ;;  %v8672_v26 = vrot.slane %v8642_v3, %v15368_v56  ;;  %v8683_v25 = vrot.slane %v8642_v3, %v15366_v31 }
 0xaca   : > { %v8694_v46 = vrot.slane %v8642_v3, %v15367_v6  ;;  %v8705_v38 = vrot.slane %v8642_v3, %v15369_v22  ;;  %v8716_v36 = vrot.slane %v8642_v3, %v15370_v7  ;;  %v8738_v24 = vrot.slane %v8642_v3, %v15371_v12  ;;  %v15384_v3 = vld [vmem:[#allocation177_spill] sm:$0xff] }
 0xacb   : > { %8729 = vbcast.lane.b32.xlu1 %v8727_v54, 256  ;;  %8663 = vbcast.lane.b32.xlu0 %v8661_v33, 256 }
 0xacc   : > { %v8643_v5 = vpop.trf.xlu1 }
 0xacd   : > { %v8771_v47 = vrot.slane %v8643_v5, %v15366_v31  ;;  %v8782_v29 = vrot.slane %v8643_v5, %v15367_v6  ;;  %v8793_v42 = vrot.slane %v8643_v5, %v15369_v22  ;;  %v8804_v34 = vrot.slane %v8643_v5, %v15370_v7  ;;  %v15387_v6 = vld [vmem:[#allocation191_spill] sm:$0xff] }
 0xace   : > { %v8815_v51 = vrot.slane %v8643_v5, %v15364_v2  ;;  %v8826_v44 = vrot.slane %v8643_v5, %v15371_v12  ;;  %v8749_v9 = vrot.slane %v8643_v5, %v15365_v19  ;;  %v8760_v1 = vrot.slane %v8643_v5, %v15368_v56  ;;  %v15386_v5 = vld [vmem:[#allocation116_spill] sm:$0xff]  ;;  %v15389_v7 = vld [vmem:[#allocation179_spill] sm:$0xff] }
 0xacf   : > { %8667 = vbcast.lane.b32.xlu0 %v8661_v33, 264  ;;  %8773 = vbcast.lane.b32.xlu1 %v8771_v47, 256 }
 0xad3   : > { %8674 = vbcast.lane.b32.xlu0 %v8672_v26, 256  ;;  %8784 = vbcast.lane.b32.xlu1 %v8782_v29, 256 }
 0xad7   : > { %8678 = vbcast.lane.b32.xlu0 %v8672_v26, 264  ;;  %8795 = vbcast.lane.b32.xlu1 %v8793_v42, 256  ;;  %v15388_v26 = vld [vmem:[#allocation190_spill] sm:$0xff] }
 0xadb   : > { %8685 = vbcast.lane.b32.xlu0 %v8683_v25, 256  ;;  %8806 = vbcast.lane.b32.xlu1 %v8804_v34, 256 }
 0xadf   : > { %8689 = vbcast.lane.b32.xlu0 %v8683_v25, 264  ;;  %8817 = vbcast.lane.b32.xlu1 %v8815_v51, 256 }
 0xae3   : > { %8696 = vbcast.lane.b32.xlu0 %v8694_v46, 256  ;;  %8828 = vbcast.lane.b32.xlu1 %v8826_v44, 256 }
 0xae7   : > { %8700 = vbcast.lane.b32.xlu0 %v8694_v46, 264  ;;  %v15391_v46 = vld [vmem:[#allocation193_spill] sm:$0xff] }
 0xaeb   : > { %8707 = vbcast.lane.b32.xlu0 %v8705_v38, 256 }
 0xaef   : > { %8711 = vbcast.lane.b32.xlu0 %v8705_v38, 264 }
 0xaf3   : > { %8718 = vbcast.lane.b32.xlu0 %v8716_v36, 256 }
 0xaf7   : > { %8722 = vbcast.lane.b32.xlu0 %v8716_v36, 264 }
 0xafb   : > { %8733 = vbcast.lane.b32.xlu0 %v8727_v54, 264  ;;  %v15385_v54 = vld [vmem:[#allocation164_spill] sm:$0xff] }
 0xaff   : > { %8740 = vbcast.lane.b32.xlu0 %v8738_v24, 256 }
 0xb03   : > { %8744 = vbcast.lane.b32.xlu0 %v8738_v24, 264  ;;  %v15392_v24 = vld [vmem:[#allocation205_spill] sm:$0xff] }
 0xb07   : > { %8751 = vbcast.lane.b32.xlu0 %v8749_v9, 256 }
 0xb0b   : > { %8755 = vbcast.lane.b32.xlu0 %v8749_v9, 264 }
 0xb0f   : > { %8762 = vbcast.lane.b32.xlu0 %v8760_v1, 256 }
 0xb13   : > { %8766 = vbcast.lane.b32.xlu0 %v8760_v1, 264 }
 0xb17   : > { %8777 = vbcast.lane.b32.xlu0 %v8771_v47, 264 }
 0xb1b   : > { %8788 = vbcast.lane.b32.xlu0 %v8782_v29, 264 }
 0xb1f   : > { %8799 = vbcast.lane.b32.xlu0 %v8793_v42, 264 }
 0xb23   : > { %8810 = vbcast.lane.b32.xlu0 %v8804_v34, 264 }
 0xb27   : > { %8821 = vbcast.lane.b32.xlu0 %v8815_v51, 264  ;;  %v15390_v51 = vld [vmem:[#allocation118_spill] sm:$0xff] }
 0xb2b   : > { %8832 = vbcast.lane.b32.xlu0 %v8826_v44, 264 }
 0xb3d   : > { %v8664_v45 = vpop.permute.xlu0 %8663  ;;  %v8730_v57 = vpop.permute.xlu1 %8729 }
 0xb3e   : > { %v8834_v50 = vmul.f32 %v8664_v45, %v15372_v32  ;;  %v8846_v23 = vmul.f32 %v8730_v57, %v15373_v58  ;;  %v15393_v45 = vld [vmem:[#allocation78_spill] sm:$0xff] }
 0xb40   : > { %8866 = vst.msk [vmem:[%s14165_s20] sm:$0xff] %vm360_vm0, %v8834_v50  ;;  %8878 = vst.msk [vmem:[%s14165_s20 + $0x60] sm:$0xff] %vm360_vm0, %v8846_v23  ;;  %v15394_v50 = vld [vmem:[#allocation199_spill] sm:$0xff] }
 0xb41   : > { %v8668_v27 = vpop.permute.xlu0 %8667  ;;  %v8774_v43 = vpop.permute.xlu1 %8773 }
 0xb42   : > { %v8835_v35 = vmul.f32 %v15374_v15, %v8668_v27  ;;  %v8854_v48 = vmul.f32 %v8774_v43, %v15375_v37  ;;  %v15395_v27 = vld [vmem:[#allocation197_spill] sm:$0xff] }
 0xb44   : > { %8867 = vst.msk [vmem:[%s14165_s20 + $0x8] sm:$0xff] %vm360_vm0, %v8835_v35  ;;  %8886 = vst.msk [vmem:[%s14165_s20 + $0xa0] sm:$0xff] %vm360_vm0, %v8854_v48  ;;  %v15396_v35 = vld [vmem:[#allocation178_spill] sm:$0xff] }
 0xb45   : > { %v8675_v60 = vpop.permute.xlu0 %8674  ;;  %v8785_v8 = vpop.permute.xlu1 %8784 }
 0xb46   : > { %v8836_v49 = vmul.f32 %v8675_v60, %v15376_v41  ;;  %v8856_v61 = vmul.f32 %v8785_v8, %v15377_v11  ;;  %v15397_v60 = vld [vmem:[#allocation172_spill] sm:$0xff] }
 0xb48   : > { %8868 = vst.msk [vmem:[%s14165_s20 + $0x10] sm:$0xff] %vm360_vm0, %v8836_v49  ;;  %8888 = vst.msk [vmem:[%s14165_s20 + $0xb0] sm:$0xff] %vm360_vm0, %v8856_v61  ;;  %v15398_v49 = vld [vmem:[#allocation200_spill] sm:$0xff] }
 0xb49   : > { %v8679_v20 = vpop.permute.xlu0 %8678  ;;  %v8796_v0 = vpop.permute.xlu1 %8795 }
 0xb4a   : > { %v8837_v62 = vmul.f32 %v15378_v21, %v8679_v20  ;;  %v8858_v59 = vmul.f32 %v8796_v0, %v15379_v13  ;;  %v15399_v20 = vld [vmem:[#allocation75_spill] sm:$0xff] }
 0xb4c   : > { %8869 = vst.msk [vmem:[%s14165_s20 + $0x18] sm:$0xff] %vm360_vm0, %v8837_v62  ;;  %8890 = vst.msk [vmem:[%s14165_s20 + $0xc0] sm:$0xff] %vm360_vm0, %v8858_v59  ;;  %v15400_v62 = vld [vmem:[#allocation204_spill] sm:$0xff] }
 0xb4d   : > { %v8686_v63 = vpop.permute.xlu0 %8685  ;;  %v8807_v28 = vpop.permute.xlu1 %8806 }
 0xb4e   : > { %v8838_v30 = vmul.f32 %v8686_v63, %v15380_v17  ;;  %v8860_v39 = vmul.f32 %v8807_v28, %v15381_v53  ;;  %v15401_v63 = vld [vmem:[#allocation180_spill] sm:$0xff] }
 0xb50   : > { %8870 = vst.msk [vmem:[%s14165_s20 + $0x20] sm:$0xff] %vm360_vm0, %v8838_v30  ;;  %8892 = vst.msk [vmem:[%s14165_s20 + $0xd0] sm:$0xff] %vm360_vm0, %v8860_v39  ;;  %v15402_v30 = vld [vmem:[#allocation173_spill] sm:$0xff] }
 0xb51   : > { %v8690_v55 = vpop.permute.xlu0 %8689  ;;  %v8818_v14 = vpop.permute.xlu1 %8817 }
 0xb52   : > { %v8839_v10 = vmul.f32 %v15382_v40, %v8690_v55  ;;  %v8862_v18 = vmul.f32 %v8818_v14, %v15383_v52  ;;  %v15403_v55 = vld [vmem:[#allocation152_spill] sm:$0xff] }
 0xb54   : > { %8871 = vst.msk [vmem:[%s14165_s20 + $0x28] sm:$0xff] %vm360_vm0, %v8839_v10  ;;  %8894 = vst.msk [vmem:[%s14165_s20 + $0xe0] sm:$0xff] %vm360_vm0, %v8862_v18 }
 0xb55   : > { %v8697_v16 = vpop.permute.xlu0 %8696  ;;  %v8829_v4 = vpop.permute.xlu1 %8828 }
 0xb56   : > { %v8840_v2 = vmul.f32 %v8697_v16, %v15384_v3  ;;  %v8864_v19 = vmul.f32 %v8829_v4, %v15385_v54 }
 0xb58   : > { %8872 = vst.msk [vmem:[%s14165_s20 + $0x30] sm:$0xff] %vm360_vm0, %v8840_v2  ;;  %8896 = vst.msk [vmem:[%s14165_s20 + $0xf0] sm:$0xff] %vm360_vm0, %v8864_v19 }
 0xb59   : > { %v8701_v33 = vpop.permute.xlu0 %8700 }
 0xb5a   : > { %v8841_v31 = vmul.f32 %v15386_v5, %v8701_v33 }
 0xb5c   : > { %8873 = vst.msk [vmem:[%s14165_s20 + $0x38] sm:$0xff] %vm360_vm0, %v8841_v31 }
 0xb5d   : > { %v8708_v47 = vpop.permute.xlu0 %8707 }
 0xb5e   : > { %v8842_v29 = vmul.f32 %v8708_v47, %v15387_v6 }
 0xb60   : > { %8874 = vst.msk [vmem:[%s14165_s20 + $0x40] sm:$0xff] %vm360_vm0, %v8842_v29 }
 0xb61   : > { %v8712_v56 = vpop.permute.xlu0 %8711 }
 0xb62   : > { %v8843_v22 = vmul.f32 %v15388_v26, %v8712_v56 }
 0xb64   : > { %8875 = vst.msk [vmem:[%s14165_s20 + $0x48] sm:$0xff] %vm360_vm0, %v8843_v22 }
 0xb65   : > { %v8719_v42 = vpop.permute.xlu0 %8718 }
 0xb66   : > { %v8844_v34 = vmul.f32 %v8719_v42, %v15389_v7 }
 0xb68   : > { %8876 = vst.msk [vmem:[%s14165_s20 + $0x50] sm:$0xff] %vm360_vm0, %v8844_v34 }
 0xb69   : > { %v8723_v25 = vpop.permute.xlu0 %8722 }
 0xb6a   : > { %v8845_v12 = vmul.f32 %v15390_v51, %v8723_v25 }
 0xb6c   : > { %8877 = vst.msk [vmem:[%s14165_s20 + $0x58] sm:$0xff] %vm360_vm0, %v8845_v12 }
 0xb6d   : > { %v8734_v44 = vpop.permute.xlu0 %8733 }
 0xb6e   : > { %v8847_v38 = vmul.f32 %v15391_v46, %v8734_v44 }
 0xb70   : > { %8879 = vst.msk [vmem:[%s14165_s20 + $0x68] sm:$0xff] %vm360_vm0, %v8847_v38 }
 0xb71   : > { %v8741_v36 = vpop.permute.xlu0 %8740 }
 0xb72   : > { %v8848_v9 = vmul.f32 %v8741_v36, %v15392_v24 }
 0xb74   : > { %8880 = vst.msk [vmem:[%s14165_s20 + $0x70] sm:$0xff] %vm360_vm0, %v8848_v9 }
 0xb75   : > { %v8745_v1 = vpop.permute.xlu0 %8744 }
 0xb76   : > { %v8849_v57 = vmul.f32 %v15393_v45, %v8745_v1 }
 0xb78   : > { %8881 = vst.msk [vmem:[%s14165_s20 + $0x78] sm:$0xff] %vm360_vm0, %v8849_v57 }
 0xb79   : > { %v8752_v32 = vpop.permute.xlu0 %8751 }
 0xb7a   : > { %v8850_v58 = vmul.f32 %v8752_v32, %v15394_v50 }
 0xb7c   : > { %8882 = vst.msk [vmem:[%s14165_s20 + $0x80] sm:$0xff] %vm360_vm0, %v8850_v58 }
 0xb7d   : > { %v8756_v23 = vpop.permute.xlu0 %8755 }
 0xb7e   : > { %v8851_v43 = vmul.f32 %v15395_v27, %v8756_v23 }
 0xb80   : > { %8883 = vst.msk [vmem:[%s14165_s20 + $0x88] sm:$0xff] %vm360_vm0, %v8851_v43 }
 0xb81   : > { %v8763_v15 = vpop.permute.xlu0 %8762 }
 0xb82   : > { %v8852_v37 = vmul.f32 %v8763_v15, %v15396_v35 }
 0xb84   : > { %8884 = vst.msk [vmem:[%s14165_s20 + $0x90] sm:$0xff] %vm360_vm0, %v8852_v37 }
 0xb85   : > { %v8767_v48 = vpop.permute.xlu0 %8766 }
 0xb86   : > { %v8853_v8 = vmul.f32 %v15397_v60, %v8767_v48 }
 0xb88   : > { %8885 = vst.msk [vmem:[%s14165_s20 + $0x98] sm:$0xff] %vm360_vm0, %v8853_v8 }
 0xb89   : > { %v8778_v41 = vpop.permute.xlu0 %8777 }
 0xb8a   : > { %v8855_v11 = vmul.f32 %v15398_v49, %v8778_v41 }
 0xb8c   : > { %8887 = vst.msk [vmem:[%s14165_s20 + $0xa8] sm:$0xff] %vm360_vm0, %v8855_v11 }
 0xb8d   : > { %v8789_v61 = vpop.permute.xlu0 %8788 }
 0xb8e   : > { %v8857_v0 = vmul.f32 %v15399_v20, %v8789_v61 }
 0xb90   : > { %8889 = vst.msk [vmem:[%s14165_s20 + $0xb8] sm:$0xff] %vm360_vm0, %v8857_v0 }
 0xb91   : > { %v8800_v21 = vpop.permute.xlu0 %8799 }
 0xb92   : > { %v8859_v13 = vmul.f32 %v15400_v62, %v8800_v21 }
 0xb94   : > { %8891 = vst.msk [vmem:[%s14165_s20 + $0xc8] sm:$0xff] %vm360_vm0, %v8859_v13 }
 0xb95   : > { %v8811_v59 = vpop.permute.xlu0 %8810 }
 0xb96   : > { %v8861_v28 = vmul.f32 %v15401_v63, %v8811_v59 }
 0xb98   : > { %8893 = vst.msk [vmem:[%s14165_s20 + $0xd8] sm:$0xff] %vm360_vm0, %v8861_v28 }
 0xb99   : > { %v8822_v17 = vpop.permute.xlu0 %8821 }
 0xb9a   : > { %v8863_v53 = vmul.f32 %v15402_v30, %v8822_v17 }
 0xb9c   : > { %8895 = vst.msk [vmem:[%s14165_s20 + $0xe8] sm:$0xff] %vm360_vm0, %v8863_v53 }
 0xb9d   : > { %v8833_v39 = vpop.permute.xlu0 %8832 }
 0xb9e   : > { %v8865_v14 = vmul.f32 %v15403_v55, %v8833_v39 }
 0xba0   : > { %8897 = vst.msk [vmem:[%s14165_s20 + $0xf8] sm:$0xff] %vm360_vm0, %v8865_v14 }
 0xba1 PF: > { %s18_s23 = sadd.s32 1, %s10262_s23  }
 0xba2   : > { %p15_p4 = scmp.ge.s32.totalorder %s18_s23, 4  }
 0xba4   :  { %17 = sbr.rel (!%p15_p4) target bundleno = 2 (0x2), region = 85 }

</bundles_post_ra>
